<compile_context>
chip_gen: v5e
topology: v5e:2x2
jax: 0.10.0
libtpu: 0.0.40
codegen_flags: <defaults>
</compile_context>

<pallas_src>
import functools
import math

import jax
import jax.numpy as jnp
from jax.experimental import pallas as pl
from jax.experimental.pallas import tpu as pltpu


# ------------------------- VMEM budget (per generation) -------------------------

def _vmem_limit_bytes():
    # v5e/v6e: 128 MiB physical VMEM -> allow ~96 MiB scoped; v7x: 64 MiB -> ~48 MiB.
    try:
        cap = getattr(pltpu.get_tpu_info(), "vmem_capacity_bytes", 64 << 20)
    except Exception:
        cap = 64 << 20  # conservative fallback (v7x-sized)
    return max(32 << 20, min(96 << 20, (cap * 3) // 4))


_VMEM_LIMIT = _vmem_limit_bytes()
# Per-pallas_call working-set cap used by the tile pickers (double-buffered
# inputs/outputs + f32 accumulator). <=20 MiB fits every generation incl. v7x.
_TILE_BUDGET = 20 << 20

_TM_PREFS = (1024, 512, 256, 128, 64, 32, 16, 8)
_TN_PREFS = (1024, 768, 512, 256, 128)
_TK_PREFS = (512, 384, 256, 128)


def _divisor_prefs(dim, prefs):
    """Preferred tile sizes that divide dim (largest first); fallback: full dim."""
    cands = [p for p in prefs if dim % p == 0]
    return cands if cands else [dim]


def _dense_tiles(M, N, K):
    tms = _divisor_prefs(M, _TM_PREFS)
    tns = _divisor_prefs(N, _TN_PREFS)
    tks = _divisor_prefs(K, _TK_PREFS)
    tm, tn, tk = tms[0], tns[0], tks[0]

    def ws(tm_, tn_, tk_):  # bytes: 2x-buffered bf16 in/out + f32 acc + bias
        return (2 * tm_ * tk_ * 2 + 2 * tk_ * tn_ * 2 + 2 * tm_ * tn_ * 2
                + tm_ * tn_ * 4 + 2 * tn_ * 4)

    ti = tni = 0
    while ws(tm, tn, tk) > _TILE_BUDGET:
        if ti + 1 < len(tms):
            ti += 1
            tm = tms[ti]
        elif tni + 1 < len(tns):
            tni += 1
            tn = tns[tni]
        else:
            break
    # v7x has 2 TensorCores: keep >=2 blocks on a parallel axis when a single
    # block would otherwise cover everything (free on single-TC v5e/v6e).
    if M // tm == 1 and N // tn == 1 and ti + 1 < len(tms):
        ti += 1
        tm = tms[ti]
    return tm, tn, tk


# ------------------------- dense (X @ W + b, optional GELU) -------------------------

def _dense_kernel(x_ref, w_ref, b_ref, o_ref, acc_ref, *, act):
    @pl.when(pl.program_id(2) == 0)
    def _():
        acc_ref[...] = jnp.zeros_like(acc_ref)

    acc_ref[...] += jnp.dot(x_ref[...], w_ref[...],
                            preferred_element_type=jnp.float32)

    @pl.when(pl.program_id(2) == pl.num_programs(2) - 1)
    def _():
        y = acc_ref[...] + b_ref[...]
        if act == "gelu":
            # tanh-approx GELU (HF BERT uses erf-GELU; difference ~1e-3)
            # TODO(synk): switch to erf-GELU if bit-level parity is required.
            y = 0.5 * y * (1.0 + jnp.tanh(
                0.7978845608028654 * (y + 0.044715 * y * y * y)))
        o_ref[...] = y.astype(o_ref.dtype)


def dense(x, w, b, act="none"):
    M, K = x.shape
    Kw, N = w.shape
    assert K == Kw and b.shape == (N,)
    tm, tn, tk = _dense_tiles(M, N, K)
    assert M % tm == 0 and N % tn == 0 and K % tk == 0
    return pl.pallas_call(
        functools.partial(_dense_kernel, act=act),
        out_shape=jax.ShapeDtypeStruct((M, N), jnp.bfloat16),
        grid_spec=pltpu.PrefetchScalarGridSpec(
            num_scalar_prefetch=0,
            grid=(M // tm, N // tn, K // tk),
            in_specs=[
                pl.BlockSpec((tm, tk), lambda i, j, k: (i, k)),
                pl.BlockSpec((tk, tn), lambda i, j, k: (k, j)),
                pl.BlockSpec((1, tn), lambda i, j, k: (0, j)),
            ],
            out_specs=pl.BlockSpec((tm, tn), lambda i, j, k: (i, j)),
            scratch_shapes=[pltpu.VMEM((tm, tn), jnp.float32)],
        ),
        compiler_params=pltpu.CompilerParams(
            dimension_semantics=("parallel", "parallel", "arbitrary"),
            vmem_limit_bytes=_VMEM_LIMIT),
    )(x, w, b.reshape(1, N).astype(jnp.float32))


# ---------------- dense + residual add + LayerNorm fused epilogue ----------------

def _dense_add_ln_kernel(x_ref, w_ref, b_ref, r_ref, g_ref, bb_ref,
                         o_ref, acc_ref, *, eps):
    @pl.when(pl.program_id(1) == 0)
    def _():
        acc_ref[...] = jnp.zeros_like(acc_ref)

    acc_ref[...] += jnp.dot(x_ref[...], w_ref[...],
                            preferred_element_type=jnp.float32)

    @pl.when(pl.program_id(1) == pl.num_programs(1) - 1)
    def _():
        h = acc_ref[...] + b_ref[...] + r_ref[...].astype(jnp.float32)
        mu = jnp.mean(h, axis=-1, keepdims=True)
        var = jnp.mean(jnp.square(h - mu), axis=-1, keepdims=True)
        y = (h - mu) * jax.lax.rsqrt(var + eps)
        o_ref[...] = (y * g_ref[...] + bb_ref[...]).astype(o_ref.dtype)


def dense_add_ln(x, w, b, residual, gamma, beta, eps=1e-12):
    """LayerNorm((X @ W + b) + residual) over the last axis (BERT post-LN)."""
    M, K = x.shape
    Kw, N = w.shape
    assert K == Kw and residual.shape == (M, N)

    tms = _divisor_prefs(M, _TM_PREFS)
    tks = _divisor_prefs(K, _TK_PREFS)
    tm, tk = tms[0], tks[0]

    def ws(tm_, tk_):  # x, w (2x bf16), residual + out (2x bf16), acc f32, params
        return (2 * tm_ * tk_ * 2 + 2 * tk_ * N * 2 + 2 * (2 * tm_ * N * 2)
                + tm_ * N * 4 + 6 * N * 4)

    ti = 0
    while ws(tm, tk) > _TILE_BUDGET and ti + 1 < len(tms):
        ti += 1
        tm = tms[ti]
    if M // tm == 1 and ti + 1 < len(tms):      # keep both v7x TCs busy
        ti += 1
        tm = tms[ti]
    assert M % tm == 0 and K % tk == 0

    return pl.pallas_call(
        functools.partial(_dense_add_ln_kernel, eps=eps),
        out_shape=jax.ShapeDtypeStruct((M, N), jnp.bfloat16),
        grid_spec=pltpu.PrefetchScalarGridSpec(
            num_scalar_prefetch=0,
            grid=(M // tm, K // tk),
            in_specs=[
                pl.BlockSpec((tm, tk), lambda i, k: (i, k)),
                pl.BlockSpec((tk, N), lambda i, k: (k, 0)),
                pl.BlockSpec((1, N), lambda i, k: (0, 0)),
                pl.BlockSpec((tm, N), lambda i, k: (i, 0)),
                pl.BlockSpec((1, N), lambda i, k: (0, 0)),
                pl.BlockSpec((1, N), lambda i, k: (0, 0)),
            ],
            out_specs=pl.BlockSpec((tm, N), lambda i, k: (i, 0)),
            scratch_shapes=[pltpu.VMEM((tm, N), jnp.float32)],
        ),
        compiler_params=pltpu.CompilerParams(
            dimension_semantics=("parallel", "arbitrary"),
            vmem_limit_bytes=_VMEM_LIMIT),
    )(x, w, b.reshape(1, N).astype(jnp.float32), residual,
      gamma.reshape(1, N).astype(jnp.float32),
      beta.reshape(1, N).astype(jnp.float32))


# ------------------------- LayerNorm (no residual, row-tiled) -------------------------

def _ln_kernel(x_ref, g_ref, b_ref, o_ref, *, eps):
    h = x_ref[...].astype(jnp.float32)
    mu = jnp.mean(h, axis=-1, keepdims=True)
    var = jnp.mean(jnp.square(h - mu), axis=-1, keepdims=True)
    y = (h - mu) * jax.lax.rsqrt(var + eps)
    o_ref[...] = (y * g_ref[...] + b_ref[...]).astype(o_ref.dtype)


def layernorm(x, gamma, beta, eps=1e-12, out_dtype=jnp.bfloat16):
    M, H = x.shape
    tms = _divisor_prefs(M, _TM_PREFS)
    tm = tms[0]
    if M // tm == 1 and len(tms) > 1:   # give the second v7x TC a block
        tm = tms[1]
    return pl.pallas_call(
        functools.partial(_ln_kernel, eps=eps),
        out_shape=jax.ShapeDtypeStruct((M, H), out_dtype),
        grid_spec=pltpu.PrefetchScalarGridSpec(
            num_scalar_prefetch=0,
            grid=(M // tm,),
            in_specs=[
                pl.BlockSpec((tm, H), lambda i: (i, 0)),
                pl.BlockSpec((1, H), lambda i: (0, 0)),
                pl.BlockSpec((1, H), lambda i: (0, 0)),
            ],
            out_specs=pl.BlockSpec((tm, H), lambda i: (i, 0)),
        ),
        compiler_params=pltpu.CompilerParams(
            dimension_semantics=("parallel",),
            vmem_limit_bytes=_VMEM_LIMIT),
    )(x, gamma.reshape(1, H).astype(jnp.float32),
      beta.reshape(1, H).astype(jnp.float32))


# ------------------------- attention -------------------------

def _attn_kernel(q_ref, k_ref, v_ref, mb_ref, o_ref, *, d, hpb):
    """softmax(Q K^T + mask_bias) V for `hpb` heads packed on the lane axis.

    The 1/sqrt(head_dim) scale is pre-folded into Wq/bq; softmax normalization is
    deferred past the PV matmul (context * reciprocal(row_sum) on the EUP slot).
    """
    mb = mb_ref[0]                           # (1, S) additive key mask, f32
    outs = []
    for h in range(hpb):                     # static unroll (hpb == 4)
        q = q_ref[0, :, h * d:(h + 1) * d]   # (S, D) bf16
        k = k_ref[0, :, h * d:(h + 1) * d]
        v = v_ref[0, :, h * d:(h + 1) * d]
        s = jax.lax.dot_general(q, k, (((1,), (1,)), ((), ())),
                                preferred_element_type=jnp.float32) + mb
        m = jnp.max(s, axis=-1, keepdims=True)
        p = jnp.exp(s - m)                                   # unnormalized
        l = jnp.sum(p, axis=-1, keepdims=True)               # (S, 1) f32
        ctx = jnp.dot(p.astype(v.dtype), v,
                      preferred_element_type=jnp.float32)
        outs.append(ctx * pl.reciprocal(l, approx=True))
    o_ref[0] = jnp.concatenate(outs, axis=-1).astype(o_ref.dtype)  # lane-dense store


def attention(qkv, mask_bias, n_heads, head_dim):
    """qkv: (B, S, 3H) packed [Q|K|V]; returns context (B, S, H)."""
    B, S, threeH = qkv.shape
    H = n_heads * head_dim
    assert threeH == 3 * H
    # 4 heads per grid step (256-lane blocks) when the head layout allows it.
    hpb = 4 if (n_heads % 4 == 0 and (4 * head_dim) % 128 == 0) else 2
    assert n_heads % hpb == 0 and (hpb * head_dim) % 128 == 0
    block_w = hpb * head_dim                 # 256 for BERT-base
    n_hb = H // block_w                      # head-group blocks per projection
    return pl.pallas_call(
        functools.partial(_attn_kernel, d=head_dim, hpb=hpb),
        out_shape=jax.ShapeDtypeStruct((B, S, H), jnp.bfloat16),
        grid_spec=pltpu.PrefetchScalarGridSpec(
            num_scalar_prefetch=0,
            grid=(B, n_hb),
            in_specs=[
                pl.BlockSpec((1, S, block_w), lambda b, hb: (b, 0, hb)),
                pl.BlockSpec((1, S, block_w),
                             lambda b, hb, off=n_hb: (b, 0, off + hb)),
                pl.BlockSpec((1, S, block_w),
                             lambda b, hb, off=n_hb: (b, 0, 2 * off + hb)),
                pl.BlockSpec((1, 1, S), lambda b, hb: (b, 0, 0)),
            ],
            out_specs=pl.BlockSpec((1, S, block_w), lambda b, hb: (b, 0, hb)),
        ),
        compiler_params=pltpu.CompilerParams(
            dimension_semantics=("parallel", "parallel"),
            vmem_limit_bytes=_VMEM_LIMIT),
    )(qkv, qkv, qkv, mask_bias)


# ------------------------- pooler + fc head (fused) -------------------------

def _pooler_fc_kernel(cls_ref, pw_ref, pb_ref, fw_ref, fb_ref, o_ref):
    pooled = jnp.tanh(
        jnp.dot(cls_ref[...], pw_ref[...], preferred_element_type=jnp.float32)
        + pb_ref[...])                                   # (B, H) f32
    out = jnp.sum(pooled * fw_ref[...], axis=-1, keepdims=True) + fb_ref[...]
    o_ref[...] = out.astype(o_ref.dtype)


def pooler_fc(cls_tok, pooler_w, pooler_b, fc_w_row, fc_b):
    B, H = cls_tok.shape
    return pl.pallas_call(
        _pooler_fc_kernel,
        out_shape=jax.ShapeDtypeStruct((B, 1), jnp.float32),
        grid_spec=pltpu.PrefetchScalarGridSpec(
            num_scalar_prefetch=0,
            grid=(1,),
            in_specs=[
                pl.BlockSpec((B, H), lambda i: (0, 0)),
                pl.BlockSpec((H, H), lambda i: (0, 0)),
                pl.BlockSpec((1, H), lambda i: (0, 0)),
                pl.BlockSpec((1, H), lambda i: (0, 0)),
                pl.BlockSpec((1, 1), lambda i: (0, 0)),
            ],
            out_specs=pl.BlockSpec((B, 1), lambda i: (0, 0)),
        ),
        compiler_params=pltpu.CompilerParams(vmem_limit_bytes=_VMEM_LIMIT),
    )(cls_tok, pooler_w,
      pooler_b.reshape(1, H).astype(jnp.float32),
      fc_w_row.reshape(1, H).astype(jnp.float32),
      fc_b.reshape(1, 1).astype(jnp.float32))


# ------------------------- Parameters -------------------------

CFG = dict(vocab=128, max_pos=16, type_vocab=2,
           hidden=768, heads=12, intermediate=3072,
           layers=2)  # layers reduced from 12 for the small synthetic test


def init_params(key, cfg):
    H, I = cfg["hidden"], cfg["intermediate"]
    D = H // cfg["heads"]
    inv_sqrt_d = 1.0 / math.sqrt(D)

    def w(k, shape, dtype=jnp.bfloat16):
        return (0.02 * jax.random.normal(k, shape, jnp.float32)).astype(dtype)

    keys = iter(jax.random.split(key, 5 + 4 * cfg["layers"]))
    params = {
        "word_emb": w(next(keys), (cfg["vocab"], H), jnp.float32),
        "pos_emb": w(next(keys), (cfg["max_pos"], H), jnp.float32),
        "type_emb": w(next(keys), (cfg["type_vocab"], H), jnp.float32),
        "emb_ln_g": jnp.ones((H,), jnp.float32),
        "emb_ln_b": jnp.zeros((H,), jnp.float32),
        "pooler_w": w(next(keys), (H, H)),
        "pooler_b": jnp.zeros((H,), jnp.float32),
        # nn.Linear(768, 1): weight stored transposed (1, 768) so the fc head is a
        # lane-dense row vector inside the fused pooler kernel.
        "fc_w": w(next(keys), (1, H), jnp.float32),
        "fc_b": jnp.zeros((1,), jnp.float32),
        "layers": [],
    }
    for _ in range(cfg["layers"]):
        # fused [Wq | Wk | Wv] -> (H, 3H), bias likewise; the softmax 1/sqrt(D)
        # scale is folded into the Q slice here (parameter-prep time) so the
        # attention kernel never multiplies the S x S score matrix.
        qkv_w = 0.02 * jax.random.normal(next(keys), (H, 3 * H), jnp.float32)
        qkv_w = qkv_w.at[:, :H].multiply(inv_sqrt_d)
        qkv_b = jnp.zeros((3 * H,), jnp.float32).at[:H].multiply(inv_sqrt_d)
        params["layers"].append({
            "qkv_w": qkv_w.astype(jnp.bfloat16),
            "qkv_b": qkv_b,
            "o_w": w(next(keys), (H, H)), "o_b": jnp.zeros((H,), jnp.float32),
            "ln1_g": jnp.ones((H,), jnp.float32), "ln1_b": jnp.zeros((H,), jnp.float32),
            "f1_w": w(next(keys), (H, I)), "f1_b": jnp.zeros((I,), jnp.float32),
            "f2_w": w(next(keys), (I, H)), "f2_b": jnp.zeros((H,), jnp.float32),
            "ln2_g": jnp.ones((H,), jnp.float32), "ln2_b": jnp.zeros((H,), jnp.float32),
        })
    return params


# ------------------------- Forward pass -------------------------

def bert_base_uncased_forward(params, ids, mask, token_type_ids, cfg):
    B, S = ids.shape
    H, NH = cfg["hidden"], cfg["heads"]
    D = H // NH
    M = B * S

    # Embeddings (gather is plain-JAX glue; LayerNorm is a Pallas kernel, no zero
    # residual tensor is materialized).
    emb = (jnp.take(params["word_emb"], ids, axis=0)
           + params["pos_emb"][:S][None, :, :]
           + jnp.take(params["type_emb"], token_type_ids, axis=0))
    x2 = layernorm(emb.reshape(M, H), params["emb_ln_g"], params["emb_ln_b"])

    # Additive attention mask over keys, HF-style: (1 - mask) * -10000
    mask_bias = ((1.0 - mask.astype(jnp.float32)) * -10000.0).reshape(B, 1, S)

    # TODO(synk): fuse QKV dense + attention (and FFN1 + FFN2) per layer with
    # pltpu.emit_pipeline to keep the (M,3H)/(M,I) intermediates out of HBM.
    for lp in params["layers"]:
        qkv = dense(x2, lp["qkv_w"], lp["qkv_b"])                    # (M, 3H) bf16
        ctx = attention(qkv.reshape(B, S, 3 * H), mask_bias, NH, D)  # (B, S, H)
        x2 = dense_add_ln(ctx.reshape(M, H), lp["o_w"], lp["o_b"],
                          x2, lp["ln1_g"], lp["ln1_b"])
        ff = dense(x2, lp["f1_w"], lp["f1_b"], act="gelu")           # (M, I) bf16
        x2 = dense_add_ln(ff, lp["f2_w"], lp["f2_b"],
                          x2, lp["ln2_g"], lp["ln2_b"])

    cls = x2.reshape(B, S, H)[:, 0, :]                               # [CLS], (B, H)

    # pooler tanh dense + Dropout(0.3) (identity at inference) + fc(768 -> 1), fused.
    # TODO(synk): training-mode dropout (random masking) not implemented.
    return pooler_fc(cls, params["pooler_w"], params["pooler_b"],
                     params["fc_w"], params["fc_b"])                 # (B, 1) f32


# ------------------------- Driver -------------------------

if __name__ == "__main__":
    key = jax.random.PRNGKey(0)
    kp, ki = jax.random.split(key)

    # NOTE: this toy shape (M = B*S = 16) is launch/step-overhead bound; tiling
    # levers only show up at production shapes (e.g. B>=8, S=512 -> M>=4096).
    B, S = 2, 8
    params = init_params(kp, CFG)
    ids = jax.random.randint(ki, (B, S), 0, CFG["vocab"], dtype=jnp.int32)
    mask = jnp.array([[1, 1, 1, 1, 1, 1, 1, 1],
                      [1, 1, 1, 1, 1, 0, 0, 0]], dtype=jnp.int32)
    token_type_ids = jnp.zeros((B, S), dtype=jnp.int32)

    fwd = jax.jit(functools.partial(bert_base_uncased_forward, cfg=CFG))
    out = jax.block_until_ready(fwd(params, ids, mask, token_type_ids))
    assert out.shape == (B, 1) and out.dtype == jnp.float32
    assert bool(jnp.all(jnp.isfinite(out)))
    print("KERNEL_OK")
</pallas_src>

<mosaic_0001>
module attributes {stable_mosaic.version = 11 : i64} {
  func.func @_dense_kernel(%arg0: i32, %arg1: i32, %arg2: i32, %arg3: memref<16x384xbf16, #tpu.memory_space<vmem>>, %arg4: memref<384x768xbf16, #tpu.memory_space<vmem>>, %arg5: memref<1x768xf32, #tpu.memory_space<vmem>>, %arg6: memref<16x768xbf16, #tpu.memory_space<vmem>>, %arg7: memref<16x768xf32, #tpu.memory_space<vmem>>) attributes {dimension_semantics = [#tpu.dimension_semantics<parallel>, #tpu.dimension_semantics<parallel>, #tpu.dimension_semantics<arbitrary>], iteration_bounds = array<i64: 1, 3, 2>, scalar_prefetch = 0 : i64, scratch_operands = 1 : i64, tpu.core_type = #tpu.core_type<tc>, window_params = [{transform_indices = @transform_0, window_bounds = array<i64: 16, 384>}, {transform_indices = @transform_1, window_bounds = array<i64: 384, 768>}, {transform_indices = @transform_2, window_bounds = array<i64: 1, 768>}, {transform_indices = @transform_3, window_bounds = array<i64: 16, 768>}]} {
    %c0_i32 = arith.constant 0 : i32
    %0 = arith.cmpi eq, %arg2, %c0_i32 : i32
    %1 = arith.extui %0 : i1 to i32
    %c0_i32_0 = arith.constant 0 : i32
    %2 = arith.cmpi ne, %1, %c0_i32_0 : i32
    scf.if %2 {
      %cst_9 = arith.constant 0.000000e+00 : f32
      %12 = vector.broadcast %cst_9 : f32 to vector<16x768xf32>
      %c0_10 = arith.constant 0 : index
      %c0_11 = arith.constant 0 : index
      %13 = vector.load %arg7[%c0_10, %c0_11] : memref<16x768xf32, #tpu.memory_space<vmem>>, vector<16x768xf32>
      tpu.vector_store %arg7[%c0_10, %c0_11], %12 {strides = array<i32>} : memref<16x768xf32, #tpu.memory_space<vmem>>, vector<16x768xf32>,
    } else {
    }
    %c0 = arith.constant 0 : index
    %c0_1 = arith.constant 0 : index
    %3 = vector.load %arg7[%c0, %c0_1] : memref<16x768xf32, #tpu.memory_space<vmem>>, vector<16x768xf32>
    %c0_2 = arith.constant 0 : index
    %c0_3 = arith.constant 0 : index
    %4 = vector.load %arg3[%c0_2, %c0_3] : memref<16x384xbf16, #tpu.memory_space<vmem>>, vector<16x384xbf16>
    %c0_4 = arith.constant 0 : index
    %c0_5 = arith.constant 0 : index
    %5 = vector.load %arg4[%c0_4, %c0_5] : memref<384x768xbf16, #tpu.memory_space<vmem>>, vector<384x768xbf16>
    %cst = arith.constant dense<0.000000e+00> : vector<16x768xf32>
    %6 = tpu.matmul %4, %5, %cst {dimension_numbers = #tpu.dot_dimension_numbers<[1], [0], [0], [1], [0, 0, 1, 1], [], []>} : vector<16x384xbf16>, vector<384x768xbf16>, vector<16x768xf32> -> vector<16x768xf32>
    %7 = arith.addf %3, %6 : vector<16x768xf32>
    %c0_6 = arith.constant 0 : index
    %c0_7 = arith.constant 0 : index
    %8 = vector.load %arg7[%c0_6, %c0_7] : memref<16x768xf32, #tpu.memory_space<vmem>>, vector<16x768xf32>
    tpu.vector_store %arg7[%c0_6, %c0_7], %7 {strides = array<i32>} : memref<16x768xf32, #tpu.memory_space<vmem>>, vector<16x768xf32>,
    %c1_i32 = arith.constant 1 : i32
    %9 = arith.cmpi eq, %arg2, %c1_i32 : i32
    %10 = arith.extui %9 : i1 to i32
    %c0_i32_8 = arith.constant 0 : i32
    %11 = arith.cmpi ne, %10, %c0_i32_8 : i32
    scf.if %11 {
      %c0_9 = arith.constant 0 : index
      %c0_10 = arith.constant 0 : index
      %12 = vector.load %arg7[%c0_9, %c0_10] : memref<16x768xf32, #tpu.memory_space<vmem>>, vector<16x768xf32>
      %c0_11 = arith.constant 0 : index
      %c0_12 = arith.constant 0 : index
      %13 = vector.load %arg5[%c0_11, %c0_12] : memref<1x768xf32, #tpu.memory_space<vmem>>, vector<1x768xf32>
      %14 = vector.broadcast %13 : vector<1x768xf32> to vector<16x768xf32>
      %15 = arith.addf %12, %14 : vector<16x768xf32>
      %16 = arith.truncf %15 : vector<16x768xf32> to vector<16x768xbf16>
      %c0_13 = arith.constant 0 : index
      %c0_14 = arith.constant 0 : index
      %17 = vector.load %arg6[%c0_13, %c0_14] : memref<16x768xbf16, #tpu.memory_space<vmem>>, vector<16x768xbf16>
      tpu.vector_store %arg6[%c0_13, %c0_14], %16 {strides = array<i32>} : memref<16x768xbf16, #tpu.memory_space<vmem>>, vector<16x768xbf16>,
    } else {
    }
    return
  }
  func.func @transform_0(%arg0: i32, %arg1: i32, %arg2: i32) -> (i32, i32) {
    %c0_i32 = arith.constant 0 : i32
    return %arg0, %arg2 : i32, i32
  }
  func.func @transform_1(%arg0: i32, %arg1: i32, %arg2: i32) -> (i32, i32) {
    %c0_i32 = arith.constant 0 : i32
    return %arg2, %arg1 : i32, i32
  }
  func.func @transform_2(%arg0: i32, %arg1: i32, %arg2: i32) -> (i32, i32) {
    %c0_i32 = arith.constant 0 : i32
    %c0_i32_0 = arith.constant 0 : i32
    return %c0_i32, %arg1 : i32, i32
  }
  func.func @transform_3(%arg0: i32, %arg1: i32, %arg2: i32) -> (i32, i32) {
    %c0_i32 = arith.constant 0 : i32
    return %arg0, %arg1 : i32, i32
  }
}

module attributes {stable_mosaic.version = 11 : i64} {
  func.func @_ln_kernel(%arg0: i32, %arg1: memref<8x768xf32, #tpu.memory_space<vmem>>, %arg2: memref<1x768xf32, #tpu.memory_space<vmem>>, %arg3: memref<1x768xf32, #tpu.memory_space<vmem>>, %arg4: memref<8x768xbf16, #tpu.memory_space<vmem>>) attributes {dimension_semantics = [#tpu.dimension_semantics<parallel>], iteration_bounds = array<i64: 2>, scalar_prefetch = 0 : i64, scratch_operands = 0 : i64, tpu.core_type = #tpu.core_type<tc>, window_params = [{transform_indices = @transform_0, window_bounds = array<i64: 8, 768>}, {pipeline_mode = #tpu.pipeline_mode<synchronous>, transform_indices = @transform_1, window_bounds = array<i64: 1, 768>}, {pipeline_mode = #tpu.pipeline_mode<synchronous>, transform_indices = @transform_2, window_bounds = array<i64: 1, 768>}, {transform_indices = @transform_3, window_bounds = array<i64: 8, 768>}]} {
    %c0 = arith.constant 0 : index
    %c0_0 = arith.constant 0 : index
    %0 = vector.load %arg1[%c0, %c0_0] : memref<8x768xf32, #tpu.memory_space<vmem>>, vector<8x768xf32>
    %cst = arith.constant dense<0.000000e+00> : vector<8xf32>
    %1 = vector.multi_reduction <add>, %0, %cst [1] : vector<8x768xf32> to vector<8xf32>
    %2 = vector.shape_cast %1 : vector<8xf32> to vector<8x1xf32>
    %cst_1 = arith.constant 7.680000e+02 : f32
    %3 = vector.broadcast %cst_1 : f32 to vector<8x1xf32>
    %4 = arith.divf %2, %3 : vector<8x1xf32>
    %5 = vector.broadcast %4 : vector<8x1xf32> to vector<8x768xf32>
    %6 = arith.subf %0, %5 : vector<8x768xf32>
    %7 = arith.mulf %6, %6 : vector<8x768xf32>
    %cst_2 = arith.constant dense<0.000000e+00> : vector<8xf32>
    %8 = vector.multi_reduction <add>, %7, %cst_2 [1] : vector<8x768xf32> to vector<8xf32>
    %9 = vector.shape_cast %8 : vector<8xf32> to vector<8x1xf32>
    %cst_3 = arith.constant 7.680000e+02 : f32
    %10 = vector.broadcast %cst_3 : f32 to vector<8x1xf32>
    %11 = arith.divf %9, %10 : vector<8x1xf32>
    %12 = vector.broadcast %4 : vector<8x1xf32> to vector<8x768xf32>
    %13 = arith.subf %0, %12 : vector<8x768xf32>
    %cst_4 = arith.constant 9.99999996E-13 : f32
    %14 = vector.broadcast %cst_4 : f32 to vector<8x1xf32>
    %15 = arith.addf %11, %14 : vector<8x1xf32>
    %16 = math.rsqrt %15 : vector<8x1xf32>
    %17 = vector.broadcast %16 : vector<8x1xf32> to vector<8x768xf32>
    %18 = arith.mulf %13, %17 : vector<8x768xf32>
    %c0_5 = arith.constant 0 : index
    %c0_6 = arith.constant 0 : index
    %19 = vector.load %arg2[%c0_5, %c0_6] : memref<1x768xf32, #tpu.memory_space<vmem>>, vector<1x768xf32>
    %20 = vector.broadcast %19 : vector<1x768xf32> to vector<8x768xf32>
    %21 = arith.mulf %18, %20 : vector<8x768xf32>
    %c0_7 = arith.constant 0 : index
    %c0_8 = arith.constant 0 : index
    %22 = vector.load %arg3[%c0_7, %c0_8] : memref<1x768xf32, #tpu.memory_space<vmem>>, vector<1x768xf32>
    %23 = vector.broadcast %22 : vector<1x768xf32> to vector<8x768xf32>
    %24 = arith.addf %21, %23 : vector<8x768xf32>
    %25 = arith.truncf %24 : vector<8x768xf32> to vector<8x768xbf16>
    %c0_9 = arith.constant 0 : index
    %c0_10 = arith.constant 0 : index
    %26 = vector.load %arg4[%c0_9, %c0_10] : memref<8x768xbf16, #tpu.memory_space<vmem>>, vector<8x768xbf16>
    tpu.vector_store %arg4[%c0_9, %c0_10], %25 {strides = array<i32>} : memref<8x768xbf16, #tpu.memory_space<vmem>>, vector<8x768xbf16>,
    return
  }
  func.func @transform_0(%arg0: i32) -> (i32, i32) {
    %c0_i32 = arith.constant 0 : i32
    %c0_i32_0 = arith.constant 0 : i32
    return %arg0, %c0_i32 : i32, i32
  }
  func.func @transform_1(%arg0: i32) -> (i32, i32) {
    %c0_i32 = arith.constant 0 : i32
    %c0_i32_0 = arith.constant 0 : i32
    %c0_i32_1 = arith.constant 0 : i32
    return %c0_i32, %c0_i32_0 : i32, i32
  }
  func.func @transform_2(%arg0: i32) -> (i32, i32) {
    %c0_i32 = arith.constant 0 : i32
    %c0_i32_0 = arith.constant 0 : i32
    %c0_i32_1 = arith.constant 0 : i32
    return %c0_i32, %c0_i32_0 : i32, i32
  }
  func.func @transform_3(%arg0: i32) -> (i32, i32) {
    %c0_i32 = arith.constant 0 : i32
    %c0_i32_0 = arith.constant 0 : i32
    return %arg0, %c0_i32 : i32, i32
  }
}

module attributes {stable_mosaic.version = 11 : i64} {
  func.func @_attn_kernel(%arg0: i32, %arg1: i32, %arg2: memref<1x8x256xbf16, #tpu.memory_space<vmem>>, %arg3: memref<1x8x256xbf16, #tpu.memory_space<vmem>>, %arg4: memref<1x8x256xbf16, #tpu.memory_space<vmem>>, %arg5: memref<1x1x8xf32, #tpu.memory_space<vmem>>, %arg6: memref<1x8x256xbf16, #tpu.memory_space<vmem>>) attributes {dimension_semantics = [#tpu.dimension_semantics<parallel>, #tpu.dimension_semantics<parallel>], iteration_bounds = array<i64: 2, 3>, scalar_prefetch = 0 : i64, scratch_operands = 0 : i64, tpu.core_type = #tpu.core_type<tc>, window_params = [{transform_indices = @transform_0, window_bounds = array<i64: 1, 8, 256>}, {transform_indices = @transform_1, window_bounds = array<i64: 1, 8, 256>}, {transform_indices = @transform_2, window_bounds = array<i64: 1, 8, 256>}, {transform_indices = @transform_3, window_bounds = array<i64: 1, 1, 8>}, {transform_indices = @transform_4, window_bounds = array<i64: 1, 8, 256>}]} {
    %c0 = arith.constant 0 : index
    %c0_0 = arith.constant 0 : index
    %c0_1 = arith.constant 0 : index
    %0 = vector.load %arg5[%c0, %c0_0, %c0_1] : memref<1x1x8xf32, #tpu.memory_space<vmem>>, vector<1x1x8xf32>
    %1 = vector.shape_cast %0 : vector<1x1x8xf32> to vector<1x8xf32>
    %c0_2 = arith.constant 0 : index
    %c0_3 = arith.constant 0 : index
    %c0_4 = arith.constant 0 : index
    %2 = vector.load %arg2[%c0_2, %c0_3, %c0_4] : memref<1x8x256xbf16, #tpu.memory_space<vmem>>, vector<1x8x64xbf16>
    %3 = vector.shape_cast %2 : vector<1x8x64xbf16> to vector<8x64xbf16>
    %c0_5 = arith.constant 0 : index
    %c0_6 = arith.constant 0 : index
    %c0_7 = arith.constant 0 : index
    %4 = vector.load %arg3[%c0_5, %c0_6, %c0_7] : memref<1x8x256xbf16, #tpu.memory_space<vmem>>, vector<1x8x64xbf16>
    %5 = vector.shape_cast %4 : vector<1x8x64xbf16> to vector<8x64xbf16>
    %c0_8 = arith.constant 0 : index
    %c0_9 = arith.constant 0 : index
    %c0_10 = arith.constant 0 : index
    %6 = vector.load %arg4[%c0_8, %c0_9, %c0_10] : memref<1x8x256xbf16, #tpu.memory_space<vmem>>, vector<1x8x64xbf16>
    %7 = vector.shape_cast %6 : vector<1x8x64xbf16> to vector<8x64xbf16>
    %cst = arith.constant dense<0.000000e+00> : vector<8x8xf32>
    %8 = tpu.matmul %3, %5, %cst {dimension_numbers = #tpu.dot_dimension_numbers<[1], [1], [0], [0], [0, 0, 1, 0], [], []>} : vector<8x64xbf16>, vector<8x64xbf16>, vector<8x8xf32> -> vector<8x8xf32>
    %9 = vector.broadcast %1 : vector<1x8xf32> to vector<8x8xf32>
    %10 = arith.addf %8, %9 : vector<8x8xf32>
    %cst_11 = arith.constant dense<0xFF800000> : vector<8xf32>
    %11 = vector.multi_reduction <maximumf>, %10, %cst_11 [1] : vector<8x8xf32> to vector<8xf32>
    %12 = vector.shape_cast %11 : vector<8xf32> to vector<8x1xf32>
    %13 = vector.broadcast %12 : vector<8x1xf32> to vector<8x8xf32>
    %14 = arith.subf %10, %13 : vector<8x8xf32>
    %15 = math.exp %14 : vector<8x8xf32>
    %cst_12 = arith.constant dense<0.000000e+00> : vector<8xf32>
    %16 = vector.multi_reduction <add>, %15, %cst_12 [1] : vector<8x8xf32> to vector<8xf32>
    %17 = vector.shape_cast %16 : vector<8xf32> to vector<8x1xf32>
    %18 = arith.truncf %15 : vector<8x8xf32> to vector<8x8xbf16>
    %cst_13 = arith.constant dense<0.000000e+00> : vector<8x64xf32>
    %19 = tpu.matmul %18, %7, %cst_13 {dimension_numbers = #tpu.dot_dimension_numbers<[1], [0], [0], [1], [0, 0, 1, 1], [], []>} : vector<8x8xbf16>, vector<8x64xbf16>, vector<8x64xf32> -> vector<8x64xf32>
    %20 = tpu.reciprocal %17 {approx = true} : vector<8x1xf32> -> vector<8x1xf32>
    %21 = vector.broadcast %20 : vector<8x1xf32> to vector<8x64xf32>
    %22 = arith.mulf %19, %21 : vector<8x64xf32>
    %c0_14 = arith.constant 0 : index
    %c0_15 = arith.constant 0 : index
    %c64 = arith.constant 64 : index
    %23 = vector.load %arg2[%c0_14, %c0_15, %c64] : memref<1x8x256xbf16, #tpu.memory_space<vmem>>, vector<1x8x64xbf16>
    %24 = vector.shape_cast %23 : vector<1x8x64xbf16> to vector<8x64xbf16>
    %c0_16 = arith.constant 0 : index
    %c0_17 = arith.constant 0 : index
    %c64_18 = arith.constant 64 : index
    %25 = vector.load %arg3[%c0_16, %c0_17, %c64_18] : memref<1x8x256xbf16, #tpu.memory_space<vmem>>, vector<1x8x64xbf16>
    %26 = vector.shape_cast %25 : vector<1x8x64xbf16> to vector<8x64xbf16>
    %c0_19 = arith.constant 0 : index
    %c0_20 = arith.constant 0 : index
    %c64_21 = arith.constant 64 : index
    %27 = vector.load %arg4[%c0_19, %c0_20, %c64_21] : memref<1x8x256xbf16, #tpu.memory_space<vmem>>, vector<1x8x64xbf16>
    %28 = vector.shape_cast %27 : vector<1x8x64xbf16> to vector<8x64xbf16>
    %cst_22 = arith.constant dense<0.000000e+00> : vector<8x8xf32>
    %29 = tpu.matmul %24, %26, %cst_22 {dimension_numbers = #tpu.dot_dimension_numbers<[1], [1], [0], [0], [0, 0, 1, 0], [], []>} : vector<8x64xbf16>, vector<8x64xbf16>, vector<8x8xf32> -> vector<8x8xf32>
    %30 = vector.broadcast %1 : vector<1x8xf32> to vector<8x8xf32>
    %31 = arith.addf %29, %30 : vector<8x8xf32>
    %cst_23 = arith.constant dense<0xFF800000> : vector<8xf32>
    %32 = vector.multi_reduction <maximumf>, %31, %cst_23 [1] : vector<8x8xf32> to vector<8xf32>
    %33 = vector.shape_cast %32 : vector<8xf32> to vector<8x1xf32>
    %34 = vector.broadcast %33 : vector<8x1xf32> to vector<8x8xf32>
    %35 = arith.subf %31, %34 : vector<8x8xf32>
    %36 = math.exp %35 : vector<8x8xf32>
    %cst_24 = arith.constant dense<0.000000e+00> : vector<8xf32>
    %37 = vector.multi_reduction <add>, %36, %cst_24 [1] : vector<8x8xf32> to vector<8xf32>
    %38 = vector.shape_cast %37 : vector<8xf32> to vector<8x1xf32>
    %39 = arith.truncf %36 : vector<8x8xf32> to vector<8x8xbf16>
    %cst_25 = arith.constant dense<0.000000e+00> : vector<8x64xf32>
    %40 = tpu.matmul %39, %28, %cst_25 {dimension_numbers = #tpu.dot_dimension_numbers<[1], [0], [0], [1], [0, 0, 1, 1], [], []>} : vector<8x8xbf16>, vector<8x64xbf16>, vector<8x64xf32> -> vector<8x64xf32>
    %41 = tpu.reciprocal %38 {approx = true} : vector<8x1xf32> -> vector<8x1xf32>
    %42 = vector.broadcast %41 : vector<8x1xf32> to vector<8x64xf32>
    %43 = arith.mulf %40, %42 : vector<8x64xf32>
    %c0_26 = arith.constant 0 : index
    %c0_27 = arith.constant 0 : index
    %c128 = arith.constant 128 : index
    %44 = vector.load %arg2[%c0_26, %c0_27, %c128] : memref<1x8x256xbf16, #tpu.memory_space<vmem>>, vector<1x8x64xbf16>
    %45 = vector.shape_cast %44 : vector<1x8x64xbf16> to vector<8x64xbf16>
    %c0_28 = arith.constant 0 : index
    %c0_29 = arith.constant 0 : index
    %c128_30 = arith.constant 128 : index
    %46 = vector.load %arg3[%c0_28, %c0_29, %c128_30] : memref<1x8x256xbf16, #tpu.memory_space<vmem>>, vector<1x8x64xbf16>
    %47 = vector.shape_cast %46 : vector<1x8x64xbf16> to vector<8x64xbf16>
    %c0_31 = arith.constant 0 : index
    %c0_32 = arith.constant 0 : index
    %c128_33 = arith.constant 128 : index
    %48 = vector.load %arg4[%c0_31, %c0_32, %c128_33] : memref<1x8x256xbf16, #tpu.memory_space<vmem>>, vector<1x8x64xbf16>
    %49 = vector.shape_cast %48 : vector<1x8x64xbf16> to vector<8x64xbf16>
    %cst_34 = arith.constant dense<0.000000e+00> : vector<8x8xf32>
    %50 = tpu.matmul %45, %47, %cst_34 {dimension_numbers = #tpu.dot_dimension_numbers<[1], [1], [0], [0], [0, 0, 1, 0], [], []>} : vector<8x64xbf16>, vector<8x64xbf16>, vector<8x8xf32> -> vector<8x8xf32>
    %51 = vector.broadcast %1 : vector<1x8xf32> to vector<8x8xf32>
    %52 = arith.addf %50, %51 : vector<8x8xf32>
    %cst_35 = arith.constant dense<0xFF800000> : vector<8xf32>
    %53 = vector.multi_reduction <maximumf>, %52, %cst_35 [1] : vector<8x8xf32> to vector<8xf32>
    %54 = vector.shape_cast %53 : vector<8xf32> to vector<8x1xf32>
    %55 = vector.broadcast %54 : vector<8x1xf32> to vector<8x8xf32>
    %56 = arith.subf %52, %55 : vector<8x8xf32>
    %57 = math.exp %56 : vector<8x8xf32>
    %cst_36 = arith.constant dense<0.000000e+00> : vector<8xf32>
    %58 = vector.multi_reduction <add>, %57, %cst_36 [1] : vector<8x8xf32> to vector<8xf32>
    %59 = vector.shape_cast %58 : vector<8xf32> to vector<8x1xf32>
    %60 = arith.truncf %57 : vector<8x8xf32> to vector<8x8xbf16>
    %cst_37 = arith.constant dense<0.000000e+00> : vector<8x64xf32>
    %61 = tpu.matmul %60, %49, %cst_37 {dimension_numbers = #tpu.dot_dimension_numbers<[1], [0], [0], [1], [0, 0, 1, 1], [], []>} : vector<8x8xbf16>, vector<8x64xbf16>, vector<8x64xf32> -> vector<8x64xf32>
    %62 = tpu.reciprocal %59 {approx = true} : vector<8x1xf32> -> vector<8x1xf32>
    %63 = vector.broadcast %62 : vector<8x1xf32> to vector<8x64xf32>
    %64 = arith.mulf %61, %63 : vector<8x64xf32>
    %c0_38 = arith.constant 0 : index
    %c0_39 = arith.constant 0 : index
    %c192 = arith.constant 192 : index
    %65 = vector.load %arg2[%c0_38, %c0_39, %c192] : memref<1x8x256xbf16, #tpu.memory_space<vmem>>, vector<1x8x64xbf16>
    %66 = vector.shape_cast %65 : vector<1x8x64xbf16> to vector<8x64xbf16>
    %c0_40 = arith.constant 0 : index
    %c0_41 = arith.constant 0 : index
    %c192_42 = arith.constant 192 : index
    %67 = vector.load %arg3[%c0_40, %c0_41, %c192_42] : memref<1x8x256xbf16, #tpu.memory_space<vmem>>, vector<1x8x64xbf16>
    %68 = vector.shape_cast %67 : vector<1x8x64xbf16> to vector<8x64xbf16>
    %c0_43 = arith.constant 0 : index
    %c0_44 = arith.constant 0 : index
    %c192_45 = arith.constant 192 : index
    %69 = vector.load %arg4[%c0_43, %c0_44, %c192_45] : memref<1x8x256xbf16, #tpu.memory_space<vmem>>, vector<1x8x64xbf16>
    %70 = vector.shape_cast %69 : vector<1x8x64xbf16> to vector<8x64xbf16>
    %cst_46 = arith.constant dense<0.000000e+00> : vector<8x8xf32>
    %71 = tpu.matmul %66, %68, %cst_46 {dimension_numbers = #tpu.dot_dimension_numbers<[1], [1], [0], [0], [0, 0, 1, 0], [], []>} : vector<8x64xbf16>, vector<8x64xbf16>, vector<8x8xf32> -> vector<8x8xf32>
    %72 = vector.broadcast %1 : vector<1x8xf32> to vector<8x8xf32>
    %73 = arith.addf %71, %72 : vector<8x8xf32>
    %cst_47 = arith.constant dense<0xFF800000> : vector<8xf32>
    %74 = vector.multi_reduction <maximumf>, %73, %cst_47 [1] : vector<8x8xf32> to vector<8xf32>
    %75 = vector.shape_cast %74 : vector<8xf32> to vector<8x1xf32>
    %76 = vector.broadcast %75 : vector<8x1xf32> to vector<8x8xf32>
    %77 = arith.subf %73, %76 : vector<8x8xf32>
    %78 = math.exp %77 : vector<8x8xf32>
    %cst_48 = arith.constant dense<0.000000e+00> : vector<8xf32>
    %79 = vector.multi_reduction <add>, %78, %cst_48 [1] : vector<8x8xf32> to vector<8xf32>
    %80 = vector.shape_cast %79 : vector<8xf32> to vector<8x1xf32>
    %81 = arith.truncf %78 : vector<8x8xf32> to vector<8x8xbf16>
    %cst_49 = arith.constant dense<0.000000e+00> : vector<8x64xf32>
    %82 = tpu.matmul %81, %70, %cst_49 {dimension_numbers = #tpu.dot_dimension_numbers<[1], [0], [0], [1], [0, 0, 1, 1], [], []>} : vector<8x8xbf16>, vector<8x64xbf16>, vector<8x64xf32> -> vector<8x64xf32>
    %83 = tpu.reciprocal %80 {approx = true} : vector<8x1xf32> -> vector<8x1xf32>
    %84 = vector.broadcast %83 : vector<8x1xf32> to vector<8x64xf32>
    %85 = arith.mulf %82, %84 : vector<8x64xf32>
    %86 = tpu.concatenate %22, %43, %64, %85 in 1 : vector<8x64xf32>, vector<8x64xf32>, vector<8x64xf32>, vector<8x64xf32> -> vector<8x256xf32>
    %87 = arith.truncf %86 : vector<8x256xf32> to vector<8x256xbf16>
    %c0_50 = arith.constant 0 : index
    %c0_51 = arith.constant 0 : index
    %c0_52 = arith.constant 0 : index
    %88 = vector.load %arg6[%c0_50, %c0_51, %c0_52] : memref<1x8x256xbf16, #tpu.memory_space<vmem>>, vector<1x8x256xbf16>
    %89 = vector.shape_cast %88 : vector<1x8x256xbf16> to vector<8x256xbf16>
    %90 = vector.shape_cast %87 : vector<8x256xbf16> to vector<1x8x256xbf16>
    tpu.vector_store %arg6[%c0_50, %c0_51, %c0_52], %90 {strides = array<i32>} : memref<1x8x256xbf16, #tpu.memory_space<vmem>>, vector<1x8x256xbf16>,
    return
  }
  func.func @transform_0(%arg0: i32, %arg1: i32) -> (i32, i32, i32) {
    %c0_i32 = arith.constant 0 : i32
    %c0_i32_0 = arith.constant 0 : i32
    return %arg0, %c0_i32, %arg1 : i32, i32, i32
  }
  func.func @transform_1(%arg0: i32, %arg1: i32) -> (i32, i32, i32) {
    %c3_i32 = arith.constant 3 : i32
    %0 = arith.addi %c3_i32, %arg1 : i32
    %c0_i32 = arith.constant 0 : i32
    %c0_i32_0 = arith.constant 0 : i32
    return %arg0, %c0_i32, %0 : i32, i32, i32
  }
  func.func @transform_2(%arg0: i32, %arg1: i32) -> (i32, i32, i32) {
    %c6_i32 = arith.constant 6 : i32
    %0 = arith.addi %c6_i32, %arg1 : i32
    %c0_i32 = arith.constant 0 : i32
    %c0_i32_0 = arith.constant 0 : i32
    return %arg0, %c0_i32, %0 : i32, i32, i32
  }
  func.func @transform_3(%arg0: i32, %arg1: i32) -> (i32, i32, i32) {
    %c0_i32 = arith.constant 0 : i32
    %c0_i32_0 = arith.constant 0 : i32
    %c0_i32_1 = arith.constant 0 : i32
    return %arg0, %c0_i32, %c0_i32_0 : i32, i32, i32
  }
  func.func @transform_4(%arg0: i32, %arg1: i32) -> (i32, i32, i32) {
    %c0_i32 = arith.constant 0 : i32
    %c0_i32_0 = arith.constant 0 : i32
    return %arg0, %c0_i32, %arg1 : i32, i32, i32
  }
}

module attributes {stable_mosaic.version = 11 : i64} {
  func.func @_dense_add_ln_kernel(%arg0: i32, %arg1: i32, %arg2: memref<8x384xbf16, #tpu.memory_space<vmem>>, %arg3: memref<384x768xbf16, #tpu.memory_space<vmem>>, %arg4: memref<1x768xf32, #tpu.memory_space<vmem>>, %arg5: memref<8x768xbf16, #tpu.memory_space<vmem>>, %arg6: memref<1x768xf32, #tpu.memory_space<vmem>>, %arg7: memref<1x768xf32, #tpu.memory_space<vmem>>, %arg8: memref<8x768xbf16, #tpu.memory_space<vmem>>, %arg9: memref<8x768xf32, #tpu.memory_space<vmem>>) attributes {dimension_semantics = [#tpu.dimension_semantics<parallel>, #tpu.dimension_semantics<arbitrary>], iteration_bounds = array<i64: 2, 2>, scalar_prefetch = 0 : i64, scratch_operands = 1 : i64, tpu.core_type = #tpu.core_type<tc>, window_params = [{transform_indices = @transform_0, window_bounds = array<i64: 8, 384>}, {transform_indices = @transform_1, window_bounds = array<i64: 384, 768>}, {pipeline_mode = #tpu.pipeline_mode<synchronous>, transform_indices = @transform_2, window_bounds = array<i64: 1, 768>}, {transform_indices = @transform_3, window_bounds = array<i64: 8, 768>}, {pipeline_mode = #tpu.pipeline_mode<synchronous>, transform_indices = @transform_4, window_bounds = array<i64: 1, 768>}, {pipeline_mode = #tpu.pipeline_mode<synchronous>, transform_indices = @transform_5, window_bounds = array<i64: 1, 768>}, {transform_indices = @transform_6, window_bounds = array<i64: 8, 768>}]} {
    %c0_i32 = arith.constant 0 : i32
    %0 = arith.cmpi eq, %arg1, %c0_i32 : i32
    %1 = arith.extui %0 : i1 to i32
    %c0_i32_0 = arith.constant 0 : i32
    %2 = arith.cmpi ne, %1, %c0_i32_0 : i32
    scf.if %2 {
      %cst_9 = arith.constant 0.000000e+00 : f32
      %12 = vector.broadcast %cst_9 : f32 to vector<8x768xf32>
      %c0_10 = arith.constant 0 : index
      %c0_11 = arith.constant 0 : index
      %13 = vector.load %arg9[%c0_10, %c0_11] : memref<8x768xf32, #tpu.memory_space<vmem>>, vector<8x768xf32>
      tpu.vector_store %arg9[%c0_10, %c0_11], %12 {strides = array<i32>} : memref<8x768xf32, #tpu.memory_space<vmem>>, vector<8x768xf32>,
    } else {
    }
    %c0 = arith.constant 0 : index
    %c0_1 = arith.constant 0 : index
    %3 = vector.load %arg9[%c0, %c0_1] : memref<8x768xf32, #tpu.memory_space<vmem>>, vector<8x768xf32>
    %c0_2 = arith.constant 0 : index
    %c0_3 = arith.constant 0 : index
    %4 = vector.load %arg2[%c0_2, %c0_3] : memref<8x384xbf16, #tpu.memory_space<vmem>>, vector<8x384xbf16>
    %c0_4 = arith.constant 0 : index
    %c0_5 = arith.constant 0 : index
    %5 = vector.load %arg3[%c0_4, %c0_5] : memref<384x768xbf16, #tpu.memory_space<vmem>>, vector<384x768xbf16>
    %cst = arith.constant dense<0.000000e+00> : vector<8x768xf32>
    %6 = tpu.matmul %4, %5, %cst {dimension_numbers = #tpu.dot_dimension_numbers<[1], [0], [0], [1], [0, 0, 1, 1], [], []>} : vector<8x384xbf16>, vector<384x768xbf16>, vector<8x768xf32> -> vector<8x768xf32>
    %7 = arith.addf %3, %6 : vector<8x768xf32>
    %c0_6 = arith.constant 0 : index
    %c0_7 = arith.constant 0 : index
    %8 = vector.load %arg9[%c0_6, %c0_7] : memref<8x768xf32, #tpu.memory_space<vmem>>, vector<8x768xf32>
    tpu.vector_store %arg9[%c0_6, %c0_7], %7 {strides = array<i32>} : memref<8x768xf32, #tpu.memory_space<vmem>>, vector<8x768xf32>,
    %c1_i32 = arith.constant 1 : i32
    %9 = arith.cmpi eq, %arg1, %c1_i32 : i32
    %10 = arith.extui %9 : i1 to i32
    %c0_i32_8 = arith.constant 0 : i32
    %11 = arith.cmpi ne, %10, %c0_i32_8 : i32
    scf.if %11 {
      %c0_9 = arith.constant 0 : index
      %c0_10 = arith.constant 0 : index
      %12 = vector.load %arg9[%c0_9, %c0_10] : memref<8x768xf32, #tpu.memory_space<vmem>>, vector<8x768xf32>
      %c0_11 = arith.constant 0 : index
      %c0_12 = arith.constant 0 : index
      %13 = vector.load %arg4[%c0_11, %c0_12] : memref<1x768xf32, #tpu.memory_space<vmem>>, vector<1x768xf32>
      %14 = vector.broadcast %13 : vector<1x768xf32> to vector<8x768xf32>
      %15 = arith.addf %12, %14 : vector<8x768xf32>
      %c0_13 = arith.constant 0 : index
      %c0_14 = arith.constant 0 : index
      %16 = vector.load %arg5[%c0_13, %c0_14] : memref<8x768xbf16, #tpu.memory_space<vmem>>, vector<8x768xbf16>
      %17 = arith.extf %16 : vector<8x768xbf16> to vector<8x768xf32>
      %18 = arith.addf %15, %17 : vector<8x768xf32>
      %cst_15 = arith.constant dense<0.000000e+00> : vector<8xf32>
      %19 = vector.multi_reduction <add>, %18, %cst_15 [1] : vector<8x768xf32> to vector<8xf32>
      %20 = vector.shape_cast %19 : vector<8xf32> to vector<8x1xf32>
      %cst_16 = arith.constant 7.680000e+02 : f32
      %21 = vector.broadcast %cst_16 : f32 to vector<8x1xf32>
      %22 = arith.divf %20, %21 : vector<8x1xf32>
      %23 = vector.broadcast %22 : vector<8x1xf32> to vector<8x768xf32>
      %24 = arith.subf %18, %23 : vector<8x768xf32>
      %25 = arith.mulf %24, %24 : vector<8x768xf32>
      %cst_17 = arith.constant dense<0.000000e+00> : vector<8xf32>
      %26 = vector.multi_reduction <add>, %25, %cst_17 [1] : vector<8x768xf32> to vector<8xf32>
      %27 = vector.shape_cast %26 : vector<8xf32> to vector<8x1xf32>
      %cst_18 = arith.constant 7.680000e+02 : f32
      %28 = vector.broadcast %cst_18 : f32 to vector<8x1xf32>
      %29 = arith.divf %27, %28 : vector<8x1xf32>
      %30 = vector.broadcast %22 : vector<8x1xf32> to vector<8x768xf32>
      %31 = arith.subf %18, %30 : vector<8x768xf32>
      %cst_19 = arith.constant 9.99999996E-13 : f32
      %32 = vector.broadcast %cst_19 : f32 to vector<8x1xf32>
      %33 = arith.addf %29, %32 : vector<8x1xf32>
      %34 = math.rsqrt %33 : vector<8x1xf32>
      %35 = vector.broadcast %34 : vector<8x1xf32> to vector<8x768xf32>
      %36 = arith.mulf %31, %35 : vector<8x768xf32>
      %c0_20 = arith.constant 0 : index
      %c0_21 = arith.constant 0 : index
      %37 = vector.load %arg6[%c0_20, %c0_21] : memref<1x768xf32, #tpu.memory_space<vmem>>, vector<1x768xf32>
      %38 = vector.broadcast %37 : vector<1x768xf32> to vector<8x768xf32>
      %39 = arith.mulf %36, %38 : vector<8x768xf32>
      %c0_22 = arith.constant 0 : index
      %c0_23 = arith.constant 0 : index
      %40 = vector.load %arg7[%c0_22, %c0_23] : memref<1x768xf32, #tpu.memory_space<vmem>>, vector<1x768xf32>
      %41 = vector.broadcast %40 : vector<1x768xf32> to vector<8x768xf32>
      %42 = arith.addf %39, %41 : vector<8x768xf32>
      %43 = arith.truncf %42 : vector<8x768xf32> to vector<8x768xbf16>
      %c0_24 = arith.constant 0 : index
      %c0_25 = arith.constant 0 : index
      %44 = vector.load %arg8[%c0_24, %c0_25] : memref<8x768xbf16, #tpu.memory_space<vmem>>, vector<8x768xbf16>
      tpu.vector_store %arg8[%c0_24, %c0_25], %43 {strides = array<i32>} : memref<8x768xbf16, #tpu.memory_space<vmem>>, vector<8x768xbf16>,
    } else {
    }
    return
  }
  func.func @transform_0(%arg0: i32, %arg1: i32) -> (i32, i32) {
    %c0_i32 = arith.constant 0 : i32
    return %arg0, %arg1 : i32, i32
  }
  func.func @transform_1(%arg0: i32, %arg1: i32) -> (i32, i32) {
    %c0_i32 = arith.constant 0 : i32
    %c0_i32_0 = arith.constant 0 : i32
    return %arg1, %c0_i32 : i32, i32
  }
  func.func @transform_2(%arg0: i32, %arg1: i32) -> (i32, i32) {
    %c0_i32 = arith.constant 0 : i32
    %c0_i32_0 = arith.constant 0 : i32
    %c0_i32_1 = arith.constant 0 : i32
    return %c0_i32, %c0_i32_0 : i32, i32
  }
  func.func @transform_3(%arg0: i32, %arg1: i32) -> (i32, i32) {
    %c0_i32 = arith.constant 0 : i32
    %c0_i32_0 = arith.constant 0 : i32
    return %arg0, %c0_i32 : i32, i32
  }
  func.func @transform_4(%arg0: i32, %arg1: i32) -> (i32, i32) {
    %c0_i32 = arith.constant 0 : i32
    %c0_i32_0 = arith.constant 0 : i32
    %c0_i32_1 = arith.constant 0 : i32
    return %c0_i32, %c0_i32_0 : i32, i32
  }
  func.func @transform_5(%arg0: i32, %arg1: i32) -> (i32, i32) {
    %c0_i32 = arith.constant 0 : i32
    %c0_i32_0 = arith.constant 0 : i32
    %c0_i32_1 = arith.constant 0 : i32
    return %c0_i32, %c0_i32_0 : i32, i32
  }
  func.func @transform_6(%arg0: i32, %arg1: i32) -> (i32, i32) {
    %c0_i32 = arith.constant 0 : i32
    %c0_i32_0 = arith.constant 0 : i32
    return %arg0, %c0_i32 : i32, i32
  }
}

module attributes {stable_mosaic.version = 11 : i64} {
  func.func @_dense_kernel(%arg0: i32, %arg1: i32, %arg2: i32, %arg3: memref<16x384xbf16, #tpu.memory_space<vmem>>, %arg4: memref<384x1024xbf16, #tpu.memory_space<vmem>>, %arg5: memref<1x1024xf32, #tpu.memory_space<vmem>>, %arg6: memref<16x1024xbf16, #tpu.memory_space<vmem>>, %arg7: memref<16x1024xf32, #tpu.memory_space<vmem>>) attributes {dimension_semantics = [#tpu.dimension_semantics<parallel>, #tpu.dimension_semantics<parallel>, #tpu.dimension_semantics<arbitrary>], iteration_bounds = array<i64: 1, 3, 2>, scalar_prefetch = 0 : i64, scratch_operands = 1 : i64, tpu.core_type = #tpu.core_type<tc>, window_params = [{transform_indices = @transform_0, window_bounds = array<i64: 16, 384>}, {transform_indices = @transform_1, window_bounds = array<i64: 384, 1024>}, {transform_indices = @transform_2, window_bounds = array<i64: 1, 1024>}, {transform_indices = @transform_3, window_bounds = array<i64: 16, 1024>}]} {
    %c0_i32 = arith.constant 0 : i32
    %0 = arith.cmpi eq, %arg2, %c0_i32 : i32
    %1 = arith.extui %0 : i1 to i32
    %c0_i32_0 = arith.constant 0 : i32
    %2 = arith.cmpi ne, %1, %c0_i32_0 : i32
    scf.if %2 {
      %cst_9 = arith.constant 0.000000e+00 : f32
      %12 = vector.broadcast %cst_9 : f32 to vector<16x1024xf32>
      %c0_10 = arith.constant 0 : index
      %c0_11 = arith.constant 0 : index
      %13 = vector.load %arg7[%c0_10, %c0_11] : memref<16x1024xf32, #tpu.memory_space<vmem>>, vector<16x1024xf32>
      tpu.vector_store %arg7[%c0_10, %c0_11], %12 {strides = array<i32>} : memref<16x1024xf32, #tpu.memory_space<vmem>>, vector<16x1024xf32>,
    } else {
    }
    %c0 = arith.constant 0 : index
    %c0_1 = arith.constant 0 : index
    %3 = vector.load %arg7[%c0, %c0_1] : memref<16x1024xf32, #tpu.memory_space<vmem>>, vector<16x1024xf32>
    %c0_2 = arith.constant 0 : index
    %c0_3 = arith.constant 0 : index
    %4 = vector.load %arg3[%c0_2, %c0_3] : memref<16x384xbf16, #tpu.memory_space<vmem>>, vector<16x384xbf16>
    %c0_4 = arith.constant 0 : index
    %c0_5 = arith.constant 0 : index
    %5 = vector.load %arg4[%c0_4, %c0_5] : memref<384x1024xbf16, #tpu.memory_space<vmem>>, vector<384x1024xbf16>
    %cst = arith.constant dense<0.000000e+00> : vector<16x1024xf32>
    %6 = tpu.matmul %4, %5, %cst {dimension_numbers = #tpu.dot_dimension_numbers<[1], [0], [0], [1], [0, 0, 1, 1], [], []>} : vector<16x384xbf16>, vector<384x1024xbf16>, vector<16x1024xf32> -> vector<16x1024xf32>
    %7 = arith.addf %3, %6 : vector<16x1024xf32>
    %c0_6 = arith.constant 0 : index
    %c0_7 = arith.constant 0 : index
    %8 = vector.load %arg7[%c0_6, %c0_7] : memref<16x1024xf32, #tpu.memory_space<vmem>>, vector<16x1024xf32>
    tpu.vector_store %arg7[%c0_6, %c0_7], %7 {strides = array<i32>} : memref<16x1024xf32, #tpu.memory_space<vmem>>, vector<16x1024xf32>,
    %c1_i32 = arith.constant 1 : i32
    %9 = arith.cmpi eq, %arg2, %c1_i32 : i32
    %10 = arith.extui %9 : i1 to i32
    %c0_i32_8 = arith.constant 0 : i32
    %11 = arith.cmpi ne, %10, %c0_i32_8 : i32
    scf.if %11 {
      %c0_9 = arith.constant 0 : index
      %c0_10 = arith.constant 0 : index
      %12 = vector.load %arg7[%c0_9, %c0_10] : memref<16x1024xf32, #tpu.memory_space<vmem>>, vector<16x1024xf32>
      %c0_11 = arith.constant 0 : index
      %c0_12 = arith.constant 0 : index
      %13 = vector.load %arg5[%c0_11, %c0_12] : memref<1x1024xf32, #tpu.memory_space<vmem>>, vector<1x1024xf32>
      %14 = vector.broadcast %13 : vector<1x1024xf32> to vector<16x1024xf32>
      %15 = arith.addf %12, %14 : vector<16x1024xf32>
      %cst_13 = arith.constant 5.000000e-01 : f32
      %16 = vector.broadcast %cst_13 : f32 to vector<16x1024xf32>
      %17 = arith.mulf %16, %15 : vector<16x1024xf32>
      %cst_14 = arith.constant 4.471500e-02 : f32
      %18 = vector.broadcast %cst_14 : f32 to vector<16x1024xf32>
      %19 = arith.mulf %18, %15 : vector<16x1024xf32>
      %20 = arith.mulf %19, %15 : vector<16x1024xf32>
      %21 = arith.mulf %20, %15 : vector<16x1024xf32>
      %22 = arith.addf %15, %21 : vector<16x1024xf32>
      %cst_15 = arith.constant 0.797884583 : f32
      %23 = vector.broadcast %cst_15 : f32 to vector<16x1024xf32>
      %24 = arith.mulf %23, %22 : vector<16x1024xf32>
      %25 = math.tanh %24 : vector<16x1024xf32>
      %cst_16 = arith.constant 1.000000e+00 : f32
      %26 = vector.broadcast %cst_16 : f32 to vector<16x1024xf32>
      %27 = arith.addf %26, %25 : vector<16x1024xf32>
      %28 = arith.mulf %17, %27 : vector<16x1024xf32>
      %29 = arith.truncf %28 : vector<16x1024xf32> to vector<16x1024xbf16>
      %c0_17 = arith.constant 0 : index
      %c0_18 = arith.constant 0 : index
      %30 = vector.load %arg6[%c0_17, %c0_18] : memref<16x1024xbf16, #tpu.memory_space<vmem>>, vector<16x1024xbf16>
      tpu.vector_store %arg6[%c0_17, %c0_18], %29 {strides = array<i32>} : memref<16x1024xbf16, #tpu.memory_space<vmem>>, vector<16x1024xbf16>,
    } else {
    }
    return
  }
  func.func @transform_0(%arg0: i32, %arg1: i32, %arg2: i32) -> (i32, i32) {
    %c0_i32 = arith.constant 0 : i32
    return %arg0, %arg2 : i32, i32
  }
  func.func @transform_1(%arg0: i32, %arg1: i32, %arg2: i32) -> (i32, i32) {
    %c0_i32 = arith.constant 0 : i32
    return %arg2, %arg1 : i32, i32
  }
  func.func @transform_2(%arg0: i32, %arg1: i32, %arg2: i32) -> (i32, i32) {
    %c0_i32 = arith.constant 0 : i32
    %c0_i32_0 = arith.constant 0 : i32
    return %c0_i32, %arg1 : i32, i32
  }
  func.func @transform_3(%arg0: i32, %arg1: i32, %arg2: i32) -> (i32, i32) {
    %c0_i32 = arith.constant 0 : i32
    return %arg0, %arg1 : i32, i32
  }
}

module attributes {stable_mosaic.version = 11 : i64} {
  func.func @_dense_add_ln_kernel(%arg0: i32, %arg1: i32, %arg2: memref<8x512xbf16, #tpu.memory_space<vmem>>, %arg3: memref<512x768xbf16, #tpu.memory_space<vmem>>, %arg4: memref<1x768xf32, #tpu.memory_space<vmem>>, %arg5: memref<8x768xbf16, #tpu.memory_space<vmem>>, %arg6: memref<1x768xf32, #tpu.memory_space<vmem>>, %arg7: memref<1x768xf32, #tpu.memory_space<vmem>>, %arg8: memref<8x768xbf16, #tpu.memory_space<vmem>>, %arg9: memref<8x768xf32, #tpu.memory_space<vmem>>) attributes {dimension_semantics = [#tpu.dimension_semantics<parallel>, #tpu.dimension_semantics<arbitrary>], iteration_bounds = array<i64: 2, 6>, scalar_prefetch = 0 : i64, scratch_operands = 1 : i64, tpu.core_type = #tpu.core_type<tc>, window_params = [{transform_indices = @transform_0, window_bounds = array<i64: 8, 512>}, {transform_indices = @transform_1, window_bounds = array<i64: 512, 768>}, {pipeline_mode = #tpu.pipeline_mode<synchronous>, transform_indices = @transform_2, window_bounds = array<i64: 1, 768>}, {transform_indices = @transform_3, window_bounds = array<i64: 8, 768>}, {pipeline_mode = #tpu.pipeline_mode<synchronous>, transform_indices = @transform_4, window_bounds = array<i64: 1, 768>}, {pipeline_mode = #tpu.pipeline_mode<synchronous>, transform_indices = @transform_5, window_bounds = array<i64: 1, 768>}, {transform_indices = @transform_6, window_bounds = array<i64: 8, 768>}]} {
    %c0_i32 = arith.constant 0 : i32
    %0 = arith.cmpi eq, %arg1, %c0_i32 : i32
    %1 = arith.extui %0 : i1 to i32
    %c0_i32_0 = arith.constant 0 : i32
    %2 = arith.cmpi ne, %1, %c0_i32_0 : i32
    scf.if %2 {
      %cst_9 = arith.constant 0.000000e+00 : f32
      %12 = vector.broadcast %cst_9 : f32 to vector<8x768xf32>
      %c0_10 = arith.constant 0 : index
      %c0_11 = arith.constant 0 : index
      %13 = vector.load %arg9[%c0_10, %c0_11] : memref<8x768xf32, #tpu.memory_space<vmem>>, vector<8x768xf32>
      tpu.vector_store %arg9[%c0_10, %c0_11], %12 {strides = array<i32>} : memref<8x768xf32, #tpu.memory_space<vmem>>, vector<8x768xf32>,
    } else {
    }
    %c0 = arith.constant 0 : index
    %c0_1 = arith.constant 0 : index
    %3 = vector.load %arg9[%c0, %c0_1] : memref<8x768xf32, #tpu.memory_space<vmem>>, vector<8x768xf32>
    %c0_2 = arith.constant 0 : index
    %c0_3 = arith.constant 0 : index
    %4 = vector.load %arg2[%c0_2, %c0_3] : memref<8x512xbf16, #tpu.memory_space<vmem>>, vector<8x512xbf16>
    %c0_4 = arith.constant 0 : index
    %c0_5 = arith.constant 0 : index
    %5 = vector.load %arg3[%c0_4, %c0_5] : memref<512x768xbf16, #tpu.memory_space<vmem>>, vector<512x768xbf16>
    %cst = arith.constant dense<0.000000e+00> : vector<8x768xf32>
    %6 = tpu.matmul %4, %5, %cst {dimension_numbers = #tpu.dot_dimension_numbers<[1], [0], [0], [1], [0, 0, 1, 1], [], []>} : vector<8x512xbf16>, vector<512x768xbf16>, vector<8x768xf32> -> vector<8x768xf32>
    %7 = arith.addf %3, %6 : vector<8x768xf32>
    %c0_6 = arith.constant 0 : index
    %c0_7 = arith.constant 0 : index
    %8 = vector.load %arg9[%c0_6, %c0_7] : memref<8x768xf32, #tpu.memory_space<vmem>>, vector<8x768xf32>
    tpu.vector_store %arg9[%c0_6, %c0_7], %7 {strides = array<i32>} : memref<8x768xf32, #tpu.memory_space<vmem>>, vector<8x768xf32>,
    %c5_i32 = arith.constant 5 : i32
    %9 = arith.cmpi eq, %arg1, %c5_i32 : i32
    %10 = arith.extui %9 : i1 to i32
    %c0_i32_8 = arith.constant 0 : i32
    %11 = arith.cmpi ne, %10, %c0_i32_8 : i32
    scf.if %11 {
      %c0_9 = arith.constant 0 : index
      %c0_10 = arith.constant 0 : index
      %12 = vector.load %arg9[%c0_9, %c0_10] : memref<8x768xf32, #tpu.memory_space<vmem>>, vector<8x768xf32>
      %c0_11 = arith.constant 0 : index
      %c0_12 = arith.constant 0 : index
      %13 = vector.load %arg4[%c0_11, %c0_12] : memref<1x768xf32, #tpu.memory_space<vmem>>, vector<1x768xf32>
      %14 = vector.broadcast %13 : vector<1x768xf32> to vector<8x768xf32>
      %15 = arith.addf %12, %14 : vector<8x768xf32>
      %c0_13 = arith.constant 0 : index
      %c0_14 = arith.constant 0 : index
      %16 = vector.load %arg5[%c0_13, %c0_14] : memref<8x768xbf16, #tpu.memory_space<vmem>>, vector<8x768xbf16>
      %17 = arith.extf %16 : vector<8x768xbf16> to vector<8x768xf32>
      %18 = arith.addf %15, %17 : vector<8x768xf32>
      %cst_15 = arith.constant dense<0.000000e+00> : vector<8xf32>
      %19 = vector.multi_reduction <add>, %18, %cst_15 [1] : vector<8x768xf32> to vector<8xf32>
      %20 = vector.shape_cast %19 : vector<8xf32> to vector<8x1xf32>
      %cst_16 = arith.constant 7.680000e+02 : f32
      %21 = vector.broadcast %cst_16 : f32 to vector<8x1xf32>
      %22 = arith.divf %20, %21 : vector<8x1xf32>
      %23 = vector.broadcast %22 : vector<8x1xf32> to vector<8x768xf32>
      %24 = arith.subf %18, %23 : vector<8x768xf32>
      %25 = arith.mulf %24, %24 : vector<8x768xf32>
      %cst_17 = arith.constant dense<0.000000e+00> : vector<8xf32>
      %26 = vector.multi_reduction <add>, %25, %cst_17 [1] : vector<8x768xf32> to vector<8xf32>
      %27 = vector.shape_cast %26 : vector<8xf32> to vector<8x1xf32>
      %cst_18 = arith.constant 7.680000e+02 : f32
      %28 = vector.broadcast %cst_18 : f32 to vector<8x1xf32>
      %29 = arith.divf %27, %28 : vector<8x1xf32>
      %30 = vector.broadcast %22 : vector<8x1xf32> to vector<8x768xf32>
      %31 = arith.subf %18, %30 : vector<8x768xf32>
      %cst_19 = arith.constant 9.99999996E-13 : f32
      %32 = vector.broadcast %cst_19 : f32 to vector<8x1xf32>
      %33 = arith.addf %29, %32 : vector<8x1xf32>
      %34 = math.rsqrt %33 : vector<8x1xf32>
      %35 = vector.broadcast %34 : vector<8x1xf32> to vector<8x768xf32>
      %36 = arith.mulf %31, %35 : vector<8x768xf32>
      %c0_20 = arith.constant 0 : index
      %c0_21 = arith.constant 0 : index
      %37 = vector.load %arg6[%c0_20, %c0_21] : memref<1x768xf32, #tpu.memory_space<vmem>>, vector<1x768xf32>
      %38 = vector.broadcast %37 : vector<1x768xf32> to vector<8x768xf32>
      %39 = arith.mulf %36, %38 : vector<8x768xf32>
      %c0_22 = arith.constant 0 : index
      %c0_23 = arith.constant 0 : index
      %40 = vector.load %arg7[%c0_22, %c0_23] : memref<1x768xf32, #tpu.memory_space<vmem>>, vector<1x768xf32>
      %41 = vector.broadcast %40 : vector<1x768xf32> to vector<8x768xf32>
      %42 = arith.addf %39, %41 : vector<8x768xf32>
      %43 = arith.truncf %42 : vector<8x768xf32> to vector<8x768xbf16>
      %c0_24 = arith.constant 0 : index
      %c0_25 = arith.constant 0 : index
      %44 = vector.load %arg8[%c0_24, %c0_25] : memref<8x768xbf16, #tpu.memory_space<vmem>>, vector<8x768xbf16>
      tpu.vector_store %arg8[%c0_24, %c0_25], %43 {strides = array<i32>} : memref<8x768xbf16, #tpu.memory_space<vmem>>, vector<8x768xbf16>,
    } else {
    }
    return
  }
  func.func @transform_0(%arg0: i32, %arg1: i32) -> (i32, i32) {
    %c0_i32 = arith.constant 0 : i32
    return %arg0, %arg1 : i32, i32
  }
  func.func @transform_1(%arg0: i32, %arg1: i32) -> (i32, i32) {
    %c0_i32 = arith.constant 0 : i32
    %c0_i32_0 = arith.constant 0 : i32
    return %arg1, %c0_i32 : i32, i32
  }
  func.func @transform_2(%arg0: i32, %arg1: i32) -> (i32, i32) {
    %c0_i32 = arith.constant 0 : i32
    %c0_i32_0 = arith.constant 0 : i32
    %c0_i32_1 = arith.constant 0 : i32
    return %c0_i32, %c0_i32_0 : i32, i32
  }
  func.func @transform_3(%arg0: i32, %arg1: i32) -> (i32, i32) {
    %c0_i32 = arith.constant 0 : i32
    %c0_i32_0 = arith.constant 0 : i32
    return %arg0, %c0_i32 : i32, i32
  }
  func.func @transform_4(%arg0: i32, %arg1: i32) -> (i32, i32) {
    %c0_i32 = arith.constant 0 : i32
    %c0_i32_0 = arith.constant 0 : i32
    %c0_i32_1 = arith.constant 0 : i32
    return %c0_i32, %c0_i32_0 : i32, i32
  }
  func.func @transform_5(%arg0: i32, %arg1: i32) -> (i32, i32) {
    %c0_i32 = arith.constant 0 : i32
    %c0_i32_0 = arith.constant 0 : i32
    %c0_i32_1 = arith.constant 0 : i32
    return %c0_i32, %c0_i32_0 : i32, i32
  }
  func.func @transform_6(%arg0: i32, %arg1: i32) -> (i32, i32) {
    %c0_i32 = arith.constant 0 : i32
    %c0_i32_0 = arith.constant 0 : i32
    return %arg0, %c0_i32 : i32, i32
  }
}

module attributes {stable_mosaic.version = 11 : i64} {
  func.func @_pooler_fc_kernel(%arg0: i32, %arg1: memref<2x768xbf16, #tpu.memory_space<vmem>>, %arg2: memref<768x768xbf16, #tpu.memory_space<vmem>>, %arg3: memref<1x768xf32, #tpu.memory_space<vmem>>, %arg4: memref<1x768xf32, #tpu.memory_space<vmem>>, %arg5: memref<1x1xf32, #tpu.memory_space<vmem>>, %arg6: memref<2x1xf32, #tpu.memory_space<vmem>>) attributes {dimension_semantics = [#tpu.dimension_semantics<arbitrary>], iteration_bounds = array<i64: 1>, scalar_prefetch = 0 : i64, scratch_operands = 0 : i64, tpu.core_type = #tpu.core_type<tc>, window_params = [{pipeline_mode = #tpu.pipeline_mode<synchronous>, transform_indices = @transform_0, window_bounds = array<i64: 2, 768>}, {pipeline_mode = #tpu.pipeline_mode<synchronous>, transform_indices = @transform_1, window_bounds = array<i64: 768, 768>}, {pipeline_mode = #tpu.pipeline_mode<synchronous>, transform_indices = @transform_2, window_bounds = array<i64: 1, 768>}, {pipeline_mode = #tpu.pipeline_mode<synchronous>, transform_indices = @transform_3, window_bounds = array<i64: 1, 768>}, {pipeline_mode = #tpu.pipeline_mode<synchronous>, transform_indices = @transform_4, window_bounds = array<i64: 1, 1>}, {pipeline_mode = #tpu.pipeline_mode<synchronous>, transform_indices = @transform_5, window_bounds = array<i64: 2, 1>}]} {
    %c0 = arith.constant 0 : index
    %c0_0 = arith.constant 0 : index
    %0 = vector.load %arg1[%c0, %c0_0] : memref<2x768xbf16, #tpu.memory_space<vmem>>, vector<2x768xbf16>
    %c0_1 = arith.constant 0 : index
    %c0_2 = arith.constant 0 : index
    %1 = vector.load %arg2[%c0_1, %c0_2] : memref<768x768xbf16, #tpu.memory_space<vmem>>, vector<768x768xbf16>
    %cst = arith.constant dense<0.000000e+00> : vector<2x768xf32>
    %2 = tpu.matmul %0, %1, %cst {dimension_numbers = #tpu.dot_dimension_numbers<[1], [0], [0], [1], [0, 0, 1, 1], [], []>} : vector<2x768xbf16>, vector<768x768xbf16>, vector<2x768xf32> -> vector<2x768xf32>
    %c0_3 = arith.constant 0 : index
    %c0_4 = arith.constant 0 : index
    %3 = vector.load %arg3[%c0_3, %c0_4] : memref<1x768xf32, #tpu.memory_space<vmem>>, vector<1x768xf32>
    %4 = vector.broadcast %3 : vector<1x768xf32> to vector<2x768xf32>
    %5 = arith.addf %2, %4 : vector<2x768xf32>
    %6 = math.tanh %5 : vector<2x768xf32>
    %c0_5 = arith.constant 0 : index
    %c0_6 = arith.constant 0 : index
    %7 = vector.load %arg4[%c0_5, %c0_6] : memref<1x768xf32, #tpu.memory_space<vmem>>, vector<1x768xf32>
    %8 = vector.broadcast %7 : vector<1x768xf32> to vector<2x768xf32>
    %9 = arith.mulf %6, %8 : vector<2x768xf32>
    %cst_7 = arith.constant dense<0.000000e+00> : vector<2xf32>
    %10 = vector.multi_reduction <add>, %9, %cst_7 [1] : vector<2x768xf32> to vector<2xf32>
    %11 = vector.shape_cast %10 : vector<2xf32> to vector<2x1xf32>
    %c0_8 = arith.constant 0 : index
    %c0_9 = arith.constant 0 : index
    %12 = vector.load %arg5[%c0_8, %c0_9] : memref<1x1xf32, #tpu.memory_space<vmem>>, vector<1x1xf32>
    %13 = vector.broadcast %12 : vector<1x1xf32> to vector<2x1xf32>
    %14 = arith.addf %11, %13 : vector<2x1xf32>
    %c0_10 = arith.constant 0 : index
    %c0_11 = arith.constant 0 : index
    %15 = vector.load %arg6[%c0_10, %c0_11] : memref<2x1xf32, #tpu.memory_space<vmem>>, vector<2x1xf32>
    tpu.vector_store %arg6[%c0_10, %c0_11], %14 {strides = array<i32>} : memref<2x1xf32, #tpu.memory_space<vmem>>, vector<2x1xf32>,
    return
  }
  func.func @transform_0(%arg0: i32) -> (i32, i32) {
    %c0_i32 = arith.constant 0 : i32
    %c0_i32_0 = arith.constant 0 : i32
    %c0_i32_1 = arith.constant 0 : i32
    return %c0_i32, %c0_i32_0 : i32, i32
  }
  func.func @transform_1(%arg0: i32) -> (i32, i32) {
    %c0_i32 = arith.constant 0 : i32
    %c0_i32_0 = arith.constant 0 : i32
    %c0_i32_1 = arith.constant 0 : i32
    return %c0_i32, %c0_i32_0 : i32, i32
  }
  func.func @transform_2(%arg0: i32) -> (i32, i32) {
    %c0_i32 = arith.constant 0 : i32
    %c0_i32_0 = arith.constant 0 : i32
    %c0_i32_1 = arith.constant 0 : i32
    return %c0_i32, %c0_i32_0 : i32, i32
  }
  func.func @transform_3(%arg0: i32) -> (i32, i32) {
    %c0_i32 = arith.constant 0 : i32
    %c0_i32_0 = arith.constant 0 : i32
    %c0_i32_1 = arith.constant 0 : i32
    return %c0_i32, %c0_i32_0 : i32, i32
  }
  func.func @transform_4(%arg0: i32) -> (i32, i32) {
    %c0_i32 = arith.constant 0 : i32
    %c0_i32_0 = arith.constant 0 : i32
    %c0_i32_1 = arith.constant 0 : i32
    return %c0_i32, %c0_i32_0 : i32, i32
  }
  func.func @transform_5(%arg0: i32) -> (i32, i32) {
    %c0_i32 = arith.constant 0 : i32
    %c0_i32_0 = arith.constant 0 : i32
    %c0_i32_1 = arith.constant 0 : i32
    return %c0_i32, %c0_i32_0 : i32, i32
  }
}

</mosaic_0001>

<bundles_post_ra>
// kernel: bert_base_uncased_forward.12
= control target key start
LH: loop header
LB: loop body
LE: loop exit
PB: predicated region body
PF: predicated region fallthrough
CT: control target
= control target key end

     0   :  { %s383_s12 = smov 0   ;;  %s410_s0 = inlined_call_operand.vmem [shape: f32[16,768], index: 0, kind: input, shape index: {}]   ;;  %s411_s1 = inlined_call_operand.vmem [shape: f32[1,768], index: 1, kind: input, shape index: {}]   ;;  %s412_s2 = inlined_call_operand.vmem [shape: f32[1,768], index: 2, kind: input, shape index: {}]   ;;  %s413_s3 = inlined_call_operand.vmem [shape: bf16[16,768], index: 3, kind: output, shape index: {}]  }
   0x1 LB: > { %s330_s13 = sadd.s32 4294967295, %s360_s12   ;;  %p334_p0 = scmp.ge.s32.totalorder %s360_s12, 1  ;;  %s360_s12 = sphi %s383_s12, %s13_s12  }
   0x2   : > { %p137_p1 = scmp.lt.s32.totalorder %s360_s12, 3 }
   0x4   : > { %p138_p2 = pnand %p334_p0, %p137_p1 }
   0x5   : > { %p161_p3 = scmp.lt.s32.totalorder (!%p138_p2), %s330_s13, 1 }
   0x6   : > { %141 = sbr.rel (%p138_p2) target bundleno = 307 (0x133), region = 32 }
   0xb   : > { %s415_s13 = smov (!%p161_p3, %s330_s13), 1  ;;  %v362_v11 = vmov 768.0   ;;  %v229_v43 = vld [vmem:[%s411_s1] sm:$0x3f] }
   0xc   : > { %s339_s14 = smul.u32 48, %s415_s13  ;;  %350 = vrcp.f32 %v362_v11  ;;  %v249_v45 = vld [vmem:[%s412_s2] sm:$0x3f]  ;;  %v231_v47 = vperm.slane %v229_v43, 0  ;;  %v232_v48 = vperm.slane %v229_v43, 1  ;;  %v233_v49 = vperm.slane %v229_v43, 2 }
   0xd   : > { %v234_v51 = vperm.slane %v229_v43, 3  ;;  %v235_v52 = vperm.slane %v229_v43, 4  ;;  %v236_v53 = vperm.slane %v229_v43, 5  ;;  %v251_v54 = vperm.slane %v249_v45, 0  ;;  %s340_s22 = smul.u32 24, %s415_s13 }
   0xe   : > { %s165_s17 = scalar_lea.vmem %s410_s0, %s339_s14  ;;  %v252_v55 = vperm.slane %v249_v45, 1  ;;  %v253_v56 = vperm.slane %v249_v45, 2  ;;  %v254_v57 = vperm.slane %v249_v45, 3  ;;  %v255_v63 = vperm.slane %v249_v45, 4 }
   0xf   : > { %v171_v0 = vld [vmem:[%s165_s17] sm:$0xff]  ;;  %v172_v1 = vld [vmem:[%s165_s17 + $0x8] sm:$0xff]  ;;  %v173_v2 = vld [vmem:[%s165_s17 + $0x10] sm:$0xff]  ;;  %s170_s25 = scalar_lea.vmem %s413_s3, %s340_s22 }
  0x10   : > { %v177_v3 = vadd.f32 %v172_v1, %v171_v0  ;;  %v174_v4 = vld [vmem:[%s165_s17 + $0x18] sm:$0xff]  ;;  %v175_v6 = vld [vmem:[%s165_s17 + $0x20] sm:$0xff]  ;;  %v176_v8 = vld [vmem:[%s165_s17 + $0x28] sm:$0xff] }
  0x12   : > { %v178_v5 = vadd.f32 %v177_v3, %v173_v2  ;;  %v351_v12 = vpop.eup %350 }
  0x13   : > { %v185_v13 = vmul.f32 768.0, %v351_v12  ;;  %vm189_vm0 = vweird.f32 %v351_v12 }
  0x14   : > { %v179_v7 = vadd.f32 %v178_v5, %v174_v4 }
  0x15   : > { %v186_v14 = vsub.f32 1.0, %v185_v13 }
  0x16   : > { %v180_v9 = vadd.f32 %v179_v7, %v175_v6 }
  0x17   : > { %v187_v15 = vmul.f32 %v351_v12, %v186_v14 }
  0x18   : > { %v181_v10 = vadd.f32 %v180_v9, %v176_v8 }
  0x19   : > { %v188_v16 = vadd.f32 %v351_v12, %v187_v15 }
  0x1a   : > { %182 = vadd.xlane.f32.xlu0 %v181_v10 }
  0x1b   : > { %v190_v17 = vsel %vm189_vm0, %v351_v12, %v188_v16 }
  0x8d   : > { %v183_v18 = vpop.xlane.xlu0 %182 }
  0x8e   : > { %v191_v19 = vmul.f32 %v190_v17, %v183_v18 }
  0x90   : > { %v192_v20 = vsub.f32 %v171_v0, %v191_v19  ;;  %v193_v21 = vsub.f32 %v172_v1, %v191_v19  ;;  %v194_v22 = vsub.f32 %v173_v2, %v191_v19  ;;  %v195_v23 = vsub.f32 %v174_v4, %v191_v19 }
  0x91   : > { %v196_v26 = vsub.f32 %v175_v6, %v191_v19  ;;  %v197_v29 = vsub.f32 %v176_v8, %v191_v19  ;;  %v256_v0 = vperm.slane %v249_v45, 5 }
  0x92   : > { %v198_v24 = vmul.f32 %v192_v20, %v192_v20  ;;  %v199_v25 = vmul.f32 %v193_v21, %v193_v21  ;;  %v200_v27 = vmul.f32 %v194_v22, %v194_v22  ;;  %v201_v30 = vmul.f32 %v195_v23, %v195_v23 }
  0x93   : > { %v202_v32 = vmul.f32 %v196_v26, %v196_v26  ;;  %v203_v34 = vmul.f32 %v197_v29, %v197_v29 }
  0x94   : > { %v204_v28 = vadd.f32 %v199_v25, %v198_v24 }
  0x96   : > { %v205_v31 = vadd.f32 %v204_v28, %v200_v27 }
  0x98   : > { %v206_v33 = vadd.f32 %v205_v31, %v201_v30 }
  0x9a   : > { %v207_v35 = vadd.f32 %v206_v33, %v202_v32 }
  0x9c   : > { %v208_v36 = vadd.f32 %v207_v35, %v203_v34 }
  0x9e   : > { %209 = vadd.xlane.f32.xlu0 %v208_v36 }
 0x111   : > { %v210_v37 = vpop.xlane.xlu0 %209 }
 0x112   : > { %v211_v38 = vmul.f32 %v210_v37, %v190_v17 }
 0x114   : > { %v212_v39 = vadd.f32 1e-12, %v211_v38 }
 0x116   : > { %352 = vrsqrt.f32 %v212_v39  ;;  %vm219_vm2 = vweird.f32 %v212_v39 }
 0x11c   : > { %v353_v40 = vpop.eup %352 }
 0x11d   : > { %v214_v41 = vmul.f32 %v353_v40, %v212_v39  ;;  %vm220_vm1 = vweird.f32 %v353_v40 }
 0x11e   : > { %vm221_vm3 = vmor %vm219_vm2, %vm220_vm1 }
 0x11f   : > { %v215_v42 = vmul.f32 %v353_v40, %v214_v41 }
 0x121   : > { %v216_v44 = vmul.f32 0.5, %v215_v42 }
 0x123   : > { %v217_v46 = vsub.f32 1.5, %v216_v44 }
 0x125   : > { %v218_v50 = vmul.f32 %v353_v40, %v217_v46 }
 0x127   : > { %v222_v58 = vsel %vm221_vm3, %v353_v40, %v218_v50 }
 0x128   : > { %v223_v59 = vmul.f32 %v222_v58, %v192_v20  ;;  %v224_v60 = vmul.f32 %v222_v58, %v193_v21  ;;  %v225_v61 = vmul.f32 %v222_v58, %v194_v22  ;;  %v226_v62 = vmul.f32 %v222_v58, %v195_v23 }
 0x129   : > { %v227_v1 = vmul.f32 %v222_v58, %v196_v26  ;;  %v228_v2 = vmul.f32 %v222_v58, %v197_v29 }
 0x12a   : > { %v243_v3 = vmul.f32 %v231_v47, %v223_v59  ;;  %v244_v4 = vmul.f32 %v232_v48, %v224_v60  ;;  %v245_v5 = vmul.f32 %v233_v49, %v225_v61  ;;  %v246_v6 = vmul.f32 %v234_v51, %v226_v62 }
 0x12b   : > { %v247_v7 = vmul.f32 %v235_v52, %v227_v1  ;;  %v248_v8 = vmul.f32 %v236_v53, %v228_v2 }
 0x12c   : > { %v263_v9 = vadd.f32 %v251_v54, %v243_v3  ;;  %v264_v10 = vadd.f32 %v252_v55, %v244_v4  ;;  %v265_v11 = vadd.f32 %v253_v56, %v245_v5  ;;  %v266_v12 = vadd.f32 %v254_v57, %v246_v6 }
 0x12d   : > { %v267_v13 = vadd.f32 %v255_v63, %v247_v7  ;;  %v268_v14 = vadd.f32 %v256_v0, %v248_v8 }
 0x12e   : > { %v269_v15 = vpack.c.bf16 %v264_v10, %v263_v9  ;;  %v270_v16 = vpack.c.bf16 %v266_v12, %v265_v11 }
 0x12f   : > { %v271_v17 = vpack.c.bf16 %v268_v14, %v267_v13 }
 0x130   : > { %272 = vst [vmem:[%s170_s25] sm:$0xff] %v269_v15 }
 0x131   : > { %273 = vst [vmem:[%s170_s25 + $0x8] sm:$0xff] %v270_v16 }
 0x132   : > { %274 = vst [vmem:[%s170_s25 + $0x10] sm:$0xff] %v271_v17 }
 0x133 PF: > { %s13_s12 = sadd.s32 1, %s360_s12  }
 0x134   : > { %p10_p4 = scmp.ge.s32.totalorder %s13_s12, 4  }
 0x136   :  { %12 = sbr.rel (!%p10_p4) target bundleno = 1 (0x1), region = 62 }

// kernel: bert_base_uncased_forward.14
= control target key start
LH: loop header
LB: loop body
LE: loop exit
PB: predicated region body
PF: predicated region fallthrough
CT: control target
= control target key end

     0   :  { %s886_s15 = smov 0   ;;  %s888_s16 = smov 0   ;;  %s1007_s0 = inlined_call_operand.vmem [shape: bf16[2,8,2304], index: 0, kind: input, shape index: {}, may-alias: {0,1,2}]   ;;  %s1008_s1 = inlined_call_operand.vmem [shape: bf16[2,8,2304], index: 1, kind: input, shape index: {}, may-alias: {0,1,2}]   ;;  %s1009_s2 = inlined_call_operand.vmem [shape: bf16[2,8,2304], index: 2, kind: input, shape index: {}, may-alias: {0,1,2}]   ;;  %s1010_s3 = inlined_call_operand.vmem [shape: f32[2,1,8], index: 3, kind: input, shape index: {}]   ;;  %s1011_s4 = inlined_call_operand.vmem [shape: bf16[2,8,768], index: 4, kind: output, shape index: {}]  }
   0x1   :  { %s890_s17 = smov 0   ;;  %s892_s18 = smov 0  }
   0x2   :  { %s894_s19 = smov 0  }
   0x3 LB: > { %s23_s20 = sadd.s32 1, %s850_s17  ;;  %s26_s21 = sadd.s32 1, %s854_s18  ;;  %s858_s19 = sphi %s894_s19, %s14_s19   ;;  %s854_s18 = sphi %s892_s18, %s1015_s18   ;;  %s850_s17 = sphi %s890_s17, %s1014_s17   ;;  %s846_s16 = sphi %s888_s16, %s1013_s16   ;;  %s842_s15 = sphi %s886_s15, %s1012_s15  }
   0x4   : > { %p24_p0 = scmp.ge.s32.totalorder %s23_s20, 3  ;;  %p732_p1 = scmp.ge.s32.totalorder %s858_s19, 1 }
   0x5   : > { %p233_p2 = scmp.lt.s32.totalorder %s858_s19, 7 }
   0x6   : > { %s1017_s20 = smov (%p24_p0, %s23_s20), 0  ;;  %s1019_s21 = smov (!%p24_p0, %s26_s21), %s854_s18 }
   0x7   : > { %p234_p3 = pnand %p732_p1, %p233_p2  ;;  %p28_p4 = scmp.ge.s32.totalorder %s1019_s21, 2 }
   0x8   : > { %s916_s22 = sshll.u32 (!%p234_p3), %s842_s15, 1  ;;  %p291_p5 = scmp.lt.s32.totalorder (!%p234_p3), %s846_s16, 1 }
   0x9   : > { %s1021_s21 = smov (%p28_p4, %s1019_s21), 0  ;;  %237 = sbr.rel (%p234_p3) target bundleno = 701 (0x2bd), region = 36 }
   0xa   : > { %s752_s23 = sadd.s32 (!%p234_p3), 6, %s916_s22  ;;  %p293_p7 = scmp.lt.s32.totalorder (!%p234_p3), %s916_s22, 17 }
   0xb   : > { %p304_p6 = scmp.lt.s32.totalorder (!%p234_p3), %s752_s23, 17  ;;  %s860_s13 = smov (!%p234_p3), 64  }
   0xc   : > { %s754_s14 = sadd.s32 (!%p234_p3), 12, %s916_s22  ;;  %p330_p9 = scmp.lt.s32.totalorder (!%p234_p3), %s916_s22, 5 }
   0xd   : > { %p316_p8 = scmp.lt.s32.totalorder (!%p234_p3), %s754_s14, 17 }
   0xe   : > { %s1023_s16 = smov (!%p291_p5, %s846_s16), 1  ;;  %s1025_s23 = smov (!%p304_p6, %s752_s23), 17  ;;  %vm345_vm0 = vcmask 523264   ;;  %vm365_vm1 = vcmask 64512   ;;  %vm379_vm2 = vcmask 1043456  }
   0xf   : > { %s923_s24 = smul.u32 18, %s1023_s16  ;;  %s326_s12 = scalar_lea.vmem %s1010_s3, %s1023_s16 }
  0x10   : > { %s294_s25 = scalar_select %p293_p7, %s916_s22, 17  ;;  %v950_v18 = vld [vmem:[%s326_s12] ss:$0 sm:$0xff] }
  0x11   : > { %s307_s26 = sadd.s32 %s923_s24, %s1025_s23  ;;  %s1027_s14 = smov (!%p316_p8, %s754_s14), 17 }
  0x12   : > { %s736_s27 = sshll.u32 %s307_s26, 2  ;;  %s296_s28 = sadd.s32 %s923_s24, %s294_s25 }
  0x13   : > { %s309_s5 = scalar_lea.vmem %s1008_s1, %s736_s27  ;;  %s734_s6 = sshll.u32 %s296_s28, 2 }
  0x14   : > { %v340_v0 = vld [vmem:[%s309_s5] sm:$0xf]  ;;  %s298_s9 = scalar_lea.vmem %s1007_s0, %s734_s6  ;;  %v464_v4 = vld [vmem:[%s309_s5 + $0x4] sm:$0xf]  ;;  %s319_s15 = sadd.s32 %s923_s24, %s1027_s14 }
  0x15   : > { %v350_v1 = vsel %vm345_vm0, %v340_v0, 0  ;;  %v404_v2 = vunpack.c.l.b16 %v340_v0  ;;  %v339_v3 = vld [vmem:[%s298_s9] sm:$0xf]  ;;  %v939_v7 = vld [vmem:[%s298_s9 + $0x4] sm:$0xf]  ;;  %v522_v9 = vunpack.c.l.b16 %v464_v4  ;;  %s738_s23 = sshll.u32 %s319_s15, 2 }
  0x16   : > { %359 = vmatpush.bf16.xpose.msra.mxu0 %v350_v1  ;;  %v399_v5 = vunpack.c.l.b16 %v339_v3  ;;  %v517_v10 = vunpack.c.l.b16 %v939_v7  ;;  %s321_s27 = scalar_lea.vmem %s1009_s2, %s738_s23  ;;  %v470_v28 = vsel %vm345_vm0, %v464_v4, 0  ;;  %s756_s24 = smul.u32 6, %s1023_s16 }
  0x17   : > { %v405_v6 = vpack.c.b16 %v404_v2, %v404_v2  ;;  %v523_v11 = vpack.c.b16 %v522_v9, %v522_v9  ;;  %v341_v24 = vld [vmem:[%s321_s27] sm:$0xf]  ;;  %v465_v42 = vld [vmem:[%s321_s27 + $0x4] sm:$0xf]  ;;  %s1029_s22 = smov (!%p330_p9, %s916_s22), 5 }
  0x18   : > { %v400_v8 = vpack.c.b16 %v399_v5, %v399_v5  ;;  %v518_v12 = vpack.c.b16 %v517_v10, %v517_v10  ;;  %v381_v25 = vsel %vm379_vm2, %v341_v24, 0  ;;  %v438_v26 = vunpack.c.l.b16 %v341_v24  ;;  %s333_s28 = sadd.s32 %s756_s24, %s1029_s22 }
  0x19   : > { %406 = vrot.lane.b32.xlu0 %v405_v6, %s860_s13  ;;  %390 = vmatpush.bf16.msra.mxu1 %v381_v25  ;;  %v556_v43 = vunpack.c.l.b16 %v465_v42  ;;  %v499_v4 = vsel %vm379_vm2, %v465_v42, 0  ;;  %s740_s29 = sshll.u32 %s333_s28, 2 }
  0x1a   : > { %401 = vrot.lane.b32.xlu1 %v400_v8, %s860_s13  ;;  %v439_v27 = vpack.c.b16 %v438_v26, %v438_v26  ;;  %s335_s6 = scalar_lea.vmem %s1011_s4, %s740_s29 }
  0x1b   : > { %v557_v44 = vpack.c.b16 %v556_v43, %v556_v43 }
  0x1d   : > { %741 = vmatmul.msk.bf16.vlgmr.msra.gmra.mxu0 %vm345_vm0, %v339_v3  ;;  %479 = vmatpush.bf16.xpose.msrb.mxu1 %v470_v28 }
  0x21   : > { %524 = vrot.lane.b32.xlu0 %v523_v11, %s860_s13 }
  0x22   : > { %519 = vrot.lane.b32.xlu1 %v518_v12, %s860_s13 }
  0x2a   : > { %440 = vrot.lane.b32.xlu1 %v439_v27, %s860_s13 }
  0x8b   : > { %v407_v13 = vpop.permute.xlu0 %406 }
  0x8c   : > { %v412_v14 = vsel %vm345_vm0, %v407_v13, 0  ;;  %v402_v15 = vpop.permute.xlu1 %401 }
  0x8d   : > { %421 = vmatpush.bf16.xpose.msra.mxu2 %v412_v14 }
  0x93   : > { %v525_v16 = vpop.permute.xlu0 %524 }
  0x94   : > { %743 = vmatmul.msk.bf16.vlgmr.msra.gmra.mxu2 %vm345_vm0, %v402_v15  ;;  %v530_v17 = vsel %vm345_vm0, %v525_v16, 0  ;;  %v520_v19 = vpop.permute.xlu1 %519 }
  0x95   : > { %539 = vmatpush.bf16.xpose.msrb.mxu0 %v530_v17 }
  0x9a   : > { %v361_v20 = vpop.f32.mrf.mxu0 }
  0x9b   : > { %v362_v21 = vadd.f32 %v950_v18, %v361_v20 }
  0x9c   : > { %747 = vmatmul.msk.bf16.vlgmr.msrb.gmra.mxu0 %vm345_vm0, %v520_v19  ;;  %v441_v45 = vpop.permute.xlu1 %440 }
  0x9d   : > { %v366_v22 = vsel %vm365_vm1, %v362_v21, -inf  ;;  %v446_v46 = vsel %vm379_vm2, %v441_v45, 0 }
  0x9e   : > { %367 = vmax.xlane.f32.xlu2 %v366_v22  ;;  %455 = vmatpush.bf16.msra.mxu3 %v446_v46 }
  0xa2   : > { %v363_v23 = vpop.f32.mrf.mxu0  ;;  %508 = vmatpush.bf16.msrb.mxu3 %v499_v4 }
 0x111   : > { %v368_v29 = vpop.xlane.xlu2 %367 }
 0x112   : > { %v369_v30 = vsub.f32 %v362_v21, %v368_v29 }
 0x114   : > { %v370_v31 = vmul.f32 1.442695, %v369_v30 }
 0x116   : > { %804 = vpow2.f32 %v370_v31 }
 0x117   : > { %v423_v32 = vpop.f32.mrf.mxu2 }
 0x118   : > { %v424_v33 = vadd.f32 %v950_v18, %v423_v32 }
 0x119   : > { %v541_v34 = vpop.f32.mrf.mxu0 }
 0x11a   : > { %v542_v35 = vadd.f32 %v950_v18, %v541_v34  ;;  %v427_v36 = vsel %vm365_vm1, %v424_v33, -inf }
 0x11b   : > { %428 = vmax.xlane.f32.xlu2 %v427_v36 }
 0x11c   : > { %v805_v37 = vpop.eup %804  ;;  %v545_v38 = vsel %vm365_vm1, %v542_v35, -inf }
 0x11d   : > { %546 = vmax.xlane.f32.xlu0 %v545_v38  ;;  %v375_v39 = vpack.c.bf16 %v805_v37, %v805_v37  ;;  %v372_v63 = vsel %vm365_vm1, %v805_v37, 0.0 }
 0x11f   : > { %742 = vmatmul.msk.bf16.vlgmr.msra.gmra.mxu1 %vm365_vm1, %v375_v39  ;;  %v425_v40 = vpop.f32.mrf.mxu2 }
 0x121   : > { %v543_v41 = vpop.f32.mrf.mxu0 }
 0x12f   : > { %745 = vmatmul.msk.bf16.vlgmr.msrb.gmra.mxu1 %vm345_vm0, %v939_v7 }
 0x133   : > { %558 = vrot.lane.b32.xlu2 %v557_v44, %s860_s13 }
 0x18e   : > { %v429_v47 = vpop.xlane.xlu2 %428 }
 0x18f   : > { %v430_v48 = vsub.f32 %v424_v33, %v429_v47 }
 0x190   : > { %v547_v49 = vpop.xlane.xlu0 %546 }
 0x191   : > { %v431_v50 = vmul.f32 1.442695, %v430_v48  ;;  %v548_v51 = vsub.f32 %v542_v35, %v547_v49 }
 0x193   : > { %806 = vpow2.f32 %v431_v50  ;;  %v549_v52 = vmul.f32 1.442695, %v548_v51 }
 0x195   : > { %808 = vpow2.f32 %v549_v52 }
 0x196   : > { %v559_v53 = vpop.permute.xlu2 %558 }
 0x197   : > { %v564_v54 = vsel %vm379_vm2, %v559_v53, 0 }
 0x198   : > { %573 = vmatpush.bf16.msrb.mxu2 %v564_v54 }
 0x199   : > { %v807_v55 = vpop.eup %806 }
 0x19a   : > { %v433_v56 = vsel %vm365_vm1, %v807_v55, 0.0  ;;  %v436_v57 = vpack.c.bf16 %v807_v55, %v807_v55 }
 0x19b   : > { %v809_v58 = vpop.eup %808  ;;  %434 = vadd.xlane.f32.xlu2 %v433_v56 }
 0x19c   : > { %v392_v59 = vpop.f32.mrf.mxu1  ;;  %744 = vmatmul.msk.bf16.vlgmr.msra.gmra.mxu3 %vm365_vm1, %v436_v57  ;;  %v551_v60 = vsel %vm365_vm1, %v809_v58, 0.0  ;;  %v554_v61 = vpack.c.bf16 %v809_v58, %v809_v58 }
 0x19d   : > { %552 = vadd.xlane.f32.xlu0 %v551_v60 }
 0x19e   : > { %748 = vmatmul.msk.bf16.vlgmr.msrb.gmra.mxu2 %vm365_vm1, %v554_v61 }
 0x1a4   : > { %v394_v62 = vpop.f32.mrf.mxu1 }
 0x1a5   : > { %373 = vadd.xlane.f32.xlu0 %v372_v63 }
 0x1ac   : > { %v481_v0 = vpop.f32.mrf.mxu1 }
 0x1ad   : > { %v482_v1 = vadd.f32 %v950_v18, %v481_v0 }
 0x1af   : > { %v485_v2 = vsel %vm365_vm1, %v482_v1, -inf }
 0x1b0   : > { %486 = vmax.xlane.f32.xlu1 %v485_v2 }
 0x1b4   : > { %v483_v3 = vpop.f32.mrf.mxu1 }
 0x20e   : > { %v435_v5 = vpop.xlane.xlu2 %434 }
 0x20f   : > { %810 = vrcp.f32 %v435_v5 }
 0x210   : > { %v553_v6 = vpop.xlane.xlu0 %552 }
 0x211   : > { %812 = vrcp.f32 %v553_v6 }
 0x215   : > { %v811_v8 = vpop.eup %810 }
 0x217   : > { %v813_v9 = vpop.eup %812 }
 0x218   : > { %v374_v22 = vpop.xlane.xlu0 %373 }
 0x21f   : > { %v457_v7 = vpop.f32.mrf.mxu3 }
 0x220   : > { %v462_v11 = vmul.f32 %v811_v8, %v457_v7 }
 0x221   : > { %v575_v10 = vpop.f32.mrf.mxu2 }
 0x222   : > { %v580_v12 = vmul.f32 %v813_v9, %v575_v10 }
 0x223   : > { %v487_v13 = vpop.xlane.xlu1 %486 }
 0x224   : > { %v798_v14 = vpack.i.bf16 %v580_v12, %v462_v11  ;;  %v488_v15 = vsub.f32 %v482_v1, %v487_v13 }
 0x226   : > { %v489_v16 = vmul.f32 1.442695, %v488_v15  ;;  %799 = vrot.lane.b32.xlu0 %v798_v14, %s860_s13 }
 0x227   : > { %v459_v17 = vpop.f32.mrf.mxu3 }
 0x228   : > { %814 = vpow2.f32 %v489_v16 }
 0x229   : > { %v577_v18 = vpop.f32.mrf.mxu2  ;;  %816 = vrcp.f32 %v374_v22 }
 0x22e   : > { %v815_v19 = vpop.eup %814 }
 0x22f   : > { %v491_v20 = vsel %vm365_vm1, %v815_v19, 0.0  ;;  %v494_v21 = vpack.c.bf16 %v815_v19, %v815_v19  ;;  %v817_v25 = vpop.eup %816 }
 0x230   : > { %492 = vadd.xlane.f32.xlu1 %v491_v20  ;;  %v397_v29 = vmul.f32 %v817_v25, %v392_v59 }
 0x231   : > { %746 = vmatmul.msk.bf16.vlgmr.msrb.gmra.mxu3 %vm365_vm1, %v494_v21 }
 0x298   : > { %v800_v24 = vpop.permute.xlu0 %799 }
 0x299   : > { %v801_v26 = vunpack.i.l.bf16 %v800_v24  ;;  %v802_v30 = vunpack.i.h.bf16 %v800_v24 }
 0x29b   : > { %v589_v32 = vsel %vm345_vm0, %v397_v29, %v801_v26 }
 0x2a3   : > { %v493_v23 = vpop.xlane.xlu1 %492 }
 0x2a4   : > { %818 = vrcp.f32 %v493_v23 }
 0x2aa   : > { %v819_v27 = vpop.eup %818 }
 0x2b4   : > { %v510_v28 = vpop.f32.mrf.mxu3 }
 0x2b5   : > { %v515_v31 = vmul.f32 %v819_v27, %v510_v28 }
 0x2b7   : > { %v590_v33 = vsel %vm345_vm0, %v515_v31, %v802_v30 }
 0x2b8   : > { %v591_v34 = vpack.c.bf16 %v590_v33, %v589_v32 }
 0x2ba   : > { %592 = vst [vmem:[%s335_s6] sm:$0xff] %v591_v34 }
 0x2bc   : > { %v512_v35 = vpop.f32.mrf.mxu3 }
 0x2bd PF: > { %s14_s19 = sadd.s32 1, %s858_s19   ;;  %s1012_s15 = smov %s850_s17 }
 0x2be   : > { %p11_p10 = scmp.ge.s32.totalorder %s14_s19, 8   ;;  %s1013_s16 = smov %s854_s18 }
 0x2bf   : > { %s1014_s17 = smov %s1017_s20  ;;  %s1015_s18 = smov %s1021_s21 }
 0x2c0   :  { %13 = sbr.rel (!%p11_p10) target bundleno = 3 (0x3), region = 75 }

// kernel: bert_base_uncased_forward.13
= control target key start
LH: loop header
LB: loop body
LE: loop exit
PB: predicated region body
PF: predicated region fallthrough
CT: control target
= control target key end

     0   :  { %s3241_s0 = inlined_call_operand.vmem [shape: bf16[16,768], index: 0, kind: input, shape index: {}]   ;;  %s3242_s1 = inlined_call_operand.hbm [shape: bf16[768,2304], index: 1, kind: input, shape index: {}]   ;;  %s3243_s2 = inlined_call_operand.vmem [shape: f32[1,2304], index: 2, kind: input, shape index: {}]   ;;  %s3244_s3 = inlined_call_operand.vmem [shape: bf16[16,2304], index: 3, kind: output, shape index: {}]  }
   0x1   :  { %3249 = sst [smem:[#allocation15_spill]] %s3241_s0 }
   0x2   :  { %8 = vsyncpa [#allocation5], 0 }
   0x3   :  { %10 = vsyncpa [#allocation5 + $0x1], 0  ;;  %s2711_s12 = smov 0   ;;  %s2713_s13 = smov 0  }
   0x4   :  { %s2715_s14 = smov 0   ;;  %s2717_s15 = smov 0  }
   0x5   :  { %s2719_s16 = smov 0   ;;  %s2721_s17 = smov 0  }
   0x6   :  { %s2723_s18 = smov 0   ;;  %s2725_s19 = smov 0  }
   0x7   :  { %s2727_s20 = smov 0   ;;  %s2729_s21 = smov 0  }
   0x8   :  { %s2731_s22 = smov 0   ;;  %s2733_s23 = smov 0  }
   0x9 LB: > { %3250 = sst [smem:[#allocation8_spill]] %s2645_s13  ;;  %s1697_s24 = sadd.s32 4294967295, %s2685_s23   ;;  %s2685_s23 = sphi %s2733_s23, %s16_s23   ;;  %s2681_s22 = sphi %s2731_s22, %s3275_s22   ;;  %s2677_s21 = sphi %s2729_s21, %s3274_s21   ;;  %s2673_s20 = sphi %s2727_s20, %s3273_s20   ;;  %s2669_s19 = sphi %s2725_s19, %s3272_s19   ;;  %s2665_s18 = sphi %s2723_s18, %s3266_s18   ;;  %s2661_s17 = sphi %s2721_s17, %s3265_s17   ;;  %s2657_s16 = sphi %s2719_s16, %s3271_s16   ;;  %s2653_s15 = sphi %s2717_s15, %s3270_s15   ;;  %s2649_s14 = sphi %s2715_s14, %s3269_s14   ;;  %s2645_s13 = sphi %s2713_s13, %s3263_s13   ;;  %s2641_s12 = sphi %s2711_s12, %s3262_s12  }
   0xa   : > { %3251 = sst [smem:[#allocation9_spill]] %s2665_s18  ;;  %s28_s25 = sadd.s32 1, %s2677_s21 }
   0xb   : > { %p29_p0 = scmp.ge.s32.totalorder %s28_s25, 2  ;;  %s31_s26 = sadd.s32 1, %s2681_s22 }
   0xc   : > { %s44_s27 = sadd.s32 1, %s2665_s18  ;;  %p51_p1 = scmp.ne.s32.totalorder %s2665_s18, %s2661_s17 }
   0xd   : > { %s3277_s25 = smov (%p29_p0, %s28_s25), 0  ;;  %s3279_s26 = smov (!%p29_p0, %s31_s26), %s2681_s22 }
   0xe   : > { %3252 = sst [smem:[#allocation10_spill]] %s3277_s25  ;;  %s40_s28 = ssub.s32 %s2677_s21, %s3277_s25 }
   0xf   : > { %p52_p2 = scmp.eq.s32.totalorder %s2685_s23, 0  ;;  %p33_p3 = scmp.ge.s32.totalorder %s3279_s26, 3 }
  0x10   : > { %p42_p4 = scmp.eq.s32.totalorder %s40_s28, 0  ;;  %s72_s30 = sadd.s32 1, %s2657_s16 }
  0x11   : > { %p2783_p5 = por %p52_p2, %p51_p1  ;;  %s3281_s26 = smov (%p33_p3, %s3279_s26), 0 }
  0x12   : > { %3254 = sst [smem:[#allocation11_spill]] %s3281_s26  ;;  %s68_s5 = ssub.s32 %s2681_s22, %s3281_s26 }
  0x13   : > { %s2791_s4 = scalar_select %p42_p4, %s2665_s18, %s44_s27  }
  0x14   : > { %p79_p6 = scmp.ne.s32.totalorder %s2657_s16, %s2653_s15  ;;  %s69_s6 = sor.u32 %s68_s5, %s40_s28 }
  0x15   : > { %3255 = sst [smem:[#allocation12_spill]] %s2791_s4  ;;  %p85_p7 = scmp.ne.s32.totalorder %s2653_s15, %s2649_s14 }
  0x16   : > { %p70_p8 = scmp.eq.s32.totalorder %s69_s6, 0  ;;  %p2799_p9 = por %p79_p6, %p52_p2 }
  0x17   : > { %p86_p10 = scmp.eq.s32.totalorder %s1697_s24, 0  ;;  %p124_p11 = scmp.eq.s32.totalorder %s68_s5, 0 }
  0x18   : > { %s2806_s8 = scalar_select %p70_p8, %s2657_s16, %s72_s30  }
  0x19   : > { %p2808_p12 = por %p86_p10, %p85_p7  ;;  %s126_s10 = sadd.s32 1, %s2645_s13 }
  0x1a   : > { %3257 = sst [smem:[#allocation13_spill]] %s2806_s8  ;;  %p136_p13 = scmp.ne.s32.totalorder %s2645_s13, %s2641_s12 }
  0x1b   : > { %s2814_s11 = scalar_select %p124_p11, %s2645_s13, %s126_s10  }
  0x1c   : > { %p137_p0 = scmp.eq.s32.totalorder %s1697_s24, 5  ;;  %p1700_p2 = scmp.ge.s32.totalorder %s2685_s23, 6 }
  0x1d   : > { %3259 = sst [smem:[#allocation14_spill]] %s2814_s11 }
  0x1e   : > { %p2820_p1 = por %p137_p0, %p136_p13  ;;  %159 = sbr.rel (%p1700_p2) target bundleno = 57 (0x39), region = 16 }
  0x23   : > { %162 = sbr.rel (!%p2783_p5) target bundleno = 48 (0x30), region = 20  ;;  %s164_s27 = sand.u32 (%p2783_p5), 1, %s2665_s18  }
  0x24   : > { %s2301_s28 = smul.u32 (%p2783_p5), 12, %s2677_s21  ;;  %s3261_s0 = sld [smem:[#allocation15_spill]] (%p2783_p5) }
  0x25   : > { %s2450_s30 = smul.u32 (%p2783_p5), 24, %s164_s27 }
  0x27   : > { %s166_s24 = scalar_lea.vmem (%p2783_p5), [#allocation3], %s2450_s30 }
  0x2a   : > { %s172_s10 = scalar_lea.vmem %s3261_s0, %s2301_s28 }
  0x2b   : > { %v187_v0 = vld [vmem:[%s172_s10] sm:$0xff]  ;;  %v189_v1 = vld [vmem:[%s172_s10 + $0x18] sm:$0xff]  ;;  %v1702_v2 = vld [vmem:[%s172_s10 + $0x8] sm:$0xf] }
  0x2c   : > { %188 = vst [vmem:[%s166_s24] sm:$0xff] %v187_v0  ;;  %v1704_v3 = vld [vmem:[%s172_s10 + $0x20] sm:$0xf] }
  0x2d   : > { %190 = vst [vmem:[%s166_s24 + $0xc] sm:$0xff] %v189_v1 }
  0x2e   : > { %1703 = vst [vmem:[%s166_s24 + $0x8] sm:$0xf] %v1702_v2 }
  0x2f   : > { %1705 = vst [vmem:[%s166_s24 + $0x14] sm:$0xf] %v1704_v3 }
  0x30 PF: > { %s209_s29 = sand.u32 1, %s2657_s16   ;;  %s215_s26 = smul.u32 6, %s2681_s22 }
  0x31   : > { %s2451_s27 = smul.u32 1152, %s209_s29  ;;  %s210_s24 = scalar_lea.sflag [#allocation5], %s209_s29 }
  0x32   : > { %s2458_s25 = smul.u32 864, %s2677_s21  ;;  %s2687_s8 = smov 1152  }
  0x33   : > { %s213_s5 = scalar_lea.vmem [#allocation4], %s2451_s27  ;;  %s2688_s11 = smov 384  }
  0x34   : > { %s224_s28 = sshll.u32 %s213_s5, 4  ;;  %s219_s6 = sadd.s32 %s2458_s25, %s215_s26  ;;  %s225_s28 = int_to_ptr.vmem [resolvable:$true] %s224_s28 }
  0x35   : > { %s1706_s0 = sshll.u32 %s219_s6, 2  ;;  %s2689_s13 = smov 24  }
  0x36   : > { %s221_s10 = scalar_lea.hbm %s3242_s1, %s1706_s0 }
  0x37   : > { %s222_s18 = sshll.u32 %s221_s10, 4  ;;  %s223_s18 = int_to_ptr.hbm [resolvable:$true] %s222_s18 }
  0x38   : > { %2456 = dma.hbm_to_vmem [thread:$0]  (%p2799_p9), %s223_s18, 18432, %s225_s28, %s210_s24, %s2687_s8, %s2688_s11, %s2689_s13  }
  0x39 PF: > { %p1707_p3 = scmp.ge.s32.totalorder %s2685_s23, 1  ;;  %p240_p4 = scmp.lt.s32.totalorder %s2685_s23, 7 }
  0x3b   : > { %p241_p5 = pnand %p1707_p3, %p240_p4 }
  0x3c   : > { %s247_s25 = sand.u32 (!%p241_p5), 1, %s2661_s17   ;;  %s253_s0 = sand.u32 (!%p241_p5), 1, %s2653_s15  }
  0x3d   : > { %244 = sbr.rel (%p241_p5) target bundleno = 415 (0x19f), region = 54  ;;  %s254_s27 = scalar_lea.sflag (!%p241_p5), [#allocation5], %s253_s0 }
  0x3e   : > { %s2453_s26 = smul.u32 (!%p241_p5), 24, %s247_s25 }
  0x3f   : > { %s2454_s4 = smul.u32 (!%p241_p5), 1152, %s253_s0 }
  0x40   : > { %s2844_s29 = scalar_lea.vmem (!%p241_p5), [#allocation3], %s2453_s26 }
  0x41   : > { %s2846_s5 = scalar_lea.vmem (!%p241_p5), [#allocation4], %s2454_s4 }
  0x42   : > { %2636 = dma.done.wait (%p2808_p12), %s254_s27, 18432  }
  0x43   : > { %2638 = vsyncadd (%p2808_p12), %s254_s27, 4294948864  ;;  %s285_s13 = sand.u32 1, %s2641_s12   ;;  %s292_s18 = smul.u32 6, %s2673_s20 }
  0x44   : > { %s2455_s7 = smul.u32 48, %s285_s13  ;;  %p1708_p7 = scmp.ne.s32.totalorder %s2669_s19, 0 }
  0x45   : > { %p293_p6 = scmp.lt.s32.totalorder %s292_s18, 17 }
  0x46   : > { %s2860_s28 = scalar_lea.vmem [#allocation6], %s2455_s7  ;;  %302 = sbr.rel (%p1708_p7) target bundleno = 88 (0x58), region = 66 }
  0x47   : > { %s3283_s18 = smov (!%p293_p6, %s292_s18), 17 }
  0x48   : > { %s295_s11 = scalar_lea.vmem %s3243_s2, %s3283_s18 }
  0x4b   : > { %v2690_v4 = vmov 0.0  }
  0x4c   : > { %303 = vst [vmem:[#allocation2 + $0x30] sm:$0xff] %v2690_v4 }
  0x4d   : > { %304 = vst [vmem:[#allocation2] sm:$0xff] %v2690_v4 }
  0x4e   : > { %305 = vst [vmem:[#allocation2 + $0x58] sm:$0xff] %v2690_v4 }
  0x4f   : > { %306 = vst [vmem:[#allocation2 + $0x18] sm:$0xff] %v2690_v4 }
  0x50   : > { %307 = vst [vmem:[#allocation2 + $0x50] sm:$0xff] %v2690_v4 }
  0x51   : > { %308 = vst [vmem:[#allocation2 + $0x20] sm:$0xff] %v2690_v4 }
  0x52   : > { %309 = vst [vmem:[#allocation2 + $0x8] sm:$0xff] %v2690_v4 }
  0x53   : > { %310 = vst [vmem:[#allocation2 + $0x38] sm:$0xff] %v2690_v4 }
  0x54   : > { %311 = vst [vmem:[#allocation2 + $0x28] sm:$0xff] %v2690_v4 }
  0x55   : > { %312 = vst [vmem:[#allocation2 + $0x48] sm:$0xff] %v2690_v4 }
  0x56   : > { %313 = vst [vmem:[#allocation2 + $0x10] sm:$0xff] %v2690_v4 }
  0x57   : > { %314 = vst [vmem:[#allocation2 + $0x40] sm:$0xff] %v2690_v4 }
  0x58 PF: > { %v1891_v5 = vld [vmem:[%s2846_s5 + $0x150] sm:$0xf]  ;;  %v2350_v6 = vld [vmem:[%s2846_s5 + $0x164] sm:$0xf0]  ;;  %v1867_v14 = vld [vmem:[%s2846_s5 + $0x120] sm:$0xf] }
  0x59   : > { %v2083_v7 = vld [vmem:[%s2846_s5 + $0x2d0] sm:$0xf]  ;;  %v1892_v8 = vor.u32 %v2350_v6, %v1891_v5  ;;  %v2398_v9 = vld [vmem:[%s2846_s5 + $0x2e4] sm:$0xf0]  ;;  %v2344_v15 = vld [vmem:[%s2846_s5 + $0x134] sm:$0xf0] }
  0x5a   : > { %v2275_v10 = vld [vmem:[%s2846_s5 + $0x450] sm:$0xf]  ;;  %v2446_v11 = vld [vmem:[%s2846_s5 + $0x464] sm:$0xf0]  ;;  %v2084_v12 = vor.u32 %v2398_v9, %v2083_v7  ;;  %v2059_v16 = vld [vmem:[%s2846_s5 + $0x2a0] sm:$0xf]  ;;  %v1868_v17 = vor.u32 %v2344_v15, %v1867_v14 }
  0x5b   : > { %v2276_v13 = vor.u32 %v2446_v11, %v2275_v10  ;;  %1211 = vmatpush.bf16.msra.mxu0 %v1892_v8  ;;  %v2392_v18 = vld [vmem:[%s2846_s5 + $0x2b4] sm:$0xf0]  ;;  %v2251_v19 = vld [vmem:[%s2846_s5 + $0x420] sm:$0xf]  ;;  %v1843_v23 = vld [vmem:[%s2846_s5 + $0xf0] sm:$0xf] }
  0x5c   : > { %v2440_v20 = vld [vmem:[%s2846_s5 + $0x434] sm:$0xf0]  ;;  %1225 = vmatpush.bf16.msra.mxu1 %v2084_v12  ;;  %v2060_v21 = vor.u32 %v2392_v18, %v2059_v16  ;;  %v2338_v24 = vld [vmem:[%s2846_s5 + $0x104] sm:$0xf0]  ;;  %v2035_v25 = vld [vmem:[%s2846_s5 + $0x270] sm:$0xf] }
  0x5d   : > { %1239 = vmatpush.bf16.msra.mxu2 %v2276_v13  ;;  %v2252_v22 = vor.u32 %v2440_v20, %v2251_v19  ;;  %v2386_v26 = vld [vmem:[%s2846_s5 + $0x284] sm:$0xf0]  ;;  %v2227_v27 = vld [vmem:[%s2846_s5 + $0x3f0] sm:$0xf]  ;;  %v1844_v29 = vor.u32 %v2338_v24, %v1843_v23  ;;  %v1819_v30 = vld [vmem:[%s2846_s5 + $0xc0] sm:$0xf] }
  0x5e   : > { %v2434_v28 = vld [vmem:[%s2846_s5 + $0x404] sm:$0xf0]  ;;  %v2332_v31 = vld [vmem:[%s2846_s5 + $0xd4] sm:$0xf0]  ;;  %v2036_v32 = vor.u32 %v2386_v26, %v2035_v25  ;;  %v2011_v34 = vld [vmem:[%s2846_s5 + $0x240] sm:$0xf] }
  0x5f   : > { %1212 = vmatpush.bf16.msra.mxu0 %v1868_v17  ;;  %v2228_v33 = vor.u32 %v2434_v28, %v2227_v27  ;;  %v2347_v35 = vld [vmem:[%s2846_s5 + $0x154] sm:$0xf]  ;;  %v1893_v36 = vld [vmem:[%s2846_s5 + $0x168] sm:$0xf0]  ;;  %v2380_v37 = vld [vmem:[%s2846_s5 + $0x254] sm:$0xf0]  ;;  %v1820_v42 = vor.u32 %v2332_v31, %v1819_v30 }
  0x60   : > { %1226 = vmatpush.bf16.msra.mxu1 %v2060_v21  ;;  %v2203_v38 = vld [vmem:[%s2846_s5 + $0x3c0] sm:$0xf]  ;;  %v2428_v39 = vld [vmem:[%s2846_s5 + $0x3d4] sm:$0xf0]  ;;  %v1896_v40 = vor.u32 %v2347_v35, %v1893_v36  ;;  %v2341_v41 = vld [vmem:[%s2846_s5 + $0x124] sm:$0xf]  ;;  %v2012_v46 = vor.u32 %v2380_v37, %v2011_v34 }
  0x61   : > { %1240 = vmatpush.bf16.msra.mxu2 %v2252_v22  ;;  %v1795_v43 = vld [vmem:[%s2846_s5 + $0x90] sm:$0xf]  ;;  %v2326_v44 = vld [vmem:[%s2846_s5 + $0xa4] sm:$0xf0]  ;;  %v1869_v45 = vld [vmem:[%s2846_s5 + $0x138] sm:$0xf0]  ;;  %v2204_v47 = vor.u32 %v2428_v39, %v2203_v38 }
  0x62   : > { %1253 = vmatpush.bf16.msra.mxu3 %v1896_v40  ;;  %v1987_v48 = vld [vmem:[%s2846_s5 + $0x210] sm:$0xf]  ;;  %v2374_v49 = vld [vmem:[%s2846_s5 + $0x224] sm:$0xf0]  ;;  %v1872_v51 = vor.u32 %v2341_v41, %v1869_v45  ;;  %v2335_v53 = vld [vmem:[%s2846_s5 + $0xf4] sm:$0xf]  ;;  %v1796_v55 = vor.u32 %v2326_v44, %v1795_v43 }
  0x63   : > { %1213 = vmatpush.bf16.msra.mxu0 %v1844_v29  ;;  %v2179_v50 = vld [vmem:[%s2846_s5 + $0x390] sm:$0xf]  ;;  %v2422_v52 = vld [vmem:[%s2846_s5 + $0x3a4] sm:$0xf0]  ;;  %v1845_v54 = vld [vmem:[%s2846_s5 + $0x108] sm:$0xf0]  ;;  %v1988_v59 = vor.u32 %v2374_v49, %v1987_v48 }
  0x64   : > { %1227 = vmatpush.bf16.msra.mxu1 %v2036_v32  ;;  %v1771_v56 = vld [vmem:[%s2846_s5 + $0x60] sm:$0xf]  ;;  %v2320_v57 = vld [vmem:[%s2846_s5 + $0x74] sm:$0xf0]  ;;  %v1848_v58 = vor.u32 %v2335_v53, %v1845_v54  ;;  %v2180_v60 = vor.u32 %v2422_v52, %v2179_v50  ;;  %v2329_v62 = vld [vmem:[%s2846_s5 + $0xc4] sm:$0xf] }
  0x65   : > { %1241 = vmatpush.bf16.msra.mxu2 %v2228_v33  ;;  %v1963_v61 = vld [vmem:[%s2846_s5 + $0x1e0] sm:$0xf]  ;;  %v1821_v63 = vld [vmem:[%s2846_s5 + $0xd8] sm:$0xf0]  ;;  %v2368_v0 = vld [vmem:[%s2846_s5 + $0x1f4] sm:$0xf0]  ;;  %v1772_v3 = vor.u32 %v2320_v57, %v1771_v56 }
  0x66   : > { %1254 = vmatpush.bf16.msra.mxu3 %v1872_v51  ;;  %v2155_v1 = vld [vmem:[%s2846_s5 + $0x360] sm:$0xf]  ;;  %v2416_v2 = vld [vmem:[%s2846_s5 + $0x374] sm:$0xf0]  ;;  %v1747_v4 = vld [vmem:[%s2846_s5 + $0x30] sm:$0xf]  ;;  %v1824_v6 = vor.u32 %v2329_v62, %v1821_v63  ;;  %v1964_v7 = vor.u32 %v2368_v0, %v1963_v61 }
  0x67   : > { %1214 = vmatpush.bf16.msra.mxu0 %v1820_v42  ;;  %v2314_v5 = vld [vmem:[%s2846_s5 + $0x44] sm:$0xf0]  ;;  %v2156_v8 = vor.u32 %v2416_v2, %v2155_v1  ;;  %v1939_v9 = vld [vmem:[%s2846_s5 + $0x1b0] sm:$0xf]  ;;  %v2323_v11 = vld [vmem:[%s2846_s5 + $0x94] sm:$0xf] }
  0x68   : > { %1228 = vmatpush.bf16.msra.mxu1 %v2012_v46  ;;  %v2362_v10 = vld [vmem:[%s2846_s5 + $0x1c4] sm:$0xf0]  ;;  %v2131_v12 = vld [vmem:[%s2846_s5 + $0x330] sm:$0xf]  ;;  %v1797_v14 = vld [vmem:[%s2846_s5 + $0xa8] sm:$0xf0]  ;;  %v1748_v15 = vor.u32 %v2314_v5, %v1747_v4 }
  0x69   : > { %1242 = vmatpush.bf16.msra.mxu2 %v2204_v47  ;;  %v2410_v13 = vld [vmem:[%s2846_s5 + $0x344] sm:$0xf0]  ;;  %v1723_v16 = vld [vmem:[%s2846_s5] sm:$0xf]  ;;  %v2308_v17 = vld [vmem:[%s2846_s5 + $0x14] sm:$0xf0]  ;;  %v1800_v19 = vor.u32 %v2323_v11, %v1797_v14  ;;  %v1940_v20 = vor.u32 %v2362_v10, %v1939_v9 }
  0x6a   : > { %1255 = vmatpush.bf16.msra.mxu3 %v1848_v58  ;;  %v1915_v18 = vld [vmem:[%s2846_s5 + $0x180] sm:$0xf]  ;;  %v2132_v21 = vor.u32 %v2410_v13, %v2131_v12  ;;  %v2356_v22 = vld [vmem:[%s2846_s5 + $0x194] sm:$0xf0]  ;;  %v2317_v23 = vld [vmem:[%s2846_s5 + $0x64] sm:$0xf]  ;;  %v1724_v31 = vor.u32 %v2308_v17, %v1723_v16 }
  0x6b   : > { %1215 = vmatpush.bf16.msra.mxu0 %v1796_v55  ;;  %v1773_v24 = vld [vmem:[%s2846_s5 + $0x78] sm:$0xf0]  ;;  %v2107_v25 = vld [vmem:[%s2846_s5 + $0x300] sm:$0xf]  ;;  %v2404_v26 = vld [vmem:[%s2846_s5 + $0x314] sm:$0xf0]  ;;  %v1916_v35 = vor.u32 %v2356_v22, %v1915_v18 }
  0x6c   : > { %1229 = vmatpush.bf16.msra.mxu1 %v1988_v59  ;;  %v2395_v27 = vld [vmem:[%s2846_s5 + $0x2d4] sm:$0xf]  ;;  %v2085_v28 = vld [vmem:[%s2846_s5 + $0x2e8] sm:$0xf0]  ;;  %v1899_v32 = vld [vmem:[%s2846_s5 + $0x158] sm:$0xf]  ;;  %v1776_v34 = vor.u32 %v2317_v23, %v1773_v24  ;;  %v2108_v36 = vor.u32 %v2404_v26, %v2107_v25 }
  0x6d   : > { %1243 = vmatpush.bf16.msra.mxu2 %v2180_v60  ;;  %v2443_v29 = vld [vmem:[%s2846_s5 + $0x454] sm:$0xf]  ;;  %v2277_v30 = vld [vmem:[%s2846_s5 + $0x468] sm:$0xf0]  ;;  %v2351_v33 = vld [vmem:[%s2846_s5 + $0x16c] sm:$0xf0]  ;;  %v2088_v39 = vor.u32 %v2395_v27, %v2085_v28 }
  0x6e   : > { %1256 = vmatpush.bf16.msra.mxu3 %v1824_v6  ;;  %v2311_v37 = vld [vmem:[%s2846_s5 + $0x34] sm:$0xf]  ;;  %v1749_v38 = vld [vmem:[%s2846_s5 + $0x48] sm:$0xf0]  ;;  %v2280_v40 = vor.u32 %v2443_v29, %v2277_v30  ;;  %v2389_v41 = vld [vmem:[%s2846_s5 + $0x2a4] sm:$0xf]  ;;  %v1900_v43 = vor.u32 %v2351_v33, %v1899_v32 }
  0x6f   : > { %1216 = vmatpush.bf16.msra.mxu0 %v1772_v3  ;;  %v2061_v42 = vld [vmem:[%s2846_s5 + $0x2b8] sm:$0xf0]  ;;  %v2437_v44 = vld [vmem:[%s2846_s5 + $0x424] sm:$0xf]  ;;  %v1875_v46 = vld [vmem:[%s2846_s5 + $0x128] sm:$0xf]  ;;  %v1752_v48 = vor.u32 %v2311_v37, %v1749_v38 }
  0x70   : > { %1230 = vmatpush.bf16.msra.mxu1 %v1964_v7  ;;  %v2253_v45 = vld [vmem:[%s2846_s5 + $0x438] sm:$0xf0]  ;;  %v2345_v47 = vld [vmem:[%s2846_s5 + $0x13c] sm:$0xf0]  ;;  %v1719_v49 = vld [vmem:[%s2844_s29 + $0x8] sm:$0xf]  ;;  %v2064_v57 = vor.u32 %v2389_v41, %v2061_v42 }
  0x71   : > { %1244 = vmatpush.bf16.msra.mxu2 %v2156_v8  ;;  %v2304_v50 = vld [vmem:[%s2844_s29 + $0x10] sm:$0xf0]  ;;  %v2383_v51 = vld [vmem:[%s2846_s5 + $0x274] sm:$0xf]  ;;  %v2037_v52 = vld [vmem:[%s2846_s5 + $0x288] sm:$0xf0]  ;;  %v2256_v58 = vor.u32 %v2437_v44, %v2253_v45  ;;  %v1876_v62 = vor.u32 %v2345_v47, %v1875_v46 }
  0x72   : > { %1257 = vmatpush.bf16.msra.mxu3 %v1800_v19  ;;  %v2431_v53 = vld [vmem:[%s2846_s5 + $0x3f4] sm:$0xf]  ;;  %v2305_v54 = vld [vmem:[%s2846_s5 + $0x4] sm:$0xf]  ;;  %v1725_v55 = vld [vmem:[%s2846_s5 + $0x18] sm:$0xf0]  ;;  %v2944_v56 = vor.u32 %v2304_v50, %v1719_v49  ;;  %v2040_v9 = vor.u32 %v2383_v51, %v2037_v52 }
  0x73   : > { %1217 = vmatpush.bf16.msra.mxu0 %v1748_v15  ;;  %v2229_v59 = vld [vmem:[%s2846_s5 + $0x408] sm:$0xf0]  ;;  %v2091_v60 = vld [vmem:[%s2846_s5 + $0x2d8] sm:$0xf]  ;;  %v2399_v61 = vld [vmem:[%s2846_s5 + $0x2ec] sm:$0xf0]  ;;  %v1728_v2 = vor.u32 %v2305_v54, %v1725_v55 }
  0x74   : > { %1231 = vmatpush.bf16.msra.mxu1 %v1940_v20  ;;  %v1851_v63 = vld [vmem:[%s2846_s5 + $0xf8] sm:$0xf]  ;;  %v2339_v0 = vld [vmem:[%s2846_s5 + $0x10c] sm:$0xf0]  ;;  %v2303_v3 = vld [vmem:[%s2844_s29 + $0x8] sm:$0xf0]  ;;  %v2092_v6 = vor.u32 %v2399_v61, %v2091_v60  ;;  %v2232_v10 = vor.u32 %v2431_v53, %v2229_v59 }
  0x75   : > { %1245 = vmatpush.bf16.msra.mxu2 %v2132_v21  ;;  %v1711_v1 = vld [vmem:[%s2844_s29] sm:$0xf]  ;;  %v2302_v4 = vld [vmem:[%s2844_s29 + $0x4] sm:$0xf]  ;;  %v1713_v5 = vld [vmem:[%s2844_s29 + $0xc] sm:$0xf0]  ;;  %v1852_v14 = vor.u32 %v2339_v0, %v1851_v63 }
  0x76   : > { %1258 = vmatpush.bf16.msra.mxu3 %v1776_v34  ;;  %v2956_v7 = vor.u32 %v2303_v3, %v1711_v1  ;;  %v2958_v8 = vor.u32 %v2302_v4, %v1713_v5  ;;  %v2377_v11 = vld [vmem:[%s2846_s5 + $0x244] sm:$0xf]  ;;  %v2067_v12 = vld [vmem:[%s2846_s5 + $0x2a8] sm:$0xf]  ;;  %v2393_v13 = vld [vmem:[%s2846_s5 + $0x2bc] sm:$0xf0] }
  0x77   : > { %1218 = vmatpush.bf16.msra.mxu0 %v1724_v31  ;;  %v2013_v15 = vld [vmem:[%s2846_s5 + $0x258] sm:$0xf0]  ;;  %v2425_v16 = vld [vmem:[%s2846_s5 + $0x3c4] sm:$0xf]  ;;  %v1827_v18 = vld [vmem:[%s2846_s5 + $0xc8] sm:$0xf]  ;;  %v2068_v20 = vor.u32 %v2393_v13, %v2067_v12 }
  0x78   : > { %1232 = vmatpush.bf16.msra.mxu1 %v1916_v35  ;;  %v2205_v17 = vld [vmem:[%s2846_s5 + $0x3d8] sm:$0xf0]  ;;  %v2333_v19 = vld [vmem:[%s2846_s5 + $0xdc] sm:$0xf0]  ;;  %v2016_v21 = vor.u32 %v2377_v11, %v2013_v15  ;;  %v2371_v23 = vld [vmem:[%s2846_s5 + $0x214] sm:$0xf] }
  0x79   : > { %1246 = vmatpush.bf16.msra.mxu2 %v2108_v36  ;;  %v2208_v22 = vor.u32 %v2425_v16, %v2205_v17  ;;  %v2043_v24 = vld [vmem:[%s2846_s5 + $0x278] sm:$0xf]  ;;  %v2387_v25 = vld [vmem:[%s2846_s5 + $0x28c] sm:$0xf0]  ;;  %v1828_v26 = vor.u32 %v2333_v19, %v1827_v18  ;;  %v1989_v27 = vld [vmem:[%s2846_s5 + $0x228] sm:$0xf0] }
  0x7a   : > { %1259 = vmatpush.bf16.msra.mxu3 %v1752_v48  ;;  %1219 = vmatmul.bf16.vlgmr.msra.gmra.mxu0 %v2956_v7  ;;  %v2419_v28 = vld [vmem:[%s2846_s5 + $0x394] sm:$0xf]  ;;  %v2181_v29 = vld [vmem:[%s2846_s5 + $0x3a8] sm:$0xf0]  ;;  %v1803_v30 = vld [vmem:[%s2846_s5 + $0x98] sm:$0xf]  ;;  %v2044_v32 = vor.u32 %v2387_v25, %v2043_v24  ;;  %v1992_v33 = vor.u32 %v2371_v23, %v1989_v27 }
  0x7b   : > { %1267 = vmatpush.bf16.msrb.mxu0 %v2088_v39  ;;  %1233 = vmatmul.bf16.vlgmr.msra.gmra.mxu1 %v2958_v8  ;;  %v2327_v31 = vld [vmem:[%s2846_s5 + $0xac] sm:$0xf0]  ;;  %v2184_v34 = vor.u32 %v2419_v28, %v2181_v29  ;;  %v2365_v35 = vld [vmem:[%s2846_s5 + $0x1e4] sm:$0xf]  ;;  %v2019_v36 = vld [vmem:[%s2846_s5 + $0x248] sm:$0xf] }
  0x7c   : > { %1281 = vmatpush.bf16.msrb.mxu1 %v2280_v40  ;;  %1247 = vmatmul.bf16.vlgmr.msra.gmra.mxu2 %v2944_v56  ;;  %v2381_v37 = vld [vmem:[%s2846_s5 + $0x25c] sm:$0xf0]  ;;  %v1804_v38 = vor.u32 %v2327_v31, %v1803_v30  ;;  %v1965_v39 = vld [vmem:[%s2846_s5 + $0x1f8] sm:$0xf0]  ;;  %v2413_v40 = vld [vmem:[%s2846_s5 + $0x364] sm:$0xf] }
  0x7d   : > { %1295 = vmatpush.bf16.msrb.mxu2 %v1900_v43  ;;  %v2157_v41 = vld [vmem:[%s2846_s5 + $0x378] sm:$0xf0]  ;;  %v1779_v42 = vld [vmem:[%s2846_s5 + $0x68] sm:$0xf]  ;;  %v2321_v43 = vld [vmem:[%s2846_s5 + $0x7c] sm:$0xf0]  ;;  %v2020_v44 = vor.u32 %v2381_v37, %v2019_v36  ;;  %v1968_v45 = vor.u32 %v2365_v35, %v1965_v39 }
  0x7e   : > { %1260 = vmatpush.bf16.msra.mxu3 %v1728_v2  ;;  %v2160_v46 = vor.u32 %v2413_v40, %v2157_v41  ;;  %v2359_v47 = vld [vmem:[%s2846_s5 + $0x1b4] sm:$0xf]  ;;  %v1995_v48 = vld [vmem:[%s2846_s5 + $0x218] sm:$0xf]  ;;  %v2375_v49 = vld [vmem:[%s2846_s5 + $0x22c] sm:$0xf0]  ;;  %v1780_v50 = vor.u32 %v2321_v43, %v1779_v42 }
  0x7f   : > { %1268 = vmatpush.bf16.msrb.mxu0 %v2064_v57  ;;  %v1941_v51 = vld [vmem:[%s2846_s5 + $0x1c8] sm:$0xf0]  ;;  %v2407_v52 = vld [vmem:[%s2846_s5 + $0x334] sm:$0xf]  ;;  %v1755_v54 = vld [vmem:[%s2846_s5 + $0x38] sm:$0xf]  ;;  %v1996_v59 = vor.u32 %v2375_v49, %v1995_v48 }
  0x80   : > { %1282 = vmatpush.bf16.msrb.mxu1 %v2256_v58  ;;  %v2133_v53 = vld [vmem:[%s2846_s5 + $0x348] sm:$0xf0]  ;;  %v2315_v55 = vld [vmem:[%s2846_s5 + $0x4c] sm:$0xf0]  ;;  %v2353_v57 = vld [vmem:[%s2846_s5 + $0x184] sm:$0xf]  ;;  %v1944_v60 = vor.u32 %v2359_v47, %v1941_v51 }
  0x81   : > { %1296 = vmatpush.bf16.msrb.mxu2 %v1876_v62  ;;  %1261 = vmatmul.bf16.vlgmr.msra.gmra.mxu3 %v2956_v7  ;;  %v1917_v58 = vld [vmem:[%s2846_s5 + $0x198] sm:$0xf0]  ;;  %v2136_v61 = vor.u32 %v2407_v52, %v2133_v53  ;;  %v2401_v62 = vld [vmem:[%s2846_s5 + $0x304] sm:$0xf]  ;;  %v1971_v63 = vld [vmem:[%s2846_s5 + $0x1e8] sm:$0xf]  ;;  %v1756_v1 = vor.u32 %v2315_v55, %v1755_v54 }
  0x82   : > { %1309 = vmatpush.bf16.msrb.mxu3 %v2092_v6  ;;  %v2369_v0 = vld [vmem:[%s2846_s5 + $0x1fc] sm:$0xf0]  ;;  %v2109_v2 = vld [vmem:[%s2846_s5 + $0x318] sm:$0xf0]  ;;  %v1731_v3 = vld [vmem:[%s2846_s5 + $0x8] sm:$0xf] }
  0x83   : > { %1269 = vmatpush.bf16.msrb.mxu0 %v2040_v9  ;;  %v2309_v4 = vld [vmem:[%s2846_s5 + $0x1c] sm:$0xf0]  ;;  %v2283_v5 = vld [vmem:[%s2846_s5 + $0x458] sm:$0xf]  ;;  %v2447_v6 = vld [vmem:[%s2846_s5 + $0x46c] sm:$0xf0]  ;;  %v1972_v13 = vor.u32 %v2369_v0, %v1971_v63  ;;  %v2112_v15 = vor.u32 %v2401_v62, %v2109_v2 }
  0x84   : > { %1283 = vmatpush.bf16.msrb.mxu1 %v2232_v10  ;;  %v2348_v9 = vld [vmem:[%s2846_s5 + $0x15c] sm:$0xf]  ;;  %v1901_v10 = vld [vmem:[%s2846_s5 + $0x170] sm:$0xf0]  ;;  %v1947_v16 = vld [vmem:[%s2846_s5 + $0x1b8] sm:$0xf]  ;;  %v1732_v18 = vor.u32 %v2309_v4, %v1731_v3  ;;  %v2284_v19 = vor.u32 %v2447_v6, %v2283_v5 }
  0x85   : > { %1297 = vmatpush.bf16.msrb.mxu2 %v1852_v14  ;;  %v2396_v11 = vld [vmem:[%s2846_s5 + $0x2dc] sm:$0xf]  ;;  %v2093_v12 = vld [vmem:[%s2846_s5 + $0x2f0] sm:$0xf0]  ;;  %v1920_v14 = vor.u32 %v2353_v57, %v1917_v58  ;;  %v2363_v17 = vld [vmem:[%s2846_s5 + $0x1cc] sm:$0xf0] }
  0x86   : > { %1310 = vmatpush.bf16.msrb.mxu3 %v2068_v20  ;;  %v1904_v20 = vor.u32 %v2348_v9, %v1901_v10  ;;  %v2441_v23 = vld [vmem:[%s2846_s5 + $0x43c] sm:$0xf0]  ;;  %v2342_v24 = vld [vmem:[%s2846_s5 + $0x12c] sm:$0xf]  ;;  %v1877_v25 = vld [vmem:[%s2846_s5 + $0x140] sm:$0xf0]  ;;  %v1948_v28 = vor.u32 %v2363_v17, %v1947_v16 }
  0x87   : > { %1270 = vmatpush.bf16.msrb.mxu0 %v2016_v21  ;;  %v2096_v21 = vor.u32 %v2396_v11, %v2093_v12  ;;  %v2069_v27 = vld [vmem:[%s2846_s5 + $0x2c0] sm:$0xf0]  ;;  %v1923_v29 = vld [vmem:[%s2846_s5 + $0x188] sm:$0xf]  ;;  %v2357_v30 = vld [vmem:[%s2846_s5 + $0x19c] sm:$0xf0] }
  0x88   : > { %1284 = vmatpush.bf16.msrb.mxu1 %v2208_v22  ;;  %v2259_v22 = vld [vmem:[%s2846_s5 + $0x428] sm:$0xf]  ;;  %v2235_v36 = vld [vmem:[%s2846_s5 + $0x3f8] sm:$0xf]  ;;  %v2435_v37 = vld [vmem:[%s2846_s5 + $0x40c] sm:$0xf0]  ;;  %v1924_v42 = vor.u32 %v2357_v30, %v1923_v29 }
  0x89   : > { %1298 = vmatpush.bf16.msrb.mxu2 %v1828_v26  ;;  %v2390_v26 = vld [vmem:[%s2846_s5 + $0x2ac] sm:$0xf]  ;;  %v2260_v31 = vor.u32 %v2441_v23, %v2259_v22  ;;  %v1853_v39 = vld [vmem:[%s2846_s5 + $0x110] sm:$0xf0]  ;;  %v2384_v40 = vld [vmem:[%s2846_s5 + $0x27c] sm:$0xf] }
  0x8a   : > { %1311 = vmatpush.bf16.msrb.mxu3 %v2044_v32  ;;  %v2444_v32 = vld [vmem:[%s2846_s5 + $0x45c] sm:$0xf]  ;;  %v2072_v35 = vor.u32 %v2390_v26, %v2069_v27  ;;  %v2045_v41 = vld [vmem:[%s2846_s5 + $0x290] sm:$0xf0]  ;;  %v2211_v49 = vld [vmem:[%s2846_s5 + $0x3c8] sm:$0xf] }
  0x8b   : > { %1271 = vmatpush.bf16.msrb.mxu0 %v1992_v33  ;;  %v2285_v33 = vld [vmem:[%s2846_s5 + $0x470] sm:$0xf0]  ;;  %v2048_v48 = vor.u32 %v2384_v40, %v2045_v41  ;;  %v2330_v51 = vld [vmem:[%s2846_s5 + $0xcc] sm:$0xf]  ;;  %v1829_v52 = vld [vmem:[%s2846_s5 + $0xe0] sm:$0xf0] }
  0x8c   : > { %1285 = vmatpush.bf16.msrb.mxu1 %v2184_v34  ;;  %v1880_v34 = vor.u32 %v2342_v24, %v1877_v25  ;;  %v2288_v43 = vor.u32 %v2444_v32, %v2285_v33  ;;  %v2378_v53 = vld [vmem:[%s2846_s5 + $0x24c] sm:$0xf]  ;;  %v2021_v54 = vld [vmem:[%s2846_s5 + $0x260] sm:$0xf0]  ;;  %v2432_v58 = vld [vmem:[%s2846_s5 + $0x3fc] sm:$0xf] }
  0x8d   : > { %1299 = vmatpush.bf16.msrb.mxu2 %v1804_v38  ;;  %v2336_v38 = vld [vmem:[%s2846_s5 + $0xfc] sm:$0xf]  ;;  %v2187_v62 = vld [vmem:[%s2846_s5 + $0x398] sm:$0xf]  ;;  %v2423_v63 = vld [vmem:[%s2846_s5 + $0x3ac] sm:$0xf0] }
  0x8e   : > { %1312 = vmatpush.bf16.msrb.mxu3 %v2020_v44  ;;  %v2236_v44 = vor.u32 %v2435_v37, %v2235_v36  ;;  %v1856_v47 = vor.u32 %v2336_v38, %v1853_v39  ;;  %v2324_v0 = vld [vmem:[%s2846_s5 + $0x9c] sm:$0xf]  ;;  %v1997_v3 = vld [vmem:[%s2846_s5 + $0x230] sm:$0xf0]  ;;  %v2188_v5 = vor.u32 %v2423_v63, %v2187_v62  ;;  %v2426_v6 = vld [vmem:[%s2846_s5 + $0x3cc] sm:$0xf] }
  0x8f   : > { %1272 = vmatpush.bf16.msrb.mxu0 %v1968_v45  ;;  %v2438_v45 = vld [vmem:[%s2846_s5 + $0x42c] sm:$0xf]  ;;  %v2372_v2 = vld [vmem:[%s2846_s5 + $0x21c] sm:$0xf]  ;;  %v2213_v9 = vld [vmem:[%s2846_s5 + $0x3e0] sm:$0xf0] }
  0x90   : > { %1286 = vmatpush.bf16.msrb.mxu1 %v2160_v46  ;;  %v2261_v46 = vld [vmem:[%s2846_s5 + $0x440] sm:$0xf0]  ;;  %v2000_v11 = vor.u32 %v2372_v2, %v1997_v3  ;;  %v2163_v12 = vld [vmem:[%s2846_s5 + $0x368] sm:$0xf]  ;;  %v2366_v16 = vld [vmem:[%s2846_s5 + $0x1ec] sm:$0xf] }
  0x91   : > { %1300 = vmatpush.bf16.msrb.mxu2 %v1780_v50  ;;  %v2429_v50 = vld [vmem:[%s2846_s5 + $0x3dc] sm:$0xf0]  ;;  %v2264_v55 = vor.u32 %v2438_v45, %v2261_v46  ;;  %v1973_v17 = vld [vmem:[%s2846_s5 + $0x200] sm:$0xf0]  ;;  %v2139_v24 = vld [vmem:[%s2846_s5 + $0x338] sm:$0xf] }
  0x92   : > { %1313 = vmatpush.bf16.msrb.mxu3 %v1996_v59  ;;  %v2212_v57 = vor.u32 %v2429_v50, %v2211_v49  ;;  %v2237_v59 = vld [vmem:[%s2846_s5 + $0x410] sm:$0xf0]  ;;  %v1976_v23 = vor.u32 %v2366_v16, %v1973_v17  ;;  %v2411_v25 = vld [vmem:[%s2846_s5 + $0x34c] sm:$0xf0]  ;;  %v2312_v26 = vld [vmem:[%s2846_s5 + $0x3c] sm:$0xf] }
  0x93   : > { %1273 = vmatpush.bf16.msrb.mxu0 %v1944_v60  ;;  %v1832_v60 = vor.u32 %v2330_v51, %v1829_v52  ;;  %v2240_v4 = vor.u32 %v2432_v58, %v2237_v59  ;;  %v1757_v27 = vld [vmem:[%s2846_s5 + $0x50] sm:$0xf0]  ;;  %v2115_v30 = vld [vmem:[%s2846_s5 + $0x308] sm:$0xf]  ;;  %v2140_v32 = vor.u32 %v2411_v25, %v2139_v24  ;;  %v2405_v33 = vld [vmem:[%s2846_s5 + $0x31c] sm:$0xf0] }
  0x94   : > { %1287 = vmatpush.bf16.msrb.mxu1 %v2136_v61  ;;  %v2024_v61 = vor.u32 %v2378_v53, %v2021_v54  ;;  %v1949_v29 = vld [vmem:[%s2846_s5 + $0x1d0] sm:$0xf0]  ;;  %v1760_v36 = vor.u32 %v2312_v26, %v1757_v27  ;;  %v2306_v38 = vld [vmem:[%s2846_s5 + $0xc] sm:$0xf]  ;;  %v1733_v39 = vld [vmem:[%s2846_s5 + $0x20] sm:$0xf0] }
  0x95   : > { %1301 = vmatpush.bf16.msrb.mxu2 %v1756_v1  ;;  %v1805_v1 = vld [vmem:[%s2846_s5 + $0xb0] sm:$0xf0]  ;;  %v2354_v40 = vld [vmem:[%s2846_s5 + $0x18c] sm:$0xf]  ;;  %v1925_v41 = vld [vmem:[%s2846_s5 + $0x1a0] sm:$0xf0]  ;;  %v1736_v52 = vor.u32 %v2306_v38, %v1733_v39 }
  0x96   : > { %1314 = vmatpush.bf16.msrb.mxu3 %v1972_v13  ;;  %v1808_v10 = vor.u32 %v2324_v0, %v1805_v1  ;;  %v2417_v13 = vld [vmem:[%s2846_s5 + $0x37c] sm:$0xf0]  ;;  %v2400_v45 = vld [vmem:[%s2846_s5 + $0x2f4] sm:$0xf0]  ;;  %v2408_v50 = vld [vmem:[%s2846_s5 + $0x33c] sm:$0xf]  ;;  %v1928_v53 = vor.u32 %v2354_v40, %v1925_v41 }
  0x97   : > { %1274 = vmatpush.bf16.msrb.mxu0 %v1920_v14  ;;  %v2318_v14 = vld [vmem:[%s2846_s5 + $0x6c] sm:$0xf]  ;;  %v2291_v46 = vld [vmem:[%s2846_s5 + $0x460] sm:$0xf]  ;;  %v2448_v49 = vld [vmem:[%s2846_s5 + $0x474] sm:$0xf0] }
  0x98   : > { %1288 = vmatpush.bf16.msrb.mxu1 %v2112_v15  ;;  %v1781_v15 = vld [vmem:[%s2846_s5 + $0x80] sm:$0xf0]  ;;  %v2141_v51 = vld [vmem:[%s2846_s5 + $0x350] sm:$0xf0]  ;;  %v2346_v58 = vld [vmem:[%s2846_s5 + $0x144] sm:$0xf0]  ;;  %v2292_v59 = vor.u32 %v2448_v49, %v2291_v46 }
  0x99   : > { %1302 = vmatpush.bf16.msrb.mxu2 %v1732_v18  ;;  %v2216_v18 = vor.u32 %v2426_v6, %v2213_v9  ;;  %v1784_v22 = vor.u32 %v2318_v14, %v1781_v15  ;;  %v2267_v62 = vld [vmem:[%s2846_s5 + $0x430] sm:$0xf]  ;;  %v2144_v63 = vor.u32 %v2408_v50, %v2141_v51  ;;  %v2442_v0 = vld [vmem:[%s2846_s5 + $0x444] sm:$0xf0]  ;;  %v2402_v1 = vld [vmem:[%s2846_s5 + $0x30c] sm:$0xf] }
  0x9a   : > { %1315 = vmatpush.bf16.msrb.mxu3 %v1948_v28  ;;  %1275 = vmatmul.bf16.vlgmr.msrb.gmra.mxu0 %v2958_v8  ;;  %v2360_v28 = vld [vmem:[%s2846_s5 + $0x1bc] sm:$0xf]  ;;  %v2117_v2 = vld [vmem:[%s2846_s5 + $0x320] sm:$0xf0]  ;;  %v1859_v9 = vld [vmem:[%s2846_s5 + $0x100] sm:$0xf] }
  0x9b   : > { %1323 = vmatpush.bf16.msra.mxu0 %v2284_v19  ;;  %1289 = vmatmul.bf16.vlgmr.msrb.gmra.mxu1 %v2944_v56  ;;  %v2164_v19 = vor.u32 %v2417_v13, %v2163_v12  ;;  %v1952_v37 = vor.u32 %v2360_v28, %v1949_v29  ;;  %v2349_v3 = vld [vmem:[%s2846_s5 + $0x164] sm:$0xf]  ;;  %v2051_v12 = vld [vmem:[%s2846_s5 + $0x280] sm:$0xf]  ;;  %v2388_v13 = vld [vmem:[%s2846_s5 + $0x294] sm:$0xf0]  ;;  %v2120_v14 = vor.u32 %v2402_v1, %v2117_v2 }
  0x9c   : > { %1337 = vmatpush.bf16.msra.mxu1 %v1904_v20  ;;  %1303 = vmatmul.bf16.vlgmr.msrb.gmra.mxu2 %v2956_v7  ;;  %v2420_v20 = vld [vmem:[%s2846_s5 + $0x39c] sm:$0xf]  ;;  %v2243_v15 = vld [vmem:[%s2846_s5 + $0x400] sm:$0xf]  ;;  %v2436_v16 = vld [vmem:[%s2846_s5 + $0x414] sm:$0xf0] }
  0x9d   : > { %1351 = vmatpush.bf16.msra.mxu2 %v2096_v21  ;;  %v2189_v21 = vld [vmem:[%s2846_s5 + $0x3b0] sm:$0xf0]  ;;  %v2334_v24 = vld [vmem:[%s2846_s5 + $0xe4] sm:$0xf0]  ;;  %v2027_v25 = vld [vmem:[%s2846_s5 + $0x250] sm:$0xf] }
  0x9e   : > { %1316 = vmatpush.bf16.msrb.mxu3 %v1924_v42  ;;  %v1907_v42 = vld [vmem:[%s2846_s5 + $0x160] sm:$0xf]  ;;  %v2382_v26 = vld [vmem:[%s2846_s5 + $0x264] sm:$0xf0]  ;;  %v2219_v27 = vld [vmem:[%s2846_s5 + $0x3d0] sm:$0xf] }
  0x9f   : > { %1324 = vmatpush.bf16.msra.mxu0 %v2260_v31  ;;  %v2192_v31 = vor.u32 %v2420_v20, %v2189_v21  ;;  %v2052_v21 = vor.u32 %v2388_v13, %v2051_v12  ;;  %v2430_v28 = vld [vmem:[%s2846_s5 + $0x3e4] sm:$0xf0]  ;;  %v2376_v38 = vld [vmem:[%s2846_s5 + $0x234] sm:$0xf0]  ;;  %v2195_v39 = vld [vmem:[%s2846_s5 + $0x3a0] sm:$0xf] }
  0xa0   : > { %1338 = vmatpush.bf16.msra.mxu1 %v1880_v34  ;;  %v2414_v34 = vld [vmem:[%s2846_s5 + $0x36c] sm:$0xf]  ;;  %v2424_v40 = vld [vmem:[%s2846_s5 + $0x3b4] sm:$0xf0]  ;;  %v1787_v46 = vld [vmem:[%s2846_s5 + $0x70] sm:$0xf] }
  0xa1   : > { %1352 = vmatpush.bf16.msra.mxu2 %v2072_v35  ;;  %1317 = vmatmul.bf16.vlgmr.msrb.gmra.mxu3 %v2958_v8  ;;  %v2165_v35 = vld [vmem:[%s2846_s5 + $0x380] sm:$0xf0]  ;;  %v1979_v49 = vld [vmem:[%s2846_s5 + $0x1f0] sm:$0xf]  ;;  %v2370_v50 = vld [vmem:[%s2846_s5 + $0x204] sm:$0xf0] }
  0xa2   : > { %1365 = vmatpush.bf16.msra.mxu3 %v2288_v43  ;;  %v2352_v43 = vld [vmem:[%s2846_s5 + $0x174] sm:$0xf0]  ;;  %v2171_v51 = vld [vmem:[%s2846_s5 + $0x370] sm:$0xf]  ;;  %v2358_v13 = vld [vmem:[%s2846_s5 + $0x1a4] sm:$0xf0] }
  0xa3   : > { %1325 = vmatpush.bf16.msra.mxu0 %v2236_v44  ;;  %v2099_v44 = vld [vmem:[%s2846_s5 + $0x2e0] sm:$0xf]  ;;  %v1908_v54 = vor.u32 %v2352_v43, %v1907_v42  ;;  %v2331_v42 = vld [vmem:[%s2846_s5 + $0xd4] sm:$0xf]  ;;  %v1837_v43 = vld [vmem:[%s2846_s5 + $0xe8] sm:$0xf0] }
  0xa4   : > { %1339 = vmatpush.bf16.msra.mxu1 %v1856_v47  ;;  %v2168_v47 = vor.u32 %v2414_v34, %v2165_v35  ;;  %v1811_v34 = vld [vmem:[%s2846_s5 + $0xa0] sm:$0xf]  ;;  %v2220_v35 = vor.u32 %v2430_v28, %v2219_v27  ;;  %v2412_v1 = vld [vmem:[%s2846_s5 + $0x354] sm:$0xf0]  ;;  %v2391_v28 = vld [vmem:[%s2846_s5 + $0x2b4] sm:$0xf] }
  0xa5   : > { %1353 = vmatpush.bf16.msra.mxu2 %v2048_v48  ;;  %v2116_v48 = vor.u32 %v2405_v33, %v2115_v30  ;;  %v2337_v30 = vld [vmem:[%s2846_s5 + $0x104] sm:$0xf]  ;;  %v2028_v33 = vor.u32 %v2382_v26, %v2027_v25  ;;  %p2297_p8 = scmp.ne.s32.totalorder %s2669_s19, 1 }
  0xa6   : > { %1366 = vmatpush.bf16.msra.mxu3 %v2264_v55  ;;  %v2100_v55 = vor.u32 %v2400_v45, %v2099_v44 }
  0xa7   : > { %1326 = vmatpush.bf16.msra.mxu0 %v2212_v57  ;;  %v1883_v57 = vld [vmem:[%s2846_s5 + $0x130] sm:$0xf] }
  0xa8   : > { %1340 = vmatpush.bf16.msra.mxu1 %v1832_v60  ;;  %v2075_v60 = vld [vmem:[%s2846_s5 + $0x2b0] sm:$0xf] }
  0xa9   : > { %1354 = vmatpush.bf16.msra.mxu2 %v2024_v61  ;;  %v2394_v61 = vld [vmem:[%s2846_s5 + $0x2c4] sm:$0xf0] }
  0xaa   : > { %1367 = vmatpush.bf16.msra.mxu3 %v2240_v4  ;;  %v1909_v4 = vld [vmem:[%s2846_s5 + $0x178] sm:$0xf0]  ;;  %v2076_v6 = vor.u32 %v2394_v61, %v2075_v60  ;;  %v2316_v61 = vld [vmem:[%s2846_s5 + $0x54] sm:$0xf0] }
  0xab   : > { %1327 = vmatpush.bf16.msra.mxu0 %v2188_v5  ;;  %v1884_v5 = vor.u32 %v2346_v58, %v1883_v57  ;;  %v1912_v17 = vor.u32 %v2349_v3, %v1909_v4  ;;  %v1980_v58 = vor.u32 %v2370_v50, %v1979_v49  ;;  %v2319_v3 = vld [vmem:[%s2846_s5 + $0x74] sm:$0xf]  ;;  %v1789_v4 = vld [vmem:[%s2846_s5 + $0x88] sm:$0xf0]  ;;  %v2373_v50 = vld [vmem:[%s2846_s5 + $0x224] sm:$0xf] }
  0xac   : > { %1341 = vmatpush.bf16.msra.mxu1 %v1808_v10  ;;  %v2268_v10 = vor.u32 %v2442_v0, %v2267_v62  ;;  %v1955_v62 = vld [vmem:[%s2846_s5 + $0x1c0] sm:$0xf] }
  0xad   : > { %1355 = vmatpush.bf16.msra.mxu2 %v2000_v11  ;;  %v2340_v11 = vld [vmem:[%s2846_s5 + $0x114] sm:$0xf0]  ;;  %v2147_v0 = vld [vmem:[%s2846_s5 + $0x340] sm:$0xf] }
  0xae   : > { %1368 = vmatpush.bf16.msra.mxu3 %v2216_v18  ;;  %v2343_v18 = vld [vmem:[%s2846_s5 + $0x134] sm:$0xf]  ;;  %v1860_v20 = vor.u32 %v2340_v11, %v1859_v9  ;;  %v1739_v9 = vld [vmem:[%s2846_s5 + $0x10] sm:$0xf]  ;;  %v2148_v12 = vor.u32 %v2412_v1, %v2147_v0  ;;  %v2409_v0 = vld [vmem:[%s2846_s5 + $0x344] sm:$0xf] }
  0xaf   : > { %1328 = vmatpush.bf16.msra.mxu0 %v2164_v19  ;;  %v1885_v19 = vld [vmem:[%s2846_s5 + $0x148] sm:$0xf0]  ;;  %v1931_v11 = vld [vmem:[%s2846_s5 + $0x190] sm:$0xf]  ;;  %v2149_v1 = vld [vmem:[%s2846_s5 + $0x358] sm:$0xf0] }
  0xb0   : > { %1342 = vmatpush.bf16.msra.mxu1 %v1784_v22  ;;  %v1835_v22 = vld [vmem:[%s2846_s5 + $0xd0] sm:$0xf]  ;;  %v1888_v29 = vor.u32 %v2343_v18, %v1885_v19  ;;  %v2445_v18 = vld [vmem:[%s2846_s5 + $0x464] sm:$0xf]  ;;  %v1792_v19 = vor.u32 %v2319_v3, %v1789_v4  ;;  %v2152_v3 = vor.u32 %v2409_v0, %v2149_v1  ;;  %v2355_v4 = vld [vmem:[%s2846_s5 + $0x194] sm:$0xf] }
  0xb1   : > { %1356 = vmatpush.bf16.msra.mxu2 %v1976_v23  ;;  %v2244_v23 = vor.u32 %v2436_v16, %v2243_v15  ;;  %v2406_v15 = vld [vmem:[%s2846_s5 + $0x324] sm:$0xf0]  ;;  %v2397_v16 = vld [vmem:[%s2846_s5 + $0x2e4] sm:$0xf] }
  0xb2   : > { %1369 = vmatpush.bf16.msra.mxu3 %v2192_v31  ;;  %v1861_v31 = vld [vmem:[%s2846_s5 + $0x118] sm:$0xf0] }
  0xb3   : > { %1329 = vmatpush.bf16.msra.mxu0 %v2140_v32  ;;  %v1836_v32 = vor.u32 %v2334_v24, %v1835_v22  ;;  %v1864_v41 = vor.u32 %v2337_v30, %v1861_v31  ;;  %v1765_v22 = vld [vmem:[%s2846_s5 + $0x58] sm:$0xf0]  ;;  %v1932_v24 = vor.u32 %v2358_v13, %v1931_v11  ;;  %v2439_v30 = vld [vmem:[%s2846_s5 + $0x434] sm:$0xf] }
  0xb4   : > { %1343 = vmatpush.bf16.msra.mxu1 %v1760_v36  ;;  %v2328_v36 = vld [vmem:[%s2846_s5 + $0xb4] sm:$0xf0] }
  0xb5   : > { %1357 = vmatpush.bf16.msra.mxu2 %v1952_v37  ;;  %v2003_v37 = vld [vmem:[%s2846_s5 + $0x220] sm:$0xf]  ;;  %v1812_v44 = vor.u32 %v2328_v36, %v1811_v34  ;;  %v1741_v34 = vld [vmem:[%s2846_s5 + $0x28] sm:$0xf0] }
  0xb6   : > { %1370 = vmatpush.bf16.msra.mxu3 %v2168_v47  ;;  %v2004_v45 = vor.u32 %v2376_v38, %v2003_v37  ;;  %v2196_v47 = vor.u32 %v2424_v40, %v2195_v39  ;;  %v2385_v37 = vld [vmem:[%s2846_s5 + $0x284] sm:$0xf]  ;;  %v2053_v38 = vld [vmem:[%s2846_s5 + $0x298] sm:$0xf0] }
  0xb7   : > { %1330 = vmatpush.bf16.msra.mxu0 %v2116_v48  ;;  %v2322_v48 = vld [vmem:[%s2846_s5 + $0x84] sm:$0xf0]  ;;  %v2433_v40 = vld [vmem:[%s2846_s5 + $0x404] sm:$0xf] }
  0xb8   : > { %1344 = vmatpush.bf16.msra.mxu1 %v1736_v52  ;;  %v2418_v52 = vld [vmem:[%s2846_s5 + $0x384] sm:$0xf0]  ;;  %v1788_v57 = vor.u32 %v2322_v48, %v1787_v46  ;;  %v2427_v46 = vld [vmem:[%s2846_s5 + $0x3d4] sm:$0xf] }
  0xb9   : > { %1358 = vmatpush.bf16.msra.mxu2 %v1928_v53  ;;  %v1840_v53 = vor.u32 %v2331_v42, %v1837_v43  ;;  %v2172_v60 = vor.u32 %v2418_v52, %v2171_v51  ;;  %v2056_v42 = vor.u32 %v2385_v37, %v2053_v38  ;;  %v2005_v51 = vld [vmem:[%s2846_s5 + $0x238] sm:$0xf0]  ;;  %v2421_v52 = vld [vmem:[%s2846_s5 + $0x3a4] sm:$0xf] }
  0xba   : > { %1371 = vmatpush.bf16.msra.mxu3 %v2144_v63  ;;  %1331 = vmatmul.bf16.vlgmr.msra.gmra.mxu0 %v2944_v56  ;;  %v2364_v63 = vld [vmem:[%s2846_s5 + $0x1d4] sm:$0xf0] }
  0xbb   : > { %1379 = vmatpush.bf16.msrb.mxu0 %v1908_v54  ;;  %1345 = vmatmul.bf16.vlgmr.msra.gmra.mxu1 %v2956_v7  ;;  %v2325_v54 = vld [vmem:[%s2846_s5 + $0xa4] sm:$0xf] }
  0xbc   : > { %1393 = vmatpush.bf16.msrb.mxu1 %v2100_v55  ;;  %1359 = vmatmul.bf16.vlgmr.msra.gmra.mxu2 %v2958_v8  ;;  %v1813_v55 = vld [vmem:[%s2846_s5 + $0xb8] sm:$0xf0] }
  0xbd   : > { %1407 = vmatpush.bf16.msrb.mxu2 %v2292_v59  ;;  %v1763_v59 = vld [vmem:[%s2846_s5 + $0x40] sm:$0xf]  ;;  %v1816_v2 = vor.u32 %v2325_v54, %v1813_v55  ;;  %v2008_v54 = vor.u32 %v2373_v50, %v2005_v51  ;;  %v323_v50 = vld [vmem:[#allocation2 + $0x28] sm:$0xff] }
  0xbe   : > { %1372 = vmatpush.bf16.msra.mxu3 %v2120_v14  ;;  %v2123_v14 = vld [vmem:[%s2846_s5 + $0x310] sm:$0xf] }
  0xbf   : > { %1380 = vmatpush.bf16.msrb.mxu0 %v1884_v5  ;;  %v1764_v5 = vor.u32 %v2316_v61, %v1763_v59  ;;  %v2124_v25 = vor.u32 %v2406_v15, %v2123_v14  ;;  %v2415_v59 = vld [vmem:[%s2846_s5 + $0x374] sm:$0xf]  ;;  %v315_v15 = vld [vmem:[#allocation2 + $0x30] sm:$0xff] }
  0xc0   : > { %1394 = vmatpush.bf16.msrb.mxu1 %v2076_v6  ;;  %v1956_v6 = vor.u32 %v2364_v63, %v1955_v62  ;;  %v2361_v62 = vld [vmem:[%s2846_s5 + $0x1c4] sm:$0xf]  ;;  %v1957_v63 = vld [vmem:[%s2846_s5 + $0x1d8] sm:$0xf0] }
  0xc1   : > { %1408 = vmatpush.bf16.msrb.mxu2 %v2268_v10  ;;  %1373 = vmatmul.bf16.vlgmr.msra.gmra.mxu3 %v2944_v56  ;;  %v2310_v10 = vld [vmem:[%s2846_s5 + $0x24] sm:$0xf0] }
  0xc2   : > { %1421 = vmatpush.bf16.msrb.mxu3 %v1912_v17  ;;  %v2101_v17 = vld [vmem:[%s2846_s5 + $0x2f8] sm:$0xf0] }
  0xc3   : > { %1381 = vmatpush.bf16.msrb.mxu0 %v1860_v20  ;;  %v2293_v20 = vld [vmem:[%s2846_s5 + $0x478] sm:$0xf0]  ;;  %v2104_v26 = vor.u32 %v2397_v16, %v2101_v17 }
  0xc4   : > { %1395 = vmatpush.bf16.msrb.mxu1 %v2052_v21  ;;  %v2313_v21 = vld [vmem:[%s2846_s5 + $0x44] sm:$0xf]  ;;  %v2296_v27 = vor.u32 %v2445_v18, %v2293_v20 }
  0xc5   : > { %1409 = vmatpush.bf16.msrb.mxu2 %v2244_v23  ;;  %v1740_v23 = vor.u32 %v2310_v10, %v1739_v9  ;;  %v1768_v31 = vor.u32 %v2313_v21, %v1765_v22  ;;  %v2125_v9 = vld [vmem:[%s2846_s5 + $0x328] sm:$0xf0]  ;;  %v321_v22 = vld [vmem:[#allocation2 + $0x8] sm:$0xff] }
  0xc6   : > { %1422 = vmatpush.bf16.msrb.mxu3 %v1888_v29  ;;  %v2077_v29 = vld [vmem:[%s2846_s5 + $0x2c8] sm:$0xf0] }
  0xc7   : > { %1382 = vmatpush.bf16.msrb.mxu0 %v1836_v32  ;;  %v2269_v32 = vld [vmem:[%s2846_s5 + $0x448] sm:$0xf0] }
  0xc8   : > { %1396 = vmatpush.bf16.msrb.mxu1 %v2028_v33  ;;  %v2307_v33 = vld [vmem:[%s2846_s5 + $0x14] sm:$0xf]  ;;  %v2272_v36 = vor.u32 %v2439_v30, %v2269_v32 }
  0xc9   : > { %1410 = vmatpush.bf16.msrb.mxu2 %v2220_v35  ;;  %v2080_v35 = vor.u32 %v2391_v28, %v2077_v29  ;;  %v1744_v39 = vor.u32 %v2307_v33, %v1741_v34  ;;  %v316_v28 = vld [vmem:[#allocation2] sm:$0xff] }
  0xca   : > { %1423 = vmatpush.bf16.msrb.mxu3 %v1864_v41  ;;  %v2245_v41 = vld [vmem:[%s2846_s5 + $0x418] sm:$0xf0] }
  0xcb   : > { %1383 = vmatpush.bf16.msrb.mxu0 %v1812_v44  ;;  %v2248_v43 = vor.u32 %v2433_v40, %v2245_v41  ;;  %v2379_v44 = vld [vmem:[%s2846_s5 + $0x254] sm:$0xf] }
  0xcc   : > { %1397 = vmatpush.bf16.msrb.mxu1 %v2004_v45  ;;  %v2029_v45 = vld [vmem:[%s2846_s5 + $0x268] sm:$0xf0] }
  0xcd   : > { %1411 = vmatpush.bf16.msrb.mxu2 %v2196_v47  ;;  %v2221_v47 = vld [vmem:[%s2846_s5 + $0x3e8] sm:$0xf0]  ;;  %v2032_v48 = vor.u32 %v2379_v44, %v2029_v45 }
  0xce   : > { %1424 = vmatpush.bf16.msrb.mxu3 %v1840_v53  ;;  %v2224_v49 = vor.u32 %v2427_v46, %v2221_v47  ;;  %v2197_v53 = vld [vmem:[%s2846_s5 + $0x3b8] sm:$0xf0] }
  0xcf   : > { %1384 = vmatpush.bf16.msrb.mxu0 %v1788_v57  ;;  %v2200_v55 = vor.u32 %v2421_v52, %v2197_v53  ;;  %v2367_v57 = vld [vmem:[%s2846_s5 + $0x1f4] sm:$0xf] }
  0xd0   : > { %1398 = vmatpush.bf16.msrb.mxu1 %v1980_v58  ;;  %v1981_v58 = vld [vmem:[%s2846_s5 + $0x208] sm:$0xf0] }
  0xd1   : > { %1412 = vmatpush.bf16.msrb.mxu2 %v2172_v60  ;;  %v1984_v60 = vor.u32 %v2367_v57, %v1981_v58 }
  0xd2   : > { %1425 = vmatpush.bf16.msrb.mxu3 %v1816_v2  ;;  %v1960_v2 = vor.u32 %v2361_v62, %v1957_v63  ;;  %v324_v62 = vld [vmem:[#allocation2 + $0x48] sm:$0xff] }
  0xd3   : > { %1385 = vmatpush.bf16.msrb.mxu0 %v1764_v5  ;;  %v1933_v5 = vld [vmem:[%s2846_s5 + $0x1a8] sm:$0xf0] }
  0xd4   : > { %1399 = vmatpush.bf16.msrb.mxu1 %v1956_v6  ;;  %v2403_v6 = vld [vmem:[%s2846_s5 + $0x314] sm:$0xf]  ;;  %v1936_v10 = vor.u32 %v2355_v4, %v1933_v5  ;;  %v319_v5 = vld [vmem:[#allocation2 + $0x50] sm:$0xff] }
  0xd5   : > { %1413 = vmatpush.bf16.msrb.mxu2 %v2148_v12  ;;  %v2128_v11 = vor.u32 %v2403_v6, %v2125_v9 }
  0xd6   : > { %1426 = vmatpush.bf16.msrb.mxu3 %v1792_v19 }
  0xd7   : > { %1386 = vmatpush.bf16.msrb.mxu0 %v1740_v23 }
  0xd8   : > { %1400 = vmatpush.bf16.msrb.mxu1 %v1932_v24 }
  0xd9   : > { %1414 = vmatpush.bf16.msrb.mxu2 %v2124_v25 }
  0xda   : > { %1427 = vmatpush.bf16.msrb.mxu3 %v1768_v31  ;;  %1387 = vmatmul.bf16.vlgmr.msrb.gmra.mxu0 %v2956_v7 }
  0xdb   : > { %1435 = vmatpush.bf16.msra.mxu0 %v2104_v26  ;;  %1401 = vmatmul.bf16.vlgmr.msrb.gmra.mxu1 %v2958_v8 }
  0xdc   : > { %1449 = vmatpush.bf16.msra.mxu1 %v2296_v27  ;;  %1415 = vmatmul.bf16.vlgmr.msrb.gmra.mxu2 %v2944_v56 }
  0xde   : > { %1428 = vmatpush.bf16.msrb.mxu3 %v1744_v39 }
  0xdf   : > { %1436 = vmatpush.bf16.msra.mxu0 %v2080_v35  ;;  %v322_v35 = vld [vmem:[#allocation2 + $0x38] sm:$0xff] }
  0xe0   : > { %1450 = vmatpush.bf16.msra.mxu1 %v2272_v36 }
  0xe1   : > { %1429 = vmatmul.bf16.vlgmr.msrb.gmra.mxu3 %v2956_v7  ;;  %v2173_v7 = vld [vmem:[%s2846_s5 + $0x388] sm:$0xf0] }
  0xe2   : > { %v2176_v61 = vor.u32 %v2415_v59, %v2173_v7 }
  0xe3   : > { %1437 = vmatpush.bf16.msra.mxu0 %v2056_v42  ;;  %v317_v42 = vld [vmem:[#allocation2 + $0x58] sm:$0xff] }
  0xe4   : > { %1451 = vmatpush.bf16.msra.mxu1 %v2248_v43 }
  0xe7   : > { %1438 = vmatpush.bf16.msra.mxu0 %v2032_v48 }
  0xe8   : > { %1452 = vmatpush.bf16.msra.mxu1 %v2224_v49 }
  0xeb   : > { %1439 = vmatpush.bf16.msra.mxu0 %v2008_v54 }
  0xec   : > { %1453 = vmatpush.bf16.msra.mxu1 %v2200_v55  ;;  %v318_v55 = vld [vmem:[#allocation2 + $0x18] sm:$0xff] }
  0xef   : > { %1440 = vmatpush.bf16.msra.mxu0 %v1984_v60 }
  0xf0   : > { %1454 = vmatpush.bf16.msra.mxu1 %v2176_v61 }
  0xf3   : > { %1441 = vmatpush.bf16.msra.mxu0 %v1960_v2 }
  0xf4   : > { %1455 = vmatpush.bf16.msra.mxu1 %v2152_v3 }
  0xf7   : > { %1442 = vmatpush.bf16.msra.mxu0 %v1936_v10  ;;  %v1220_v12 = vpop.f32.mrf.mxu0 }
  0xf8   : > { %1456 = vmatpush.bf16.msra.mxu1 %v2128_v11  ;;  %v1234_v13 = vpop.f32.mrf.mxu1 }
  0xf9   : > { %v1235_v14 = vadd.f32 %v1234_v13, %v1220_v12 }
  0xfa   : > { %1443 = vmatmul.bf16.vlgmr.msra.gmra.mxu0 %v2958_v8 }
  0xfb   : > { %1457 = vmatmul.bf16.vlgmr.msra.gmra.mxu1 %v2944_v56 }
  0xff   : > { %v1248_v16 = vpop.f32.mrf.mxu2  ;;  %v1222_v19 = vpop.f32.mrf.mxu0 }
 0x100   : > { %v1249_v17 = vadd.f32 %v1248_v16, %v1235_v14  ;;  %v1236_v20 = vpop.f32.mrf.mxu1  ;;  %v325_v14 = vld [vmem:[#allocation2 + $0x10] sm:$0xff] }
 0x101   : > { %v1237_v21 = vadd.f32 %v1236_v20, %v1222_v19 }
 0x102   : > { %v1463_v18 = vadd.f32 %v1249_v17, %v315_v15 }
 0x104   : > { %1475 = vst [vmem:[#allocation2 + $0x30] sm:$0xff] %v1463_v18  ;;  %v1262_v26 = vpop.f32.mrf.mxu3 }
 0x107   : > { %v1250_v23 = vpop.f32.mrf.mxu2 }
 0x108   : > { %v1251_v24 = vadd.f32 %v1250_v23, %v1237_v21 }
 0x10a   : > { %v1469_v25 = vadd.f32 %v1251_v24, %v321_v22  ;;  %v320_v22 = vld [vmem:[#allocation2 + $0x20] sm:$0xff] }
 0x10c   : > { %1481 = vst [vmem:[#allocation2 + $0x8] sm:$0xff] %v1469_v25  ;;  %v1264_v31 = vpop.f32.mrf.mxu3 }
 0x117   : > { %v1276_v8 = vpop.f32.mrf.mxu0 }
 0x118   : > { %v1277_v27 = vadd.f32 %v1276_v8, %v1262_v26  ;;  %v1290_v56 = vpop.f32.mrf.mxu1 }
 0x11a   : > { %v1291_v29 = vadd.f32 %v1290_v56, %v1277_v27  ;;  %v326_v27 = vld [vmem:[#allocation2 + $0x40] sm:$0xff] }
 0x11c   : > { %v1464_v30 = vadd.f32 %v1291_v29, %v316_v28 }
 0x11e   : > { %1476 = vst [vmem:[#allocation2] sm:$0xff] %v1464_v30 }
 0x11f   : > { %v1278_v32 = vpop.f32.mrf.mxu0  ;;  %v1304_v38 = vpop.f32.mrf.mxu2 }
 0x120   : > { %v1279_v33 = vadd.f32 %v1278_v32, %v1264_v31  ;;  %v1292_v34 = vpop.f32.mrf.mxu1 }
 0x122   : > { %v1293_v36 = vadd.f32 %v1292_v34, %v1279_v33 }
 0x124   : > { %v1470_v37 = vadd.f32 %v1293_v36, %v322_v35  ;;  %v1318_v39 = vpop.f32.mrf.mxu3 }
 0x125   : > { %v1319_v41 = vadd.f32 %v1318_v39, %v1304_v38 }
 0x126   : > { %1482 = vst [vmem:[#allocation2 + $0x38] sm:$0xff] %v1470_v37 }
 0x127   : > { %v1306_v40 = vpop.f32.mrf.mxu2 }
 0x12c   : > { %v1320_v45 = vpop.f32.mrf.mxu3 }
 0x12d   : > { %v1321_v47 = vadd.f32 %v1320_v45, %v1306_v40 }
 0x137   : > { %v1332_v43 = vpop.f32.mrf.mxu0 }
 0x138   : > { %v1333_v44 = vadd.f32 %v1332_v43, %v1319_v41  ;;  %v1346_v49 = vpop.f32.mrf.mxu1 }
 0x13a   : > { %v1465_v46 = vadd.f32 %v1333_v44, %v317_v42 }
 0x13c   : > { %1477 = vst [vmem:[#allocation2 + $0x58] sm:$0xff] %v1465_v46 }
 0x13f   : > { %v1360_v48 = vpop.f32.mrf.mxu2  ;;  %v1334_v51 = vpop.f32.mrf.mxu0 }
 0x140   : > { %v1335_v52 = vadd.f32 %v1334_v51, %v1321_v47  ;;  %v1361_v53 = vadd.f32 %v1360_v48, %v1346_v49  ;;  %v1348_v60 = vpop.f32.mrf.mxu1 }
 0x142   : > { %v1471_v54 = vadd.f32 %v1335_v52, %v323_v50 }
 0x144   : > { %v1374_v57 = vpop.f32.mrf.mxu3  ;;  %1483 = vst [vmem:[#allocation2 + $0x28] sm:$0xff] %v1471_v54 }
 0x145   : > { %v1375_v58 = vadd.f32 %v1374_v57, %v1361_v53 }
 0x147   : > { %v1362_v59 = vpop.f32.mrf.mxu2  ;;  %v1466_v7 = vadd.f32 %v1375_v58, %v318_v55 }
 0x148   : > { %v1363_v61 = vadd.f32 %v1362_v59, %v1348_v60 }
 0x149   : > { %1478 = vst [vmem:[#allocation2 + $0x18] sm:$0xff] %v1466_v7 }
 0x14c   : > { %v1376_v63 = vpop.f32.mrf.mxu3 }
 0x14d   : > { %v1377_v0 = vadd.f32 %v1376_v63, %v1363_v61 }
 0x14f   : > { %v1472_v1 = vadd.f32 %v1377_v0, %v324_v62 }
 0x151   : > { %1484 = vst [vmem:[#allocation2 + $0x48] sm:$0xff] %v1472_v1 }
 0x157   : > { %v1388_v2 = vpop.f32.mrf.mxu0 }
 0x158   : > { %v1402_v3 = vpop.f32.mrf.mxu1 }
 0x159   : > { %v1403_v4 = vadd.f32 %v1402_v3, %v1388_v2 }
 0x15f   : > { %v1416_v6 = vpop.f32.mrf.mxu2  ;;  %v1390_v10 = vpop.f32.mrf.mxu0 }
 0x160   : > { %v1417_v9 = vadd.f32 %v1416_v6, %v1403_v4  ;;  %v1404_v11 = vpop.f32.mrf.mxu1 }
 0x161   : > { %v1405_v13 = vadd.f32 %v1404_v11, %v1390_v10 }
 0x162   : > { %v1467_v12 = vadd.f32 %v1417_v9, %v319_v5 }
 0x164   : > { %1479 = vst [vmem:[#allocation2 + $0x50] sm:$0xff] %v1467_v12  ;;  %v1430_v18 = vpop.f32.mrf.mxu3 }
 0x167   : > { %v1418_v15 = vpop.f32.mrf.mxu2 }
 0x168   : > { %v1419_v16 = vadd.f32 %v1418_v15, %v1405_v13 }
 0x16a   : > { %v1473_v17 = vadd.f32 %v1419_v16, %v325_v14 }
 0x16c   : > { %1485 = vst [vmem:[#allocation2 + $0x10] sm:$0xff] %v1473_v17  ;;  %v1432_v25 = vpop.f32.mrf.mxu3 }
 0x177   : > { %v1444_v19 = vpop.f32.mrf.mxu0 }
 0x178   : > { %v1445_v20 = vadd.f32 %v1444_v19, %v1430_v18  ;;  %v1458_v21 = vpop.f32.mrf.mxu1 }
 0x17a   : > { %v1459_v23 = vadd.f32 %v1458_v21, %v1445_v20 }
 0x17c   : > { %v1468_v24 = vadd.f32 %v1459_v23, %v320_v22 }
 0x17e   : > { %1480 = vst [vmem:[#allocation2 + $0x20] sm:$0xff] %v1468_v24 }
 0x17f   : > { %v1446_v26 = vpop.f32.mrf.mxu0 }
 0x180   : > { %v1447_v8 = vadd.f32 %v1446_v26, %v1432_v25  ;;  %v1460_v56 = vpop.f32.mrf.mxu1 }
 0x182   : > { %v1461_v28 = vadd.f32 %v1460_v56, %v1447_v8  ;;  %1490 = sbr.rel (%p2297_p8) target bundleno = 405 (0x195), region = 70 }
 0x184   : > { %v1474_v29 = vadd.f32 %v1461_v28, %v326_v27 }
 0x186   : > { %1486 = vst [vmem:[#allocation2 + $0x40] sm:$0xff] %v1474_v29 }
 0x187   : > { %v1491_v30 = vld [vmem:[#allocation2 + $0x30] sm:$0xff]  ;;  %v1492_v31 = vld [vmem:[#allocation2] sm:$0xff]  ;;  %v1493_v35 = vld [vmem:[#allocation2 + $0x58] sm:$0xff] }
 0x188   : > { %v1503_v32 = vld [vmem:[%s295_s11] sm:$0x3f]  ;;  %v1494_v36 = vld [vmem:[#allocation2 + $0x18] sm:$0xff]  ;;  %v1495_v39 = vld [vmem:[#allocation2 + $0x50] sm:$0xff] }
 0x189   : > { %v1505_v33 = vperm.slane %v1503_v32, 0  ;;  %v1506_v34 = vperm.slane %v1503_v32, 1  ;;  %v1507_v37 = vperm.slane %v1503_v32, 2  ;;  %v1508_v38 = vperm.slane %v1503_v32, 3  ;;  %v1496_v40 = vld [vmem:[#allocation2 + $0x20] sm:$0xff]  ;;  %v1497_v43 = vld [vmem:[#allocation2 + $0x8] sm:$0xff] }
 0x18a   : > { %v1509_v41 = vperm.slane %v1503_v32, 4  ;;  %v1510_v42 = vperm.slane %v1503_v32, 5  ;;  %v1498_v48 = vld [vmem:[#allocation2 + $0x38] sm:$0xff]  ;;  %v1499_v49 = vld [vmem:[#allocation2 + $0x28] sm:$0xff]  ;;  %v1501_v55 = vld [vmem:[#allocation2 + $0x10] sm:$0xff] }
 0x18b   : > { %v1517_v44 = vadd.f32 %v1505_v33, %v1491_v30  ;;  %v1518_v45 = vadd.f32 %v1506_v34, %v1492_v31  ;;  %v1519_v46 = vadd.f32 %v1507_v37, %v1493_v35  ;;  %v1520_v47 = vadd.f32 %v1508_v38, %v1494_v36  ;;  %v1500_v50 = vld [vmem:[#allocation2 + $0x48] sm:$0xff] }
 0x18c   : > { %v1521_v51 = vadd.f32 %v1509_v41, %v1495_v39  ;;  %v1522_v52 = vadd.f32 %v1510_v42, %v1496_v40  ;;  %v1523_v53 = vadd.f32 %v1505_v33, %v1497_v43  ;;  %v1524_v54 = vadd.f32 %v1506_v34, %v1498_v48 }
 0x18d   : > { %v1502_v57 = vld [vmem:[#allocation2 + $0x40] sm:$0xff]  ;;  %v1529_v58 = vpack.c.bf16 %v1518_v45, %v1517_v44  ;;  %v1530_v59 = vpack.c.bf16 %v1520_v47, %v1519_v46  ;;  %v1525_v7 = vadd.f32 %v1507_v37, %v1499_v49  ;;  %v1526_v60 = vadd.f32 %v1508_v38, %v1500_v50 }
 0x18e   : > { %v1531_v61 = vpack.c.bf16 %v1522_v52, %v1521_v51  ;;  %v1532_v62 = vpack.c.bf16 %v1524_v54, %v1523_v53  ;;  %v1527_v63 = vadd.f32 %v1509_v41, %v1501_v55  ;;  %v1528_v0 = vadd.f32 %v1510_v42, %v1502_v57 }
 0x18f   : > { %1535 = vst [vmem:[%s2860_s28] sm:$0xff] %v1529_v58  ;;  %v1533_v1 = vpack.c.bf16 %v1526_v60, %v1525_v7 }
 0x190   : > { %1536 = vst [vmem:[%s2860_s28 + $0x8] sm:$0xff] %v1530_v59  ;;  %v1534_v2 = vpack.c.bf16 %v1528_v0, %v1527_v63 }
 0x191   : > { %1537 = vst [vmem:[%s2860_s28 + $0x10] sm:$0xff] %v1531_v61 }
 0x192   : > { %1538 = vst [vmem:[%s2860_s28 + $0x18] sm:$0xff] %v1532_v62 }
 0x193   : > { %1539 = vst [vmem:[%s2860_s28 + $0x20] sm:$0xff] %v1533_v1 }
 0x194   : > { %1540 = vst [vmem:[%s2860_s28 + $0x28] sm:$0xff] %v1534_v2 }
 0x195 PF: > { %1547 = sbr.rel (!%p2820_p1) target bundleno = 415 (0x19f), region = 74 }
 0x196   : > { %s2449_s19 = smul.u32 (%p2820_p1), 24, %s2673_s20  ;;  %v1566_v3 = vld [vmem:[%s2860_s28] sm:$0xff] (%p2820_p1) }
 0x197   : > { %v1568_v4 = vld [vmem:[%s2860_s28 + $0x8] sm:$0xff] (%p2820_p1) }
 0x198   : > { %s1553_s10 = scalar_lea.vmem (%p2820_p1), %s3244_s3, %s2449_s19  ;;  %v1570_v5 = vld [vmem:[%s2860_s28 + $0x10] sm:$0xff] (%p2820_p1) }
 0x199   : > { %1567 = vst [vmem:[%s1553_s10] sm:$0xff] (%p2820_p1), %v1566_v3  ;;  %v1572_v6 = vld [vmem:[%s2860_s28 + $0x18] sm:$0xff] (%p2820_p1) }
 0x19a   : > { %1569 = vst [vmem:[%s1553_s10 + $0x8] sm:$0xff] %v1568_v4  ;;  %v1574_v9 = vld [vmem:[%s2860_s28 + $0x20] sm:$0xff] }
 0x19b   : > { %1571 = vst [vmem:[%s1553_s10 + $0x10] sm:$0xff] %v1570_v5  ;;  %v1576_v10 = vld [vmem:[%s2860_s28 + $0x28] sm:$0xff] }
 0x19c   : > { %1573 = vst [vmem:[%s1553_s10 + $0x48] sm:$0xff] %v1572_v6 }
 0x19d   : > { %1575 = vst [vmem:[%s1553_s10 + $0x50] sm:$0xff] %v1574_v9 }
 0x19e   : > { %1577 = vst [vmem:[%s1553_s10 + $0x58] sm:$0xff] %v1576_v10 }
 0x19f PF: > { %s16_s23 = sadd.s32 1, %s2685_s23   ;;  %s3262_s12 = sld [smem:[#allocation8_spill]] }
 0x1a0   : > { %p13_p9 = scmp.ge.s32.totalorder %s16_s23, 8   ;;  %s3263_s13 = sld [smem:[#allocation14_spill]] }
 0x1a1   : > { %s3264_s20 = sld [smem:[#allocation13_spill]]  ;;  %s3269_s14 = smov %s2653_s15 }
 0x1a2   : > { %s3265_s17 = sld [smem:[#allocation9_spill]]  ;;  %s3270_s15 = smov %s2657_s16 }
 0x1a3   : > { %s3266_s18 = sld [smem:[#allocation12_spill]]  ;;  %s3272_s19 = smov %s2677_s21 }
 0x1a4   : > { %s3267_s24 = sld [smem:[#allocation10_spill]] }
 0x1a5   : > { %s3268_s25 = sld [smem:[#allocation11_spill]] }
 0x1a7   : > { %s3271_s16 = smov %s3264_s20  ;;  %s3273_s20 = smov %s2681_s22 }
 0x1a8   :  { %15 = sbr.rel (!%p13_p9) target bundleno = 9 (0x9), region = 146 }
 0x1aa   : > { %s3274_s21 = smov %s3267_s24 }
 0x1ab   : > { %s3275_s22 = smov %s3268_s25 }
 0x1ad   :  { %1593 = vsyncpa [#allocation5], 1 }
 0x1ae   :  { %1595 = vsyncpa [#allocation5 + $0x1], 1 }

// kernel: bert_base_uncased_forward.15
= control target key start
LH: loop header
LB: loop body
LE: loop exit
PB: predicated region body
PF: predicated region fallthrough
CT: control target
= control target key end

     0   :  { %11 = vsyncpa [#allocation4], 0  ;;  %s3137_s0 = inlined_call_operand.vmem [shape: bf16[16,768], index: 0, kind: input, shape index: {}]   ;;  %s3138_s1 = inlined_call_operand.hbm [shape: bf16[768,768], index: 1, kind: input, shape index: {}]   ;;  %s3139_s2 = inlined_call_operand.vmem [shape: f32[1,768], index: 2, kind: input, shape index: {}]   ;;  %s3140_s3 = inlined_call_operand.vmem [shape: bf16[16,768], index: 3, kind: input, shape index: {}]   ;;  %s3141_s4 = inlined_call_operand.vmem [shape: f32[1,768], index: 4, kind: input, shape index: {}]   ;;  %s3142_s5 = inlined_call_operand.vmem [shape: f32[1,768], index: 5, kind: input, shape index: {}]   ;;  %s3143_s6 = inlined_call_operand.vmem [shape: bf16[16,768], index: 6, kind: output, shape index: {}]  }
   0x1   :  { %13 = vsyncpa [#allocation4 + $0x1], 0  ;;  %s2689_s21 = smov 0   ;;  %s2691_s22 = smov 0  }
   0x2   :  { %s2693_s23 = smov 0   ;;  %s2695_s24 = smov 0  }
   0x3   :  { %s2697_s25 = smov 0   ;;  %s2699_s26 = smov 0  }
   0x4   :  { %s2701_s27 = smov 0   ;;  %s2703_s28 = smov 0  }
   0x5 LB: > { %s1734_s29 = sadd.s32 4294967295, %s2648_s28   ;;  %s28_s30 = sadd.s32 1, %s2640_s26  ;;  %s2648_s28 = sphi %s2703_s28, %s19_s28   ;;  %s2644_s27 = sphi %s2701_s27, %s3153_s27   ;;  %s2640_s26 = sphi %s2699_s26, %s3152_s26   ;;  %s2636_s25 = sphi %s2697_s25, %s3151_s25   ;;  %s2632_s24 = sphi %s2695_s24, %s3150_s24   ;;  %s2628_s23 = sphi %s2693_s23, %s3149_s23   ;;  %s2624_s22 = sphi %s2691_s22, %s3148_s22   ;;  %s2620_s21 = sphi %s2689_s21, %s3147_s21  }
   0x6   : > { %p29_p0 = scmp.ge.s32.totalorder %s28_s30, 2  ;;  %s31_s7 = sadd.s32 1, %s2644_s27 }
   0x7   : > { %s66_s8 = sadd.s32 1, %s2628_s23  ;;  %p73_p1 = scmp.ne.s32.totalorder %s2628_s23, %s2624_s22 }
   0x8   : > { %s3155_s30 = smov (%p29_p0, %s28_s30), 0  ;;  %s3157_s7 = smov (!%p29_p0, %s31_s7), %s2644_s27 }
   0x9   : > { %s63_s9 = ssub.s32 %s2640_s26, %s3155_s30  ;;  %p74_p2 = scmp.eq.s32.totalorder %s2648_s28, 0 }
   0xa   : > { %p33_p3 = scmp.ge.s32.totalorder %s3157_s7, 2  ;;  %p64_p4 = scmp.eq.s32.totalorder %s63_s9, 0 }
   0xb   : > { %p75_p5 = por %p74_p2, %p73_p1  ;;  %p79_p6 = scmp.ne.s32.totalorder %s2624_s22, %s2620_s21 }
   0xc   : > { %s3159_s7 = smov (%p33_p3, %s3157_s7), 0  ;;  %p80_p7 = scmp.eq.s32.totalorder %s1734_s29, 0 }
   0xd   : > { %3144 = sst [smem:[#allocation6_spill]] %s3159_s7  ;;  %p2478_p8 = scmp.lt.s32.totalorder %s2648_s28, 4 }
   0xe   : > { %s2743_s10 = scalar_select %p64_p4, %s2628_s23, %s66_s8  }
   0xf   : > { %s240_s11 = sand.u32 1, %s2628_s23   ;;  %p2747_p9 = por %p80_p7, %p79_p6 }
  0x10   : > { %s2467_s13 = smul.u32 1152, %s240_s11  ;;  %p2475_p10 = pnand %p2478_p8, %p75_p5 }
  0x11   : > { %s2479_s14 = smul.u32 1152, %s2640_s26  ;;  %p1739_p11 = scmp.ge.s32.totalorder %s2648_s28, 1 }
  0x12   : > { %s244_s15 = scalar_lea.vmem [#allocation3], %s2467_s13  ;;  %s241_s21 = scalar_lea.sflag [#allocation4], %s240_s11 }
  0x13   : > { %s253_s16 = sshll.u32 %s244_s15, 4  ;;  %s250_s19 = scalar_lea.hbm %s3138_s1, %s2479_s14  ;;  %s254_s16 = int_to_ptr.vmem [resolvable:$true] %s253_s16 }
  0x14   : > { %s251_s20 = sshll.u32 %s250_s19, 4  ;;  %s2650_s29 = smov 384   ;;  %s252_s20 = int_to_ptr.hbm [resolvable:$true] %s251_s20 }
  0x15   : > { %s2651_s8 = smov 24   ;;  %p269_p12 = scmp.lt.s32.totalorder %s2648_s28, 5 }
  0x16   : > { %2477 = dma.hbm_to_vmem [thread:$0]  (!%p2475_p10), %s252_s20, 18432, %s254_s16, %s241_s21, %s2650_s29, %s2650_s29, %s2651_s8  }
  0x17   : > { %p270_p13 = pnand %p1739_p11, %p269_p12 }
  0x18   : > { %s275_s9 = sand.u32 (!%p270_p13), 1, %s2624_s22  }
  0x19   : > { %273 = sbr.rel (%p270_p13) target bundleno = 644 (0x284), region = 44  ;;  %s276_s15 = scalar_lea.sflag (!%p270_p13), [#allocation4], %s275_s9 }
  0x1a   : > { %s2469_s13 = smul.u32 (!%p270_p13), 1152, %s275_s9 }
  0x1c   : > { %s2758_s7 = scalar_lea.vmem (!%p270_p13), [#allocation3], %s2469_s13 }
  0x1e   : > { %2615 = dma.done.wait (%p2747_p9), %s276_s15, 18432  }
  0x1f   : > { %2617 = vsyncadd (%p2747_p9), %s276_s15, 4294948864  ;;  %s323_s11 = smul.u32 3, %s2632_s24  ;;  %p324_p0 = scmp.lt.s32.totalorder %s2636_s25, 1 }
  0x20   : > { %p1743_p2 = scmp.ne.s32.totalorder %s2632_s24, 0 }
  0x21   : > { %s3161_s25 = smov (!%p324_p0, %s2636_s25), 1  ;;  %p326_p1 = scmp.lt.s32.totalorder %s323_s11, 5 }
  0x22   : > { %s2470_s14 = smul.u32 6, %s3161_s25 }
  0x23   : > { %s3163_s11 = smov (!%p326_p1, %s323_s11), 5  ;;  %s2471_s16 = smul.u32 24, %s3161_s25 }
  0x24   : > { %s329_s17 = sadd.s32 %s2470_s14, %s3163_s11  ;;  %347 = sbr.rel (%p1743_p2) target bundleno = 48 (0x30), region = 52 }
  0x25   : > { %s1740_s18 = sshll.u32 %s329_s17, 2  ;;  %s2770_s21 = scalar_lea.vmem %s3140_s3, %s2471_s16 }
  0x26   : > { %s2775_s8 = scalar_lea.vmem %s3137_s0, %s1740_s18  ;;  %s2780_s15 = scalar_lea.vmem %s3143_s6, %s2471_s16 }
  0x29   : > { %v2652_v0 = vmov 0.0  }
  0x2a   : > { %348 = vst [vmem:[#allocation2 + $0x28] sm:$0xff] %v2652_v0 }
  0x2b   : > { %349 = vst [vmem:[#allocation2 + $0x10] sm:$0xff] %v2652_v0 }
  0x2c   : > { %350 = vst [vmem:[#allocation2 + $0x8] sm:$0xff] %v2652_v0 }
  0x2d   : > { %351 = vst [vmem:[#allocation2] sm:$0xff] %v2652_v0 }
  0x2e   : > { %352 = vst [vmem:[#allocation2 + $0x18] sm:$0xff] %v2652_v0 }
  0x2f   : > { %353 = vst [vmem:[#allocation2 + $0x20] sm:$0xff] %v2652_v0 }
  0x30 PF: > { %v1914_v1 = vld [vmem:[%s2758_s7 + $0x150] sm:$0xf]  ;;  %v2368_v2 = vld [vmem:[%s2758_s7 + $0x164] sm:$0xf0]  ;;  %v1890_v6 = vld [vmem:[%s2758_s7 + $0x120] sm:$0xf] }
  0x31   : > { %v2106_v3 = vld [vmem:[%s2758_s7 + $0x2d0] sm:$0xf]  ;;  %v1915_v4 = vor.u32 %v2368_v2, %v1914_v1  ;;  %v2416_v5 = vld [vmem:[%s2758_s7 + $0x2e4] sm:$0xf0]  ;;  %v2362_v7 = vld [vmem:[%s2758_s7 + $0x134] sm:$0xf0] }
  0x32   : > { %v2107_v8 = vor.u32 %v2416_v5, %v2106_v3  ;;  %v2082_v9 = vld [vmem:[%s2758_s7 + $0x2a0] sm:$0xf]  ;;  %v2410_v10 = vld [vmem:[%s2758_s7 + $0x2b4] sm:$0xf0]  ;;  %v1891_v11 = vor.u32 %v2362_v7, %v1890_v6  ;;  %v1866_v12 = vld [vmem:[%s2758_s7 + $0xf0] sm:$0xf] }
  0x33   : > { %1237 = vmatpush.bf16.msra.mxu0 %v1915_v4  ;;  %v2083_v13 = vor.u32 %v2410_v10, %v2082_v9  ;;  %v2356_v14 = vld [vmem:[%s2758_s7 + $0x104] sm:$0xf0]  ;;  %v2298_v15 = vld [vmem:[%s2758_s7 + $0x450] sm:$0xf]  ;;  %v2274_v20 = vld [vmem:[%s2758_s7 + $0x420] sm:$0xf] }
  0x34   : > { %1250 = vmatpush.bf16.msra.mxu1 %v2107_v8  ;;  %v2464_v16 = vld [vmem:[%s2758_s7 + $0x464] sm:$0xf0]  ;;  %v2058_v17 = vld [vmem:[%s2758_s7 + $0x270] sm:$0xf]  ;;  %v2458_v21 = vld [vmem:[%s2758_s7 + $0x434] sm:$0xf0]  ;;  %v1867_v23 = vor.u32 %v2356_v14, %v1866_v12 }
  0x35   : > { %v2404_v18 = vld [vmem:[%s2758_s7 + $0x284] sm:$0xf0]  ;;  %v2299_v19 = vor.u32 %v2464_v16, %v2298_v15  ;;  %v2365_v22 = vld [vmem:[%s2758_s7 + $0x154] sm:$0xf]  ;;  %v1842_v24 = vld [vmem:[%s2758_s7 + $0xc0] sm:$0xf]  ;;  %v2275_v26 = vor.u32 %v2458_v21, %v2274_v20 }
  0x36   : > { %v2350_v25 = vld [vmem:[%s2758_s7 + $0xd4] sm:$0xf0]  ;;  %v1916_v27 = vld [vmem:[%s2758_s7 + $0x168] sm:$0xf0]  ;;  %v2059_v28 = vor.u32 %v2404_v18, %v2058_v17  ;;  %v2034_v29 = vld [vmem:[%s2758_s7 + $0x240] sm:$0xf] }
  0x37   : > { %1238 = vmatpush.bf16.msra.mxu0 %v1891_v11  ;;  %1263 = vmatpush.bf16.msra.mxu2 %v2299_v19  ;;  %v2398_v30 = vld [vmem:[%s2758_s7 + $0x254] sm:$0xf0]  ;;  %v1919_v31 = vor.u32 %v2365_v22, %v1916_v27  ;;  %v2250_v32 = vld [vmem:[%s2758_s7 + $0x3f0] sm:$0xf]  ;;  %v2452_v33 = vld [vmem:[%s2758_s7 + $0x404] sm:$0xf0]  ;;  %v1843_v37 = vor.u32 %v2350_v25, %v1842_v24 }
  0x38   : > { %1251 = vmatpush.bf16.msra.mxu1 %v2083_v13  ;;  %v2359_v34 = vld [vmem:[%s2758_s7 + $0x124] sm:$0xf]  ;;  %v1892_v35 = vld [vmem:[%s2758_s7 + $0x138] sm:$0xf0]  ;;  %v1818_v38 = vld [vmem:[%s2758_s7 + $0x90] sm:$0xf]  ;;  %v2251_v40 = vor.u32 %v2452_v33, %v2250_v32  ;;  %v2035_v42 = vor.u32 %v2398_v30, %v2034_v29 }
  0x39   : > { %1276 = vmatpush.bf16.msra.mxu3 %v1919_v31  ;;  %v1895_v36 = vor.u32 %v2359_v34, %v1892_v35  ;;  %v2344_v39 = vld [vmem:[%s2758_s7 + $0xa4] sm:$0xf0]  ;;  %v2226_v41 = vld [vmem:[%s2758_s7 + $0x3c0] sm:$0xf]  ;;  %v2446_v43 = vld [vmem:[%s2758_s7 + $0x3d4] sm:$0xf0] }
  0x3a   : > { %v2353_v44 = vld [vmem:[%s2758_s7 + $0xf4] sm:$0xf]  ;;  %v1868_v45 = vld [vmem:[%s2758_s7 + $0x108] sm:$0xf0]  ;;  %v2010_v46 = vld [vmem:[%s2758_s7 + $0x210] sm:$0xf]  ;;  %v1819_v49 = vor.u32 %v2344_v39, %v1818_v38  ;;  %v2227_v51 = vor.u32 %v2446_v43, %v2226_v41 }
  0x3b   : > { %1239 = vmatpush.bf16.msra.mxu0 %v1867_v23  ;;  %1264 = vmatpush.bf16.msra.mxu2 %v2275_v26  ;;  %v2392_v47 = vld [vmem:[%s2758_s7 + $0x224] sm:$0xf0]  ;;  %v1871_v48 = vor.u32 %v2353_v44, %v1868_v45  ;;  %v1794_v50 = vld [vmem:[%s2758_s7 + $0x60] sm:$0xf]  ;;  %v2347_v52 = vld [vmem:[%s2758_s7 + $0xc4] sm:$0xf] }
  0x3c   : > { %1252 = vmatpush.bf16.msra.mxu1 %v2059_v28  ;;  %v1844_v53 = vld [vmem:[%s2758_s7 + $0xd8] sm:$0xf0]  ;;  %v2011_v54 = vor.u32 %v2392_v47, %v2010_v46  ;;  %v2338_v55 = vld [vmem:[%s2758_s7 + $0x74] sm:$0xf0]  ;;  %v2202_v56 = vld [vmem:[%s2758_s7 + $0x390] sm:$0xf] }
  0x3d   : > { %1277 = vmatpush.bf16.msra.mxu3 %v1895_v36  ;;  %v2440_v57 = vld [vmem:[%s2758_s7 + $0x3a4] sm:$0xf0]  ;;  %v1986_v58 = vld [vmem:[%s2758_s7 + $0x1e0] sm:$0xf]  ;;  %v2386_v59 = vld [vmem:[%s2758_s7 + $0x1f4] sm:$0xf0]  ;;  %v1847_v60 = vor.u32 %v2347_v52, %v1844_v53  ;;  %v1795_v61 = vor.u32 %v2338_v55, %v1794_v50 }
  0x3e   : > { %v1770_v62 = vld [vmem:[%s2758_s7 + $0x30] sm:$0xf]  ;;  %v2203_v63 = vor.u32 %v2440_v57, %v2202_v56  ;;  %v2341_v0 = vld [vmem:[%s2758_s7 + $0x94] sm:$0xf]  ;;  %v1820_v1 = vld [vmem:[%s2758_s7 + $0xa8] sm:$0xf0]  ;;  %v1987_v2 = vor.u32 %v2386_v59, %v1986_v58 }
  0x3f   : > { %1240 = vmatpush.bf16.msra.mxu0 %v1843_v37  ;;  %1265 = vmatpush.bf16.msra.mxu2 %v2251_v40  ;;  %v2332_v3 = vld [vmem:[%s2758_s7 + $0x44] sm:$0xf0]  ;;  %v2178_v4 = vld [vmem:[%s2758_s7 + $0x360] sm:$0xf]  ;;  %v2434_v5 = vld [vmem:[%s2758_s7 + $0x374] sm:$0xf0]  ;;  %v1823_v9 = vor.u32 %v2341_v0, %v1820_v1 }
  0x40   : > { %1253 = vmatpush.bf16.msra.mxu1 %v2035_v42  ;;  %v1962_v6 = vld [vmem:[%s2758_s7 + $0x1b0] sm:$0xf]  ;;  %v2380_v7 = vld [vmem:[%s2758_s7 + $0x1c4] sm:$0xf0]  ;;  %v1746_v8 = vld [vmem:[%s2758_s7] sm:$0xf]  ;;  %v1771_v10 = vor.u32 %v2332_v3, %v1770_v62  ;;  %v2179_v12 = vor.u32 %v2434_v5, %v2178_v4 }
  0x41   : > { %1278 = vmatpush.bf16.msra.mxu3 %v1871_v48  ;;  %v2326_v11 = vld [vmem:[%s2758_s7 + $0x14] sm:$0xf0]  ;;  %v2335_v13 = vld [vmem:[%s2758_s7 + $0x64] sm:$0xf]  ;;  %v1796_v14 = vld [vmem:[%s2758_s7 + $0x78] sm:$0xf0]  ;;  %v1963_v15 = vor.u32 %v2380_v7, %v1962_v6 }
  0x42   : > { %v1938_v16 = vld [vmem:[%s2758_s7 + $0x180] sm:$0xf]  ;;  %v2154_v17 = vld [vmem:[%s2758_s7 + $0x330] sm:$0xf]  ;;  %v2428_v18 = vld [vmem:[%s2758_s7 + $0x344] sm:$0xf0]  ;;  %v1799_v24 = vor.u32 %v2335_v13, %v1796_v14  ;;  %v1747_v25 = vor.u32 %v2326_v11, %v1746_v8 }
  0x43   : > { %1241 = vmatpush.bf16.msra.mxu0 %v1819_v49  ;;  %1266 = vmatpush.bf16.msra.mxu2 %v2227_v51  ;;  %v2374_v19 = vld [vmem:[%s2758_s7 + $0x194] sm:$0xf0]  ;;  %v2413_v20 = vld [vmem:[%s2758_s7 + $0x2d4] sm:$0xf]  ;;  %v2108_v21 = vld [vmem:[%s2758_s7 + $0x2e8] sm:$0xf0]  ;;  %v2155_v26 = vor.u32 %v2428_v18, %v2154_v17 }
  0x44   : > { %1254 = vmatpush.bf16.msra.mxu1 %v2011_v54  ;;  %v2461_v22 = vld [vmem:[%s2758_s7 + $0x454] sm:$0xf]  ;;  %v2300_v23 = vld [vmem:[%s2758_s7 + $0x468] sm:$0xf0]  ;;  %v1939_v29 = vor.u32 %v2374_v19, %v1938_v16  ;;  %v2111_v30 = vor.u32 %v2413_v20, %v2108_v21  ;;  %v2407_v31 = vld [vmem:[%s2758_s7 + $0x2a4] sm:$0xf] }
  0x45   : > { %1279 = vmatpush.bf16.msra.mxu3 %v1847_v60  ;;  %v2329_v27 = vld [vmem:[%s2758_s7 + $0x34] sm:$0xf]  ;;  %v1772_v28 = vld [vmem:[%s2758_s7 + $0x48] sm:$0xf0]  ;;  %v2130_v32 = vld [vmem:[%s2758_s7 + $0x300] sm:$0xf]  ;;  %v2303_v34 = vor.u32 %v2461_v22, %v2300_v23 }
  0x46   : > { %v2422_v33 = vld [vmem:[%s2758_s7 + $0x314] sm:$0xf0]  ;;  %v2084_v35 = vld [vmem:[%s2758_s7 + $0x2b8] sm:$0xf0]  ;;  %v2369_v37 = vld [vmem:[%s2758_s7 + $0x16c] sm:$0xf0]  ;;  %v1775_v40 = vor.u32 %v2329_v27, %v1772_v28 }
  0x47   : > { %1242 = vmatpush.bf16.msra.mxu0 %v1795_v61  ;;  %1267 = vmatpush.bf16.msra.mxu2 %v2203_v63  ;;  %v1922_v36 = vld [vmem:[%s2758_s7 + $0x158] sm:$0xf]  ;;  %v2455_v38 = vld [vmem:[%s2758_s7 + $0x424] sm:$0xf]  ;;  %v2276_v39 = vld [vmem:[%s2758_s7 + $0x438] sm:$0xf0]  ;;  %v2131_v41 = vor.u32 %v2422_v33, %v2130_v32  ;;  %v2087_v45 = vor.u32 %v2407_v31, %v2084_v35 }
  0x48   : > { %1255 = vmatpush.bf16.msra.mxu1 %v1987_v2  ;;  %v2401_v42 = vld [vmem:[%s2758_s7 + $0x274] sm:$0xf]  ;;  %v2323_v43 = vld [vmem:[%s2758_s7 + $0x4] sm:$0xf]  ;;  %v1748_v44 = vld [vmem:[%s2758_s7 + $0x18] sm:$0xf0]  ;;  %v1923_v46 = vor.u32 %v2369_v37, %v1922_v36  ;;  %v2279_v50 = vor.u32 %v2455_v38, %v2276_v39 }
  0x49   : > { %1280 = vmatpush.bf16.msra.mxu3 %v1823_v9  ;;  %v2114_v47 = vld [vmem:[%s2758_s7 + $0x2d8] sm:$0xf]  ;;  %v2417_v48 = vld [vmem:[%s2758_s7 + $0x2ec] sm:$0xf0]  ;;  %v2060_v51 = vld [vmem:[%s2758_s7 + $0x288] sm:$0xf0]  ;;  %v1751_v58 = vor.u32 %v2323_v43, %v1748_v44 }
  0x4a   : > { %v360_v49 = vld [vmem:[%s2775_s8] sm:$0xff]  ;;  %v1898_v52 = vld [vmem:[%s2758_s7 + $0x128] sm:$0xf]  ;;  %v2363_v53 = vld [vmem:[%s2758_s7 + $0x13c] sm:$0xf0]  ;;  %v2115_v59 = vor.u32 %v2417_v48, %v2114_v47  ;;  %v2063_v63 = vor.u32 %v2401_v42, %v2060_v51  ;;  %p2320_p3 = scmp.ne.s32.totalorder %s2632_s24, 1 }
  0x4b   : > { %1243 = vmatpush.bf16.msra.mxu0 %v1771_v10  ;;  %1268 = vmatpush.bf16.msra.mxu2 %v2179_v12  ;;  %v508_v54 = vunpack.c.l.b16 %v360_v49  ;;  %v509_v55 = vunpack.c.h.b16 %v360_v49  ;;  %v2449_v56 = vld [vmem:[%s2758_s7 + $0x3f4] sm:$0xf]  ;;  %v2252_v57 = vld [vmem:[%s2758_s7 + $0x408] sm:$0xf0]  ;;  %v361_v62 = vld [vmem:[%s2775_s8 + $0x8] sm:$0xf]  ;;  %v1899_v1 = vor.u32 %v2363_v53, %v1898_v52 }
  0x4c   : > { %1256 = vmatpush.bf16.msra.mxu1 %v1963_v15  ;;  %v2395_v0 = vld [vmem:[%s2758_s7 + $0x244] sm:$0xf]  ;;  %v2090_v2 = vld [vmem:[%s2758_s7 + $0x2a8] sm:$0xf]  ;;  %v2411_v3 = vld [vmem:[%s2758_s7 + $0x2bc] sm:$0xf0]  ;;  %v510_v4 = vunpack.c.l.b16 %v361_v62  ;;  %v2255_v5 = vor.u32 %v2449_v56, %v2252_v57 }
  0x4d   : > { %1281 = vmatpush.bf16.msra.mxu3 %v1799_v24  ;;  %v2866_v60 = vpack.c.b16 %v508_v54, %v508_v54  ;;  %v2868_v61 = vpack.c.b16 %v509_v55, %v509_v55  ;;  %v2036_v6 = vld [vmem:[%s2758_s7 + $0x258] sm:$0xf0]  ;;  %v1874_v7 = vld [vmem:[%s2758_s7 + $0xf8] sm:$0xf]  ;;  %v2357_v8 = vld [vmem:[%s2758_s7 + $0x10c] sm:$0xf0]  ;;  %v2091_v12 = vor.u32 %v2411_v3, %v2090_v2 }
  0x4e   : > { %v2443_v9 = vld [vmem:[%s2758_s7 + $0x3c4] sm:$0xf]  ;;  %v2228_v10 = vld [vmem:[%s2758_s7 + $0x3d8] sm:$0xf0]  ;;  %v2881_v11 = vpack.c.b16 %v510_v4, %v510_v4  ;;  %v2039_v13 = vor.u32 %v2395_v0, %v2036_v6  ;;  %v2389_v14 = vld [vmem:[%s2758_s7 + $0x214] sm:$0xf]  ;;  %v1875_v15 = vor.u32 %v2357_v8, %v1874_v7 }
  0x4f   : > { %1244 = vmatpush.bf16.msra.mxu0 %v1747_v25  ;;  %1269 = vmatpush.bf16.msra.mxu2 %v2155_v26  ;;  %v2066_v16 = vld [vmem:[%s2758_s7 + $0x278] sm:$0xf]  ;;  %v2405_v17 = vld [vmem:[%s2758_s7 + $0x28c] sm:$0xf0]  ;;  %v2231_v18 = vor.u32 %v2443_v9, %v2228_v10  ;;  %v2012_v19 = vld [vmem:[%s2758_s7 + $0x228] sm:$0xf0] }
  0x50   : > { %1257 = vmatpush.bf16.msra.mxu1 %v1939_v29  ;;  %v1850_v20 = vld [vmem:[%s2758_s7 + $0xc8] sm:$0xf]  ;;  %v2351_v21 = vld [vmem:[%s2758_s7 + $0xdc] sm:$0xf0]  ;;  %v2437_v22 = vld [vmem:[%s2758_s7 + $0x394] sm:$0xf]  ;;  %v2067_v24 = vor.u32 %v2405_v17, %v2066_v16  ;;  %v2015_v25 = vor.u32 %v2389_v14, %v2012_v19 }
  0x51   : > { %1282 = vmatpush.bf16.msra.mxu3 %v1775_v40  ;;  %v2204_v23 = vld [vmem:[%s2758_s7 + $0x3a8] sm:$0xf0]  ;;  %v2383_v26 = vld [vmem:[%s2758_s7 + $0x1e4] sm:$0xf]  ;;  %v1851_v27 = vor.u32 %v2351_v21, %v1850_v20  ;;  %v2042_v28 = vld [vmem:[%s2758_s7 + $0x248] sm:$0xf] }
  0x52   : > { %1245 = vmatmul.bf16.vlgmr.msra.gmra.mxu0 %v2866_v60  ;;  %v2399_v29 = vld [vmem:[%s2758_s7 + $0x25c] sm:$0xf0]  ;;  %v1988_v31 = vld [vmem:[%s2758_s7 + $0x1f8] sm:$0xf0]  ;;  %v1826_v32 = vld [vmem:[%s2758_s7 + $0x98] sm:$0xf] }
  0x53   : > { %1289 = vmatpush.bf16.msrb.mxu0 %v2111_v30  ;;  %1270 = vmatpush.bf16.msra.mxu2 %v2131_v41  ;;  %v2207_v30 = vor.u32 %v2437_v22, %v2204_v23  ;;  %v2345_v33 = vld [vmem:[%s2758_s7 + $0xac] sm:$0xf0]  ;;  %v2180_v35 = vld [vmem:[%s2758_s7 + $0x378] sm:$0xf0]  ;;  %v2043_v36 = vor.u32 %v2399_v29, %v2042_v28  ;;  %v1991_v37 = vor.u32 %v2383_v26, %v1988_v31  ;;  %v2377_v38 = vld [vmem:[%s2758_s7 + $0x1b4] sm:$0xf] }
  0x54   : > { %1302 = vmatpush.bf16.msrb.mxu1 %v2303_v34  ;;  %v2431_v34 = vld [vmem:[%s2758_s7 + $0x364] sm:$0xf]  ;;  %v1827_v39 = vor.u32 %v2345_v33, %v1826_v32  ;;  %v2018_v40 = vld [vmem:[%s2758_s7 + $0x218] sm:$0xf]  ;;  %v2393_v41 = vld [vmem:[%s2758_s7 + $0x22c] sm:$0xf0] }
  0x55   : > { %1283 = vmatpush.bf16.msra.mxu3 %v1751_v58  ;;  %1258 = vmatmul.bf16.vlgmr.msra.gmra.mxu1 %v2868_v61  ;;  %v2183_v42 = vor.u32 %v2431_v34, %v2180_v35  ;;  %v1964_v43 = vld [vmem:[%s2758_s7 + $0x1c8] sm:$0xf0]  ;;  %v1802_v44 = vld [vmem:[%s2758_s7 + $0x68] sm:$0xf]  ;;  %v2371_v48 = vld [vmem:[%s2758_s7 + $0x184] sm:$0xf]  ;;  %v2019_v49 = vor.u32 %v2393_v41, %v2018_v40 }
  0x56   : > { %1271 = vmatmul.bf16.vlgmr.msra.gmra.mxu2 %v2881_v11  ;;  %v2156_v47 = vld [vmem:[%s2758_s7 + $0x348] sm:$0xf0]  ;;  %v1940_v51 = vld [vmem:[%s2758_s7 + $0x198] sm:$0xf0]  ;;  %v1994_v53 = vld [vmem:[%s2758_s7 + $0x1e8] sm:$0xf] }
  0x57   : > { %1290 = vmatpush.bf16.msrb.mxu0 %v2087_v45  ;;  %1315 = vmatpush.bf16.msrb.mxu2 %v1923_v46  ;;  %v2339_v45 = vld [vmem:[%s2758_s7 + $0x7c] sm:$0xf0]  ;;  %v2425_v46 = vld [vmem:[%s2758_s7 + $0x334] sm:$0xf]  ;;  %v2419_v56 = vld [vmem:[%s2758_s7 + $0x304] sm:$0xf]  ;;  %v1943_v3 = vor.u32 %v2371_v48, %v1940_v51 }
  0x58   : > { %1303 = vmatpush.bf16.msrb.mxu1 %v2279_v50  ;;  %1284 = vmatmul.bf16.vlgmr.msra.gmra.mxu3 %v2866_v60  ;;  %v1967_v50 = vor.u32 %v2377_v38, %v1964_v43  ;;  %v1803_v52 = vor.u32 %v2339_v45, %v1802_v44  ;;  %v2387_v54 = vld [vmem:[%s2758_s7 + $0x1fc] sm:$0xf0]  ;;  %v2159_v55 = vor.u32 %v2425_v46, %v2156_v47  ;;  %v1778_v57 = vld [vmem:[%s2758_s7 + $0x38] sm:$0xf]  ;;  %v2333_v58 = vld [vmem:[%s2758_s7 + $0x4c] sm:$0xf0] }
  0x59   : > { %1328 = vmatpush.bf16.msrb.mxu3 %v2115_v59  ;;  %v2132_v59 = vld [vmem:[%s2758_s7 + $0x318] sm:$0xf0]  ;;  %v2306_v62 = vld [vmem:[%s2758_s7 + $0x458] sm:$0xf]  ;;  %v1995_v2 = vor.u32 %v2387_v54, %v1994_v53  ;;  %v1779_v4 = vor.u32 %v2333_v58, %v1778_v57  ;;  %v2381_v6 = vld [vmem:[%s2758_s7 + $0x1cc] sm:$0xf0] }
  0x5a   : > { %v2366_v0 = vld [vmem:[%s2758_s7 + $0x15c] sm:$0xf]  ;;  %v2135_v7 = vor.u32 %v2419_v56, %v2132_v59  ;;  %v2282_v9 = vld [vmem:[%s2758_s7 + $0x428] sm:$0xf]  ;;  %v2459_v14 = vld [vmem:[%s2758_s7 + $0x43c] sm:$0xf0] }
  0x5b   : > { %1291 = vmatpush.bf16.msrb.mxu0 %v2063_v63  ;;  %1316 = vmatpush.bf16.msrb.mxu2 %v1899_v1  ;;  %v2465_v63 = vld [vmem:[%s2758_s7 + $0x46c] sm:$0xf0]  ;;  %v1924_v1 = vld [vmem:[%s2758_s7 + $0x170] sm:$0xf0]  ;;  %v1754_v10 = vld [vmem:[%s2758_s7 + $0x8] sm:$0xf]  ;;  %v2283_v23 = vor.u32 %v2459_v14, %v2282_v9 }
  0x5c   : > { %1304 = vmatpush.bf16.msrb.mxu1 %v2255_v5  ;;  %v1970_v5 = vld [vmem:[%s2758_s7 + $0x1b8] sm:$0xf]  ;;  %v2307_v8 = vor.u32 %v2465_v63, %v2306_v62  ;;  %v2116_v16 = vld [vmem:[%s2758_s7 + $0x2f0] sm:$0xf0]  ;;  %v2360_v17 = vld [vmem:[%s2758_s7 + $0x12c] sm:$0xf] }
  0x5d   : > { %1329 = vmatpush.bf16.msrb.mxu3 %v2091_v12  ;;  %v2327_v12 = vld [vmem:[%s2758_s7 + $0x1c] sm:$0xf0]  ;;  %v1971_v19 = vor.u32 %v2381_v6, %v1970_v5  ;;  %v1946_v21 = vld [vmem:[%s2758_s7 + $0x188] sm:$0xf]  ;;  %v2462_v26 = vld [vmem:[%s2758_s7 + $0x45c] sm:$0xf] }
  0x5e   : > { %v1755_v20 = vor.u32 %v2327_v12, %v1754_v10  ;;  %v2375_v22 = vld [vmem:[%s2758_s7 + $0x19c] sm:$0xf0]  ;;  %v2453_v29 = vld [vmem:[%s2758_s7 + $0x40c] sm:$0xf0]  ;;  %v2092_v31 = vld [vmem:[%s2758_s7 + $0x2c0] sm:$0xf0] }
  0x5f   : > { %1292 = vmatpush.bf16.msrb.mxu0 %v2039_v13  ;;  %1317 = vmatpush.bf16.msrb.mxu2 %v1875_v15  ;;  %v1927_v13 = vor.u32 %v2366_v0, %v1924_v1  ;;  %v2414_v15 = vld [vmem:[%s2758_s7 + $0x2dc] sm:$0xf]  ;;  %v1876_v33 = vld [vmem:[%s2758_s7 + $0x110] sm:$0xf0]  ;;  %v1947_v34 = vor.u32 %v2375_v22, %v1946_v21  ;;  %v2284_v40 = vld [vmem:[%s2758_s7 + $0x440] sm:$0xf0] }
  0x60   : > { %1305 = vmatpush.bf16.msrb.mxu1 %v2231_v18  ;;  %v1900_v18 = vld [vmem:[%s2758_s7 + $0x140] sm:$0xf0]  ;;  %v2354_v32 = vld [vmem:[%s2758_s7 + $0xfc] sm:$0xf]  ;;  %v2068_v44 = vld [vmem:[%s2758_s7 + $0x290] sm:$0xf0] }
  0x61   : > { %1330 = vmatpush.bf16.msrb.mxu3 %v2067_v24  ;;  %v2258_v24 = vld [vmem:[%s2758_s7 + $0x3f8] sm:$0xf]  ;;  %v1903_v28 = vor.u32 %v2360_v17, %v1900_v18  ;;  %v1879_v41 = vor.u32 %v2354_v32, %v1876_v33  ;;  %v2402_v43 = vld [vmem:[%s2758_s7 + $0x27c] sm:$0xf]  ;;  %v2348_v45 = vld [vmem:[%s2758_s7 + $0xcc] sm:$0xf] }
  0x62   : > { %v1852_v46 = vld [vmem:[%s2758_s7 + $0xe0] sm:$0xf0]  ;;  %v2450_v51 = vld [vmem:[%s2758_s7 + $0x3fc] sm:$0xf]  ;;  %v2441_v54 = vld [vmem:[%s2758_s7 + $0x3ac] sm:$0xf0] }
  0x63   : > { %1293 = vmatpush.bf16.msrb.mxu0 %v2015_v25  ;;  %1318 = vmatpush.bf16.msrb.mxu2 %v1851_v27  ;;  %v2119_v25 = vor.u32 %v2414_v15, %v2116_v16  ;;  %v2308_v27 = vld [vmem:[%s2758_s7 + $0x470] sm:$0xf0]  ;;  %v1855_v53 = vor.u32 %v2348_v45, %v1852_v46  ;;  %v2044_v56 = vld [vmem:[%s2758_s7 + $0x260] sm:$0xf0]  ;;  %v2342_v57 = vld [vmem:[%s2758_s7 + $0x9c] sm:$0xf] }
  0x64   : > { %1306 = vmatpush.bf16.msrb.mxu1 %v2207_v30  ;;  %v2408_v30 = vld [vmem:[%s2758_s7 + $0x2ac] sm:$0xf]  ;;  %v2311_v35 = vor.u32 %v2462_v26, %v2308_v27  ;;  %v1828_v58 = vld [vmem:[%s2758_s7 + $0xb0] sm:$0xf0]  ;;  %v2186_v63 = vld [vmem:[%s2758_s7 + $0x368] sm:$0xf] }
  0x65   : > { %1331 = vmatpush.bf16.msrb.mxu3 %v2043_v36  ;;  %v2259_v36 = vor.u32 %v2453_v29, %v2258_v24  ;;  %v2095_v38 = vor.u32 %v2408_v30, %v2092_v31  ;;  %v2444_v1 = vld [vmem:[%s2758_s7 + $0x3cc] sm:$0xf]  ;;  %v2390_v5 = vld [vmem:[%s2758_s7 + $0x21c] sm:$0xf]  ;;  %v2020_v6 = vld [vmem:[%s2758_s7 + $0x230] sm:$0xf0] }
  0x66   : > { %v2162_v12 = vld [vmem:[%s2758_s7 + $0x338] sm:$0xf]  ;;  %v2438_v14 = vld [vmem:[%s2758_s7 + $0x39c] sm:$0xf]  ;;  %v2212_v15 = vld [vmem:[%s2758_s7 + $0x3b0] sm:$0xf0] }
  0x67   : > { %1294 = vmatpush.bf16.msrb.mxu0 %v1991_v37  ;;  %1319 = vmatpush.bf16.msrb.mxu2 %v1827_v39  ;;  %v2234_v37 = vld [vmem:[%s2758_s7 + $0x3c8] sm:$0xf]  ;;  %v2456_v39 = vld [vmem:[%s2758_s7 + $0x42c] sm:$0xf]  ;;  %v2429_v17 = vld [vmem:[%s2758_s7 + $0x34c] sm:$0xf0] }
  0x68   : > { %1307 = vmatpush.bf16.msrb.mxu1 %v2183_v42  ;;  %v2447_v42 = vld [vmem:[%s2758_s7 + $0x3dc] sm:$0xf0]  ;;  %v2287_v47 = vor.u32 %v2456_v39, %v2284_v40  ;;  %v2384_v18 = vld [vmem:[%s2758_s7 + $0x1ec] sm:$0xf]  ;;  %v1780_v21 = vld [vmem:[%s2758_s7 + $0x50] sm:$0xf0]  ;;  %v2163_v24 = vor.u32 %v2429_v17, %v2162_v12 }
  0x69   : > { %1332 = vmatpush.bf16.msrb.mxu3 %v2019_v49  ;;  %v2235_v48 = vor.u32 %v2447_v42, %v2234_v37  ;;  %v2210_v49 = vld [vmem:[%s2758_s7 + $0x398] sm:$0xf]  ;;  %v2138_v22 = vld [vmem:[%s2758_s7 + $0x308] sm:$0xf]  ;;  %v2432_v27 = vld [vmem:[%s2758_s7 + $0x36c] sm:$0xf] }
  0x6a   : > { %v2211_v62 = vor.u32 %v2441_v54, %v2210_v49  ;;  %v2324_v30 = vld [vmem:[%s2758_s7 + $0xc] sm:$0xf]  ;;  %v2378_v31 = vld [vmem:[%s2758_s7 + $0x1bc] sm:$0xf]  ;;  %v1972_v32 = vld [vmem:[%s2758_s7 + $0x1d0] sm:$0xf0] }
  0x6b   : > { %1295 = vmatpush.bf16.msrb.mxu0 %v1967_v50  ;;  %1320 = vmatpush.bf16.msrb.mxu2 %v1803_v52  ;;  %v2071_v50 = vor.u32 %v2402_v43, %v2068_v44  ;;  %v2260_v52 = vld [vmem:[%s2758_s7 + $0x410] sm:$0xf0]  ;;  %v1756_v33 = vld [vmem:[%s2758_s7 + $0x20] sm:$0xf0]  ;;  %v2418_v37 = vld [vmem:[%s2758_s7 + $0x2f4] sm:$0xf0]  ;;  %v1975_v40 = vor.u32 %v2378_v31, %v1972_v32 }
  0x6c   : > { %1308 = vmatpush.bf16.msrb.mxu1 %v2159_v55  ;;  %v2396_v55 = vld [vmem:[%s2758_s7 + $0x24c] sm:$0xf]  ;;  %v2263_v59 = vor.u32 %v2450_v51, %v2260_v52  ;;  %v2164_v42 = vld [vmem:[%s2758_s7 + $0x350] sm:$0xf0]  ;;  %v1759_v43 = vor.u32 %v2324_v30, %v1756_v33  ;;  %v1906_v45 = vld [vmem:[%s2758_s7 + $0x130] sm:$0xf] }
  0x6d   : > { %1333 = vmatpush.bf16.msrb.mxu3 %v1995_v2  ;;  %v2047_v0 = vor.u32 %v2396_v55, %v2044_v56  ;;  %v2236_v2 = vld [vmem:[%s2758_s7 + $0x3e0] sm:$0xf0]  ;;  %v2372_v46 = vld [vmem:[%s2758_s7 + $0x18c] sm:$0xf]  ;;  %v2364_v49 = vld [vmem:[%s2758_s7 + $0x144] sm:$0xf0] }
  0x6e   : > { %v2239_v9 = vor.u32 %v2444_v1, %v2236_v2  ;;  %v2466_v51 = vld [vmem:[%s2758_s7 + $0x474] sm:$0xf0]  ;;  %v2098_v52 = vld [vmem:[%s2758_s7 + $0x2b0] sm:$0xf]  ;;  %v2420_v56 = vld [vmem:[%s2758_s7 + $0x30c] sm:$0xf] }
  0x6f   : > { %1296 = vmatpush.bf16.msrb.mxu0 %v1943_v3  ;;  %1321 = vmatpush.bf16.msrb.mxu2 %v1779_v4  ;;  %v1831_v3 = vor.u32 %v2342_v57, %v1828_v58  ;;  %v2435_v4 = vld [vmem:[%s2758_s7 + $0x37c] sm:$0xf0]  ;;  %v2140_v57 = vld [vmem:[%s2758_s7 + $0x320] sm:$0xf0]  ;;  %v1907_v58 = vor.u32 %v2364_v49, %v1906_v45  ;;  %v2358_v2 = vld [vmem:[%s2758_s7 + $0x114] sm:$0xf0] }
  0x70   : > { %1309 = vmatpush.bf16.msrb.mxu1 %v2135_v7  ;;  %v2336_v7 = vld [vmem:[%s2758_s7 + $0x6c] sm:$0xf]  ;;  %v2187_v10 = vor.u32 %v2435_v4, %v2186_v63  ;;  %v2367_v63 = vld [vmem:[%s2758_s7 + $0x164] sm:$0xf]  ;;  %v2460_v4 = vld [vmem:[%s2758_s7 + $0x444] sm:$0xf0] }
  0x71   : > { %1334 = vmatpush.bf16.msrb.mxu3 %v1971_v19  ;;  %v1996_v19 = vld [vmem:[%s2758_s7 + $0x200] sm:$0xf0]  ;;  %v2266_v17 = vld [vmem:[%s2758_s7 + $0x400] sm:$0xf]  ;;  %v2448_v30 = vld [vmem:[%s2758_s7 + $0x3e4] sm:$0xf0] }
  0x72   : > { %1297 = vmatmul.bf16.vlgmr.msrb.gmra.mxu0 %v2868_v61  ;;  %v1999_v26 = vor.u32 %v2384_v18, %v1996_v19  ;;  %v2454_v18 = vld [vmem:[%s2758_s7 + $0x414] sm:$0xf0]  ;;  %v2050_v19 = vld [vmem:[%s2758_s7 + $0x250] sm:$0xf]  ;;  %v2026_v31 = vld [vmem:[%s2758_s7 + $0x220] sm:$0xf] }
  0x73   : > { %1341 = vmatpush.bf16.msra.mxu0 %v2307_v8  ;;  %1322 = vmatpush.bf16.msrb.mxu2 %v1755_v20  ;;  %v1804_v8 = vld [vmem:[%s2758_s7 + $0x80] sm:$0xf0]  ;;  %v2330_v20 = vld [vmem:[%s2758_s7 + $0x3c] sm:$0xf]  ;;  %v2394_v32 = vld [vmem:[%s2758_s7 + $0x234] sm:$0xf0] }
  0x74   : > { %1354 = vmatpush.bf16.msra.mxu1 %v1927_v13  ;;  %v2023_v13 = vor.u32 %v2390_v5, %v2020_v6  ;;  %v1807_v16 = vor.u32 %v2336_v7, %v1804_v8  ;;  %v1783_v29 = vor.u32 %v2330_v20, %v1780_v21  ;;  %v2074_v5 = vld [vmem:[%s2758_s7 + $0x280] sm:$0xf]  ;;  %v2406_v6 = vld [vmem:[%s2758_s7 + $0x294] sm:$0xf0]  ;;  %v2143_v7 = vor.u32 %v2420_v56, %v2140_v57  ;;  %v2400_v20 = vld [vmem:[%s2758_s7 + $0x264] sm:$0xf0] }
  0x75   : > { %1310 = vmatmul.bf16.vlgmr.msrb.gmra.mxu1 %v2881_v11  ;;  %1335 = vmatpush.bf16.msrb.mxu3 %v1947_v34  ;;  %v1930_v34 = vld [vmem:[%s2758_s7 + $0x160] sm:$0xf]  ;;  %v2343_v49 = vld [vmem:[%s2758_s7 + $0xa4] sm:$0xf]  ;;  %v2382_v56 = vld [vmem:[%s2758_s7 + $0x1d4] sm:$0xf0] }
  0x76   : > { %1323 = vmatmul.bf16.vlgmr.msrb.gmra.mxu2 %v2866_v60  ;;  %v1762_v57 = vld [vmem:[%s2758_s7 + $0x10] sm:$0xf] }
  0x77   : > { %1342 = vmatpush.bf16.msra.mxu0 %v2283_v23  ;;  %1367 = vmatpush.bf16.msra.mxu2 %v2119_v25  ;;  %v2215_v23 = vor.u32 %v2438_v14, %v2212_v15  ;;  %v2423_v25 = vld [vmem:[%s2758_s7 + $0x31c] sm:$0xf0]  ;;  %v1908_v14 = vld [vmem:[%s2758_s7 + $0x148] sm:$0xf0]  ;;  %v2075_v15 = vor.u32 %v2406_v6, %v2074_v5  ;;  %v2430_v5 = vld [vmem:[%s2758_s7 + $0x354] sm:$0xf0] }
  0x78   : > { %1355 = vmatpush.bf16.msra.mxu1 %v1903_v28  ;;  %1336 = vmatmul.bf16.vlgmr.msrb.gmra.mxu3 %v2868_v61  ;;  %v2188_v28 = vld [vmem:[%s2758_s7 + $0x380] sm:$0xf0]  ;;  %v2139_v39 = vor.u32 %v2423_v25, %v2138_v22  ;;  %v2376_v6 = vld [vmem:[%s2758_s7 + $0x1a4] sm:$0xf0] }
  0x79   : > { %1380 = vmatpush.bf16.msra.mxu3 %v2311_v35  ;;  %v2370_v35 = vld [vmem:[%s2758_s7 + $0x174] sm:$0xf0]  ;;  %v2355_v25 = vld [vmem:[%s2758_s7 + $0x104] sm:$0xf] }
  0x7a   : > { %v1931_v44 = vor.u32 %v2370_v35, %v1930_v34  ;;  %v1810_v35 = vld [vmem:[%s2758_s7 + $0x70] sm:$0xf] }
  0x7b   : > { %1343 = vmatpush.bf16.msra.mxu0 %v2259_v36  ;;  %1368 = vmatpush.bf16.msra.mxu2 %v2095_v38  ;;  %v2122_v36 = vld [vmem:[%s2758_s7 + $0x2e0] sm:$0xf]  ;;  %v2191_v38 = vor.u32 %v2432_v27, %v2188_v28  ;;  %v2051_v27 = vor.u32 %v2400_v20, %v2050_v19  ;;  %v2346_v28 = vld [vmem:[%s2758_s7 + $0xb4] sm:$0xf0]  ;;  %v2146_v19 = vld [vmem:[%s2758_s7 + $0x310] sm:$0xf] }
  0x7c   : > { %1356 = vmatpush.bf16.msra.mxu1 %v1879_v41  ;;  %v2426_v41 = vld [vmem:[%s2758_s7 + $0x33c] sm:$0xf]  ;;  %v2424_v20 = vld [vmem:[%s2758_s7 + $0x324] sm:$0xf0] }
  0x7d   : > { %1381 = vmatpush.bf16.msra.mxu3 %v2287_v47  ;;  %v1948_v47 = vld [vmem:[%s2758_s7 + $0x1a0] sm:$0xf0]  ;;  %v2167_v54 = vor.u32 %v2426_v41, %v2164_v42  ;;  %v2218_v41 = vld [vmem:[%s2758_s7 + $0x3a0] sm:$0xf]  ;;  %v2442_v42 = vld [vmem:[%s2758_s7 + $0x3b4] sm:$0xf0] }
  0x7e   : > { %v1951_v55 = vor.u32 %v2372_v46, %v1948_v47  ;;  %v1786_v47 = vld [vmem:[%s2758_s7 + $0x40] sm:$0xf] }
  0x7f   : > { %1344 = vmatpush.bf16.msra.mxu0 %v2235_v48  ;;  %1369 = vmatpush.bf16.msra.mxu2 %v2071_v50  ;;  %v2123_v48 = vor.u32 %v2418_v37, %v2122_v36  ;;  %v2314_v50 = vld [vmem:[%s2758_s7 + $0x460] sm:$0xf]  ;;  %v2349_v37 = vld [vmem:[%s2758_s7 + $0xd4] sm:$0xf] }
  0x80   : > { %1357 = vmatpush.bf16.msra.mxu1 %v1855_v53  ;;  %v2412_v53 = vld [vmem:[%s2758_s7 + $0x2c4] sm:$0xf0] }
  0x81   : > { %1382 = vmatpush.bf16.msra.mxu3 %v2263_v59  ;;  %v1882_v59 = vld [vmem:[%s2758_s7 + $0x100] sm:$0xf]  ;;  %v2099_v1 = vor.u32 %v2412_v53, %v2098_v52  ;;  %v2334_v52 = vld [vmem:[%s2758_s7 + $0x54] sm:$0xf0]  ;;  %v2194_v53 = vld [vmem:[%s2758_s7 + $0x370] sm:$0xf] }
  0x83   : > { %1345 = vmatpush.bf16.msra.mxu0 %v2211_v62  ;;  %1370 = vmatpush.bf16.msra.mxu2 %v2047_v0  ;;  %v2315_v62 = vor.u32 %v2466_v51, %v2314_v50  ;;  %v1932_v0 = vld [vmem:[%s2758_s7 + $0x178] sm:$0xf0] }
  0x84   : > { %1358 = vmatpush.bf16.msra.mxu1 %v1831_v3  ;;  %v2290_v3 = vld [vmem:[%s2758_s7 + $0x430] sm:$0xf]  ;;  %v1935_v8 = vor.u32 %v2367_v63, %v1932_v0  ;;  %v1836_v50 = vld [vmem:[%s2758_s7 + $0xb8] sm:$0xf0]  ;;  %v2337_v0 = vld [vmem:[%s2758_s7 + $0x74] sm:$0xf] }
  0x85   : > { %1383 = vmatpush.bf16.msra.mxu3 %v2239_v9  ;;  %v1883_v9 = vor.u32 %v2358_v2, %v1882_v59  ;;  %v2291_v12 = vor.u32 %v2460_v4, %v2290_v3  ;;  %v1787_v59 = vor.u32 %v2334_v52, %v1786_v47  ;;  %v1954_v3 = vld [vmem:[%s2758_s7 + $0x190] sm:$0xf]  ;;  %v2170_v4 = vld [vmem:[%s2758_s7 + $0x340] sm:$0xf]  ;;  %v2439_v47 = vld [vmem:[%s2758_s7 + $0x3a4] sm:$0xf] }
  0x86   : > { %v2004_v52 = vld [vmem:[%s2758_s7 + $0x208] sm:$0xf0] }
  0x87   : > { %1346 = vmatpush.bf16.msra.mxu0 %v2187_v10  ;;  %1371 = vmatpush.bf16.msra.mxu2 %v2023_v13  ;;  %v1858_v10 = vld [vmem:[%s2758_s7 + $0xd0] sm:$0xf]  ;;  %v2361_v13 = vld [vmem:[%s2758_s7 + $0x134] sm:$0xf] }
  0x88   : > { %1359 = vmatpush.bf16.msra.mxu1 %v1807_v16  ;;  %v2352_v16 = vld [vmem:[%s2758_s7 + $0xe4] sm:$0xf0]  ;;  %v1911_v21 = vor.u32 %v2361_v13, %v1908_v14  ;;  %v2171_v14 = vor.u32 %v2430_v5, %v2170_v4 }
  0x89   : > { %1384 = vmatpush.bf16.msra.mxu3 %v2215_v23  ;;  %v1859_v22 = vor.u32 %v2352_v16, %v1858_v10  ;;  %v1834_v23 = vld [vmem:[%s2758_s7 + $0xa0] sm:$0xf]  ;;  %v2316_v10 = vld [vmem:[%s2758_s7 + $0x478] sm:$0xf0] }
  0x8a   : > { %v1835_v34 = vor.u32 %v2346_v28, %v1834_v23  ;;  %v1788_v16 = vld [vmem:[%s2758_s7 + $0x58] sm:$0xf0]  ;;  %v2100_v23 = vld [vmem:[%s2758_s7 + $0x2c8] sm:$0xf0]  ;;  %v2325_v28 = vld [vmem:[%s2758_s7 + $0x14] sm:$0xf] }
  0x8b   : > { %1347 = vmatpush.bf16.msra.mxu0 %v2163_v24  ;;  %1372 = vmatpush.bf16.msra.mxu2 %v1999_v26  ;;  %v2267_v24 = vor.u32 %v2454_v18, %v2266_v17  ;;  %v1884_v26 = vld [vmem:[%s2758_s7 + $0x118] sm:$0xf0]  ;;  %v1955_v17 = vor.u32 %v2376_v6, %v1954_v3  ;;  %v2148_v3 = vld [vmem:[%s2758_s7 + $0x328] sm:$0xf0] }
  0x8c   : > { %1360 = vmatpush.bf16.msra.mxu1 %v1783_v29  ;;  %v2242_v29 = vld [vmem:[%s2758_s7 + $0x3d0] sm:$0xf]  ;;  %v1887_v33 = vor.u32 %v2355_v25, %v1884_v26  ;;  %v2292_v25 = vld [vmem:[%s2758_s7 + $0x448] sm:$0xf0] }
  0x8d   : > { %1385 = vmatpush.bf16.msra.mxu3 %v2191_v38  ;;  %v2243_v36 = vor.u32 %v2448_v30, %v2242_v29  ;;  %v1860_v38 = vld [vmem:[%s2758_s7 + $0xe8] sm:$0xf0] }
  0x8e   : > { %v1863_v45 = vor.u32 %v2349_v37, %v1860_v38  ;;  %v1764_v29 = vld [vmem:[%s2758_s7 + $0x28] sm:$0xf0] }
  0x8f   : > { %1348 = vmatpush.bf16.msra.mxu0 %v2139_v39  ;;  %1373 = vmatpush.bf16.msra.mxu2 %v1975_v40  ;;  %v2027_v39 = vor.u32 %v2394_v32, %v2026_v31  ;;  %v2340_v40 = vld [vmem:[%s2758_s7 + $0x84] sm:$0xf0]  ;;  %v2403_v32 = vld [vmem:[%s2758_s7 + $0x284] sm:$0xf] }
  0x90   : > { %1361 = vmatpush.bf16.msra.mxu1 %v1759_v43  ;;  %v2002_v43 = vld [vmem:[%s2758_s7 + $0x1f0] sm:$0xf]  ;;  %v1811_v46 = vor.u32 %v2340_v40, %v1810_v35  ;;  %v2268_v35 = vld [vmem:[%s2758_s7 + $0x418] sm:$0xf0]  ;;  %v2052_v40 = vld [vmem:[%s2758_s7 + $0x268] sm:$0xf0] }
  0x91   : > { %1386 = vmatpush.bf16.msra.mxu3 %v2167_v54  ;;  %v2436_v54 = vld [vmem:[%s2758_s7 + $0x384] sm:$0xf0] }
  0x92   : > { %1349 = vmatmul.bf16.vlgmr.msra.gmra.mxu0 %v2881_v11  ;;  %v2195_v63 = vor.u32 %v2436_v54, %v2194_v53  ;;  %v2433_v53 = vld [vmem:[%s2758_s7 + $0x374] sm:$0xf]  ;;  %v2196_v54 = vld [vmem:[%s2758_s7 + $0x388] sm:$0xf0] }
  0x93   : > { %1393 = vmatpush.bf16.msrb.mxu0 %v1931_v44  ;;  %1374 = vmatpush.bf16.msra.mxu2 %v1951_v55  ;;  %v2388_v44 = vld [vmem:[%s2758_s7 + $0x204] sm:$0xf0]  ;;  %v1978_v55 = vld [vmem:[%s2758_s7 + $0x1c0] sm:$0xf] }
  0x94   : > { %1406 = vmatpush.bf16.msrb.mxu1 %v2123_v48  ;;  %v2219_v48 = vor.u32 %v2442_v42, %v2218_v41  ;;  %v2003_v51 = vor.u32 %v2388_v44, %v2002_v43  ;;  %v1979_v2 = vor.u32 %v2382_v56, %v1978_v55  ;;  %v2445_v41 = vld [vmem:[%s2758_s7 + $0x3d4] sm:$0xf]  ;;  %v2244_v42 = vld [vmem:[%s2758_s7 + $0x3e8] sm:$0xf0]  ;;  %v2379_v56 = vld [vmem:[%s2758_s7 + $0x1c4] sm:$0xf] }
  0x95   : > { %1362 = vmatmul.bf16.vlgmr.msra.gmra.mxu1 %v2866_v60  ;;  %1387 = vmatpush.bf16.msra.mxu3 %v2143_v7  ;;  %v2415_v7 = vld [vmem:[%s2758_s7 + $0x2e4] sm:$0xf]  ;;  %v2247_v44 = vor.u32 %v2445_v41, %v2244_v42 }
  0x96   : > { %1375 = vmatmul.bf16.vlgmr.msra.gmra.mxu2 %v2868_v61 }
  0x97   : > { %1394 = vmatpush.bf16.msrb.mxu0 %v1907_v58  ;;  %1419 = vmatpush.bf16.msrb.mxu2 %v2315_v62  ;;  %v1839_v58 = vor.u32 %v2343_v49, %v1836_v50  ;;  %v2328_v62 = vld [vmem:[%s2758_s7 + $0x24] sm:$0xf0] }
  0x98   : > { %1407 = vmatpush.bf16.msrb.mxu1 %v2099_v1  ;;  %1388 = vmatmul.bf16.vlgmr.msra.gmra.mxu3 %v2881_v11  ;;  %v1812_v1 = vld [vmem:[%s2758_s7 + $0x88] sm:$0xf0]  ;;  %v1763_v13 = vor.u32 %v2328_v62, %v1762_v57  ;;  %v1980_v57 = vld [vmem:[%s2758_s7 + $0x1d8] sm:$0xf0] }
  0x99   : > { %1432 = vmatpush.bf16.msrb.mxu3 %v1935_v8  ;;  %v2124_v8 = vld [vmem:[%s2758_s7 + $0x2f8] sm:$0xf0]  ;;  %v1983_v62 = vor.u32 %v2379_v56, %v1980_v57 }
  0x9a   : > { %v2127_v18 = vor.u32 %v2415_v7, %v2124_v8 }
  0x9b   : > { %1395 = vmatpush.bf16.msrb.mxu0 %v1883_v9  ;;  %1420 = vmatpush.bf16.msrb.mxu2 %v2291_v12  ;;  %v2463_v9 = vld [vmem:[%s2758_s7 + $0x464] sm:$0xf]  ;;  %v1815_v12 = vor.u32 %v2337_v0, %v1812_v1  ;;  %v2373_v0 = vld [vmem:[%s2758_s7 + $0x194] sm:$0xf]  ;;  %v1956_v1 = vld [vmem:[%s2758_s7 + $0x1a8] sm:$0xf0] }
  0x9c   : > { %1408 = vmatpush.bf16.msrb.mxu1 %v2075_v15  ;;  %v2331_v15 = vld [vmem:[%s2758_s7 + $0x44] sm:$0xf]  ;;  %v1959_v4 = vor.u32 %v2373_v0, %v1956_v1 }
  0x9d   : > { %1433 = vmatpush.bf16.msrb.mxu3 %v1911_v21  ;;  %v2319_v21 = vor.u32 %v2463_v9, %v2316_v10  ;;  %v1791_v26 = vor.u32 %v2331_v15, %v1788_v16 }
  0x9f   : > { %1396 = vmatpush.bf16.msrb.mxu0 %v1859_v22  ;;  %1421 = vmatpush.bf16.msrb.mxu2 %v2267_v24  ;;  %v2409_v22 = vld [vmem:[%s2758_s7 + $0x2b4] sm:$0xf] }
  0xa0   : > { %1409 = vmatpush.bf16.msrb.mxu1 %v2051_v27  ;;  %v2457_v24 = vld [vmem:[%s2758_s7 + $0x434] sm:$0xf]  ;;  %v2147_v27 = vor.u32 %v2424_v20, %v2146_v19  ;;  %v2103_v30 = vor.u32 %v2409_v22, %v2100_v23  ;;  %v355_v22 = vld [vmem:[#allocation2 + $0x10] sm:$0xff] }
  0xa1   : > { %1434 = vmatpush.bf16.msrb.mxu3 %v1887_v33  ;;  %v2295_v31 = vor.u32 %v2457_v24, %v2292_v25  ;;  %v2076_v33 = vld [vmem:[%s2758_s7 + $0x298] sm:$0xf0] }
  0xa2   : > { %v2079_v37 = vor.u32 %v2403_v32, %v2076_v33 }
  0xa3   : > { %1397 = vmatpush.bf16.msrb.mxu0 %v1835_v34  ;;  %1422 = vmatpush.bf16.msrb.mxu2 %v2243_v36  ;;  %v2451_v34 = vld [vmem:[%s2758_s7 + $0x404] sm:$0xf]  ;;  %v1767_v36 = vor.u32 %v2325_v28, %v1764_v29 }
  0xa4   : > { %1410 = vmatpush.bf16.msrb.mxu1 %v2027_v39  ;;  %v2271_v38 = vor.u32 %v2451_v34, %v2268_v35  ;;  %v2397_v39 = vld [vmem:[%s2758_s7 + $0x254] sm:$0xf] }
  0xa5   : > { %1435 = vmatpush.bf16.msrb.mxu3 %v1863_v45  ;;  %v2055_v43 = vor.u32 %v2397_v39, %v2052_v40  ;;  %v2391_v45 = vld [vmem:[%s2758_s7 + $0x224] sm:$0xf]  ;;  %v357_v39 = vld [vmem:[#allocation2] sm:$0xff] }
  0xa7   : > { %1398 = vmatpush.bf16.msrb.mxu0 %v1811_v46  ;;  %1423 = vmatpush.bf16.msrb.mxu2 %v2219_v48  ;;  %v2028_v46 = vld [vmem:[%s2758_s7 + $0x238] sm:$0xf0] }
  0xa8   : > { %1411 = vmatpush.bf16.msrb.mxu1 %v2003_v51  ;;  %v2220_v48 = vld [vmem:[%s2758_s7 + $0x3b8] sm:$0xf0]  ;;  %v2031_v49 = vor.u32 %v2391_v45, %v2028_v46  ;;  %v2385_v51 = vld [vmem:[%s2758_s7 + $0x1f4] sm:$0xf] }
  0xa9   : > { %1436 = vmatpush.bf16.msrb.mxu3 %v1839_v58  ;;  %v2223_v50 = vor.u32 %v2439_v47, %v2220_v48  ;;  %v2007_v55 = vor.u32 %v2385_v51, %v2004_v52  ;;  %v2427_v58 = vld [vmem:[%s2758_s7 + $0x344] sm:$0xf] }
  0xab   : > { %1399 = vmatpush.bf16.msrb.mxu0 %v1787_v59  ;;  %1424 = vmatpush.bf16.msrb.mxu2 %v2195_v63  ;;  %v2172_v59 = vld [vmem:[%s2758_s7 + $0x358] sm:$0xf0] }
  0xac   : > { %1412 = vmatpush.bf16.msrb.mxu1 %v1979_v2  ;;  %v2175_v63 = vor.u32 %v2427_v58, %v2172_v59  ;;  %v2421_v2 = vld [vmem:[%s2758_s7 + $0x314] sm:$0xf] }
  0xad   : > { %1437 = vmatpush.bf16.msrb.mxu3 %v1815_v12  ;;  %v2151_v5 = vor.u32 %v2421_v2, %v2148_v3  ;;  %v354_v12 = vld [vmem:[#allocation2 + $0x28] sm:$0xff]  ;;  %v359_v59 = vld [vmem:[#allocation2 + $0x20] sm:$0xff] }
  0xaf   : > { %1400 = vmatpush.bf16.msrb.mxu0 %v1763_v13  ;;  %1425 = vmatpush.bf16.msrb.mxu2 %v2171_v14 }
  0xb0   : > { %1413 = vmatpush.bf16.msrb.mxu1 %v1955_v17 }
  0xb1   : > { %1438 = vmatpush.bf16.msrb.mxu3 %v1791_v26 }
  0xb2   : > { %1401 = vmatmul.bf16.vlgmr.msrb.gmra.mxu0 %v2866_v60 }
  0xb3   : > { %1445 = vmatpush.bf16.msra.mxu0 %v2127_v18  ;;  %1414 = vmatmul.bf16.vlgmr.msrb.gmra.mxu1 %v2868_v61 }
  0xb4   : > { %1458 = vmatpush.bf16.msra.mxu1 %v2319_v21  ;;  %1426 = vmatpush.bf16.msrb.mxu2 %v2147_v27 }
  0xb5   : > { %1439 = vmatpush.bf16.msrb.mxu3 %v1767_v36 }
  0xb7   : > { %1446 = vmatpush.bf16.msra.mxu0 %v2103_v30  ;;  %1427 = vmatmul.bf16.vlgmr.msrb.gmra.mxu2 %v2881_v11  ;;  %v356_v30 = vld [vmem:[#allocation2 + $0x8] sm:$0xff] }
  0xb8   : > { %1459 = vmatpush.bf16.msra.mxu1 %v2295_v31  ;;  %1440 = vmatmul.bf16.vlgmr.msrb.gmra.mxu3 %v2866_v60  ;;  %v2199_v60 = vor.u32 %v2433_v53, %v2196_v54 }
  0xbb   : > { %1447 = vmatpush.bf16.msra.mxu0 %v2079_v37 }
  0xbc   : > { %1460 = vmatpush.bf16.msra.mxu1 %v2271_v38 }
  0xbf   : > { %1448 = vmatpush.bf16.msra.mxu0 %v2055_v43 }
  0xc0   : > { %1461 = vmatpush.bf16.msra.mxu1 %v2247_v44 }
  0xc3   : > { %1449 = vmatpush.bf16.msra.mxu0 %v2031_v49 }
  0xc4   : > { %1462 = vmatpush.bf16.msra.mxu1 %v2223_v50  ;;  %v358_v50 = vld [vmem:[#allocation2 + $0x18] sm:$0xff] }
  0xc7   : > { %1450 = vmatpush.bf16.msra.mxu0 %v2007_v55 }
  0xc8   : > { %1463 = vmatpush.bf16.msra.mxu1 %v2199_v60 }
  0xcb   : > { %1451 = vmatpush.bf16.msra.mxu0 %v1983_v62 }
  0xcc   : > { %1464 = vmatpush.bf16.msra.mxu1 %v2175_v63 }
  0xcf   : > { %1452 = vmatpush.bf16.msra.mxu0 %v1959_v4  ;;  %v1246_v6 = vpop.f32.mrf.mxu0 }
  0xd0   : > { %1465 = vmatpush.bf16.msra.mxu1 %v2151_v5 }
  0xd2   : > { %1453 = vmatmul.bf16.vlgmr.msra.gmra.mxu0 %v2868_v61  ;;  %v1259_v7 = vpop.f32.mrf.mxu1 }
  0xd3   : > { %1466 = vmatmul.bf16.vlgmr.msra.gmra.mxu1 %v2881_v11  ;;  %v1260_v8 = vadd.f32 %v1259_v7, %v1246_v6 }
  0xd7   : > { %v1248_v9 = vpop.f32.mrf.mxu0 }
  0xd9   : > { %v1272_v13 = vpop.f32.mrf.mxu2 }
  0xda   : > { %v1261_v10 = vpop.f32.mrf.mxu1  ;;  %v1273_v14 = vadd.f32 %v1272_v13, %v1260_v8 }
  0xdb   : > { %v1285_v15 = vpop.f32.mrf.mxu3 }
  0xdc   : > { %v1471_v16 = vadd.f32 %v1273_v14, %v354_v12 }
  0xde   : > { %1477 = vst [vmem:[#allocation2 + $0x28] sm:$0xff] %v1471_v16 }
  0xe1   : > { %v1274_v17 = vpop.f32.mrf.mxu2 }
  0xe3   : > { %v1287_v18 = vpop.f32.mrf.mxu3 }
  0xef   : > { %v1298_v19 = vpop.f32.mrf.mxu0 }
  0xf0   : > { %v1299_v20 = vadd.f32 %v1298_v19, %v1285_v15 }
  0xf2   : > { %v1311_v21 = vpop.f32.mrf.mxu1 }
  0xf3   : > { %v1312_v61 = vadd.f32 %v1311_v21, %v1299_v20 }
  0xf5   : > { %v1472_v23 = vadd.f32 %v1312_v61, %v355_v22 }
  0xf7   : > { %1478 = vst [vmem:[#allocation2 + $0x10] sm:$0xff] %v1472_v23  ;;  %v1300_v11 = vpop.f32.mrf.mxu0 }
  0xf9   : > { %v1324_v25 = vpop.f32.mrf.mxu2 }
  0xfa   : > { %v1313_v24 = vpop.f32.mrf.mxu1 }
  0xfb   : > { %v1337_v26 = vpop.f32.mrf.mxu3 }
  0xfc   : > { %v1338_v29 = vadd.f32 %v1337_v26, %v1324_v25 }
 0x101   : > { %v1326_v27 = vpop.f32.mrf.mxu2 }
 0x103   : > { %v1339_v28 = vpop.f32.mrf.mxu3 }
 0x10f   : > { %v1350_v31 = vpop.f32.mrf.mxu0 }
 0x110   : > { %v1351_v32 = vadd.f32 %v1350_v31, %v1338_v29 }
 0x112   : > { %v1363_v33 = vpop.f32.mrf.mxu1  ;;  %v1473_v34 = vadd.f32 %v1351_v32, %v356_v30 }
 0x114   : > { %1479 = vst [vmem:[#allocation2 + $0x8] sm:$0xff] %v1473_v34 }
 0x117   : > { %v1352_v35 = vpop.f32.mrf.mxu0 }
 0x119   : > { %v1376_v37 = vpop.f32.mrf.mxu2 }
 0x11a   : > { %v1365_v36 = vpop.f32.mrf.mxu1  ;;  %v1377_v38 = vadd.f32 %v1376_v37, %v1363_v33 }
 0x11b   : > { %v1389_v40 = vpop.f32.mrf.mxu3 }
 0x11c   : > { %v1390_v41 = vadd.f32 %v1389_v40, %v1377_v38 }
 0x11e   : > { %v1474_v42 = vadd.f32 %v1390_v41, %v357_v39 }
 0x120   : > { %1480 = vst [vmem:[#allocation2] sm:$0xff] %v1474_v42 }
 0x121   : > { %v1378_v43 = vpop.f32.mrf.mxu2 }
 0x123   : > { %v1391_v44 = vpop.f32.mrf.mxu3 }
 0x12f   : > { %v1402_v45 = vpop.f32.mrf.mxu0 }
 0x130   : > { %v1415_v46 = vpop.f32.mrf.mxu1 }
 0x131   : > { %v1416_v47 = vadd.f32 %v1415_v46, %v1402_v45 }
 0x137   : > { %v1404_v48 = vpop.f32.mrf.mxu0 }
 0x138   : > { %v1417_v49 = vpop.f32.mrf.mxu1 }
 0x13a   : > { %v1428_v51 = vpop.f32.mrf.mxu2 }
 0x13b   : > { %v1429_v52 = vadd.f32 %v1428_v51, %v1416_v47  ;;  %v1441_v54 = vpop.f32.mrf.mxu3 }
 0x13d   : > { %v1475_v53 = vadd.f32 %v1429_v52, %v358_v50 }
 0x13f   : > { %1481 = vst [vmem:[#allocation2 + $0x18] sm:$0xff] %v1475_v53 }
 0x142   : > { %v1430_v55 = vpop.f32.mrf.mxu2 }
 0x143   : > { %v1443_v60 = vpop.f32.mrf.mxu3 }
 0x14f   : > { %v1454_v56 = vpop.f32.mrf.mxu0 }
 0x150   : > { %v1455_v57 = vadd.f32 %v1454_v56, %v1441_v54  ;;  %v1467_v58 = vpop.f32.mrf.mxu1 }
 0x152   : > { %v1468_v62 = vadd.f32 %v1467_v58, %v1455_v57 }
 0x154   : > { %v1476_v63 = vadd.f32 %v1468_v62, %v359_v59  ;;  %1486 = sbr.rel (%p2320_p3) target bundleno = 644 (0x284), region = 56 }
 0x156   : > { %1482 = vst [vmem:[#allocation2 + $0x20] sm:$0xff] %v1476_v63 }
 0x157   : > { %v1456_v0 = vpop.f32.mrf.mxu0 }
 0x158   : > { %v1469_v1 = vpop.f32.mrf.mxu1 }
 0x159   : > { %v1487_v2 = vld [vmem:[#allocation2 + $0x28] sm:$0xff]  ;;  %v1488_v3 = vld [vmem:[#allocation2 + $0x10] sm:$0xff]  ;;  %v1490_v5 = vld [vmem:[#allocation2] sm:$0xff]  ;;  %v2653_v40 = vmov 768.0  }
 0x15a   : > { %v1489_v4 = vld [vmem:[#allocation2 + $0x8] sm:$0xff]  ;;  %v1493_v6 = vld [vmem:[%s3139_s2] sm:$0x3f]  ;;  %v1491_v14 = vld [vmem:[#allocation2 + $0x18] sm:$0xff]  ;;  %2548 = vrcp.f32 %v2653_v40 }
 0x15b   : > { %v1513_v7 = vld [vmem:[%s2770_s21] sm:$0xff]  ;;  %v1495_v8 = vperm.slane %v1493_v6, 0  ;;  %v1496_v9 = vperm.slane %v1493_v6, 1  ;;  %v1497_v10 = vperm.slane %v1493_v6, 2  ;;  %v1498_v12 = vperm.slane %v1493_v6, 3  ;;  %v1514_v13 = vld [vmem:[%s2770_s21 + $0x8] sm:$0xff] }
 0x15c   : > { %v1499_v15 = vperm.slane %v1493_v6, 4  ;;  %v1500_v16 = vperm.slane %v1493_v6, 5  ;;  %v1515_v17 = vld [vmem:[%s2770_s21 + $0x10] sm:$0xff]  ;;  %v1516_v18 = vunpack.c.l.bf16 %v1513_v7  ;;  %v1517_v19 = vunpack.c.h.bf16 %v1513_v7 }
 0x15d   : > { %v1507_v20 = vadd.f32 %v1495_v8, %v1487_v2  ;;  %v1508_v21 = vadd.f32 %v1496_v9, %v1488_v3  ;;  %v1509_v22 = vadd.f32 %v1497_v10, %v1489_v4  ;;  %v1510_v61 = vadd.f32 %v1498_v12, %v1490_v5  ;;  %v1492_v23 = vld [vmem:[#allocation2 + $0x20] sm:$0xff] }
 0x15e   : > { %v1518_v11 = vunpack.c.l.bf16 %v1514_v13  ;;  %v1519_v24 = vunpack.c.h.bf16 %v1514_v13  ;;  %v1511_v25 = vadd.f32 %v1499_v15, %v1491_v14  ;;  %v1520_v26 = vunpack.c.l.bf16 %v1515_v17  ;;  %v1580_v9 = vld [vmem:[%s3141_s4] sm:$0x3f] }
 0x15f   : > { %v1522_v27 = vadd.f32 %v1516_v18, %v1507_v20  ;;  %v1523_v28 = vadd.f32 %v1517_v19, %v1508_v21  ;;  %v1512_v30 = vadd.f32 %v1500_v16, %v1492_v23  ;;  %v1521_v31 = vunpack.c.h.bf16 %v1515_v17  ;;  %v1600_v12 = vld [vmem:[%s3142_s5] sm:$0x3f] }
 0x160   : > { %v1524_v29 = vadd.f32 %v1518_v11, %v1509_v22  ;;  %v1525_v32 = vadd.f32 %v1519_v24, %v1510_v61  ;;  %v1526_v34 = vadd.f32 %v1520_v26, %v1511_v25  ;;  %v2549_v41 = vpop.eup %2548  ;;  %v1582_v14 = vperm.slane %v1580_v9, 0 }
 0x161   : > { %v1528_v33 = vadd.f32 %v1523_v28, %v1522_v27  ;;  %v1527_v36 = vadd.f32 %v1521_v31, %v1512_v30  ;;  %v1536_v42 = vmul.f32 768.0, %v2549_v41  ;;  %vm1540_vm0 = vweird.f32 %v2549_v41 }
 0x162   : > { %v1583_v15 = vperm.slane %v1580_v9, 1  ;;  %v1584_v16 = vperm.slane %v1580_v9, 2  ;;  %v1585_v18 = vperm.slane %v1580_v9, 3  ;;  %v1586_v19 = vperm.slane %v1580_v9, 4 }
 0x163   : > { %v1529_v35 = vadd.f32 %v1528_v33, %v1524_v29  ;;  %v1537_v43 = vsub.f32 1.0, %v1536_v42  ;;  %v1587_v20 = vperm.slane %v1580_v9, 5  ;;  %v1602_v21 = vperm.slane %v1600_v12, 0 }
 0x164   : > { %v1603_v22 = vperm.slane %v1600_v12, 1  ;;  %v1604_v61 = vperm.slane %v1600_v12, 2  ;;  %v1605_v23 = vperm.slane %v1600_v12, 3 }
 0x165   : > { %v1530_v37 = vadd.f32 %v1529_v35, %v1525_v32  ;;  %v1538_v44 = vmul.f32 %v2549_v41, %v1537_v43 }
 0x167   : > { %v1531_v38 = vadd.f32 %v1530_v37, %v1526_v34  ;;  %v1539_v45 = vadd.f32 %v2549_v41, %v1538_v44 }
 0x169   : > { %v1532_v39 = vadd.f32 %v1531_v38, %v1527_v36  ;;  %v1541_v46 = vsel %vm1540_vm0, %v2549_v41, %v1539_v45 }
 0x16b   : > { %1533 = vadd.xlane.f32.xlu0 %v1532_v39 }
 0x1de   : > { %v1534_v47 = vpop.xlane.xlu0 %1533 }
 0x1df   : > { %v1542_v48 = vmul.f32 %v1541_v46, %v1534_v47 }
 0x1e1   : > { %v1543_v49 = vsub.f32 %v1522_v27, %v1542_v48  ;;  %v1544_v50 = vsub.f32 %v1523_v28, %v1542_v48  ;;  %v1545_v51 = vsub.f32 %v1524_v29, %v1542_v48  ;;  %v1546_v52 = vsub.f32 %v1525_v32, %v1542_v48 }
 0x1e2   : > { %v1547_v55 = vsub.f32 %v1526_v34, %v1542_v48  ;;  %v1548_v57 = vsub.f32 %v1527_v36, %v1542_v48  ;;  %v1606_v28 = vperm.slane %v1600_v12, 4  ;;  %v1607_v29 = vperm.slane %v1600_v12, 5 }
 0x1e3   : > { %v1549_v53 = vmul.f32 %v1543_v49, %v1543_v49  ;;  %v1550_v54 = vmul.f32 %v1544_v50, %v1544_v50  ;;  %v1551_v60 = vmul.f32 %v1545_v51, %v1545_v51  ;;  %v1552_v58 = vmul.f32 %v1546_v52, %v1546_v52 }
 0x1e4   : > { %v1553_v62 = vmul.f32 %v1547_v55, %v1547_v55  ;;  %v1554_v0 = vmul.f32 %v1548_v57, %v1548_v57 }
 0x1e5   : > { %v1555_v56 = vadd.f32 %v1550_v54, %v1549_v53 }
 0x1e7   : > { %v1556_v59 = vadd.f32 %v1555_v56, %v1551_v60 }
 0x1e9   : > { %v1557_v63 = vadd.f32 %v1556_v59, %v1552_v58 }
 0x1eb   : > { %v1558_v1 = vadd.f32 %v1557_v63, %v1553_v62 }
 0x1ed   : > { %v1559_v2 = vadd.f32 %v1558_v1, %v1554_v0 }
 0x1ef   : > { %1560 = vadd.xlane.f32.xlu0 %v1559_v2 }
 0x262   : > { %v1561_v3 = vpop.xlane.xlu0 %1560 }
 0x263   : > { %v1562_v4 = vmul.f32 %v1561_v3, %v1541_v46 }
 0x265   : > { %v1563_v5 = vadd.f32 1e-12, %v1562_v4 }
 0x267   : > { %2550 = vrsqrt.f32 %v1563_v5  ;;  %vm1570_vm2 = vweird.f32 %v1563_v5 }
 0x26d   : > { %v2551_v6 = vpop.eup %2550 }
 0x26e   : > { %v1565_v7 = vmul.f32 %v2551_v6, %v1563_v5  ;;  %vm1571_vm1 = vweird.f32 %v2551_v6 }
 0x26f   : > { %vm1572_vm3 = vmor %vm1570_vm2, %vm1571_vm1 }
 0x270   : > { %v1566_v8 = vmul.f32 %v2551_v6, %v1565_v7 }
 0x272   : > { %v1567_v10 = vmul.f32 0.5, %v1566_v8 }
 0x274   : > { %v1568_v13 = vsub.f32 1.5, %v1567_v10 }
 0x276   : > { %v1569_v17 = vmul.f32 %v2551_v6, %v1568_v13 }
 0x278   : > { %v1573_v11 = vsel %vm1572_vm3, %v2551_v6, %v1569_v17 }
 0x279   : > { %v1574_v24 = vmul.f32 %v1573_v11, %v1543_v49  ;;  %v1575_v25 = vmul.f32 %v1573_v11, %v1544_v50  ;;  %v1576_v26 = vmul.f32 %v1573_v11, %v1545_v51  ;;  %v1577_v27 = vmul.f32 %v1573_v11, %v1546_v52 }
 0x27a   : > { %v1578_v30 = vmul.f32 %v1573_v11, %v1547_v55  ;;  %v1579_v31 = vmul.f32 %v1573_v11, %v1548_v57 }
 0x27b   : > { %v1594_v32 = vmul.f32 %v1582_v14, %v1574_v24  ;;  %v1595_v33 = vmul.f32 %v1583_v15, %v1575_v25  ;;  %v1596_v34 = vmul.f32 %v1584_v16, %v1576_v26  ;;  %v1597_v35 = vmul.f32 %v1585_v18, %v1577_v27 }
 0x27c   : > { %v1598_v36 = vmul.f32 %v1586_v19, %v1578_v30  ;;  %v1599_v37 = vmul.f32 %v1587_v20, %v1579_v31 }
 0x27d   : > { %v1614_v38 = vadd.f32 %v1602_v21, %v1594_v32  ;;  %v1615_v39 = vadd.f32 %v1603_v22, %v1595_v33  ;;  %v1616_v40 = vadd.f32 %v1604_v61, %v1596_v34  ;;  %v1617_v41 = vadd.f32 %v1605_v23, %v1597_v35 }
 0x27e   : > { %v1618_v42 = vadd.f32 %v1606_v28, %v1598_v36  ;;  %v1619_v43 = vadd.f32 %v1607_v29, %v1599_v37 }
 0x27f   : > { %v1620_v44 = vpack.c.bf16 %v1615_v39, %v1614_v38  ;;  %v1621_v45 = vpack.c.bf16 %v1617_v41, %v1616_v40 }
 0x280   : > { %v1622_v46 = vpack.c.bf16 %v1619_v43, %v1618_v42 }
 0x281   : > { %1623 = vst [vmem:[%s2780_s15] sm:$0xff] %v1620_v44 }
 0x282   : > { %1624 = vst [vmem:[%s2780_s15 + $0x8] sm:$0xff] %v1621_v45 }
 0x283   : > { %1625 = vst [vmem:[%s2780_s15 + $0x10] sm:$0xff] %v1622_v46 }
 0x284 PF: > { %s19_s28 = sadd.s32 1, %s2648_s28   ;;  %s3146_s17 = sld [smem:[#allocation6_spill]] }
 0x285   : > { %p16_p4 = scmp.ge.s32.totalorder %s19_s28, 6   ;;  %s3147_s21 = smov %s2624_s22 }
 0x286   : > { %s3148_s22 = smov %s2628_s23  ;;  %s3149_s23 = smov %s2743_s10 }
 0x287   : > { %s3150_s24 = smov %s2640_s26  ;;  %s3151_s25 = smov %s2644_s27 }
 0x288   : > { %s3152_s26 = smov %s3155_s30  ;;  %18 = sbr.rel (!%p16_p4) target bundleno = 5 (0x5), region = 98 }
 0x28a   : > { %s3153_s27 = smov %s3146_s17 }
 0x28d   :  { %1647 = vsyncpa [#allocation4], 1 }
 0x28e   :  { %1649 = vsyncpa [#allocation4 + $0x1], 1 }

// kernel: bert_base_uncased_forward.17
= control target key start
LH: loop header
LB: loop body
LE: loop exit
PB: predicated region body
PF: predicated region fallthrough
CT: control target
= control target key end

     0   :  { %11 = vsyncpa [#allocation4], 0  ;;  %s3851_s0 = inlined_call_operand.vmem [shape: bf16[16,3072], index: 0, kind: input, shape index: {}]   ;;  %s3852_s1 = inlined_call_operand.hbm [shape: bf16[3072,768], index: 1, kind: input, shape index: {}]   ;;  %s3853_s2 = inlined_call_operand.vmem [shape: f32[1,768], index: 2, kind: input, shape index: {}]   ;;  %s3854_s3 = inlined_call_operand.vmem [shape: bf16[16,768], index: 3, kind: input, shape index: {}]   ;;  %s3855_s4 = inlined_call_operand.vmem [shape: f32[1,768], index: 4, kind: input, shape index: {}]   ;;  %s3856_s5 = inlined_call_operand.vmem [shape: f32[1,768], index: 5, kind: input, shape index: {}]   ;;  %s3857_s6 = inlined_call_operand.vmem [shape: bf16[16,768], index: 6, kind: output, shape index: {}]  }
   0x1   :  { %13 = vsyncpa [#allocation4 + $0x1], 0  ;;  %s3299_s21 = smov 0   ;;  %s3301_s22 = smov 0  }
   0x2   :  { %s3303_s23 = smov 0   ;;  %s3305_s24 = smov 0  }
   0x3   :  { %s3307_s25 = smov 0   ;;  %s3309_s26 = smov 0  }
   0x4   :  { %s3311_s27 = smov 0   ;;  %s3313_s28 = smov 0  }
   0x5 LB: > { %s2103_s29 = sadd.s32 4294967295, %s3258_s28   ;;  %s28_s30 = sadd.s32 1, %s3250_s26  ;;  %s3258_s28 = sphi %s3313_s28, %s19_s28   ;;  %s3254_s27 = sphi %s3311_s27, %s3870_s27   ;;  %s3250_s26 = sphi %s3309_s26, %s3869_s26   ;;  %s3246_s25 = sphi %s3307_s25, %s3868_s25   ;;  %s3242_s24 = sphi %s3305_s24, %s3867_s24   ;;  %s3238_s23 = sphi %s3303_s23, %s3866_s23   ;;  %s3234_s22 = sphi %s3301_s22, %s3865_s22   ;;  %s3230_s21 = sphi %s3299_s21, %s3864_s21  }
   0x6   : > { %p29_p0 = scmp.ge.s32.totalorder %s28_s30, 6  ;;  %s31_s7 = sadd.s32 1, %s3254_s27 }
   0x7   : > { %s66_s8 = sadd.s32 1, %s3238_s23  ;;  %p73_p1 = scmp.ne.s32.totalorder %s3238_s23, %s3234_s22 }
   0x8   : > { %s3872_s30 = smov (%p29_p0, %s28_s30), 0  ;;  %s3874_s7 = smov (!%p29_p0, %s31_s7), %s3254_s27 }
   0x9   : > { %3859 = sst [smem:[#allocation6_spill]] %s3872_s30  ;;  %s63_s9 = ssub.s32 %s3250_s26, %s3872_s30 }
   0xa   : > { %p74_p2 = scmp.eq.s32.totalorder %s3258_s28, 0  ;;  %p33_p3 = scmp.ge.s32.totalorder %s3874_s7, 2 }
   0xb   : > { %p64_p4 = scmp.eq.s32.totalorder %s63_s9, 0  ;;  %p79_p6 = scmp.ne.s32.totalorder %s3234_s22, %s3230_s21 }
   0xc   : > { %p75_p5 = por %p74_p2, %p73_p1  ;;  %s3876_s7 = smov (%p33_p3, %s3874_s7), 0 }
   0xd   : > { %3860 = sst [smem:[#allocation7_spill]] %s3876_s7  ;;  %p80_p7 = scmp.eq.s32.totalorder %s2103_s29, 0 }
   0xe   : > { %s3353_s10 = scalar_select %p64_p4, %s3238_s23, %s66_s8  }
   0xf   : > { %p3089_p8 = scmp.lt.s32.totalorder %s3258_s28, 12  ;;  %s240_s11 = sand.u32 1, %s3238_s23  }
  0x10   : > { %p3357_p9 = por %p80_p7, %p79_p6  ;;  %s3079_s13 = smul.u32 1536, %s240_s11 }
  0x11   : > { %p3086_p10 = pnand %p3089_p8, %p75_p5  ;;  %s3080_s14 = smul.u32 1536, %s3250_s26 }
  0x12   : > { %s244_s18 = scalar_lea.vmem [#allocation3], %s3079_s13  ;;  %s241_s21 = scalar_lea.sflag [#allocation4], %s240_s11 }
  0x13   : > { %s250_s17 = scalar_lea.hbm %s3852_s1, %s3080_s14  ;;  %s253_s19 = sshll.u32 %s244_s18, 4  ;;  %s254_s19 = int_to_ptr.vmem [resolvable:$true] %s253_s19 }
  0x14   : > { %s251_s20 = sshll.u32 %s250_s17, 4  ;;  %s3260_s29 = smov 384   ;;  %s252_s20 = int_to_ptr.hbm [resolvable:$true] %s251_s20 }
  0x15   : > { %s3261_s8 = smov 24   ;;  %p2110_p11 = scmp.ge.s32.totalorder %s3258_s28, 1 }
  0x16   : > { %3088 = dma.hbm_to_vmem [thread:$0]  (!%p3086_p10), %s252_s20, 24576, %s254_s19, %s241_s21, %s3260_s29, %s3260_s29, %s3261_s8  }
  0x17   : > { %p269_p12 = scmp.lt.s32.totalorder %s3258_s28, 13 }
  0x19   : > { %p270_p13 = pnand %p2110_p11, %p269_p12 }
  0x1a   : > { %s275_s9 = sand.u32 (!%p270_p13), 1, %s3234_s22  }
  0x1b   : > { %273 = sbr.rel (%p270_p13) target bundleno = 685 (0x2ad), region = 44  ;;  %s276_s30 = scalar_lea.sflag (!%p270_p13), [#allocation4], %s275_s9 }
  0x1c   : > { %s3081_s7 = smul.u32 (!%p270_p13), 1536, %s275_s9 }
  0x1e   : > { %s3368_s15 = scalar_lea.vmem (!%p270_p13), [#allocation3], %s3081_s7 }
  0x20   : > { %3225 = dma.done.wait (%p3357_p9), %s276_s30, 24576  }
  0x21   : > { %3227 = vsyncadd (%p3357_p9), %s276_s30, 4294942720  ;;  %s2111_s11 = sshll.u32 %s3242_s24, 2  ;;  %p324_p0 = scmp.lt.s32.totalorder %s3246_s25, 1 }
  0x22   : > { %p326_p1 = scmp.lt.s32.totalorder %s2111_s11, 23  ;;  %p2115_p2 = scmp.ne.s32.totalorder %s3242_s24, 0 }
  0x23   : > { %s3878_s25 = smov (!%p324_p0, %s3246_s25), 1 }
  0x24   : > { %s3880_s11 = smov (!%p326_p1, %s2111_s11), 23  ;;  %s3082_s13 = smul.u32 24, %s3878_s25 }
  0x25   : > { %347 = sbr.rel (%p2115_p2) target bundleno = 49 (0x31), region = 52 }
  0x26   : > { %s329_s14 = sadd.s32 %s3082_s13, %s3880_s11  ;;  %s3380_s7 = scalar_lea.vmem %s3854_s3, %s3082_s13 }
  0x27   : > { %s2112_s18 = sshll.u32 %s329_s14, 2  ;;  %s3385_s30 = scalar_lea.vmem %s3857_s6, %s3082_s13 }
  0x28   : > { %s3390_s29 = scalar_lea.vmem %s3851_s0, %s2112_s18 }
  0x2a   : > { %v3262_v0 = vmov 0.0  }
  0x2b   : > { %348 = vst [vmem:[#allocation2 + $0x28] sm:$0xff] %v3262_v0 }
  0x2c   : > { %349 = vst [vmem:[#allocation2 + $0x10] sm:$0xff] %v3262_v0 }
  0x2d   : > { %350 = vst [vmem:[#allocation2 + $0x8] sm:$0xff] %v3262_v0 }
  0x2e   : > { %351 = vst [vmem:[#allocation2] sm:$0xff] %v3262_v0 }
  0x2f   : > { %352 = vst [vmem:[#allocation2 + $0x18] sm:$0xff] %v3262_v0 }
  0x30   : > { %353 = vst [vmem:[#allocation2 + $0x20] sm:$0xff] %v3262_v0 }
  0x31 PF: > { %v2286_v1 = vld [vmem:[%s3368_s15 + $0x150] sm:$0xf]  ;;  %v2932_v2 = vld [vmem:[%s3368_s15 + $0x164] sm:$0xf0]  ;;  %v2262_v12 = vld [vmem:[%s3368_s15 + $0x120] sm:$0xf] }
  0x32   : > { %v2478_v3 = vld [vmem:[%s3368_s15 + $0x2d0] sm:$0xf]  ;;  %v2287_v4 = vor.u32 %v2932_v2, %v2286_v1  ;;  %v2980_v5 = vld [vmem:[%s3368_s15 + $0x2e4] sm:$0xf0]  ;;  %v2926_v14 = vld [vmem:[%s3368_s15 + $0x134] sm:$0xf0] }
  0x33   : > { %v2670_v6 = vld [vmem:[%s3368_s15 + $0x450] sm:$0xf]  ;;  %v3028_v7 = vld [vmem:[%s3368_s15 + $0x464] sm:$0xf0]  ;;  %v2479_v8 = vor.u32 %v2980_v5, %v2478_v3  ;;  %v2454_v15 = vld [vmem:[%s3368_s15 + $0x2a0] sm:$0xf]  ;;  %v2263_v17 = vor.u32 %v2926_v14, %v2262_v12 }
  0x34   : > { %v2671_v9 = vor.u32 %v3028_v7, %v2670_v6  ;;  %v2862_v10 = vld [vmem:[%s3368_s15 + $0x5d0] sm:$0xf]  ;;  %v3076_v11 = vld [vmem:[%s3368_s15 + $0x5e4] sm:$0xf0]  ;;  %1528 = vmatpush.bf16.msra.mxu0 %v2287_v4  ;;  %v2974_v16 = vld [vmem:[%s3368_s15 + $0x2b4] sm:$0xf0] }
  0x35   : > { %v2863_v13 = vor.u32 %v3076_v11, %v2862_v10  ;;  %1541 = vmatpush.bf16.msra.mxu1 %v2479_v8  ;;  %v2455_v18 = vor.u32 %v2974_v16, %v2454_v15  ;;  %v2646_v19 = vld [vmem:[%s3368_s15 + $0x420] sm:$0xf]  ;;  %v3022_v20 = vld [vmem:[%s3368_s15 + $0x434] sm:$0xf0]  ;;  %v2238_v24 = vld [vmem:[%s3368_s15 + $0xf0] sm:$0xf] }
  0x36   : > { %1554 = vmatpush.bf16.msra.mxu2 %v2671_v9  ;;  %v2838_v21 = vld [vmem:[%s3368_s15 + $0x5a0] sm:$0xf]  ;;  %v2647_v22 = vor.u32 %v3022_v20, %v2646_v19  ;;  %v3070_v23 = vld [vmem:[%s3368_s15 + $0x5b4] sm:$0xf0]  ;;  %v2920_v25 = vld [vmem:[%s3368_s15 + $0x104] sm:$0xf0] }
  0x37   : > { %1567 = vmatpush.bf16.msra.mxu3 %v2863_v13  ;;  %v2839_v26 = vor.u32 %v3070_v23, %v2838_v21  ;;  %v2430_v27 = vld [vmem:[%s3368_s15 + $0x270] sm:$0xf]  ;;  %v2968_v28 = vld [vmem:[%s3368_s15 + $0x284] sm:$0xf0]  ;;  %v2239_v30 = vor.u32 %v2920_v25, %v2238_v24  ;;  %v2214_v36 = vld [vmem:[%s3368_s15 + $0xc0] sm:$0xf] }
  0x38   : > { %v2622_v29 = vld [vmem:[%s3368_s15 + $0x3f0] sm:$0xf]  ;;  %1529 = vmatpush.bf16.msra.mxu0 %v2263_v17  ;;  %v3016_v31 = vld [vmem:[%s3368_s15 + $0x404] sm:$0xf0]  ;;  %v2431_v34 = vor.u32 %v2968_v28, %v2430_v27  ;;  %v2914_v37 = vld [vmem:[%s3368_s15 + $0xd4] sm:$0xf0] }
  0x39   : > { %v2814_v32 = vld [vmem:[%s3368_s15 + $0x570] sm:$0xf]  ;;  %v3064_v33 = vld [vmem:[%s3368_s15 + $0x584] sm:$0xf0]  ;;  %1542 = vmatpush.bf16.msra.mxu1 %v2455_v18  ;;  %v2623_v35 = vor.u32 %v3016_v31, %v2622_v29  ;;  %v2406_v38 = vld [vmem:[%s3368_s15 + $0x240] sm:$0xf]  ;;  %v2215_v45 = vor.u32 %v2914_v37, %v2214_v36 }
  0x3a   : > { %1555 = vmatpush.bf16.msra.mxu2 %v2647_v22  ;;  %v2815_v39 = vor.u32 %v3064_v33, %v2814_v32  ;;  %v2962_v40 = vld [vmem:[%s3368_s15 + $0x254] sm:$0xf0]  ;;  %v2598_v41 = vld [vmem:[%s3368_s15 + $0x3c0] sm:$0xf]  ;;  %v2190_v48 = vld [vmem:[%s3368_s15 + $0x90] sm:$0xf] }
  0x3b   : > { %1568 = vmatpush.bf16.msra.mxu3 %v2839_v26  ;;  %v3010_v42 = vld [vmem:[%s3368_s15 + $0x3d4] sm:$0xf0]  ;;  %v2790_v43 = vld [vmem:[%s3368_s15 + $0x540] sm:$0xf]  ;;  %v2407_v46 = vor.u32 %v2962_v40, %v2406_v38  ;;  %v2908_v49 = vld [vmem:[%s3368_s15 + $0xa4] sm:$0xf0] }
  0x3c   : > { %v3058_v44 = vld [vmem:[%s3368_s15 + $0x554] sm:$0xf0]  ;;  %1530 = vmatpush.bf16.msra.mxu0 %v2239_v30  ;;  %v2599_v47 = vor.u32 %v3010_v42, %v2598_v41  ;;  %v2382_v50 = vld [vmem:[%s3368_s15 + $0x210] sm:$0xf]  ;;  %v2956_v52 = vld [vmem:[%s3368_s15 + $0x224] sm:$0xf0]  ;;  %v2191_v57 = vor.u32 %v2908_v49, %v2190_v48 }
  0x3d   : > { %1543 = vmatpush.bf16.msra.mxu1 %v2431_v34  ;;  %v2791_v51 = vor.u32 %v3058_v44, %v2790_v43  ;;  %v2574_v53 = vld [vmem:[%s3368_s15 + $0x390] sm:$0xf]  ;;  %v3004_v54 = vld [vmem:[%s3368_s15 + $0x3a4] sm:$0xf0]  ;;  %v2383_v58 = vor.u32 %v2956_v52, %v2382_v50  ;;  %v2166_v60 = vld [vmem:[%s3368_s15 + $0x60] sm:$0xf] }
  0x3e   : > { %1556 = vmatpush.bf16.msra.mxu2 %v2623_v35  ;;  %v2766_v55 = vld [vmem:[%s3368_s15 + $0x510] sm:$0xf]  ;;  %v3052_v56 = vld [vmem:[%s3368_s15 + $0x524] sm:$0xf0]  ;;  %v2575_v59 = vor.u32 %v3004_v54, %v2574_v53  ;;  %v2902_v61 = vld [vmem:[%s3368_s15 + $0x74] sm:$0xf0] }
  0x3f   : > { %1569 = vmatpush.bf16.msra.mxu3 %v2815_v39  ;;  %v2358_v62 = vld [vmem:[%s3368_s15 + $0x1e0] sm:$0xf]  ;;  %v2767_v63 = vor.u32 %v3052_v56, %v2766_v55  ;;  %v2950_v0 = vld [vmem:[%s3368_s15 + $0x1f4] sm:$0xf0]  ;;  %v2167_v5 = vor.u32 %v2902_v61, %v2166_v60  ;;  %v2142_v8 = vld [vmem:[%s3368_s15 + $0x30] sm:$0xf] }
  0x40   : > { %1531 = vmatpush.bf16.msra.mxu0 %v2215_v45  ;;  %v2550_v1 = vld [vmem:[%s3368_s15 + $0x360] sm:$0xf]  ;;  %v2998_v2 = vld [vmem:[%s3368_s15 + $0x374] sm:$0xf0]  ;;  %v2359_v6 = vor.u32 %v2950_v0, %v2358_v62  ;;  %v2896_v9 = vld [vmem:[%s3368_s15 + $0x44] sm:$0xf0] }
  0x41   : > { %1544 = vmatpush.bf16.msra.mxu1 %v2407_v46  ;;  %v2742_v3 = vld [vmem:[%s3368_s15 + $0x4e0] sm:$0xf]  ;;  %v3046_v4 = vld [vmem:[%s3368_s15 + $0x4f4] sm:$0xf0]  ;;  %v2551_v7 = vor.u32 %v2998_v2, %v2550_v1  ;;  %v2334_v10 = vld [vmem:[%s3368_s15 + $0x1b0] sm:$0xf]  ;;  %v2143_v17 = vor.u32 %v2896_v9, %v2142_v8 }
  0x42   : > { %1557 = vmatpush.bf16.msra.mxu2 %v2599_v47  ;;  %v2743_v11 = vor.u32 %v3046_v4, %v2742_v3  ;;  %v2944_v12 = vld [vmem:[%s3368_s15 + $0x1c4] sm:$0xf0]  ;;  %v2526_v13 = vld [vmem:[%s3368_s15 + $0x330] sm:$0xf]  ;;  %v2118_v18 = vld [vmem:[%s3368_s15] sm:$0xf] }
  0x43   : > { %1570 = vmatpush.bf16.msra.mxu3 %v2791_v51  ;;  %v2992_v14 = vld [vmem:[%s3368_s15 + $0x344] sm:$0xf0]  ;;  %v2718_v15 = vld [vmem:[%s3368_s15 + $0x4b0] sm:$0xf]  ;;  %v2890_v19 = vld [vmem:[%s3368_s15 + $0x14] sm:$0xf0]  ;;  %v2335_v20 = vor.u32 %v2944_v12, %v2334_v10 }
  0x44   : > { %1532 = vmatpush.bf16.msra.mxu0 %v2191_v57  ;;  %v3040_v16 = vld [vmem:[%s3368_s15 + $0x4c4] sm:$0xf0]  ;;  %v2527_v21 = vor.u32 %v2992_v14, %v2526_v13  ;;  %v2310_v22 = vld [vmem:[%s3368_s15 + $0x180] sm:$0xf]  ;;  %v2938_v23 = vld [vmem:[%s3368_s15 + $0x194] sm:$0xf0]  ;;  %v2119_v32 = vor.u32 %v2890_v19, %v2118_v18 }
  0x45   : > { %1545 = vmatpush.bf16.msra.mxu1 %v2383_v58  ;;  %v2502_v24 = vld [vmem:[%s3368_s15 + $0x300] sm:$0xf]  ;;  %v2719_v25 = vor.u32 %v3040_v16, %v2718_v15  ;;  %v2986_v26 = vld [vmem:[%s3368_s15 + $0x314] sm:$0xf0]  ;;  %v2929_v29 = vld [vmem:[%s3368_s15 + $0x154] sm:$0xf]  ;;  %v2311_v36 = vor.u32 %v2938_v23, %v2310_v22 }
  0x46   : > { %1558 = vmatpush.bf16.msra.mxu2 %v2575_v59  ;;  %v2694_v27 = vld [vmem:[%s3368_s15 + $0x480] sm:$0xf]  ;;  %v3034_v28 = vld [vmem:[%s3368_s15 + $0x494] sm:$0xf0]  ;;  %v2288_v30 = vld [vmem:[%s3368_s15 + $0x168] sm:$0xf0]  ;;  %v2503_v37 = vor.u32 %v2986_v26, %v2502_v24 }
  0x47   : > { %1571 = vmatpush.bf16.msra.mxu3 %v2767_v63  ;;  %v2977_v31 = vld [vmem:[%s3368_s15 + $0x2d4] sm:$0xf]  ;;  %v2480_v33 = vld [vmem:[%s3368_s15 + $0x2e8] sm:$0xf0]  ;;  %v2695_v40 = vor.u32 %v3034_v28, %v2694_v27  ;;  %v2291_v41 = vor.u32 %v2929_v29, %v2288_v30  ;;  %v2923_v44 = vld [vmem:[%s3368_s15 + $0x124] sm:$0xf] }
  0x48   : > { %1533 = vmatpush.bf16.msra.mxu0 %v2167_v5  ;;  %v3025_v34 = vld [vmem:[%s3368_s15 + $0x454] sm:$0xf]  ;;  %v2672_v35 = vld [vmem:[%s3368_s15 + $0x468] sm:$0xf0]  ;;  %v2483_v42 = vor.u32 %v2977_v31, %v2480_v33  ;;  %v2264_v45 = vld [vmem:[%s3368_s15 + $0x138] sm:$0xf0] }
  0x49   : > { %1546 = vmatpush.bf16.msra.mxu1 %v2359_v6  ;;  %v3073_v38 = vld [vmem:[%s3368_s15 + $0x5d4] sm:$0xf]  ;;  %v2864_v39 = vld [vmem:[%s3368_s15 + $0x5e8] sm:$0xf0]  ;;  %v2675_v43 = vor.u32 %v3025_v34, %v2672_v35  ;;  %v2971_v46 = vld [vmem:[%s3368_s15 + $0x2a4] sm:$0xf]  ;;  %v2267_v53 = vor.u32 %v2923_v44, %v2264_v45 }
  0x4a   : > { %1559 = vmatpush.bf16.msra.mxu2 %v2551_v7  ;;  %v2867_v47 = vor.u32 %v3073_v38, %v2864_v39  ;;  %v2456_v48 = vld [vmem:[%s3368_s15 + $0x2b8] sm:$0xf0]  ;;  %v3019_v49 = vld [vmem:[%s3368_s15 + $0x424] sm:$0xf]  ;;  %v2917_v56 = vld [vmem:[%s3368_s15 + $0xf4] sm:$0xf] }
  0x4b   : > { %1572 = vmatpush.bf16.msra.mxu3 %v2743_v11  ;;  %v2648_v50 = vld [vmem:[%s3368_s15 + $0x438] sm:$0xf0]  ;;  %v3067_v51 = vld [vmem:[%s3368_s15 + $0x5a4] sm:$0xf]  ;;  %v2459_v54 = vor.u32 %v2971_v46, %v2456_v48  ;;  %v2240_v57 = vld [vmem:[%s3368_s15 + $0x108] sm:$0xf0] }
  0x4c   : > { %1534 = vmatpush.bf16.msra.mxu0 %v2143_v17  ;;  %v2840_v52 = vld [vmem:[%s3368_s15 + $0x5b8] sm:$0xf0]  ;;  %v2651_v55 = vor.u32 %v3019_v49, %v2648_v50  ;;  %v2965_v58 = vld [vmem:[%s3368_s15 + $0x274] sm:$0xf]  ;;  %v2432_v60 = vld [vmem:[%s3368_s15 + $0x288] sm:$0xf0]  ;;  %v2243_v1 = vor.u32 %v2917_v56, %v2240_v57 }
  0x4d   : > { %1547 = vmatpush.bf16.msra.mxu1 %v2335_v20  ;;  %v2843_v59 = vor.u32 %v3067_v51, %v2840_v52  ;;  %v3013_v61 = vld [vmem:[%s3368_s15 + $0x3f4] sm:$0xf]  ;;  %v2624_v62 = vld [vmem:[%s3368_s15 + $0x408] sm:$0xf0]  ;;  %v361_v2 = vld [vmem:[%s3390_s29 + $0x8] sm:$0xff]  ;;  %v2435_v3 = vor.u32 %v2965_v58, %v2432_v60  ;;  %p2884_p3 = scmp.ne.s32.totalorder %s3242_s24, 5 }
  0x4e   : > { %1560 = vmatpush.bf16.msra.mxu2 %v2527_v21  ;;  %v3061_v63 = vld [vmem:[%s3368_s15 + $0x574] sm:$0xf]  ;;  %v2816_v0 = vld [vmem:[%s3368_s15 + $0x588] sm:$0xf0]  ;;  %v2627_v4 = vor.u32 %v3013_v61, %v2624_v62  ;;  %v2911_v5 = vld [vmem:[%s3368_s15 + $0xc4] sm:$0xf]  ;;  %v558_v8 = vunpack.c.l.b16 %v361_v2  ;;  %v559_v9 = vunpack.c.h.b16 %v361_v2 }
  0x4f   : > { %1573 = vmatpush.bf16.msra.mxu3 %v2719_v25  ;;  %v2216_v6 = vld [vmem:[%s3368_s15 + $0xd8] sm:$0xf0]  ;;  %v2959_v7 = vld [vmem:[%s3368_s15 + $0x244] sm:$0xf]  ;;  %v2819_v10 = vor.u32 %v3061_v63, %v2816_v0  ;;  %v360_v18 = vld [vmem:[%s3390_s29] sm:$0xff] }
  0x50   : > { %1535 = vmatpush.bf16.msra.mxu0 %v2119_v32  ;;  %v2408_v11 = vld [vmem:[%s3368_s15 + $0x258] sm:$0xf0]  ;;  %v3007_v12 = vld [vmem:[%s3368_s15 + $0x3c4] sm:$0xf]  ;;  %v3490_v16 = vpack.c.b16 %v558_v8, %v558_v8  ;;  %v3492_v17 = vpack.c.b16 %v559_v9, %v559_v9  ;;  %v2219_v19 = vor.u32 %v2911_v5, %v2216_v6  ;;  %v556_v20 = vunpack.c.l.b16 %v360_v18  ;;  %v2905_v24 = vld [vmem:[%s3368_s15 + $0x94] sm:$0xf] }
  0x51   : > { %1548 = vmatpush.bf16.msra.mxu1 %v2311_v36  ;;  %v2600_v13 = vld [vmem:[%s3368_s15 + $0x3d8] sm:$0xf0]  ;;  %v3055_v14 = vld [vmem:[%s3368_s15 + $0x544] sm:$0xf]  ;;  %v557_v21 = vunpack.c.h.b16 %v360_v18  ;;  %v2411_v22 = vor.u32 %v2959_v7, %v2408_v11  ;;  %v2192_v25 = vld [vmem:[%s3368_s15 + $0xa8] sm:$0xf0] }
  0x52   : > { %1561 = vmatpush.bf16.msra.mxu2 %v2503_v37  ;;  %v2792_v15 = vld [vmem:[%s3368_s15 + $0x558] sm:$0xf0]  ;;  %v2603_v23 = vor.u32 %v3007_v12, %v2600_v13  ;;  %v2953_v26 = vld [vmem:[%s3368_s15 + $0x214] sm:$0xf]  ;;  %v2384_v28 = vld [vmem:[%s3368_s15 + $0x228] sm:$0xf0]  ;;  %v3502_v31 = vpack.c.b16 %v556_v20, %v556_v20  ;;  %v2195_v35 = vor.u32 %v2905_v24, %v2192_v25 }
  0x53   : > { %1574 = vmatpush.bf16.msra.mxu3 %v2695_v40  ;;  %v2795_v27 = vor.u32 %v3055_v14, %v2792_v15  ;;  %v3001_v29 = vld [vmem:[%s3368_s15 + $0x394] sm:$0xf]  ;;  %v2576_v30 = vld [vmem:[%s3368_s15 + $0x3a8] sm:$0xf0]  ;;  %v3504_v32 = vpack.c.b16 %v557_v21, %v557_v21  ;;  %v2387_v36 = vor.u32 %v2953_v26, %v2384_v28  ;;  %v2899_v38 = vld [vmem:[%s3368_s15 + $0x64] sm:$0xf] }
  0x54   : > { %1580 = vmatpush.bf16.msrb.mxu0 %v2291_v41  ;;  %v3049_v33 = vld [vmem:[%s3368_s15 + $0x514] sm:$0xf]  ;;  %v2768_v34 = vld [vmem:[%s3368_s15 + $0x528] sm:$0xf0]  ;;  %v2579_v37 = vor.u32 %v3001_v29, %v2576_v30  ;;  %v2168_v39 = vld [vmem:[%s3368_s15 + $0x78] sm:$0xf0] }
  0x55   : > { %1593 = vmatpush.bf16.msrb.mxu1 %v2483_v42  ;;  %1562 = vmatmul.bf16.vlgmr.msra.gmra.mxu2 %v3490_v16  ;;  %v2947_v40 = vld [vmem:[%s3368_s15 + $0x1e4] sm:$0xf]  ;;  %v2771_v41 = vor.u32 %v3049_v33, %v2768_v34  ;;  %v2360_v42 = vld [vmem:[%s3368_s15 + $0x1f8] sm:$0xf0]  ;;  %v2893_v50 = vld [vmem:[%s3368_s15 + $0x34] sm:$0xf] }
  0x56   : > { %1606 = vmatpush.bf16.msrb.mxu2 %v2675_v43  ;;  %1575 = vmatmul.bf16.vlgmr.msra.gmra.mxu3 %v3492_v17  ;;  %v2995_v43 = vld [vmem:[%s3368_s15 + $0x364] sm:$0xf]  ;;  %v2552_v44 = vld [vmem:[%s3368_s15 + $0x378] sm:$0xf0]  ;;  %v2363_v48 = vor.u32 %v2947_v40, %v2360_v42  ;;  %v2144_v51 = vld [vmem:[%s3368_s15 + $0x48] sm:$0xf0] }
  0x57   : > { %1619 = vmatpush.bf16.msrb.mxu3 %v2867_v47  ;;  %1549 = vmatmul.bf16.vlgmr.msra.gmra.mxu1 %v3504_v32  ;;  %v3043_v45 = vld [vmem:[%s3368_s15 + $0x4e4] sm:$0xf]  ;;  %v2744_v46 = vld [vmem:[%s3368_s15 + $0x4f8] sm:$0xf0]  ;;  %v2171_v47 = vor.u32 %v2899_v38, %v2168_v39  ;;  %v2555_v49 = vor.u32 %v2995_v43, %v2552_v44  ;;  %v2941_v52 = vld [vmem:[%s3368_s15 + $0x1b4] sm:$0xf] }
  0x58   : > { %1581 = vmatpush.bf16.msrb.mxu0 %v2267_v53  ;;  %v2747_v53 = vor.u32 %v3043_v45, %v2744_v46  ;;  %v2528_v56 = vld [vmem:[%s3368_s15 + $0x348] sm:$0xf0]  ;;  %v3037_v57 = vld [vmem:[%s3368_s15 + $0x4b4] sm:$0xf]  ;;  %v2887_v60 = vld [vmem:[%s3368_s15 + $0x4] sm:$0xf] }
  0x59   : > { %1594 = vmatpush.bf16.msrb.mxu1 %v2459_v54  ;;  %1536 = vmatmul.bf16.vlgmr.msra.gmra.mxu0 %v3502_v31  ;;  %v2336_v54 = vld [vmem:[%s3368_s15 + $0x1c8] sm:$0xf0]  ;;  %v2120_v61 = vld [vmem:[%s3368_s15 + $0x18] sm:$0xf0]  ;;  %v2935_v0 = vld [vmem:[%s3368_s15 + $0x184] sm:$0xf] }
  0x5a   : > { %1607 = vmatpush.bf16.msrb.mxu2 %v2651_v55  ;;  %v2989_v55 = vld [vmem:[%s3368_s15 + $0x334] sm:$0xf]  ;;  %v2720_v58 = vld [vmem:[%s3368_s15 + $0x4c8] sm:$0xf0]  ;;  %v2339_v62 = vor.u32 %v2941_v52, %v2336_v54  ;;  %v2983_v2 = vld [vmem:[%s3368_s15 + $0x304] sm:$0xf] }
  0x5b   : > { %1620 = vmatpush.bf16.msrb.mxu3 %v2843_v59  ;;  %v2147_v59 = vor.u32 %v2893_v50, %v2144_v51  ;;  %v2531_v63 = vor.u32 %v2989_v55, %v2528_v56  ;;  %v3031_v5 = vld [vmem:[%s3368_s15 + $0x484] sm:$0xf]  ;;  %v2696_v6 = vld [vmem:[%s3368_s15 + $0x498] sm:$0xf0]  ;;  %v2294_v7 = vld [vmem:[%s3368_s15 + $0x158] sm:$0xf] }
  0x5c   : > { %1582 = vmatpush.bf16.msrb.mxu0 %v2243_v1  ;;  %v2312_v1 = vld [vmem:[%s3368_s15 + $0x198] sm:$0xf0]  ;;  %v2933_v8 = vld [vmem:[%s3368_s15 + $0x16c] sm:$0xf0]  ;;  %v2486_v9 = vld [vmem:[%s3368_s15 + $0x2d8] sm:$0xf]  ;;  %v2699_v20 = vor.u32 %v3031_v5, %v2696_v6 }
  0x5d   : > { %1595 = vmatpush.bf16.msrb.mxu1 %v2435_v3  ;;  %v2723_v3 = vor.u32 %v3037_v57, %v2720_v58  ;;  %v2981_v11 = vld [vmem:[%s3368_s15 + $0x2ec] sm:$0xf0]  ;;  %v2678_v12 = vld [vmem:[%s3368_s15 + $0x458] sm:$0xf]  ;;  %v2315_v14 = vor.u32 %v2935_v0, %v2312_v1  ;;  %v2295_v21 = vor.u32 %v2933_v8, %v2294_v7  ;;  %v2270_v24 = vld [vmem:[%s3368_s15 + $0x128] sm:$0xf] }
  0x5e   : > { %1608 = vmatpush.bf16.msrb.mxu2 %v2627_v4  ;;  %v2504_v4 = vld [vmem:[%s3368_s15 + $0x318] sm:$0xf0]  ;;  %v3029_v13 = vld [vmem:[%s3368_s15 + $0x46c] sm:$0xf0]  ;;  %v2870_v18 = vld [vmem:[%s3368_s15 + $0x5d8] sm:$0xf] }
  0x5f   : > { %1621 = vmatpush.bf16.msrb.mxu3 %v2819_v10  ;;  %v2123_v10 = vor.u32 %v2887_v60, %v2120_v61  ;;  %v2507_v15 = vor.u32 %v2983_v2, %v2504_v4  ;;  %v2927_v25 = vld [vmem:[%s3368_s15 + $0x13c] sm:$0xf0]  ;;  %v2462_v26 = vld [vmem:[%s3368_s15 + $0x2a8] sm:$0xf]  ;;  %v2246_v38 = vld [vmem:[%s3368_s15 + $0xf8] sm:$0xf] }
  0x60   : > { %1583 = vmatpush.bf16.msrb.mxu0 %v2219_v19  ;;  %v3077_v19 = vld [vmem:[%s3368_s15 + $0x5ec] sm:$0xf0]  ;;  %v2975_v28 = vld [vmem:[%s3368_s15 + $0x2bc] sm:$0xf0]  ;;  %v2654_v29 = vld [vmem:[%s3368_s15 + $0x428] sm:$0xf] }
  0x61   : > { %1596 = vmatpush.bf16.msrb.mxu1 %v2411_v22  ;;  %v2487_v22 = vor.u32 %v2981_v11, %v2486_v9  ;;  %v3023_v30 = vld [vmem:[%s3368_s15 + $0x43c] sm:$0xf0]  ;;  %v2846_v33 = vld [vmem:[%s3368_s15 + $0x5a8] sm:$0xf]  ;;  %v2921_v39 = vld [vmem:[%s3368_s15 + $0x10c] sm:$0xf0] }
  0x62   : > { %1609 = vmatpush.bf16.msrb.mxu2 %v2603_v23  ;;  %v2679_v23 = vor.u32 %v3029_v13, %v2678_v12  ;;  %v3071_v34 = vld [vmem:[%s3368_s15 + $0x5bc] sm:$0xf0]  ;;  %v2438_v40 = vld [vmem:[%s3368_s15 + $0x278] sm:$0xf]  ;;  %v2969_v42 = vld [vmem:[%s3368_s15 + $0x28c] sm:$0xf0] }
  0x63   : > { %1622 = vmatpush.bf16.msrb.mxu3 %v2795_v27  ;;  %v2871_v27 = vor.u32 %v3077_v19, %v2870_v18  ;;  %v2630_v43 = vld [vmem:[%s3368_s15 + $0x3f8] sm:$0xf]  ;;  %v3017_v44 = vld [vmem:[%s3368_s15 + $0x40c] sm:$0xf0]  ;;  %v2222_v50 = vld [vmem:[%s3368_s15 + $0xc8] sm:$0xf] }
  0x64   : > { %1584 = vmatpush.bf16.msrb.mxu0 %v2195_v35  ;;  %v2271_v35 = vor.u32 %v2927_v25, %v2270_v24  ;;  %v2822_v45 = vld [vmem:[%s3368_s15 + $0x578] sm:$0xf]  ;;  %v3065_v46 = vld [vmem:[%s3368_s15 + $0x58c] sm:$0xf0]  ;;  %v2915_v51 = vld [vmem:[%s3368_s15 + $0xdc] sm:$0xf0] }
  0x65   : > { %1597 = vmatpush.bf16.msrb.mxu1 %v2387_v36  ;;  %v2463_v36 = vor.u32 %v2975_v28, %v2462_v26  ;;  %v2414_v52 = vld [vmem:[%s3368_s15 + $0x248] sm:$0xf]  ;;  %v2963_v54 = vld [vmem:[%s3368_s15 + $0x25c] sm:$0xf0]  ;;  %v2390_v0 = vld [vmem:[%s3368_s15 + $0x218] sm:$0xf] }
  0x66   : > { %1610 = vmatpush.bf16.msrb.mxu2 %v2579_v37  ;;  %v2655_v37 = vor.u32 %v3023_v30, %v2654_v29  ;;  %v2606_v55 = vld [vmem:[%s3368_s15 + $0x3c8] sm:$0xf]  ;;  %v3011_v56 = vld [vmem:[%s3368_s15 + $0x3dc] sm:$0xf0]  ;;  %v2415_v60 = vor.u32 %v2963_v54, %v2414_v52  ;;  %v2957_v2 = vld [vmem:[%s3368_s15 + $0x22c] sm:$0xf0] }
  0x67   : > { %1623 = vmatpush.bf16.msrb.mxu3 %v2771_v41  ;;  %v2847_v41 = vor.u32 %v3071_v34, %v2846_v33  ;;  %v2798_v57 = vld [vmem:[%s3368_s15 + $0x548] sm:$0xf]  ;;  %v3059_v58 = vld [vmem:[%s3368_s15 + $0x55c] sm:$0xf0]  ;;  %v2607_v61 = vor.u32 %v3011_v56, %v2606_v55  ;;  %v3005_v4 = vld [vmem:[%s3368_s15 + $0x3ac] sm:$0xf0]  ;;  %v2391_v8 = vor.u32 %v2957_v2, %v2390_v0 }
  0x68   : > { %1585 = vmatpush.bf16.msrb.mxu0 %v2171_v47  ;;  %v2247_v47 = vor.u32 %v2921_v39, %v2246_v38  ;;  %v2799_v1 = vor.u32 %v3059_v58, %v2798_v57  ;;  %v2774_v5 = vld [vmem:[%s3368_s15 + $0x518] sm:$0xf]  ;;  %v3053_v6 = vld [vmem:[%s3368_s15 + $0x52c] sm:$0xf0]  ;;  %v2903_v11 = vld [vmem:[%s3368_s15 + $0x7c] sm:$0xf0] }
  0x69   : > { %1598 = vmatpush.bf16.msrb.mxu1 %v2363_v48  ;;  %v2439_v48 = vor.u32 %v2969_v42, %v2438_v40  ;;  %v2366_v12 = vld [vmem:[%s3368_s15 + $0x1e8] sm:$0xf]  ;;  %v2775_v13 = vor.u32 %v3053_v6, %v2774_v5  ;;  %v2999_v18 = vld [vmem:[%s3368_s15 + $0x37c] sm:$0xf0]  ;;  %v2150_v24 = vld [vmem:[%s3368_s15 + $0x38] sm:$0xf] }
  0x6a   : > { %1611 = vmatpush.bf16.msrb.mxu2 %v2555_v49  ;;  %v2631_v49 = vor.u32 %v3017_v44, %v2630_v43  ;;  %v2750_v19 = vld [vmem:[%s3368_s15 + $0x4e8] sm:$0xf]  ;;  %v2897_v25 = vld [vmem:[%s3368_s15 + $0x4c] sm:$0xf0]  ;;  %v2342_v26 = vld [vmem:[%s3368_s15 + $0x1b8] sm:$0xf] }
  0x6b   : > { %1624 = vmatpush.bf16.msrb.mxu3 %v2747_v53  ;;  %v2823_v53 = vor.u32 %v3065_v46, %v2822_v45  ;;  %v2945_v28 = vld [vmem:[%s3368_s15 + $0x1cc] sm:$0xf0]  ;;  %v2534_v29 = vld [vmem:[%s3368_s15 + $0x338] sm:$0xf]  ;;  %v2318_v40 = vld [vmem:[%s3368_s15 + $0x188] sm:$0xf] }
  0x6c   : > { %1586 = vmatpush.bf16.msrb.mxu0 %v2147_v59  ;;  %v2223_v59 = vor.u32 %v2915_v51, %v2222_v50  ;;  %v2993_v30 = vld [vmem:[%s3368_s15 + $0x34c] sm:$0xf0]  ;;  %v2726_v33 = vld [vmem:[%s3368_s15 + $0x4b8] sm:$0xf]  ;;  %v2343_v38 = vor.u32 %v2945_v28, %v2342_v26  ;;  %v2510_v42 = vld [vmem:[%s3368_s15 + $0x308] sm:$0xf] }
  0x6d   : > { %1599 = vmatpush.bf16.msrb.mxu1 %v2339_v62  ;;  %v2198_v62 = vld [vmem:[%s3368_s15 + $0x98] sm:$0xf]  ;;  %v3041_v34 = vld [vmem:[%s3368_s15 + $0x4cc] sm:$0xf0]  ;;  %v2535_v39 = vor.u32 %v2993_v30, %v2534_v29  ;;  %v2987_v44 = vld [vmem:[%s3368_s15 + $0x31c] sm:$0xf0] }
  0x6e   : > { %1612 = vmatpush.bf16.msrb.mxu2 %v2531_v63  ;;  %v2909_v63 = vld [vmem:[%s3368_s15 + $0xac] sm:$0xf0]  ;;  %v2727_v43 = vor.u32 %v3041_v34, %v2726_v33  ;;  %v2702_v45 = vld [vmem:[%s3368_s15 + $0x488] sm:$0xf]  ;;  %v3035_v46 = vld [vmem:[%s3368_s15 + $0x49c] sm:$0xf0]  ;;  %v2511_v55 = vor.u32 %v2987_v44, %v2510_v42 }
  0x6f   : > { %1625 = vmatpush.bf16.msrb.mxu3 %v2723_v3  ;;  %v2582_v3 = vld [vmem:[%s3368_s15 + $0x398] sm:$0xf]  ;;  %v2199_v7 = vor.u32 %v2909_v63, %v2198_v62  ;;  %v2488_v51 = vld [vmem:[%s3368_s15 + $0x2f0] sm:$0xf0]  ;;  %v3026_v52 = vld [vmem:[%s3368_s15 + $0x45c] sm:$0xf]  ;;  %v2703_v58 = vor.u32 %v3035_v46, %v2702_v45 }
  0x70   : > { %1587 = vmatpush.bf16.msrb.mxu0 %v2123_v10  ;;  %v2583_v9 = vor.u32 %v3005_v4, %v2582_v3  ;;  %v2174_v10 = vld [vmem:[%s3368_s15 + $0x68] sm:$0xf]  ;;  %v3074_v56 = vld [vmem:[%s3368_s15 + $0x5dc] sm:$0xf]  ;;  %v2872_v57 = vld [vmem:[%s3368_s15 + $0x5f0] sm:$0xf0] }
  0x71   : > { %1600 = vmatpush.bf16.msrb.mxu1 %v2315_v14  ;;  %v2951_v14 = vld [vmem:[%s3368_s15 + $0x1fc] sm:$0xf0]  ;;  %v2924_v62 = vld [vmem:[%s3368_s15 + $0x12c] sm:$0xf]  ;;  %v2272_v63 = vld [vmem:[%s3368_s15 + $0x140] sm:$0xf0] }
  0x72   : > { %1613 = vmatpush.bf16.msrb.mxu2 %v2507_v15  ;;  %v2558_v15 = vld [vmem:[%s3368_s15 + $0x368] sm:$0xf]  ;;  %v2972_v0 = vld [vmem:[%s3368_s15 + $0x2ac] sm:$0xf]  ;;  %v2464_v2 = vld [vmem:[%s3368_s15 + $0x2c0] sm:$0xf0] }
  0x73   : > { %1626 = vmatpush.bf16.msrb.mxu3 %v2699_v20  ;;  %1588 = vmatmul.bf16.vlgmr.msrb.gmra.mxu0 %v3502_v31  ;;  %v3047_v20 = vld [vmem:[%s3368_s15 + $0x4fc] sm:$0xf0]  ;;  %v3020_v3 = vld [vmem:[%s3368_s15 + $0x42c] sm:$0xf]  ;;  %v2656_v4 = vld [vmem:[%s3368_s15 + $0x440] sm:$0xf0] }
  0x74   : > { %1632 = vmatpush.bf16.msra.mxu0 %v2295_v21  ;;  %1601 = vmatmul.bf16.vlgmr.msrb.gmra.mxu1 %v3504_v32  ;;  %v2175_v21 = vor.u32 %v2903_v11, %v2174_v10  ;;  %v3068_v5 = vld [vmem:[%s3368_s15 + $0x5ac] sm:$0xf]  ;;  %v2848_v6 = vld [vmem:[%s3368_s15 + $0x5c0] sm:$0xf0]  ;;  %v2918_v10 = vld [vmem:[%s3368_s15 + $0xfc] sm:$0xf] }
  0x75   : > { %1645 = vmatpush.bf16.msra.mxu1 %v2487_v22  ;;  %1614 = vmatmul.bf16.vlgmr.msrb.gmra.mxu2 %v3490_v16  ;;  %v2367_v22 = vor.u32 %v2951_v14, %v2366_v12  ;;  %v2248_v11 = vld [vmem:[%s3368_s15 + $0x110] sm:$0xf0]  ;;  %v2966_v12 = vld [vmem:[%s3368_s15 + $0x27c] sm:$0xf]  ;;  %v2960_v26 = vld [vmem:[%s3368_s15 + $0x24c] sm:$0xf] }
  0x76   : > { %1658 = vmatpush.bf16.msra.mxu2 %v2679_v23  ;;  %1627 = vmatmul.bf16.vlgmr.msrb.gmra.mxu3 %v3492_v17  ;;  %v2559_v23 = vor.u32 %v2999_v18, %v2558_v15  ;;  %v2440_v14 = vld [vmem:[%s3368_s15 + $0x290] sm:$0xf0]  ;;  %v3014_v15 = vld [vmem:[%s3368_s15 + $0x3fc] sm:$0xf]  ;;  %v2416_v28 = vld [vmem:[%s3368_s15 + $0x260] sm:$0xf0] }
  0x77   : > { %1671 = vmatpush.bf16.msra.mxu3 %v2871_v27  ;;  %v2751_v27 = vor.u32 %v3047_v20, %v2750_v19  ;;  %v2632_v18 = vld [vmem:[%s3368_s15 + $0x410] sm:$0xf0]  ;;  %v3062_v19 = vld [vmem:[%s3368_s15 + $0x57c] sm:$0xf]  ;;  %v3008_v29 = vld [vmem:[%s3368_s15 + $0x3cc] sm:$0xf] }
  0x78   : > { %1633 = vmatpush.bf16.msra.mxu0 %v2271_v35  ;;  %v2151_v35 = vor.u32 %v2897_v25, %v2150_v24  ;;  %v2824_v20 = vld [vmem:[%s3368_s15 + $0x590] sm:$0xf0]  ;;  %v2912_v24 = vld [vmem:[%s3368_s15 + $0xcc] sm:$0xf]  ;;  %v2224_v25 = vld [vmem:[%s3368_s15 + $0xe0] sm:$0xf0] }
  0x79   : > { %1646 = vmatpush.bf16.msra.mxu1 %v2463_v36  ;;  %v2126_v36 = vld [vmem:[%s3368_s15 + $0x8] sm:$0xf]  ;;  %v2608_v30 = vld [vmem:[%s3368_s15 + $0x3e0] sm:$0xf0]  ;;  %v3056_v33 = vld [vmem:[%s3368_s15 + $0x54c] sm:$0xf] }
  0x7a   : > { %1659 = vmatpush.bf16.msra.mxu2 %v2655_v37  ;;  %v2891_v37 = vld [vmem:[%s3368_s15 + $0x1c] sm:$0xf0]  ;;  %v2800_v34 = vld [vmem:[%s3368_s15 + $0x560] sm:$0xf0]  ;;  %v2392_v42 = vld [vmem:[%s3368_s15 + $0x230] sm:$0xf0] }
  0x7b   : > { %1672 = vmatpush.bf16.msra.mxu3 %v2847_v41  ;;  %v2939_v41 = vld [vmem:[%s3368_s15 + $0x19c] sm:$0xf0]  ;;  %v2127_v50 = vor.u32 %v2891_v37, %v2126_v36  ;;  %v2419_v36 = vor.u32 %v2960_v26, %v2416_v28  ;;  %v2611_v37 = vor.u32 %v3008_v29, %v2608_v30  ;;  %v2584_v44 = vld [vmem:[%s3368_s15 + $0x3b0] sm:$0xf0]  ;;  %v3050_v45 = vld [vmem:[%s3368_s15 + $0x51c] sm:$0xf] }
  0x7c   : > { %1634 = vmatpush.bf16.msra.mxu0 %v2247_v47  ;;  %v2930_v47 = vld [vmem:[%s3368_s15 + $0x15c] sm:$0xf]  ;;  %v2319_v54 = vor.u32 %v2939_v41, %v2318_v40  ;;  %v2803_v41 = vor.u32 %v3056_v33, %v2800_v34  ;;  %v2776_v46 = vld [vmem:[%s3368_s15 + $0x530] sm:$0xf0]  ;;  %v2686_v26 = vld [vmem:[%s3368_s15 + $0x460] sm:$0xf] }
  0x7d   : > { %1647 = vmatpush.bf16.msra.mxu1 %v2439_v48  ;;  %v2296_v48 = vld [vmem:[%s3368_s15 + $0x170] sm:$0xf0]  ;;  %v2954_v40 = vld [vmem:[%s3368_s15 + $0x21c] sm:$0xf]  ;;  %v2878_v30 = vld [vmem:[%s3368_s15 + $0x5e0] sm:$0xf] }
  0x7e   : > { %1660 = vmatpush.bf16.msra.mxu2 %v2631_v49  ;;  %v2978_v49 = vld [vmem:[%s3368_s15 + $0x2dc] sm:$0xf]  ;;  %v3078_v33 = vld [vmem:[%s3368_s15 + $0x5f4] sm:$0xf0] }
  0x7f   : > { %1673 = vmatpush.bf16.msra.mxu3 %v2823_v53  ;;  %v2680_v53 = vld [vmem:[%s3368_s15 + $0x470] sm:$0xf0] }
  0x80   : > { %1635 = vmatpush.bf16.msra.mxu0 %v2223_v59  ;;  %v2299_v59 = vor.u32 %v2930_v47, %v2296_v48  ;;  %v2395_v48 = vor.u32 %v2954_v40, %v2392_v42  ;;  %v2470_v40 = vld [vmem:[%s3368_s15 + $0x2b0] sm:$0xf]  ;;  %v2976_v42 = vld [vmem:[%s3368_s15 + $0x2c4] sm:$0xf0] }
  0x81   : > { %1648 = vmatpush.bf16.msra.mxu1 %v2415_v60  ;;  %v2491_v60 = vor.u32 %v2978_v49, %v2488_v51  ;;  %v2176_v51 = vld [vmem:[%s3368_s15 + $0x80] sm:$0xf0] }
  0x82   : > { %1661 = vmatpush.bf16.msra.mxu2 %v2607_v61  ;;  %v2683_v61 = vor.u32 %v3026_v52, %v2680_v53  ;;  %v2948_v52 = vld [vmem:[%s3368_s15 + $0x1ec] sm:$0xf]  ;;  %v2779_v53 = vor.u32 %v3050_v45, %v2776_v46  ;;  %v2854_v45 = vld [vmem:[%s3368_s15 + $0x5b0] sm:$0xf]  ;;  %v3072_v46 = vld [vmem:[%s3368_s15 + $0x5c4] sm:$0xf0] }
  0x83   : > { %1674 = vmatpush.bf16.msra.mxu3 %v2799_v1  ;;  %v2875_v1 = vor.u32 %v3074_v56, %v2872_v57  ;;  %v2560_v56 = vld [vmem:[%s3368_s15 + $0x380] sm:$0xf0]  ;;  %v3044_v57 = vld [vmem:[%s3368_s15 + $0x4ec] sm:$0xf] }
  0x84   : > { %1636 = vmatpush.bf16.msra.mxu0 %v2199_v7  ;;  %v2275_v7 = vor.u32 %v2924_v62, %v2272_v63  ;;  %v2894_v62 = vld [vmem:[%s3368_s15 + $0x3c] sm:$0xf]  ;;  %v2152_v63 = vld [vmem:[%s3368_s15 + $0x50] sm:$0xf0] }
  0x85   : > { %1649 = vmatpush.bf16.msra.mxu1 %v2391_v8  ;;  %v2467_v8 = vor.u32 %v2972_v0, %v2464_v2  ;;  %v2942_v0 = vld [vmem:[%s3368_s15 + $0x1bc] sm:$0xf]  ;;  %v2344_v2 = vld [vmem:[%s3368_s15 + $0x1d0] sm:$0xf0] }
  0x86   : > { %1662 = vmatpush.bf16.msra.mxu2 %v2583_v9  ;;  %v2659_v9 = vor.u32 %v3020_v3, %v2656_v4  ;;  %v2990_v3 = vld [vmem:[%s3368_s15 + $0x33c] sm:$0xf]  ;;  %v2536_v4 = vld [vmem:[%s3368_s15 + $0x350] sm:$0xf0] }
  0x87   : > { %1675 = vmatpush.bf16.msra.mxu3 %v2775_v13  ;;  %v2851_v13 = vor.u32 %v3068_v5, %v2848_v6  ;;  %v3038_v5 = vld [vmem:[%s3368_s15 + $0x4bc] sm:$0xf]  ;;  %v2728_v6 = vld [vmem:[%s3368_s15 + $0x4d0] sm:$0xf0] }
  0x88   : > { %1637 = vmatpush.bf16.msra.mxu0 %v2175_v21  ;;  %v2251_v21 = vor.u32 %v2918_v10, %v2248_v11  ;;  %v2347_v10 = vor.u32 %v2942_v0, %v2344_v2  ;;  %v2539_v11 = vor.u32 %v2990_v3, %v2536_v4  ;;  %v2422_v0 = vld [vmem:[%s3368_s15 + $0x250] sm:$0xf]  ;;  %v2964_v2 = vld [vmem:[%s3368_s15 + $0x264] sm:$0xf0] }
  0x89   : > { %1650 = vmatpush.bf16.msra.mxu1 %v2367_v22  ;;  %v2443_v22 = vor.u32 %v2966_v12, %v2440_v14  ;;  %v2936_v12 = vld [vmem:[%s3368_s15 + $0x18c] sm:$0xf]  ;;  %v2614_v3 = vld [vmem:[%s3368_s15 + $0x3d0] sm:$0xf]  ;;  %v3012_v4 = vld [vmem:[%s3368_s15 + $0x3e4] sm:$0xf0] }
  0x8a   : > { %1663 = vmatpush.bf16.msra.mxu2 %v2559_v23  ;;  %v2635_v23 = vor.u32 %v3014_v15, %v2632_v18  ;;  %v2984_v14 = vld [vmem:[%s3368_s15 + $0x30c] sm:$0xf]  ;;  %v2731_v15 = vor.u32 %v3038_v5, %v2728_v6  ;;  %v2512_v18 = vld [vmem:[%s3368_s15 + $0x320] sm:$0xf0]  ;;  %v2806_v5 = vld [vmem:[%s3368_s15 + $0x550] sm:$0xf] }
  0x8b   : > { %1676 = vmatpush.bf16.msra.mxu3 %v2751_v27  ;;  %v2827_v27 = vor.u32 %v3062_v19, %v2824_v20  ;;  %v3032_v19 = vld [vmem:[%s3368_s15 + $0x48c] sm:$0xf]  ;;  %v2704_v20 = vld [vmem:[%s3368_s15 + $0x4a0] sm:$0xf0]  ;;  %v2515_v29 = vor.u32 %v2984_v14, %v2512_v18  ;;  %v3060_v6 = vld [vmem:[%s3368_s15 + $0x564] sm:$0xf0] }
  0x8c   : > { %1638 = vmatpush.bf16.msra.mxu0 %v2151_v35  ;;  %v2227_v35 = vor.u32 %v2912_v24, %v2224_v25  ;;  %v2982_v25 = vld [vmem:[%s3368_s15 + $0x2f4] sm:$0xf0]  ;;  %v2707_v34 = vor.u32 %v3032_v19, %v2704_v20  ;;  %v2782_v19 = vld [vmem:[%s3368_s15 + $0x520] sm:$0xf] }
  0x8d   : > { %1651 = vmatpush.bf16.msra.mxu1 %v2343_v38  ;;  %v2906_v38 = vld [vmem:[%s3368_s15 + $0x9c] sm:$0xf]  ;;  %v2958_v14 = vld [vmem:[%s3368_s15 + $0x234] sm:$0xf0] }
  0x8e   : > { %1664 = vmatpush.bf16.msra.mxu2 %v2535_v39  ;;  %v2200_v39 = vld [vmem:[%s3368_s15 + $0xb0] sm:$0xf0]  ;;  %v3006_v18 = vld [vmem:[%s3368_s15 + $0x3b4] sm:$0xf0] }
  0x8f   : > { %1677 = vmatpush.bf16.msra.mxu3 %v2727_v43  ;;  %v3002_v43 = vld [vmem:[%s3368_s15 + $0x39c] sm:$0xf]  ;;  %v2203_v47 = vor.u32 %v2906_v38, %v2200_v39  ;;  %v2278_v38 = vld [vmem:[%s3368_s15 + $0x130] sm:$0xf]  ;;  %v2928_v39 = vld [vmem:[%s3368_s15 + $0x144] sm:$0xf0] }
  0x90   : > { %1639 = vmatpush.bf16.msra.mxu0 %v2127_v50  ;;  %v2587_v49 = vor.u32 %v3002_v43, %v2584_v44  ;;  %v2900_v50 = vld [vmem:[%s3368_s15 + $0x6c] sm:$0xf]  ;;  %v2662_v43 = vld [vmem:[%s3368_s15 + $0x430] sm:$0xf]  ;;  %v3024_v44 = vld [vmem:[%s3368_s15 + $0x444] sm:$0xf0] }
  0x91   : > { %1652 = vmatpush.bf16.msra.mxu1 %v2319_v54  ;;  %v2368_v54 = vld [vmem:[%s3368_s15 + $0x200] sm:$0xf0]  ;;  %v3054_v20 = vld [vmem:[%s3368_s15 + $0x534] sm:$0xf0] }
  0x92   : > { %1665 = vmatpush.bf16.msra.mxu2 %v2511_v55  ;;  %v2996_v55 = vld [vmem:[%s3368_s15 + $0x36c] sm:$0xf] }
  0x93   : > { %1678 = vmatpush.bf16.msra.mxu3 %v2703_v58  ;;  %1640 = vmatmul.bf16.vlgmr.msra.gmra.mxu0 %v3502_v31  ;;  %v2752_v58 = vld [vmem:[%s3368_s15 + $0x500] sm:$0xf0] }
  0x94   : > { %1684 = vmatpush.bf16.msrb.mxu0 %v2299_v59  ;;  %1653 = vmatmul.bf16.vlgmr.msra.gmra.mxu1 %v3504_v32  ;;  %v2179_v59 = vor.u32 %v2900_v50, %v2176_v51  ;;  %v2254_v50 = vld [vmem:[%s3368_s15 + $0x100] sm:$0xf]  ;;  %v2922_v51 = vld [vmem:[%s3368_s15 + $0x114] sm:$0xf0] }
  0x95   : > { %1697 = vmatpush.bf16.msrb.mxu1 %v2491_v60  ;;  %1666 = vmatmul.bf16.vlgmr.msra.gmra.mxu2 %v3490_v16  ;;  %v2371_v60 = vor.u32 %v2948_v52, %v2368_v54  ;;  %v2446_v52 = vld [vmem:[%s3368_s15 + $0x280] sm:$0xf]  ;;  %v2970_v54 = vld [vmem:[%s3368_s15 + $0x294] sm:$0xf0] }
  0x96   : > { %1710 = vmatpush.bf16.msrb.mxu2 %v2683_v61  ;;  %1679 = vmatmul.bf16.vlgmr.msra.gmra.mxu3 %v3492_v17  ;;  %v2563_v61 = vor.u32 %v2996_v55, %v2560_v56  ;;  %v2638_v55 = vld [vmem:[%s3368_s15 + $0x400] sm:$0xf]  ;;  %v3018_v56 = vld [vmem:[%s3368_s15 + $0x414] sm:$0xf0] }
  0x97   : > { %1723 = vmatpush.bf16.msrb.mxu3 %v2875_v1  ;;  %v2755_v1 = vor.u32 %v3044_v57, %v2752_v58  ;;  %v2830_v57 = vld [vmem:[%s3368_s15 + $0x580] sm:$0xf]  ;;  %v3066_v58 = vld [vmem:[%s3368_s15 + $0x594] sm:$0xf0] }
  0x98   : > { %1685 = vmatpush.bf16.msrb.mxu0 %v2275_v7  ;;  %v2155_v7 = vor.u32 %v2894_v62, %v2152_v63  ;;  %v2230_v62 = vld [vmem:[%s3368_s15 + $0xd0] sm:$0xf]  ;;  %v2916_v63 = vld [vmem:[%s3368_s15 + $0xe4] sm:$0xf0] }
  0x99   : > { %1698 = vmatpush.bf16.msrb.mxu1 %v2467_v8  ;;  %v2888_v8 = vld [vmem:[%s3368_s15 + $0xc] sm:$0xf] }
  0x9a   : > { %1711 = vmatpush.bf16.msrb.mxu2 %v2659_v9  ;;  %v2128_v9 = vld [vmem:[%s3368_s15 + $0x20] sm:$0xf0] }
  0x9b   : > { %1724 = vmatpush.bf16.msrb.mxu3 %v2851_v13  ;;  %v2320_v13 = vld [vmem:[%s3368_s15 + $0x1a0] sm:$0xf0]  ;;  %v2131_v24 = vor.u32 %v2888_v8, %v2128_v9  ;;  %v2423_v8 = vor.u32 %v2964_v2, %v2422_v0  ;;  %v2615_v9 = vor.u32 %v3012_v4, %v2614_v3 }
  0x9c   : > { %1686 = vmatpush.bf16.msrb.mxu0 %v2251_v21  ;;  %v2302_v21 = vld [vmem:[%s3368_s15 + $0x160] sm:$0xf]  ;;  %v2323_v28 = vor.u32 %v2936_v12, %v2320_v13  ;;  %v2807_v13 = vor.u32 %v3060_v6, %v2806_v5  ;;  %v3027_v0 = vld [vmem:[%s3368_s15 + $0x464] sm:$0xf]  ;;  %v2880_v5 = vld [vmem:[%s3368_s15 + $0x5f8] sm:$0xf0] }
  0x9d   : > { %1699 = vmatpush.bf16.msrb.mxu1 %v2443_v22  ;;  %v2934_v22 = vld [vmem:[%s3368_s15 + $0x174] sm:$0xf0]  ;;  %v2398_v12 = vld [vmem:[%s3368_s15 + $0x220] sm:$0xf]  ;;  %v3075_v4 = vld [vmem:[%s3368_s15 + $0x5e4] sm:$0xf] }
  0x9e   : > { %1712 = vmatpush.bf16.msrb.mxu2 %v2635_v23  ;;  %v2494_v23 = vld [vmem:[%s3368_s15 + $0x2e0] sm:$0xf] }
  0x9f   : > { %1725 = vmatpush.bf16.msrb.mxu3 %v2827_v27  ;;  %v3030_v27 = vld [vmem:[%s3368_s15 + $0x474] sm:$0xf0] }
  0xa0   : > { %1687 = vmatpush.bf16.msrb.mxu0 %v2227_v35  ;;  %v2303_v35 = vor.u32 %v2934_v22, %v2302_v21  ;;  %v2399_v22 = vor.u32 %v2958_v14, %v2398_v12  ;;  %v2973_v12 = vld [vmem:[%s3368_s15 + $0x2b4] sm:$0xf]  ;;  %v2472_v14 = vld [vmem:[%s3368_s15 + $0x2c8] sm:$0xf0] }
  0xa1   : > { %1700 = vmatpush.bf16.msrb.mxu1 %v2419_v36  ;;  %v2495_v36 = vor.u32 %v2982_v25, %v2494_v23  ;;  %v2904_v25 = vld [vmem:[%s3368_s15 + $0x84] sm:$0xf0] }
  0xa2   : > { %1713 = vmatpush.bf16.msrb.mxu2 %v2611_v37  ;;  %v2687_v37 = vor.u32 %v3030_v27, %v2686_v26  ;;  %v2374_v26 = vld [vmem:[%s3368_s15 + $0x1f0] sm:$0xf]  ;;  %v2783_v27 = vor.u32 %v3054_v20, %v2782_v19  ;;  %v3069_v19 = vld [vmem:[%s3368_s15 + $0x5b4] sm:$0xf]  ;;  %v2856_v20 = vld [vmem:[%s3368_s15 + $0x5c8] sm:$0xf0] }
  0xa3   : > { %1726 = vmatpush.bf16.msrb.mxu3 %v2803_v41  ;;  %v2879_v41 = vor.u32 %v3078_v33, %v2878_v30  ;;  %v3000_v30 = vld [vmem:[%s3368_s15 + $0x384] sm:$0xf0]  ;;  %v2758_v33 = vld [vmem:[%s3368_s15 + $0x4f0] sm:$0xf] }
  0xa4   : > { %1688 = vmatpush.bf16.msrb.mxu0 %v2203_v47  ;;  %v2279_v47 = vor.u32 %v2928_v39, %v2278_v38  ;;  %v2158_v38 = vld [vmem:[%s3368_s15 + $0x40] sm:$0xf]  ;;  %v2898_v39 = vld [vmem:[%s3368_s15 + $0x54] sm:$0xf0] }
  0xa5   : > { %1701 = vmatpush.bf16.msrb.mxu1 %v2395_v48  ;;  %v2471_v48 = vor.u32 %v2976_v42, %v2470_v40  ;;  %v2350_v40 = vld [vmem:[%s3368_s15 + $0x1c0] sm:$0xf]  ;;  %v2946_v42 = vld [vmem:[%s3368_s15 + $0x1d4] sm:$0xf0] }
  0xa6   : > { %1714 = vmatpush.bf16.msrb.mxu2 %v2587_v49  ;;  %v2663_v49 = vor.u32 %v3024_v44, %v2662_v43  ;;  %v2542_v43 = vld [vmem:[%s3368_s15 + $0x340] sm:$0xf]  ;;  %v2994_v44 = vld [vmem:[%s3368_s15 + $0x354] sm:$0xf0] }
  0xa7   : > { %1727 = vmatpush.bf16.msrb.mxu3 %v2779_v53  ;;  %v2855_v53 = vor.u32 %v3072_v46, %v2854_v45  ;;  %v2734_v45 = vld [vmem:[%s3368_s15 + $0x4c0] sm:$0xf]  ;;  %v3042_v46 = vld [vmem:[%s3368_s15 + $0x4d4] sm:$0xf0] }
  0xa8   : > { %1689 = vmatpush.bf16.msrb.mxu0 %v2179_v59  ;;  %v2255_v59 = vor.u32 %v2922_v51, %v2254_v50  ;;  %v2351_v50 = vor.u32 %v2946_v42, %v2350_v40  ;;  %v2543_v51 = vor.u32 %v2994_v44, %v2542_v43  ;;  %v2961_v40 = vld [vmem:[%s3368_s15 + $0x254] sm:$0xf]  ;;  %v2424_v42 = vld [vmem:[%s3368_s15 + $0x268] sm:$0xf0] }
  0xa9   : > { %1702 = vmatpush.bf16.msrb.mxu1 %v2371_v60  ;;  %v2447_v60 = vor.u32 %v2970_v54, %v2446_v52  ;;  %v2326_v52 = vld [vmem:[%s3368_s15 + $0x190] sm:$0xf]  ;;  %v3009_v43 = vld [vmem:[%s3368_s15 + $0x3d4] sm:$0xf]  ;;  %v2616_v44 = vld [vmem:[%s3368_s15 + $0x3e8] sm:$0xf0] }
  0xaa   : > { %1715 = vmatpush.bf16.msrb.mxu2 %v2563_v61  ;;  %v2639_v61 = vor.u32 %v3018_v56, %v2638_v55  ;;  %v2518_v54 = vld [vmem:[%s3368_s15 + $0x310] sm:$0xf]  ;;  %v2735_v55 = vor.u32 %v3042_v46, %v2734_v45  ;;  %v2988_v56 = vld [vmem:[%s3368_s15 + $0x324] sm:$0xf0]  ;;  %v3057_v45 = vld [vmem:[%s3368_s15 + $0x554] sm:$0xf] }
  0xab   : > { %1728 = vmatpush.bf16.msrb.mxu3 %v2755_v1  ;;  %v2831_v1 = vor.u32 %v3066_v58, %v2830_v57  ;;  %v2710_v57 = vld [vmem:[%s3368_s15 + $0x490] sm:$0xf]  ;;  %v3036_v58 = vld [vmem:[%s3368_s15 + $0x4a4] sm:$0xf0]  ;;  %v2519_v3 = vor.u32 %v2988_v56, %v2518_v54  ;;  %v2808_v46 = vld [vmem:[%s3368_s15 + $0x568] sm:$0xf0] }
  0xac   : > { %1690 = vmatpush.bf16.msrb.mxu0 %v2155_v7  ;;  %v2231_v7 = vor.u32 %v2916_v63, %v2230_v62  ;;  %v2496_v63 = vld [vmem:[%s3368_s15 + $0x2f8] sm:$0xf0]  ;;  %v2711_v6 = vor.u32 %v3036_v58, %v2710_v57  ;;  %v3051_v57 = vld [vmem:[%s3368_s15 + $0x524] sm:$0xf] }
  0xad   : > { %1703 = vmatpush.bf16.msrb.mxu1 %v2347_v10  ;;  %v2206_v10 = vld [vmem:[%s3368_s15 + $0xa0] sm:$0xf]  ;;  %v2400_v54 = vld [vmem:[%s3368_s15 + $0x238] sm:$0xf0] }
  0xae   : > { %1716 = vmatpush.bf16.msrb.mxu2 %v2539_v11  ;;  %v2910_v11 = vld [vmem:[%s3368_s15 + $0xb4] sm:$0xf0]  ;;  %v2592_v56 = vld [vmem:[%s3368_s15 + $0x3b8] sm:$0xf0] }
  0xaf   : > { %1729 = vmatpush.bf16.msrb.mxu3 %v2731_v15  ;;  %v2590_v15 = vld [vmem:[%s3368_s15 + $0x3a0] sm:$0xf]  ;;  %v2207_v21 = vor.u32 %v2910_v11, %v2206_v10  ;;  %v2925_v10 = vld [vmem:[%s3368_s15 + $0x134] sm:$0xf]  ;;  %v2280_v11 = vld [vmem:[%s3368_s15 + $0x148] sm:$0xf0] }
  0xb0   : > { %1691 = vmatpush.bf16.msrb.mxu0 %v2131_v24  ;;  %v2591_v23 = vor.u32 %v3006_v18, %v2590_v15  ;;  %v2182_v24 = vld [vmem:[%s3368_s15 + $0x70] sm:$0xf]  ;;  %v3021_v15 = vld [vmem:[%s3368_s15 + $0x434] sm:$0xf]  ;;  %v2664_v18 = vld [vmem:[%s3368_s15 + $0x448] sm:$0xf0] }
  0xb1   : > { %1704 = vmatpush.bf16.msrb.mxu1 %v2323_v28  ;;  %v2952_v28 = vld [vmem:[%s3368_s15 + $0x204] sm:$0xf0]  ;;  %v2784_v58 = vld [vmem:[%s3368_s15 + $0x538] sm:$0xf0] }
  0xb2   : > { %1717 = vmatpush.bf16.msrb.mxu2 %v2515_v29  ;;  %v2566_v29 = vld [vmem:[%s3368_s15 + $0x370] sm:$0xf] }
  0xb3   : > { %1730 = vmatpush.bf16.msrb.mxu3 %v2707_v34  ;;  %1692 = vmatmul.bf16.vlgmr.msrb.gmra.mxu0 %v3502_v31  ;;  %v3048_v34 = vld [vmem:[%s3368_s15 + $0x504] sm:$0xf0] }
  0xb4   : > { %1736 = vmatpush.bf16.msra.mxu0 %v2303_v35  ;;  %1705 = vmatmul.bf16.vlgmr.msrb.gmra.mxu1 %v3504_v32  ;;  %v2183_v35 = vor.u32 %v2904_v25, %v2182_v24  ;;  %v2919_v24 = vld [vmem:[%s3368_s15 + $0x104] sm:$0xf]  ;;  %v2256_v25 = vld [vmem:[%s3368_s15 + $0x118] sm:$0xf0] }
  0xb5   : > { %1749 = vmatpush.bf16.msra.mxu1 %v2495_v36  ;;  %1718 = vmatmul.bf16.vlgmr.msrb.gmra.mxu2 %v3490_v16  ;;  %v2375_v36 = vor.u32 %v2952_v28, %v2374_v26  ;;  %v2967_v26 = vld [vmem:[%s3368_s15 + $0x284] sm:$0xf]  ;;  %v2448_v28 = vld [vmem:[%s3368_s15 + $0x298] sm:$0xf0] }
  0xb6   : > { %1762 = vmatpush.bf16.msra.mxu2 %v2687_v37  ;;  %1731 = vmatmul.bf16.vlgmr.msrb.gmra.mxu3 %v3492_v17  ;;  %v2567_v37 = vor.u32 %v3000_v30, %v2566_v29  ;;  %v3015_v29 = vld [vmem:[%s3368_s15 + $0x404] sm:$0xf]  ;;  %v2640_v30 = vld [vmem:[%s3368_s15 + $0x418] sm:$0xf0] }
  0xb7   : > { %1775 = vmatpush.bf16.msra.mxu3 %v2879_v41  ;;  %v2759_v41 = vor.u32 %v3048_v34, %v2758_v33  ;;  %v3063_v33 = vld [vmem:[%s3368_s15 + $0x584] sm:$0xf]  ;;  %v2832_v34 = vld [vmem:[%s3368_s15 + $0x598] sm:$0xf0] }
  0xb8   : > { %1737 = vmatpush.bf16.msra.mxu0 %v2279_v47  ;;  %v2159_v47 = vor.u32 %v2898_v39, %v2158_v38  ;;  %v2913_v38 = vld [vmem:[%s3368_s15 + $0xd4] sm:$0xf]  ;;  %v2232_v39 = vld [vmem:[%s3368_s15 + $0xe8] sm:$0xf0] }
  0xb9   : > { %1750 = vmatpush.bf16.msra.mxu1 %v2471_v48  ;;  %v2134_v48 = vld [vmem:[%s3368_s15 + $0x10] sm:$0xf] }
  0xba   : > { %1763 = vmatpush.bf16.msra.mxu2 %v2663_v49  ;;  %v2892_v49 = vld [vmem:[%s3368_s15 + $0x24] sm:$0xf0] }
  0xbb   : > { %1776 = vmatpush.bf16.msra.mxu3 %v2855_v53  ;;  %v2940_v53 = vld [vmem:[%s3368_s15 + $0x1a4] sm:$0xf0]  ;;  %v2135_v62 = vor.u32 %v2892_v49, %v2134_v48  ;;  %v2427_v48 = vor.u32 %v2961_v40, %v2424_v42  ;;  %v2619_v49 = vor.u32 %v3009_v43, %v2616_v44  ;;  %v2712_v40 = vld [vmem:[%s3368_s15 + $0x4a8] sm:$0xf0] }
  0xbc   : > { %1738 = vmatpush.bf16.msra.mxu0 %v2255_v59  ;;  %v2931_v59 = vld [vmem:[%s3368_s15 + $0x164] sm:$0xf]  ;;  %v2327_v2 = vor.u32 %v2940_v53, %v2326_v52  ;;  %v2811_v53 = vor.u32 %v3057_v45, %v2808_v46 }
  0xbd   : > { %1751 = vmatpush.bf16.msra.mxu1 %v2447_v60  ;;  %v2304_v60 = vld [vmem:[%s3368_s15 + $0x178] sm:$0xf0]  ;;  %v2955_v52 = vld [vmem:[%s3368_s15 + $0x224] sm:$0xf] }
  0xbe   : > { %1764 = vmatpush.bf16.msra.mxu2 %v2639_v61  ;;  %v2979_v61 = vld [vmem:[%s3368_s15 + $0x2e4] sm:$0xf] }
  0xbf   : > { %1777 = vmatpush.bf16.msra.mxu3 %v2831_v1  ;;  %v2688_v1 = vld [vmem:[%s3368_s15 + $0x478] sm:$0xf0] }
  0xc0   : > { %1739 = vmatpush.bf16.msra.mxu0 %v2231_v7  ;;  %v2307_v7 = vor.u32 %v2931_v59, %v2304_v60  ;;  %v2403_v60 = vor.u32 %v2955_v52, %v2400_v54 }
  0xc1   : > { %1752 = vmatpush.bf16.msra.mxu1 %v2423_v8  ;;  %v2499_v8 = vor.u32 %v2979_v61, %v2496_v63  ;;  %v2184_v63 = vld [vmem:[%s3368_s15 + $0x88] sm:$0xf0] }
  0xc2   : > { %1765 = vmatpush.bf16.msra.mxu2 %v2615_v9  ;;  %v2691_v9 = vor.u32 %v3027_v0, %v2688_v1  ;;  %v2949_v0 = vld [vmem:[%s3368_s15 + $0x1f4] sm:$0xf]  ;;  %v2787_v1 = vor.u32 %v3051_v57, %v2784_v58  ;;  %v355_v58 = vld [vmem:[#allocation2 + $0x10] sm:$0xff] }
  0xc3   : > { %1778 = vmatpush.bf16.msra.mxu3 %v2807_v13  ;;  %v2883_v13 = vor.u32 %v3075_v4, %v2880_v5  ;;  %v2568_v4 = vld [vmem:[%s3368_s15 + $0x388] sm:$0xf0]  ;;  %v3045_v5 = vld [vmem:[%s3368_s15 + $0x4f4] sm:$0xf] }
  0xc4   : > { %1740 = vmatpush.bf16.msra.mxu0 %v2207_v21  ;;  %v2283_v21 = vor.u32 %v2925_v10, %v2280_v11  ;;  %v2895_v10 = vld [vmem:[%s3368_s15 + $0x44] sm:$0xf]  ;;  %v2160_v11 = vld [vmem:[%s3368_s15 + $0x58] sm:$0xf0] }
  0xc5   : > { %1753 = vmatpush.bf16.msra.mxu1 %v2399_v22  ;;  %v2475_v22 = vor.u32 %v2973_v12, %v2472_v14  ;;  %v2943_v12 = vld [vmem:[%s3368_s15 + $0x1c4] sm:$0xf] }
  0xc6   : > { %1766 = vmatpush.bf16.msra.mxu2 %v2591_v23  ;;  %v2667_v23 = vor.u32 %v3021_v15, %v2664_v18  ;;  %v2352_v15 = vld [vmem:[%s3368_s15 + $0x1d8] sm:$0xf0]  ;;  %v2991_v18 = vld [vmem:[%s3368_s15 + $0x344] sm:$0xf] }
  0xc7   : > { %1779 = vmatpush.bf16.msra.mxu3 %v2783_v27  ;;  %v2859_v27 = vor.u32 %v3069_v19, %v2856_v20  ;;  %v2544_v19 = vld [vmem:[%s3368_s15 + $0x358] sm:$0xf0]  ;;  %v3039_v20 = vld [vmem:[%s3368_s15 + $0x4c4] sm:$0xf] }
  0xc8   : > { %1741 = vmatpush.bf16.msra.mxu0 %v2183_v35  ;;  %v2259_v35 = vor.u32 %v2919_v24, %v2256_v25  ;;  %v2355_v25 = vor.u32 %v2943_v12, %v2352_v15 }
  0xc9   : > { %1754 = vmatpush.bf16.msra.mxu1 %v2375_v36  ;;  %v2451_v36 = vor.u32 %v2967_v26, %v2448_v28  ;;  %v2547_v26 = vor.u32 %v2991_v18, %v2544_v19  ;;  %v2136_v28 = vld [vmem:[%s3368_s15 + $0x28] sm:$0xf0]  ;;  %v357_v18 = vld [vmem:[#allocation2] sm:$0xff] }
  0xca   : > { %1767 = vmatpush.bf16.msra.mxu2 %v2567_v37  ;;  %v2643_v37 = vor.u32 %v3015_v29, %v2640_v30  ;;  %v2937_v29 = vld [vmem:[%s3368_s15 + $0x194] sm:$0xf] }
  0xcb   : > { %1780 = vmatpush.bf16.msra.mxu3 %v2759_v41  ;;  %v2835_v41 = vor.u32 %v3063_v33, %v2832_v34  ;;  %v2328_v34 = vld [vmem:[%s3368_s15 + $0x1a8] sm:$0xf0] }
  0xcc   : > { %1742 = vmatpush.bf16.msra.mxu0 %v2159_v47  ;;  %v2235_v47 = vor.u32 %v2913_v38, %v2232_v39  ;;  %v3033_v39 = vld [vmem:[%s3368_s15 + $0x494] sm:$0xf]  ;;  %v2331_v44 = vor.u32 %v2937_v29, %v2328_v34 }
  0xcd   : > { %1755 = vmatpush.bf16.msra.mxu1 %v2351_v50  ;;  %v2907_v50 = vld [vmem:[%s3368_s15 + $0xa4] sm:$0xf] }
  0xce   : > { %1768 = vmatpush.bf16.msra.mxu2 %v2543_v51  ;;  %v2208_v51 = vld [vmem:[%s3368_s15 + $0xb8] sm:$0xf0] }
  0xcf   : > { %1781 = vmatpush.bf16.msra.mxu3 %v2735_v55  ;;  %v3003_v55 = vld [vmem:[%s3368_s15 + $0x3a4] sm:$0xf]  ;;  %v2211_v59 = vor.u32 %v2907_v50, %v2208_v51 }
  0xd0   : > { %1743 = vmatpush.bf16.msra.mxu0 %v2135_v62  ;;  %v2595_v61 = vor.u32 %v3003_v55, %v2592_v56  ;;  %v2901_v62 = vld [vmem:[%s3368_s15 + $0x74] sm:$0xf] }
  0xd1   : > { %1756 = vmatpush.bf16.msra.mxu1 %v2327_v2  ;;  %v2376_v2 = vld [vmem:[%s3368_s15 + $0x208] sm:$0xf0] }
  0xd2   : > { %1769 = vmatpush.bf16.msra.mxu2 %v2519_v3  ;;  %v2997_v3 = vld [vmem:[%s3368_s15 + $0x374] sm:$0xf] }
  0xd3   : > { %1782 = vmatpush.bf16.msra.mxu3 %v2711_v6  ;;  %1744 = vmatmul.bf16.vlgmr.msra.gmra.mxu0 %v3502_v31  ;;  %v2760_v6 = vld [vmem:[%s3368_s15 + $0x508] sm:$0xf0] }
  0xd4   : > { %1788 = vmatpush.bf16.msrb.mxu0 %v2307_v7  ;;  %1757 = vmatmul.bf16.vlgmr.msra.gmra.mxu1 %v3504_v32  ;;  %v2187_v7 = vor.u32 %v2901_v62, %v2184_v63  ;;  %v2763_v14 = vor.u32 %v3045_v5, %v2760_v6 }
  0xd5   : > { %1801 = vmatpush.bf16.msrb.mxu1 %v2499_v8  ;;  %1770 = vmatmul.bf16.vlgmr.msra.gmra.mxu2 %v3490_v16  ;;  %v2379_v8 = vor.u32 %v2949_v0, %v2376_v2 }
  0xd6   : > { %1814 = vmatpush.bf16.msrb.mxu2 %v2691_v9  ;;  %1783 = vmatmul.bf16.vlgmr.msra.gmra.mxu3 %v3492_v17  ;;  %v2571_v9 = vor.u32 %v2997_v3, %v2568_v4  ;;  %v356_v3 = vld [vmem:[#allocation2 + $0x8] sm:$0xff] }
  0xd7   : > { %1827 = vmatpush.bf16.msrb.mxu3 %v2883_v13  ;;  %v1550_v13 = vpop.f32.mrf.mxu1 }
  0xd8   : > { %1789 = vmatpush.bf16.msrb.mxu0 %v2283_v21  ;;  %v2736_v21 = vld [vmem:[%s3368_s15 + $0x4d8] sm:$0xf0]  ;;  %v1563_v30 = vpop.f32.mrf.mxu2 }
  0xd9   : > { %1802 = vmatpush.bf16.msrb.mxu1 %v2475_v22  ;;  %v1537_v22 = vpop.f32.mrf.mxu0  ;;  %v2739_v33 = vor.u32 %v3039_v20, %v2736_v21  ;;  %v1576_v38 = vpop.f32.mrf.mxu3 }
  0xda   : > { %1815 = vmatpush.bf16.msrb.mxu2 %v2667_v23  ;;  %v2163_v23 = vor.u32 %v2895_v10, %v2160_v11  ;;  %v1551_v24 = vadd.f32 %v1550_v13, %v1537_v22 }
  0xdb   : > { %1828 = vmatpush.bf16.msrb.mxu3 %v2859_v27  ;;  %v2889_v27 = vld [vmem:[%s3368_s15 + $0x14] sm:$0xf] }
  0xdc   : > { %1790 = vmatpush.bf16.msrb.mxu0 %v2259_v35  ;;  %v2985_v35 = vld [vmem:[%s3368_s15 + $0x314] sm:$0xf]  ;;  %v2139_v42 = vor.u32 %v2889_v27, %v2136_v28 }
  0xdd   : > { %1803 = vmatpush.bf16.msrb.mxu1 %v2451_v36  ;;  %v2520_v36 = vld [vmem:[%s3368_s15 + $0x328] sm:$0xf0] }
  0xde   : > { %1816 = vmatpush.bf16.msrb.mxu2 %v2643_v37  ;;  %v1564_v37 = vadd.f32 %v1563_v30, %v1551_v24  ;;  %v2523_v45 = vor.u32 %v2985_v35, %v2520_v36 }
  0xdf   : > { %1829 = vmatpush.bf16.msrb.mxu3 %v2835_v41  ;;  %v354_v41 = vld [vmem:[#allocation2 + $0x28] sm:$0xff]  ;;  %v1552_v46 = vpop.f32.mrf.mxu1 }
  0xe0   : > { %1791 = vmatpush.bf16.msrb.mxu0 %v2235_v47  ;;  %v1577_v43 = vadd.f32 %v1576_v38, %v1564_v37  ;;  %v2715_v47 = vor.u32 %v3033_v39, %v2712_v40  ;;  %v1565_v50 = vpop.f32.mrf.mxu2 }
  0xe1   : > { %1804 = vmatpush.bf16.msrb.mxu1 %v2427_v48  ;;  %v1578_v51 = vpop.f32.mrf.mxu3 }
  0xe2   : > { %1817 = vmatpush.bf16.msrb.mxu2 %v2619_v49  ;;  %v1840_v48 = vadd.f32 %v1577_v43, %v354_v41  ;;  %v1539_v49 = vpop.f32.mrf.mxu0 }
  0xe3   : > { %1830 = vmatpush.bf16.msrb.mxu3 %v2811_v53 }
  0xe4   : > { %1792 = vmatpush.bf16.msrb.mxu0 %v2211_v59  ;;  %1846 = vst [vmem:[#allocation2 + $0x28] sm:$0xff] %v1840_v48 }
  0xe5   : > { %1805 = vmatpush.bf16.msrb.mxu1 %v2403_v60 }
  0xe6   : > { %1818 = vmatpush.bf16.msrb.mxu2 %v2595_v61 }
  0xe7   : > { %1831 = vmatpush.bf16.msrb.mxu3 %v2787_v1 }
  0xe8   : > { %1793 = vmatpush.bf16.msrb.mxu0 %v2187_v7 }
  0xe9   : > { %1806 = vmatpush.bf16.msrb.mxu1 %v2379_v8 }
  0xea   : > { %1819 = vmatpush.bf16.msrb.mxu2 %v2571_v9 }
  0xeb   : > { %1832 = vmatpush.bf16.msrb.mxu3 %v2763_v14 }
  0xec   : > { %1794 = vmatpush.bf16.msrb.mxu0 %v2163_v23 }
  0xed   : > { %1807 = vmatpush.bf16.msrb.mxu1 %v2355_v25 }
  0xee   : > { %1820 = vmatpush.bf16.msrb.mxu2 %v2547_v26 }
  0xef   : > { %1833 = vmatpush.bf16.msrb.mxu3 %v2739_v33  ;;  %v358_v33 = vld [vmem:[#allocation2 + $0x18] sm:$0xff] }
  0xf0   : > { %1795 = vmatpush.bf16.msrb.mxu0 %v2139_v42  ;;  %v1589_v52 = vpop.f32.mrf.mxu0 }
  0xf1   : > { %1808 = vmatpush.bf16.msrb.mxu1 %v2331_v44  ;;  %v1602_v53 = vpop.f32.mrf.mxu1 }
  0xf2   : > { %1821 = vmatpush.bf16.msrb.mxu2 %v2523_v45  ;;  %v1603_v54 = vadd.f32 %v1602_v53, %v1589_v52 }
  0xf3   : > { %1834 = vmatpush.bf16.msrb.mxu3 %v2715_v47  ;;  %1796 = vmatmul.bf16.vlgmr.msrb.gmra.mxu0 %v3502_v31  ;;  %v359_v47 = vld [vmem:[#allocation2 + $0x20] sm:$0xff] }
  0xf4   : > { %1809 = vmatmul.bf16.vlgmr.msrb.gmra.mxu1 %v3504_v32 }
  0xf5   : > { %1822 = vmatmul.bf16.vlgmr.msrb.gmra.mxu2 %v3490_v16 }
  0xf6   : > { %1835 = vmatmul.bf16.vlgmr.msrb.gmra.mxu3 %v3492_v17 }
  0xf8   : > { %v1615_v55 = vpop.f32.mrf.mxu2  ;;  %v1591_v60 = vpop.f32.mrf.mxu0 }
  0xf9   : > { %v1616_v56 = vadd.f32 %v1615_v55, %v1603_v54  ;;  %v1628_v57 = vpop.f32.mrf.mxu3  ;;  %v1604_v61 = vpop.f32.mrf.mxu1 }
  0xfb   : > { %v1629_v59 = vadd.f32 %v1628_v57, %v1616_v56 }
  0xfd   : > { %v1841_v62 = vadd.f32 %v1629_v59, %v355_v58 }
  0xff   : > { %1847 = vst [vmem:[#allocation2 + $0x10] sm:$0xff] %v1841_v62 }
 0x100   : > { %v1617_v63 = vpop.f32.mrf.mxu2 }
 0x101   : > { %v1630_v31 = vpop.f32.mrf.mxu3 }
 0x110   : > { %v1641_v0 = vpop.f32.mrf.mxu0 }
 0x111   : > { %v1654_v32 = vpop.f32.mrf.mxu1 }
 0x112   : > { %v1655_v1 = vadd.f32 %v1654_v32, %v1641_v0 }
 0x118   : > { %v1667_v16 = vpop.f32.mrf.mxu2  ;;  %v1643_v5 = vpop.f32.mrf.mxu0 }
 0x119   : > { %v1668_v2 = vadd.f32 %v1667_v16, %v1655_v1  ;;  %v1680_v17 = vpop.f32.mrf.mxu3  ;;  %v1656_v6 = vpop.f32.mrf.mxu1 }
 0x11b   : > { %v1681_v4 = vadd.f32 %v1680_v17, %v1668_v2 }
 0x11d   : > { %v1842_v7 = vadd.f32 %v1681_v4, %v356_v3 }
 0x11f   : > { %1848 = vst [vmem:[#allocation2 + $0x8] sm:$0xff] %v1842_v7 }
 0x120   : > { %v1669_v8 = vpop.f32.mrf.mxu2 }
 0x121   : > { %v1682_v9 = vpop.f32.mrf.mxu3 }
 0x130   : > { %v1693_v10 = vpop.f32.mrf.mxu0 }
 0x131   : > { %v1706_v11 = vpop.f32.mrf.mxu1 }
 0x132   : > { %v1707_v12 = vadd.f32 %v1706_v11, %v1693_v10 }
 0x138   : > { %v1719_v13 = vpop.f32.mrf.mxu2  ;;  %v1695_v20 = vpop.f32.mrf.mxu0 }
 0x139   : > { %v1720_v14 = vadd.f32 %v1719_v13, %v1707_v12  ;;  %v1732_v15 = vpop.f32.mrf.mxu3  ;;  %v1708_v21 = vpop.f32.mrf.mxu1 }
 0x13b   : > { %v1733_v19 = vadd.f32 %v1732_v15, %v1720_v14 }
 0x13d   : > { %v1843_v22 = vadd.f32 %v1733_v19, %v357_v18 }
 0x13f   : > { %1849 = vst [vmem:[#allocation2] sm:$0xff] %v1843_v22 }
 0x140   : > { %v1721_v23 = vpop.f32.mrf.mxu2 }
 0x141   : > { %v1734_v24 = vpop.f32.mrf.mxu3 }
 0x150   : > { %v1745_v25 = vpop.f32.mrf.mxu0 }
 0x151   : > { %v1758_v26 = vpop.f32.mrf.mxu1 }
 0x152   : > { %v1759_v27 = vadd.f32 %v1758_v26, %v1745_v25 }
 0x158   : > { %v1771_v28 = vpop.f32.mrf.mxu2  ;;  %v1747_v35 = vpop.f32.mrf.mxu0 }
 0x159   : > { %v1772_v29 = vadd.f32 %v1771_v28, %v1759_v27  ;;  %v1784_v30 = vpop.f32.mrf.mxu3  ;;  %v1760_v36 = vpop.f32.mrf.mxu1 }
 0x15b   : > { %v1785_v34 = vadd.f32 %v1784_v30, %v1772_v29 }
 0x15d   : > { %v1844_v37 = vadd.f32 %v1785_v34, %v358_v33 }
 0x15f   : > { %1850 = vst [vmem:[#allocation2 + $0x18] sm:$0xff] %v1844_v37 }
 0x160   : > { %v1773_v38 = vpop.f32.mrf.mxu2 }
 0x161   : > { %v1786_v39 = vpop.f32.mrf.mxu3 }
 0x170   : > { %v1797_v40 = vpop.f32.mrf.mxu0 }
 0x171   : > { %v1810_v41 = vpop.f32.mrf.mxu1 }
 0x172   : > { %v1811_v42 = vadd.f32 %v1810_v41, %v1797_v40 }
 0x178   : > { %v1823_v43 = vpop.f32.mrf.mxu2  ;;  %v1799_v46 = vpop.f32.mrf.mxu0 }
 0x179   : > { %v1824_v44 = vadd.f32 %v1823_v43, %v1811_v42  ;;  %v1836_v45 = vpop.f32.mrf.mxu3  ;;  %v1812_v48 = vpop.f32.mrf.mxu1 }
 0x17b   : > { %v1837_v49 = vadd.f32 %v1836_v45, %v1824_v44 }
 0x17d   : > { %v1845_v50 = vadd.f32 %v1837_v49, %v359_v47  ;;  %1855 = sbr.rel (%p2884_p3) target bundleno = 685 (0x2ad), region = 56 }
 0x17f   : > { %1851 = vst [vmem:[#allocation2 + $0x20] sm:$0xff] %v1845_v50 }
 0x180   : > { %v1825_v51 = vpop.f32.mrf.mxu2 }
 0x181   : > { %v1838_v52 = vpop.f32.mrf.mxu3 }
 0x182   : > { %v1856_v53 = vld [vmem:[#allocation2 + $0x28] sm:$0xff]  ;;  %v1857_v54 = vld [vmem:[#allocation2 + $0x10] sm:$0xff]  ;;  %v1859_v56 = vld [vmem:[#allocation2] sm:$0xff]  ;;  %v3263_v26 = vmov 768.0  }
 0x183   : > { %v1858_v55 = vld [vmem:[#allocation2 + $0x8] sm:$0xff]  ;;  %v1862_v57 = vld [vmem:[%s3853_s2] sm:$0x3f]  ;;  %v1860_v31 = vld [vmem:[#allocation2 + $0x18] sm:$0xff]  ;;  %3158 = vrcp.f32 %v3263_v26 }
 0x184   : > { %v1882_v58 = vld [vmem:[%s3380_s7] sm:$0xff]  ;;  %v1864_v59 = vperm.slane %v1862_v57, 0  ;;  %v1865_v60 = vperm.slane %v1862_v57, 1  ;;  %v1866_v61 = vperm.slane %v1862_v57, 2  ;;  %v1867_v62 = vperm.slane %v1862_v57, 3  ;;  %v1883_v63 = vld [vmem:[%s3380_s7 + $0x8] sm:$0xff] }
 0x185   : > { %v1868_v0 = vperm.slane %v1862_v57, 4  ;;  %v1869_v32 = vperm.slane %v1862_v57, 5  ;;  %v1884_v1 = vld [vmem:[%s3380_s7 + $0x10] sm:$0xff]  ;;  %v1885_v16 = vunpack.c.l.bf16 %v1882_v58  ;;  %v1886_v2 = vunpack.c.h.bf16 %v1882_v58 }
 0x186   : > { %v1876_v17 = vadd.f32 %v1864_v59, %v1856_v53  ;;  %v1877_v3 = vadd.f32 %v1865_v60, %v1857_v54  ;;  %v1878_v4 = vadd.f32 %v1866_v61, %v1858_v55  ;;  %v1879_v5 = vadd.f32 %v1867_v62, %v1859_v56  ;;  %v1861_v6 = vld [vmem:[#allocation2 + $0x20] sm:$0xff] }
 0x187   : > { %v1887_v7 = vunpack.c.l.bf16 %v1883_v63  ;;  %v1888_v8 = vunpack.c.h.bf16 %v1883_v63  ;;  %v1880_v9 = vadd.f32 %v1868_v0, %v1860_v31  ;;  %v1889_v10 = vunpack.c.l.bf16 %v1884_v1  ;;  %v1949_v60 = vld [vmem:[%s3855_s4] sm:$0x3f] }
 0x188   : > { %v1891_v11 = vadd.f32 %v1885_v16, %v1876_v17  ;;  %v1892_v12 = vadd.f32 %v1886_v2, %v1877_v3  ;;  %v1881_v14 = vadd.f32 %v1869_v32, %v1861_v6  ;;  %v1890_v15 = vunpack.c.h.bf16 %v1884_v1  ;;  %v1969_v62 = vld [vmem:[%s3856_s5] sm:$0x3f] }
 0x189   : > { %v1893_v13 = vadd.f32 %v1887_v7, %v1878_v4  ;;  %v1894_v18 = vadd.f32 %v1888_v8, %v1879_v5  ;;  %v1895_v20 = vadd.f32 %v1889_v10, %v1880_v9  ;;  %v3159_v27 = vpop.eup %3158  ;;  %v1951_v31 = vperm.slane %v1949_v60, 0 }
 0x18a   : > { %v1897_v19 = vadd.f32 %v1892_v12, %v1891_v11  ;;  %v1896_v22 = vadd.f32 %v1890_v15, %v1881_v14  ;;  %v1905_v28 = vmul.f32 768.0, %v3159_v27  ;;  %vm1909_vm0 = vweird.f32 %v3159_v27 }
 0x18b   : > { %v1952_v0 = vperm.slane %v1949_v60, 1  ;;  %v1953_v32 = vperm.slane %v1949_v60, 2  ;;  %v1954_v16 = vperm.slane %v1949_v60, 3  ;;  %v1955_v2 = vperm.slane %v1949_v60, 4 }
 0x18c   : > { %v1898_v21 = vadd.f32 %v1897_v19, %v1893_v13  ;;  %v1906_v29 = vsub.f32 1.0, %v1905_v28  ;;  %v1956_v17 = vperm.slane %v1949_v60, 5  ;;  %v1971_v3 = vperm.slane %v1969_v62, 0 }
 0x18d   : > { %v1972_v4 = vperm.slane %v1969_v62, 1  ;;  %v1973_v5 = vperm.slane %v1969_v62, 2  ;;  %v1974_v6 = vperm.slane %v1969_v62, 3 }
 0x18e   : > { %v1899_v23 = vadd.f32 %v1898_v21, %v1894_v18  ;;  %v1907_v30 = vmul.f32 %v3159_v27, %v1906_v29 }
 0x190   : > { %v1900_v24 = vadd.f32 %v1899_v23, %v1895_v20  ;;  %v1908_v33 = vadd.f32 %v3159_v27, %v1907_v30 }
 0x192   : > { %v1901_v25 = vadd.f32 %v1900_v24, %v1896_v22  ;;  %v1910_v34 = vsel %vm1909_vm0, %v3159_v27, %v1908_v33 }
 0x194   : > { %1902 = vadd.xlane.f32.xlu0 %v1901_v25 }
 0x207   : > { %v1903_v35 = vpop.xlane.xlu0 %1902 }
 0x208   : > { %v1911_v36 = vmul.f32 %v1910_v34, %v1903_v35 }
 0x20a   : > { %v1912_v37 = vsub.f32 %v1891_v11, %v1911_v36  ;;  %v1913_v38 = vsub.f32 %v1892_v12, %v1911_v36  ;;  %v1914_v39 = vsub.f32 %v1893_v13, %v1911_v36  ;;  %v1915_v40 = vsub.f32 %v1894_v18, %v1911_v36 }
 0x20b   : > { %v1916_v43 = vsub.f32 %v1895_v20, %v1911_v36  ;;  %v1917_v46 = vsub.f32 %v1896_v22, %v1911_v36  ;;  %v1975_v12 = vperm.slane %v1969_v62, 4  ;;  %v1976_v13 = vperm.slane %v1969_v62, 5 }
 0x20c   : > { %v1918_v41 = vmul.f32 %v1912_v37, %v1912_v37  ;;  %v1919_v42 = vmul.f32 %v1913_v38, %v1913_v38  ;;  %v1920_v44 = vmul.f32 %v1914_v39, %v1914_v39  ;;  %v1921_v47 = vmul.f32 %v1915_v40, %v1915_v40 }
 0x20d   : > { %v1922_v49 = vmul.f32 %v1916_v43, %v1916_v43  ;;  %v1923_v51 = vmul.f32 %v1917_v46, %v1917_v46 }
 0x20e   : > { %v1924_v45 = vadd.f32 %v1919_v42, %v1918_v41 }
 0x210   : > { %v1925_v48 = vadd.f32 %v1924_v45, %v1920_v44 }
 0x212   : > { %v1926_v50 = vadd.f32 %v1925_v48, %v1921_v47 }
 0x214   : > { %v1927_v52 = vadd.f32 %v1926_v50, %v1922_v49 }
 0x216   : > { %v1928_v53 = vadd.f32 %v1927_v52, %v1923_v51 }
 0x218   : > { %1929 = vadd.xlane.f32.xlu0 %v1928_v53 }
 0x28b   : > { %v1930_v54 = vpop.xlane.xlu0 %1929 }
 0x28c   : > { %v1931_v55 = vmul.f32 %v1930_v54, %v1910_v34 }
 0x28e   : > { %v1932_v56 = vadd.f32 1e-12, %v1931_v55 }
 0x290   : > { %3160 = vrsqrt.f32 %v1932_v56  ;;  %vm1939_vm2 = vweird.f32 %v1932_v56 }
 0x296   : > { %v3161_v57 = vpop.eup %3160 }
 0x297   : > { %v1934_v58 = vmul.f32 %v3161_v57, %v1932_v56  ;;  %vm1940_vm1 = vweird.f32 %v3161_v57 }
 0x298   : > { %vm1941_vm3 = vmor %vm1939_vm2, %vm1940_vm1 }
 0x299   : > { %v1935_v59 = vmul.f32 %v3161_v57, %v1934_v58 }
 0x29b   : > { %v1936_v61 = vmul.f32 0.5, %v1935_v59 }
 0x29d   : > { %v1937_v63 = vsub.f32 1.5, %v1936_v61 }
 0x29f   : > { %v1938_v1 = vmul.f32 %v3161_v57, %v1937_v63 }
 0x2a1   : > { %v1942_v7 = vsel %vm1941_vm3, %v3161_v57, %v1938_v1 }
 0x2a2   : > { %v1943_v8 = vmul.f32 %v1942_v7, %v1912_v37  ;;  %v1944_v9 = vmul.f32 %v1942_v7, %v1913_v38  ;;  %v1945_v10 = vmul.f32 %v1942_v7, %v1914_v39  ;;  %v1946_v11 = vmul.f32 %v1942_v7, %v1915_v40 }
 0x2a3   : > { %v1947_v14 = vmul.f32 %v1942_v7, %v1916_v43  ;;  %v1948_v15 = vmul.f32 %v1942_v7, %v1917_v46 }
 0x2a4   : > { %v1963_v18 = vmul.f32 %v1951_v31, %v1943_v8  ;;  %v1964_v19 = vmul.f32 %v1952_v0, %v1944_v9  ;;  %v1965_v20 = vmul.f32 %v1953_v32, %v1945_v10  ;;  %v1966_v21 = vmul.f32 %v1954_v16, %v1946_v11 }
 0x2a5   : > { %v1967_v22 = vmul.f32 %v1955_v2, %v1947_v14  ;;  %v1968_v23 = vmul.f32 %v1956_v17, %v1948_v15 }
 0x2a6   : > { %v1983_v24 = vadd.f32 %v1971_v3, %v1963_v18  ;;  %v1984_v25 = vadd.f32 %v1972_v4, %v1964_v19  ;;  %v1985_v26 = vadd.f32 %v1973_v5, %v1965_v20  ;;  %v1986_v27 = vadd.f32 %v1974_v6, %v1966_v21 }
 0x2a7   : > { %v1987_v28 = vadd.f32 %v1975_v12, %v1967_v22  ;;  %v1988_v29 = vadd.f32 %v1976_v13, %v1968_v23 }
 0x2a8   : > { %v1989_v30 = vpack.c.bf16 %v1984_v25, %v1983_v24  ;;  %v1990_v33 = vpack.c.bf16 %v1986_v27, %v1985_v26 }
 0x2a9   : > { %v1991_v34 = vpack.c.bf16 %v1988_v29, %v1987_v28 }
 0x2aa   : > { %1992 = vst [vmem:[%s3385_s30] sm:$0xff] %v1989_v30 }
 0x2ab   : > { %1993 = vst [vmem:[%s3385_s30 + $0x8] sm:$0xff] %v1990_v33 }
 0x2ac   : > { %1994 = vst [vmem:[%s3385_s30 + $0x10] sm:$0xff] %v1991_v34 }
 0x2ad PF: > { %s19_s28 = sadd.s32 1, %s3258_s28   ;;  %s3862_s13 = sld [smem:[#allocation6_spill]] }
 0x2ae   : > { %p16_p4 = scmp.ge.s32.totalorder %s19_s28, 14   ;;  %s3863_s14 = sld [smem:[#allocation7_spill]] }
 0x2af   : > { %s3864_s21 = smov %s3234_s22  ;;  %s3865_s22 = smov %s3238_s23 }
 0x2b0   : > { %s3866_s23 = smov %s3353_s10  ;;  %s3867_s24 = smov %s3250_s26 }
 0x2b1   : > { %s3868_s25 = smov %s3254_s27  ;;  %18 = sbr.rel (!%p16_p4) target bundleno = 5 (0x5), region = 98 }
 0x2b3   : > { %s3869_s26 = smov %s3862_s13 }
 0x2b4   : > { %s3870_s27 = smov %s3863_s14 }
 0x2b6   :  { %2016 = vsyncpa [#allocation4], 1 }
 0x2b7   :  { %2018 = vsyncpa [#allocation4 + $0x1], 1 }

// kernel: bert_base_uncased_forward.16
= control target key start
LH: loop header
LB: loop body
LE: loop exit
PB: predicated region body
PF: predicated region fallthrough
CT: control target
= control target key end

     0   :  { %s4371_s0 = inlined_call_operand.vmem [shape: bf16[16,768], index: 0, kind: input, shape index: {}]   ;;  %s4372_s1 = inlined_call_operand.hbm [shape: bf16[768,3072], index: 1, kind: input, shape index: {}]   ;;  %s4373_s2 = inlined_call_operand.hbm [shape: f32[1,3072], index: 2, kind: input, shape index: {}]   ;;  %s4374_s3 = inlined_call_operand.vmem [shape: bf16[16,3072], index: 3, kind: output, shape index: {}]  }
   0x1   :  { %4382 = sst [smem:[#allocation23_spill]] %s4371_s0 }
   0x2   :  { %4383 = sst [smem:[#allocation24_spill]] %s4374_s3 }
   0x3   :  { %8 = vsyncpa [#allocation5], 0 }
   0x4   :  { %10 = vsyncpa [#allocation5 + $0x1], 0 }
   0x5   :  { %11 = vsyncpa [#allocation7], 0 }
   0x6   :  { %13 = vsyncpa [#allocation7 + $0x1], 0  ;;  %s3626_s12 = smov 0   ;;  %s3628_s13 = smov 0  }
   0x7   :  { %s3630_s14 = smov 0   ;;  %s3632_s15 = smov 0  }
   0x8   :  { %s3634_s16 = smov 0   ;;  %s3636_s17 = smov 0  }
   0x9   :  { %s3638_s18 = smov 0   ;;  %s3640_s19 = smov 0  }
   0xa   :  { %s3642_s20 = smov 0   ;;  %s3644_s21 = smov 0  }
   0xb   :  { %s3646_s22 = smov 0   ;;  %s3648_s23 = smov 0  }
   0xc   :  { %s3650_s24 = smov 0  }
   0xd LB: > { %4384 = sst [smem:[#allocation11_spill]] %s3572_s17  ;;  %s2284_s25 = sadd.s32 4294967295, %s3600_s24   ;;  %s3600_s24 = sphi %s3650_s24, %s19_s24   ;;  %s3596_s23 = sphi %s3648_s23, %s4417_s23   ;;  %s3592_s22 = sphi %s3646_s22, %s4416_s22   ;;  %s3588_s21 = sphi %s3644_s21, %s4415_s21   ;;  %s3584_s20 = sphi %s3642_s20, %s4414_s20   ;;  %s3580_s19 = sphi %s3640_s19, %s4423_s19   ;;  %s3576_s18 = sphi %s3638_s18, %s4412_s18   ;;  %s3572_s17 = sphi %s3636_s17, %s4411_s17   ;;  %s3568_s16 = sphi %s3634_s16, %s4422_s16   ;;  %s3564_s15 = sphi %s3632_s15, %s4421_s15   ;;  %s3560_s14 = sphi %s3630_s14, %s4420_s14   ;;  %s3556_s13 = sphi %s3628_s13, %s4419_s13   ;;  %s3552_s12 = sphi %s3626_s12, %s4418_s12  }
   0xe   : > { %4385 = sst [smem:[#allocation12_spill]] %s3580_s19  ;;  %s31_s26 = sadd.s32 1, %s3592_s22 }
   0xf   : > { %4386 = sst [smem:[#allocation13_spill]] %s3584_s20  ;;  %p32_p0 = scmp.ge.s32.totalorder %s31_s26, 2 }
  0x10   : > { %4387 = sst [smem:[#allocation14_spill]] %s3588_s21  ;;  %s34_s27 = sadd.s32 1, %s3596_s23 }
  0x11   : > { %4388 = sst [smem:[#allocation15_spill]] %s3592_s22  ;;  %s47_s28 = sadd.s32 1, %s3580_s19 }
  0x12   : > { %4389 = sst [smem:[#allocation16_spill]] %s3596_s23  ;;  %p54_p1 = scmp.ne.s32.totalorder %s3580_s19, %s3576_s18 }
  0x13   : > { %s4425_s26 = smov (%p32_p0, %s31_s26), 0  ;;  %s4427_s27 = smov (!%p32_p0, %s34_s27), %s3596_s23 }
  0x14   : > { %4390 = sst [smem:[#allocation17_spill]] %s4425_s26  ;;  %s43_s29 = ssub.s32 %s3592_s22, %s4425_s26 }
  0x15   : > { %p55_p2 = scmp.eq.s32.totalorder %s3600_s24, 0  ;;  %p36_p3 = scmp.ge.s32.totalorder %s4427_s27, 3 }
  0x16   : > { %p45_p4 = scmp.eq.s32.totalorder %s43_s29, 0  ;;  %s75_s4 = sadd.s32 1, %s3572_s17 }
  0x17   : > { %p3705_p5 = por %p55_p2, %p54_p1  ;;  %s4429_s27 = smov (%p36_p3, %s4427_s27), 0 }
  0x18   : > { %4392 = sst [smem:[#allocation18_spill]] %s4429_s27  ;;  %s71_s6 = ssub.s32 %s3596_s23, %s4429_s27 }
  0x19   : > { %s3713_s5 = scalar_select %p45_p4, %s3580_s19, %s47_s28  }
  0x1a   : > { %p82_p6 = scmp.ne.s32.totalorder %s3572_s17, %s3568_s16  ;;  %s72_s7 = sor.u32 %s71_s6, %s43_s29 }
  0x1b   : > { %4393 = sst [smem:[#allocation19_spill]] %s3713_s5  ;;  %p88_p7 = scmp.ne.s32.totalorder %s3568_s16, %s3564_s15 }
  0x1c   : > { %p73_p8 = scmp.eq.s32.totalorder %s72_s7, 0  ;;  %p3723_p9 = por %p82_p6, %p55_p2 }
  0x1d   : > { %p89_p10 = scmp.eq.s32.totalorder %s2284_s25, 0  ;;  %p99_p11 = scmp.eq.s32.totalorder %s71_s6, 0 }
  0x1e   : > { %s3730_s9 = scalar_select %p73_p8, %s3572_s17, %s75_s4  }
  0x1f   : > { %p3732_p12 = por %p89_p10, %p88_p7  ;;  %s101_s11 = sadd.s32 1, %s3560_s14 }
  0x20   : > { %4395 = sst [smem:[#allocation20_spill]] %s3730_s9  ;;  %p108_p13 = scmp.ne.s32.totalorder %s3560_s14, %s3556_s13 }
  0x21   : > { %s3738_s28 = scalar_select %p99_p11, %s3560_s14, %s101_s11  }
  0x22   : > { %p114_p0 = scmp.ne.s32.totalorder %s3556_s13, %s3552_s12  ;;  %p140_p1 = scmp.eq.s32.totalorder %s2284_s25, 5 }
  0x23   : > { %4397 = sst [smem:[#allocation21_spill]] %s3738_s28  ;;  %p3748_p3 = por %p108_p13, %p55_p2 }
  0x24   : > { %p3752_p4 = por %p114_p0, %p89_p10  ;;  %p3756_p6 = por %p140_p1, %p108_p13 }
  0x25   : > { %p2287_p7 = scmp.ge.s32.totalorder %s3600_s24, 6 }
  0x26   : > { %s4400_s4 = scalar_select %p3756_p6, 1, 0 }
  0x27   : > { %162 = sbr.rel (%p2287_p7) target bundleno = 70 (0x46), region = 16 }
  0x28   : > { %4401 = sst [smem:[#allocation22_spill]] %s4400_s4 }
  0x2c   : > { %165 = sbr.rel (!%p3705_p5) target bundleno = 57 (0x39), region = 20  ;;  %s167_s12 = sand.u32 (%p3705_p5), 1, %s3580_s19  }
  0x2d   : > { %s3087_s25 = smul.u32 (%p3705_p5), 12, %s3592_s22  ;;  %s4402_s0 = sld [smem:[#allocation23_spill]] (%p3705_p5) }
  0x2e   : > { %s3284_s6 = smul.u32 (%p3705_p5), 24, %s167_s12 }
  0x30   : > { %s169_s26 = scalar_lea.vmem (%p3705_p5), [#allocation3], %s3284_s6 }
  0x33   : > { %s175_s27 = scalar_lea.vmem %s4402_s0, %s3087_s25 }
  0x34   : > { %v190_v0 = vld [vmem:[%s175_s27] sm:$0xff]  ;;  %v192_v1 = vld [vmem:[%s175_s27 + $0x18] sm:$0xff]  ;;  %v2289_v2 = vld [vmem:[%s175_s27 + $0x8] sm:$0xf] }
  0x35   : > { %191 = vst [vmem:[%s169_s26] sm:$0xff] %v190_v0  ;;  %v2291_v3 = vld [vmem:[%s175_s27 + $0x20] sm:$0xf] }
  0x36   : > { %193 = vst [vmem:[%s169_s26 + $0xc] sm:$0xff] %v192_v1 }
  0x37   : > { %2290 = vst [vmem:[%s169_s26 + $0x8] sm:$0xf] %v2289_v2 }
  0x38   : > { %2292 = vst [vmem:[%s169_s26 + $0x14] sm:$0xf] %v2291_v3 }
  0x39 PF: > { %s212_s30 = sand.u32 1, %s3572_s17   ;;  %s2293_s5 = sshll.u32 %s3596_s23, 3 }
  0x3a   : > { %s3285_s12 = smul.u32 1536, %s212_s30  ;;  %s237_s28 = sand.u32 1, %s3560_s14  }
  0x3b   : > { %s3293_s7 = smul.u32 1152, %s3592_s22  ;;  %s213_s3 = scalar_lea.sflag [#allocation5], %s212_s30 }
  0x3c   : > { %s216_s11 = scalar_lea.vmem [#allocation4], %s3285_s12  ;;  %s3602_s21 = smov 1536  }
  0x3d   : > { %s222_s25 = sadd.s32 %s3293_s7, %s2293_s5  ;;  %s227_s0 = sshll.u32 %s216_s11, 4  ;;  %s228_s0 = int_to_ptr.vmem [resolvable:$true] %s227_s0 }
  0x3e   : > { %s2294_s19 = sshll.u32 %s222_s25, 2  ;;  %s3603_s17 = smov 512  }
  0x3f   : > { %s224_s9 = scalar_lea.hbm %s4372_s1, %s2294_s19  ;;  %s3604_s4 = smov 32  }
  0x40   : > { %s225_s26 = sshll.u32 %s224_s9, 4  ;;  %s2295_s23 = sshll.u32 %s237_s28, 3  ;;  %s226_s26 = int_to_ptr.hbm [resolvable:$true] %s225_s26 }
  0x41   : > { %3289 = dma.hbm_to_vmem [thread:$0]  (%p3723_p9), %s226_s26, 24576, %s228_s0, %s213_s3, %s3602_s21, %s3603_s17, %s3604_s4  }
  0x42   : > { %s245_s25 = scalar_lea.hbm %s4373_s2, %s2293_s5  ;;  %s241_s22 = scalar_lea.vmem [#allocation6], %s2295_s23 }
  0x43   : > { %s247_s11 = sshll.u32 %s245_s25, 4  ;;  %s249_s20 = sshll.u32 %s241_s22, 4  ;;  %s248_s11 = int_to_ptr.hbm [resolvable:$true] %s247_s11  ;;  %s250_s20 = int_to_ptr.vmem [resolvable:$true] %s249_s20 }
  0x44   : > { %s238_s19 = scalar_lea.sflag [#allocation7], %s237_s28 }
  0x45   : > { %3290 = dma.hbm_to_vmem [thread:$0]  (%p3748_p3), %s248_s11, 128, %s250_s20, %s238_s19  }
  0x46 PF: > { %p2297_p2 = scmp.ge.s32.totalorder %s3600_s24, 1  ;;  %p254_p5 = scmp.lt.s32.totalorder %s3600_s24, 7 }
  0x48   : > { %p255_p8 = pnand %p2297_p2, %p254_p5 }
  0x49   : > { %s261_s0 = sand.u32 (!%p255_p8), 1, %s3576_s18   ;;  %s267_s3 = sand.u32 (!%p255_p8), 1, %s3568_s16  }
  0x4a   : > { %258 = sbr.rel (%p255_p8) target bundleno = 549 (0x225), region = 54  ;;  %s268_s23 = scalar_lea.sflag (!%p255_p8), [#allocation5], %s267_s3 }
  0x4b   : > { %s3287_s17 = smul.u32 (!%p255_p8), 24, %s261_s0 }
  0x4c   : > { %s3288_s21 = smul.u32 (!%p255_p8), 1536, %s267_s3 }
  0x4d   : > { %s3786_s22 = scalar_lea.vmem (!%p255_p8), [#allocation3], %s3287_s17 }
  0x4e   : > { %s3788_s5 = scalar_lea.vmem (!%p255_p8), [#allocation4], %s3288_s21 }
  0x4f   : > { %3543 = dma.done.wait (%p3732_p12), %s268_s23, 24576  }
  0x50   : > { %3545 = vsyncadd (%p3732_p12), %s268_s23, 4294942720  ;;  %s277_s20 = sand.u32 1, %s3556_s13  }
  0x51   : > { %s2298_s8 = sshll.u32 %s277_s20, 3  ;;  %s278_s9 = scalar_lea.sflag [#allocation7], %s277_s20 }
  0x52   : > { %s3795_s28 = scalar_lea.vmem [#allocation6], %s2298_s8 }
  0x53   : > { %3547 = dma.done.wait (%p3752_p4), %s278_s9, 128  }
  0x54   : > { %3549 = vsyncadd (%p3752_p4), %s278_s9, 4294967168  ;;  %s2299_s18 = sshll.u32 %s277_s20, 6  ;;  %s4403_s4 = sld [smem:[#allocation13_spill]] }
  0x55   : > { %s3801_s15 = scalar_lea.vmem [#allocation8], %s2299_s18 }
  0x5a   : > { %p2300_p9 = scmp.ne.s32.totalorder %s4403_s4, 0 }
  0x5c   : > { %323 = sbr.rel (%p2300_p9) target bundleno = 114 (0x72), region = 70 }
  0x61   : > { %v3605_v4 = vmov 0.0  }
  0x62   : > { %324 = vst [vmem:[#allocation2 + $0x30] sm:$0xff] %v3605_v4 }
  0x63   : > { %325 = vst [vmem:[#allocation2] sm:$0xff] %v3605_v4 }
  0x64   : > { %326 = vst [vmem:[#allocation2 + $0x58] sm:$0xff] %v3605_v4 }
  0x65   : > { %327 = vst [vmem:[#allocation2 + $0x18] sm:$0xff] %v3605_v4 }
  0x66   : > { %328 = vst [vmem:[#allocation2 + $0x50] sm:$0xff] %v3605_v4 }
  0x67   : > { %329 = vst [vmem:[#allocation2 + $0x68] sm:$0xff] %v3605_v4 }
  0x68   : > { %330 = vst [vmem:[#allocation2 + $0x8] sm:$0xff] %v3605_v4 }
  0x69   : > { %331 = vst [vmem:[#allocation2 + $0x48] sm:$0xff] %v3605_v4 }
  0x6a   : > { %332 = vst [vmem:[#allocation2 + $0x40] sm:$0xff] %v3605_v4 }
  0x6b   : > { %333 = vst [vmem:[#allocation2 + $0x20] sm:$0xff] %v3605_v4 }
  0x6c   : > { %334 = vst [vmem:[#allocation2 + $0x10] sm:$0xff] %v3605_v4 }
  0x6d   : > { %335 = vst [vmem:[#allocation2 + $0x38] sm:$0xff] %v3605_v4 }
  0x6e   : > { %336 = vst [vmem:[#allocation2 + $0x60] sm:$0xff] %v3605_v4 }
  0x6f   : > { %337 = vst [vmem:[#allocation2 + $0x70] sm:$0xff] %v3605_v4 }
  0x70   : > { %338 = vst [vmem:[#allocation2 + $0x78] sm:$0xff] %v3605_v4 }
  0x71   : > { %339 = vst [vmem:[#allocation2 + $0x28] sm:$0xff] %v3605_v4 }
  0x72 PF: > { %v2539_v5 = vld [vmem:[%s3788_s5 + $0x1c0] sm:$0xf]  ;;  %v3147_v14 = vld [vmem:[%s3788_s5 + $0x1c4] sm:$0xf]  ;;  %s4404_s10 = sld [smem:[#allocation13_spill]] }
  0x73   : > { %v3151_v6 = vld [vmem:[%s3788_s5 + $0x1dc] sm:$0xf0]  ;;  %v2541_v15 = vld [vmem:[%s3788_s5 + $0x1e0] sm:$0xf0] }
  0x74   : > { %v2795_v7 = vld [vmem:[%s3788_s5 + $0x3c0] sm:$0xf]  ;;  %v2540_v8 = vor.u32 %v3151_v6, %v2539_v5  ;;  %v2544_v17 = vor.u32 %v3147_v14, %v2541_v15  ;;  %v3139_v25 = vld [vmem:[%s3788_s5 + $0x184] sm:$0xf] }
  0x75   : > { %v3215_v9 = vld [vmem:[%s3788_s5 + $0x3dc] sm:$0xf0]  ;;  %v2509_v27 = vld [vmem:[%s3788_s5 + $0x1a0] sm:$0xf0] }
  0x76   : > { %v3051_v10 = vld [vmem:[%s3788_s5 + $0x5c0] sm:$0xf]  ;;  %v2796_v12 = vor.u32 %v3215_v9, %v2795_v7  ;;  %1528 = vmatpush.bf16.msra.mxu0 %v2540_v8  ;;  %1570 = vmatpush.bf16.msra.mxu3 %v2544_v17  ;;  %v2512_v30 = vor.u32 %v3139_v25, %v2509_v27  ;;  %v3131_v36 = vld [vmem:[%s3788_s5 + $0x144] sm:$0xf] }
  0x77   : > { %v3279_v11 = vld [vmem:[%s3788_s5 + $0x5dc] sm:$0xf0]  ;;  %v2477_v37 = vld [vmem:[%s3788_s5 + $0x160] sm:$0xf0] }
  0x78   : > { %v3052_v13 = vor.u32 %v3279_v11, %v3051_v10  ;;  %v2507_v16 = vld [vmem:[%s3788_s5 + $0x180] sm:$0xf]  ;;  %1542 = vmatpush.bf16.msra.mxu1 %v2796_v12  ;;  %v2480_v43 = vor.u32 %v3131_v36, %v2477_v37  ;;  %v3123_v47 = vld [vmem:[%s3788_s5 + $0x104] sm:$0xf]  ;;  %p3081_p10 = scmp.ne.s32.totalorder %s4404_s10, 1 }
  0x79   : > { %v3143_v18 = vld [vmem:[%s3788_s5 + $0x19c] sm:$0xf0]  ;;  %v2445_v48 = vld [vmem:[%s3788_s5 + $0x120] sm:$0xf0] }
  0x7a   : > { %v2763_v19 = vld [vmem:[%s3788_s5 + $0x380] sm:$0xf]  ;;  %1556 = vmatpush.bf16.msra.mxu2 %v3052_v13  ;;  %v2508_v21 = vor.u32 %v3143_v18, %v2507_v16  ;;  %1571 = vmatpush.bf16.msra.mxu3 %v2512_v30  ;;  %v2448_v55 = vor.u32 %v3123_v47, %v2445_v48  ;;  %v3115_v59 = vld [vmem:[%s3788_s5 + $0xc4] sm:$0xf] }
  0x7b   : > { %v3207_v20 = vld [vmem:[%s3788_s5 + $0x39c] sm:$0xf0]  ;;  %v2413_v60 = vld [vmem:[%s3788_s5 + $0xe0] sm:$0xf0] }
  0x7c   : > { %v2764_v22 = vor.u32 %v3207_v20, %v2763_v19  ;;  %v3019_v23 = vld [vmem:[%s3788_s5 + $0x580] sm:$0xf]  ;;  %1529 = vmatpush.bf16.msra.mxu0 %v2508_v21  ;;  %v2416_v3 = vor.u32 %v3115_v59, %v2413_v60  ;;  %v3107_v7 = vld [vmem:[%s3788_s5 + $0x84] sm:$0xf] }
  0x7d   : > { %v3271_v24 = vld [vmem:[%s3788_s5 + $0x59c] sm:$0xf0]  ;;  %v2381_v8 = vld [vmem:[%s3788_s5 + $0xa0] sm:$0xf0] }
  0x7e   : > { %v3020_v26 = vor.u32 %v3271_v24, %v3019_v23  ;;  %v2475_v28 = vld [vmem:[%s3788_s5 + $0x140] sm:$0xf]  ;;  %1543 = vmatpush.bf16.msra.mxu1 %v2764_v22  ;;  %1572 = vmatpush.bf16.msra.mxu3 %v2480_v43  ;;  %v2384_v15 = vor.u32 %v3107_v7, %v2381_v8  ;;  %v3099_v19 = vld [vmem:[%s3788_s5 + $0x44] sm:$0xf]  ;;  %v3216_v43 = vld [vmem:[%s3788_s5 + $0x3e4] sm:$0xf0] }
  0x7f   : > { %v3135_v29 = vld [vmem:[%s3788_s5 + $0x15c] sm:$0xf0]  ;;  %v2349_v20 = vld [vmem:[%s3788_s5 + $0x60] sm:$0xf0]  ;;  %v2739_v8 = vld [vmem:[%s3788_s5 + $0x348] sm:$0xf] }
  0x80   : > { %v2731_v31 = vld [vmem:[%s3788_s5 + $0x340] sm:$0xf]  ;;  %v2476_v34 = vor.u32 %v3135_v29, %v2475_v28  ;;  %1557 = vmatpush.bf16.msra.mxu2 %v3020_v26  ;;  %v2352_v29 = vor.u32 %v3099_v19, %v2349_v20  ;;  %v3053_v37 = vld [vmem:[%s3788_s5 + $0x5e0] sm:$0xf0]  ;;  %v2451_v20 = vld [vmem:[%s3788_s5 + $0x108] sm:$0xf] }
  0x81   : > { %v3199_v32 = vld [vmem:[%s3788_s5 + $0x35c] sm:$0xf0]  ;;  %v3195_v60 = vld [vmem:[%s3788_s5 + $0x344] sm:$0xf] }
  0x82   : > { %v2987_v33 = vld [vmem:[%s3788_s5 + $0x540] sm:$0xf]  ;;  %v2732_v38 = vor.u32 %v3199_v32, %v2731_v31  ;;  %1530 = vmatpush.bf16.msra.mxu0 %v2476_v34  ;;  %1573 = vmatpush.bf16.msra.mxu3 %v2448_v55  ;;  %v3091_v31 = vld [vmem:[%s3788_s5 + $0x4] sm:$0xf]  ;;  %v2771_v55 = vld [vmem:[%s3788_s5 + $0x388] sm:$0xf] }
  0x83   : > { %v3263_v35 = vld [vmem:[%s3788_s5 + $0x55c] sm:$0xf0]  ;;  %v2317_v32 = vld [vmem:[%s3788_s5 + $0x20] sm:$0xf0] }
  0x84   : > { %v2988_v39 = vor.u32 %v3263_v35, %v2987_v33  ;;  %v2443_v40 = vld [vmem:[%s3788_s5 + $0x100] sm:$0xf]  ;;  %1544 = vmatpush.bf16.msra.mxu1 %v2732_v38  ;;  %v3211_v33 = vld [vmem:[%s3788_s5 + $0x3c4] sm:$0xf]  ;;  %v2547_v38 = vld [vmem:[%s3788_s5 + $0x1c8] sm:$0xf] }
  0x85   : > { %v3127_v41 = vld [vmem:[%s3788_s5 + $0x11c] sm:$0xf0]  ;;  %v2797_v34 = vld [vmem:[%s3788_s5 + $0x3e0] sm:$0xf0] }
  0x86   : > { %v2699_v42 = vld [vmem:[%s3788_s5 + $0x300] sm:$0xf]  ;;  %v2444_v49 = vor.u32 %v3127_v41, %v2443_v40  ;;  %1558 = vmatpush.bf16.msra.mxu2 %v2988_v39  ;;  %1574 = vmatpush.bf16.msra.mxu3 %v2416_v3  ;;  %v3275_v35 = vld [vmem:[%s3788_s5 + $0x5c4] sm:$0xf]  ;;  %v3152_v39 = vld [vmem:[%s3788_s5 + $0x1e4] sm:$0xf0] }
  0x87   : > { %v3191_v44 = vld [vmem:[%s3788_s5 + $0x31c] sm:$0xf0]  ;;  %v3056_v47 = vor.u32 %v3275_v35, %v3053_v37  ;;  %v2548_v48 = vor.u32 %v3152_v39, %v2547_v38  ;;  %v2483_v3 = vld [vmem:[%s3788_s5 + $0x148] sm:$0xf] }
  0x88   : > { %v2955_v45 = vld [vmem:[%s3788_s5 + $0x500] sm:$0xf]  ;;  %v2700_v50 = vor.u32 %v3191_v44, %v2699_v42  ;;  %1531 = vmatpush.bf16.msra.mxu0 %v2444_v49  ;;  %v2803_v42 = vld [vmem:[%s3788_s5 + $0x3c8] sm:$0xf]  ;;  %v2320_v44 = vor.u32 %v3091_v31, %v2317_v32  ;;  %v2765_v49 = vld [vmem:[%s3788_s5 + $0x3a0] sm:$0xf0] }
  0x89   : > { %v3255_v46 = vld [vmem:[%s3788_s5 + $0x51c] sm:$0xf0]  ;;  %v3243_v31 = vld [vmem:[%s3788_s5 + $0x4c4] sm:$0xf]  ;;  %v3120_v35 = vld [vmem:[%s3788_s5 + $0xe4] sm:$0xf0] }
  0x8a   : > { %v2956_v51 = vor.u32 %v3255_v46, %v2955_v45  ;;  %v2411_v52 = vld [vmem:[%s3788_s5 + $0xc0] sm:$0xf]  ;;  %1545 = vmatpush.bf16.msra.mxu1 %v2700_v50  ;;  %1575 = vmatpush.bf16.msra.mxu3 %v2384_v15  ;;  %v2800_v45 = vor.u32 %v3211_v33, %v2797_v34  ;;  %v3203_v46 = vld [vmem:[%s3788_s5 + $0x384] sm:$0xf]  ;;  %v2419_v34 = vld [vmem:[%s3788_s5 + $0xc8] sm:$0xf] }
  0x8b   : > { %v3119_v53 = vld [vmem:[%s3788_s5 + $0xdc] sm:$0xf0]  ;;  %v3267_v50 = vld [vmem:[%s3788_s5 + $0x584] sm:$0xf]  ;;  %v2768_v59 = vor.u32 %v3203_v46, %v2765_v49  ;;  %v3184_v37 = vld [vmem:[%s3788_s5 + $0x2e4] sm:$0xf0] }
  0x8c   : > { %v2667_v54 = vld [vmem:[%s3788_s5 + $0x2c0] sm:$0xf]  ;;  %v2412_v61 = vor.u32 %v3119_v53, %v2411_v52  ;;  %1559 = vmatpush.bf16.msra.mxu2 %v2956_v51  ;;  %v3021_v51 = vld [vmem:[%s3788_s5 + $0x5a0] sm:$0xf0]  ;;  %v2804_v52 = vor.u32 %v3216_v43, %v2803_v42  ;;  %v2515_v53 = vld [vmem:[%s3788_s5 + $0x188] sm:$0xf] }
  0x8d   : > { %v3183_v56 = vld [vmem:[%s3788_s5 + $0x2dc] sm:$0xf0]  ;;  %v2925_v33 = vld [vmem:[%s3788_s5 + $0x4e0] sm:$0xf0]  ;;  %v2387_v46 = vld [vmem:[%s3788_s5 + $0x88] sm:$0xf] }
  0x8e   : > { %v2923_v57 = vld [vmem:[%s3788_s5 + $0x4c0] sm:$0xf]  ;;  %v2668_v62 = vor.u32 %v3183_v56, %v2667_v54  ;;  %1532 = vmatpush.bf16.msra.mxu0 %v2412_v61  ;;  %1576 = vmatpush.bf16.msra.mxu3 %v2352_v29  ;;  %v3144_v54 = vld [vmem:[%s3788_s5 + $0x1a4] sm:$0xf0]  ;;  %v2733_v61 = vld [vmem:[%s3788_s5 + $0x360] sm:$0xf0]  ;;  %v2928_v39 = vor.u32 %v3243_v31, %v2925_v33 }
  0x8f   : > { %v3247_v58 = vld [vmem:[%s3788_s5 + $0x4dc] sm:$0xf0]  ;;  %v3208_v56 = vld [vmem:[%s3788_s5 + $0x3a4] sm:$0xf0]  ;;  %v3179_v29 = vld [vmem:[%s3788_s5 + $0x2c4] sm:$0xf] }
  0x90   : > { %v2924_v63 = vor.u32 %v3247_v58, %v2923_v57  ;;  %v2379_v0 = vld [vmem:[%s3788_s5 + $0x80] sm:$0xf]  ;;  %1546 = vmatpush.bf16.msra.mxu1 %v2668_v62  ;;  %v2303_v57 = vld [vmem:[%s3786_s22] sm:$0xf]  ;;  %v3089_v58 = vld [vmem:[%s3786_s22 + $0x8] sm:$0xf0] }
  0x91   : > { %v3111_v1 = vld [vmem:[%s3788_s5 + $0x9c] sm:$0xf0]  ;;  %v3888_v62 = vor.u32 %v3089_v58, %v2303_v57  ;;  %v2637_v42 = vld [vmem:[%s3788_s5 + $0x2a0] sm:$0xf0]  ;;  %v3176_v49 = vld [vmem:[%s3788_s5 + $0x2a4] sm:$0xf0] }
  0x92   : > { %v2635_v2 = vld [vmem:[%s3788_s5 + $0x280] sm:$0xf]  ;;  %v2380_v9 = vor.u32 %v3111_v1, %v2379_v0  ;;  %1560 = vmatpush.bf16.msra.mxu2 %v2924_v63  ;;  %1577 = vmatpush.bf16.msra.mxu3 %v2320_v44  ;;  %v3024_v63 = vor.u32 %v3267_v50, %v3021_v51  ;;  %v2516_v0 = vor.u32 %v3144_v54, %v2515_v53  ;;  %v3259_v1 = vld [vmem:[%s3788_s5 + $0x544] sm:$0xf]  ;;  %v2355_v58 = vld [vmem:[%s3788_s5 + $0x48] sm:$0xf] }
  0x93   : > { %v3175_v4 = vld [vmem:[%s3788_s5 + $0x29c] sm:$0xf0]  ;;  %v3235_v43 = vld [vmem:[%s3788_s5 + $0x484] sm:$0xf]  ;;  %v3204_v33 = vld [vmem:[%s3788_s5 + $0x38c] sm:$0xf] }
  0x94   : > { %v2891_v5 = vld [vmem:[%s3788_s5 + $0x480] sm:$0xf]  ;;  %v2636_v10 = vor.u32 %v3175_v4, %v2635_v2  ;;  %1533 = vmatpush.bf16.msra.mxu0 %v2380_v9  ;;  %v2989_v2 = vld [vmem:[%s3788_s5 + $0x560] sm:$0xf0]  ;;  %v2772_v4 = vor.u32 %v3208_v56, %v2771_v55  ;;  %v3200_v9 = vld [vmem:[%s3788_s5 + $0x364] sm:$0xf0] }
  0x95   : > { %v3239_v6 = vld [vmem:[%s3788_s5 + $0x49c] sm:$0xf0]  ;;  %1578 = vmatmul.bf16.vlgmr.msra.gmra.mxu3 %v3888_v62  ;;  %v2740_v19 = vor.u32 %v3200_v9, %v2739_v8  ;;  %v3163_v53 = vld [vmem:[%s3788_s5 + $0x244] sm:$0xf]  ;;  %v3096_v8 = vld [vmem:[%s3788_s5 + $0x24] sm:$0xf0] }
  0x96   : > { %v2892_v11 = vor.u32 %v3239_v6, %v2891_v5  ;;  %v2347_v12 = vld [vmem:[%s3788_s5 + $0x40] sm:$0xf]  ;;  %1547 = vmatpush.bf16.msra.mxu1 %v2636_v10  ;;  %1626 = vmatpush.bf16.msrb.mxu3 %v2804_v52  ;;  %v3136_v5 = vld [vmem:[%s3788_s5 + $0x164] sm:$0xf0]  ;;  %v3088_v6 = vld [vmem:[%s3786_s22 + $0x4] sm:$0xf] }
  0x97   : > { %v3103_v13 = vld [vmem:[%s3788_s5 + $0x5c] sm:$0xf0]  ;;  %v2484_v15 = vor.u32 %v3136_v5, %v2483_v3  ;;  %v2605_v54 = vld [vmem:[%s3788_s5 + $0x260] sm:$0xf0]  ;;  %v2579_v9 = vld [vmem:[%s3788_s5 + $0x208] sm:$0xf] }
  0x98   : > { %v2603_v14 = vld [vmem:[%s3788_s5 + $0x240] sm:$0xf]  ;;  %v2348_v21 = vor.u32 %v3103_v13, %v2347_v12  ;;  %1561 = vmatpush.bf16.msra.mxu2 %v2892_v11  ;;  %v2736_v11 = vor.u32 %v3195_v60, %v2733_v61  ;;  %v3187_v12 = vld [vmem:[%s3788_s5 + $0x304] sm:$0xf]  ;;  %v2611_v60 = vld [vmem:[%s3788_s5 + $0x248] sm:$0xf] }
  0x99   : > { %v3167_v16 = vld [vmem:[%s3788_s5 + $0x25c] sm:$0xf0]  ;;  %v2701_v13 = vld [vmem:[%s3788_s5 + $0x320] sm:$0xf0]  ;;  %v3168_v61 = vld [vmem:[%s3788_s5 + $0x264] sm:$0xf0] }
  0x9a   : > { %v2859_v17 = vld [vmem:[%s3788_s5 + $0x440] sm:$0xf]  ;;  %v2604_v24 = vor.u32 %v3167_v16, %v2603_v14  ;;  %1534 = vmatpush.bf16.msra.mxu0 %v2348_v21  ;;  %v2992_v14 = vor.u32 %v3259_v1, %v2989_v2  ;;  %v3251_v16 = vld [vmem:[%s3788_s5 + $0x504] sm:$0xf]  ;;  %1627 = vmatpush.bf16.msrb.mxu3 %v2772_v4  ;;  %v3128_v21 = vld [vmem:[%s3788_s5 + $0x124] sm:$0xf0] }
  0x9b   : > { %v3231_v18 = vld [vmem:[%s3788_s5 + $0x45c] sm:$0xf0]  ;;  %v3227_v55 = vld [vmem:[%s3788_s5 + $0x444] sm:$0xf] }
  0x9c   : > { %v2315_v22 = vld [vmem:[%s3788_s5] sm:$0xf]  ;;  %v2860_v25 = vor.u32 %v3231_v18, %v2859_v17  ;;  %1548 = vmatpush.bf16.msra.mxu1 %v2604_v24  ;;  %v2957_v17 = vld [vmem:[%s3788_s5 + $0x520] sm:$0xf0]  ;;  %v2311_v18 = vld [vmem:[%s3786_s22 + $0x8] sm:$0xf] }
  0x9d   : > { %v3095_v23 = vld [vmem:[%s3788_s5 + $0x1c] sm:$0xf0]  ;;  %v3192_v24 = vld [vmem:[%s3788_s5 + $0x324] sm:$0xf0]  ;;  %v2861_v57 = vld [vmem:[%s3788_s5 + $0x460] sm:$0xf0] }
  0x9e   : > { %v2571_v26 = vld [vmem:[%s3788_s5 + $0x200] sm:$0xf]  ;;  %v2316_v36 = vor.u32 %v3095_v23, %v2315_v22  ;;  %1562 = vmatpush.bf16.msra.mxu2 %v2860_v25  ;;  %v3090_v22 = vld [vmem:[%s3786_s22 + $0x10] sm:$0xf0]  ;;  %v2707_v23 = vld [vmem:[%s3788_s5 + $0x308] sm:$0xf]  ;;  %1628 = vmatpush.bf16.msrb.mxu3 %v2740_v19  ;;  %v2864_v2 = vor.u32 %v3227_v55, %v2861_v57 }
  0x9f   : > { %v3159_v27 = vld [vmem:[%s3788_s5 + $0x21c] sm:$0xf0]  ;;  %v3913_v25 = vor.u32 %v3090_v22, %v2311_v18  ;;  %v2708_v32 = vor.u32 %v3192_v24, %v2707_v23  ;;  %v2573_v1 = vld [vmem:[%s3788_s5 + $0x220] sm:$0xf0]  ;;  %v2805_v18 = vld [vmem:[%s3788_s5 + $0x3e8] sm:$0xf0] }
  0xa0   : > { %v2827_v28 = vld [vmem:[%s3788_s5 + $0x400] sm:$0xf]  ;;  %v2572_v40 = vor.u32 %v3159_v27, %v2571_v26  ;;  %1535 = vmatpush.bf16.msra.mxu0 %v2316_v36  ;;  %v2704_v26 = vor.u32 %v3187_v12, %v2701_v13  ;;  %v2960_v27 = vor.u32 %v3251_v16, %v2957_v17  ;;  %v2675_v36 = vld [vmem:[%s3788_s5 + $0x2c8] sm:$0xf]  ;;  %v3219_v4 = vld [vmem:[%s3788_s5 + $0x404] sm:$0xf] }
  0xa1   : > { %v3223_v30 = vld [vmem:[%s3788_s5 + $0x41c] sm:$0xf0]  ;;  %v2676_v44 = vor.u32 %v3184_v37, %v2675_v36  ;;  %v2829_v5 = vld [vmem:[%s3788_s5 + $0x420] sm:$0xf0]  ;;  %v3059_v12 = vld [vmem:[%s3788_s5 + $0x5c8] sm:$0xf] }
  0xa2   : > { %v2828_v41 = vor.u32 %v3223_v30, %v2827_v28  ;;  %1549 = vmatpush.bf16.msra.mxu1 %v2572_v40  ;;  %v2305_v7 = vld [vmem:[%s3786_s22 + $0xc] sm:$0xf0]  ;;  %v2452_v28 = vor.u32 %v3128_v21, %v2451_v20  ;;  %v2669_v30 = vld [vmem:[%s3788_s5 + $0x2e0] sm:$0xf0]  ;;  %v2420_v40 = vor.u32 %v3120_v35, %v2419_v34  ;;  %1629 = vmatpush.bf16.msrb.mxu3 %v2708_v32  ;;  %v3280_v13 = vld [vmem:[%s3788_s5 + $0x5e4] sm:$0xf0] }
  0xa3   : > { %1536 = vmatmul.bf16.vlgmr.msra.gmra.mxu0 %v3888_v62  ;;  %v3899_v10 = vor.u32 %v3088_v6, %v2305_v7  ;;  %v2672_v38 = vor.u32 %v3179_v29, %v2669_v30  ;;  %v2323_v6 = vld [vmem:[%s3788_s5 + $0x8] sm:$0xf]  ;;  %v2612_v7 = vor.u32 %v3168_v61, %v2611_v60  ;;  %v2549_v16 = vld [vmem:[%s3788_s5 + $0x1e8] sm:$0xf0]  ;;  %v2832_v19 = vor.u32 %v3219_v4, %v2829_v5 }
  0xa4   : > { %1563 = vmatpush.bf16.msra.mxu2 %v2828_v41  ;;  %1584 = vmatpush.bf16.msrb.mxu0 %v2800_v45  ;;  %v3171_v41 = vld [vmem:[%s3788_s5 + $0x284] sm:$0xf]  ;;  %v3212_v17 = vld [vmem:[%s3788_s5 + $0x3cc] sm:$0xf]  ;;  %v2324_v20 = vor.u32 %v3096_v8, %v2323_v6  ;;  %v3060_v24 = vor.u32 %v3280_v13, %v3059_v12  ;;  %v3272_v29 = vld [vmem:[%s3788_s5 + $0x5a4] sm:$0xf0] }
  0xa5   : > { %1550 = vmatmul.bf16.vlgmr.msra.gmra.mxu1 %v3899_v10  ;;  %v2893_v45 = vld [vmem:[%s3788_s5 + $0x4a0] sm:$0xf0]  ;;  %v2640_v50 = vor.u32 %v3171_v41, %v2637_v42  ;;  %v3276_v21 = vld [vmem:[%s3788_s5 + $0x5cc] sm:$0xf]  ;;  %v3264_v41 = vld [vmem:[%s3788_s5 + $0x564] sm:$0xf0] }
  0xa6   : > { %1598 = vmatpush.bf16.msrb.mxu1 %v3056_v47  ;;  %v3112_v47 = vld [vmem:[%s3788_s5 + $0xa4] sm:$0xf0]  ;;  %v2896_v51 = vor.u32 %v3235_v43, %v2893_v45  ;;  %1630 = vmatpush.bf16.msrb.mxu3 %v2676_v44  ;;  %v3061_v22 = vld [vmem:[%s3788_s5 + $0x5e8] sm:$0xf0] }
  0xa7   : > { %1564 = vmatmul.bf16.vlgmr.msra.gmra.mxu2 %v3913_v25  ;;  %v2388_v52 = vor.u32 %v3112_v47, %v2387_v46  ;;  %v3140_v30 = vld [vmem:[%s3788_s5 + $0x18c] sm:$0xf]  ;;  %v3064_v31 = vor.u32 %v3276_v21, %v3061_v22 }
  0xa8   : > { %1612 = vmatpush.bf16.msrb.mxu2 %v2548_v48  ;;  %1585 = vmatpush.bf16.msrb.mxu0 %v2768_v59  ;;  %v2643_v48 = vld [vmem:[%s3788_s5 + $0x288] sm:$0xf]  ;;  %v2517_v32 = vld [vmem:[%s3788_s5 + $0x1a8] sm:$0xf0] }
  0xa9   : > { %v2644_v56 = vor.u32 %v3176_v49, %v2643_v48  ;;  %v3104_v59 = vld [vmem:[%s3788_s5 + $0x64] sm:$0xf0]  ;;  %v2773_v34 = vld [vmem:[%s3788_s5 + $0x3a8] sm:$0xf0] }
  0xaa   : > { %1599 = vmatpush.bf16.msrb.mxu1 %v3024_v63  ;;  %v2608_v63 = vor.u32 %v3163_v53, %v2605_v54  ;;  %v2356_v3 = vor.u32 %v3104_v59, %v2355_v58  ;;  %v3268_v35 = vld [vmem:[%s3788_s5 + $0x58c] sm:$0xf]  ;;  %v3256_v53 = vld [vmem:[%s3788_s5 + $0x524] sm:$0xf0] }
  0xab   : > { %1631 = vmatpush.bf16.msrb.mxu3 %v2644_v56  ;;  %v3029_v36 = vld [vmem:[%s3788_s5 + $0x5a8] sm:$0xf0] }
  0xac   : > { %1613 = vmatpush.bf16.msrb.mxu2 %v2516_v0  ;;  %1586 = vmatpush.bf16.msrb.mxu0 %v2736_v11  ;;  %v3155_v0 = vld [vmem:[%s3788_s5 + $0x204] sm:$0xf]  ;;  %v3160_v11 = vld [vmem:[%s3788_s5 + $0x224] sm:$0xf0]  ;;  %v3132_v42 = vld [vmem:[%s3788_s5 + $0x14c] sm:$0xf]  ;;  %v3032_v43 = vor.u32 %v3268_v35, %v3029_v36 }
  0xad   : > { %v2580_v23 = vor.u32 %v3160_v11, %v2579_v9  ;;  %v2485_v44 = vld [vmem:[%s3788_s5 + $0x168] sm:$0xf0] }
  0xae   : > { %1600 = vmatpush.bf16.msrb.mxu1 %v2992_v14  ;;  %v3148_v14 = vld [vmem:[%s3788_s5 + $0x1cc] sm:$0xf] }
  0xaf   : > { %1632 = vmatpush.bf16.msrb.mxu3 %v2612_v7  ;;  %v3196_v45 = vld [vmem:[%s3788_s5 + $0x34c] sm:$0xf] }
  0xb0   : > { %1614 = vmatpush.bf16.msrb.mxu2 %v2484_v15  ;;  %1587 = vmatpush.bf16.msrb.mxu0 %v2704_v26  ;;  %v2576_v15 = vor.u32 %v3155_v0, %v2573_v1  ;;  %v2552_v26 = vor.u32 %v3148_v14, %v2549_v16  ;;  %v2741_v46 = vld [vmem:[%s3788_s5 + $0x368] sm:$0xf0]  ;;  %v2931_v1 = vld [vmem:[%s3788_s5 + $0x4c8] sm:$0xf] }
  0xb1   : > { %v3260_v47 = vld [vmem:[%s3788_s5 + $0x54c] sm:$0xf]  ;;  %v2899_v14 = vld [vmem:[%s3788_s5 + $0x488] sm:$0xf] }
  0xb2   : > { %1601 = vmatpush.bf16.msrb.mxu1 %v2960_v27  ;;  %v2808_v27 = vor.u32 %v3212_v17, %v2805_v18  ;;  %v2997_v48 = vld [vmem:[%s3788_s5 + $0x568] sm:$0xf0] }
  0xb3   : > { %1633 = vmatpush.bf16.msrb.mxu3 %v2580_v23  ;;  %v3124_v54 = vld [vmem:[%s3788_s5 + $0x10c] sm:$0xf]  ;;  %v3000_v55 = vor.u32 %v3260_v47, %v2997_v48  ;;  %v2555_v48 = vld [vmem:[%s3788_s5 + $0x1d0] sm:$0xf] }
  0xb4   : > { %1615 = vmatpush.bf16.msrb.mxu2 %v2452_v28  ;;  %1588 = vmatpush.bf16.msrb.mxu0 %v2672_v38  ;;  %v3027_v28 = vld [vmem:[%s3788_s5 + $0x588] sm:$0xf]  ;;  %v2520_v38 = vor.u32 %v3140_v30, %v2517_v32  ;;  %v2453_v56 = vld [vmem:[%s3788_s5 + $0x128] sm:$0xf0] }
  0xb5   : > { %v3028_v37 = vor.u32 %v3272_v29, %v3027_v28  ;;  %v3188_v57 = vld [vmem:[%s3788_s5 + $0x30c] sm:$0xf]  ;;  %v3232_v28 = vld [vmem:[%s3788_s5 + $0x464] sm:$0xf0] }
  0xb6   : > { %1602 = vmatpush.bf16.msrb.mxu1 %v2928_v39  ;;  %v2776_v39 = vor.u32 %v3204_v33, %v2773_v34  ;;  %1634 = vmatmul.bf16.vlgmr.msrb.gmra.mxu3 %v3899_v10  ;;  %v2709_v58 = vld [vmem:[%s3788_s5 + $0x328] sm:$0xf0] }
  0xb7   : > { %1682 = vmatpush.bf16.msra.mxu3 %v3064_v31  ;;  %v3252_v59 = vld [vmem:[%s3788_s5 + $0x50c] sm:$0xf]  ;;  %v2712_v0 = vor.u32 %v3188_v57, %v2709_v58  ;;  %v3149_v57 = vld [vmem:[%s3788_s5 + $0x1d4] sm:$0xf] }
  0xb8   : > { %1616 = vmatpush.bf16.msrb.mxu2 %v2420_v40  ;;  %1589 = vmatpush.bf16.msrb.mxu0 %v2640_v50  ;;  %v2995_v40 = vld [vmem:[%s3788_s5 + $0x548] sm:$0xf]  ;;  %v2488_v50 = vor.u32 %v3132_v42, %v2485_v44  ;;  %v2965_v60 = vld [vmem:[%s3788_s5 + $0x528] sm:$0xf0]  ;;  %v2557_v58 = vld [vmem:[%s3788_s5 + $0x1f0] sm:$0xf0] }
  0xb9   : > { %v2996_v49 = vor.u32 %v3264_v41, %v2995_v40  ;;  %v2968_v4 = vor.u32 %v3252_v59, %v2965_v60  ;;  %v2421_v5 = vld [vmem:[%s3788_s5 + $0xe8] sm:$0xf0] }
  0xba   : > { %1603 = vmatpush.bf16.msrb.mxu1 %v2896_v51  ;;  %v2744_v51 = vor.u32 %v3196_v45, %v2741_v46  ;;  %v3180_v6 = vld [vmem:[%s3788_s5 + $0x2cc] sm:$0xf] }
  0xbb   : > { %1683 = vmatpush.bf16.msra.mxu3 %v3032_v43  ;;  %v2677_v7 = vld [vmem:[%s3788_s5 + $0x2e8] sm:$0xf0] }
  0xbc   : > { %1617 = vmatpush.bf16.msrb.mxu2 %v2388_v52  ;;  %1590 = vmatpush.bf16.msrb.mxu0 %v2608_v63  ;;  %v2963_v52 = vld [vmem:[%s3788_s5 + $0x508] sm:$0xf]  ;;  %v2456_v63 = vor.u32 %v3124_v54, %v2453_v56  ;;  %v3244_v8 = vld [vmem:[%s3788_s5 + $0x4cc] sm:$0xf]  ;;  %v2680_v13 = vor.u32 %v3180_v6, %v2677_v7  ;;  %v3281_v54 = vld [vmem:[%s3788_s5 + $0x5ec] sm:$0xf0] }
  0xbd   : > { %v2964_v61 = vor.u32 %v3256_v53, %v2963_v52  ;;  %v2933_v9 = vld [vmem:[%s3788_s5 + $0x4e8] sm:$0xf0]  ;;  %v3217_v52 = vld [vmem:[%s3788_s5 + $0x3ec] sm:$0xf0]  ;;  %v3141_v7 = vld [vmem:[%s3788_s5 + $0x194] sm:$0xf] }
  0xbe   : > { %1604 = vmatpush.bf16.msrb.mxu1 %v2864_v2  ;;  %v3248_v2 = vld [vmem:[%s3788_s5 + $0x4e4] sm:$0xf0]  ;;  %v3108_v16 = vld [vmem:[%s3788_s5 + $0x8c] sm:$0xf]  ;;  %v2936_v17 = vor.u32 %v3244_v8, %v2933_v9  ;;  %v3067_v53 = vld [vmem:[%s3788_s5 + $0x5d0] sm:$0xf] }
  0xbf   : > { %1684 = vmatpush.bf16.msra.mxu3 %v3000_v55  ;;  %v2932_v11 = vor.u32 %v3248_v2, %v2931_v1  ;;  %v2389_v18 = vld [vmem:[%s3788_s5 + $0xa8] sm:$0xf0]  ;;  %v3145_v1 = vld [vmem:[%s3788_s5 + $0x1ac] sm:$0xf0]  ;;  %v2525_v8 = vld [vmem:[%s3788_s5 + $0x1b0] sm:$0xf0] }
  0xc0   : > { %1618 = vmatpush.bf16.msrb.mxu2 %v2356_v3  ;;  %1591 = vmatpush.bf16.msrb.mxu0 %v2576_v15  ;;  %v3116_v3 = vld [vmem:[%s3788_s5 + $0xcc] sm:$0xf]  ;;  %v3240_v15 = vld [vmem:[%s3788_s5 + $0x4a4] sm:$0xf0]  ;;  %v2779_v2 = vld [vmem:[%s3788_s5 + $0x390] sm:$0xf] }
  0xc1   : > { %v2424_v12 = vor.u32 %v3116_v3, %v2421_v5  ;;  %v3236_v21 = vld [vmem:[%s3788_s5 + $0x48c] sm:$0xf]  ;;  %v2900_v23 = vor.u32 %v3240_v15, %v2899_v14  ;;  %v2560_v3 = vor.u32 %v3149_v57, %v2557_v58  ;;  %v3035_v5 = vld [vmem:[%s3788_s5 + $0x590] sm:$0xf]  ;;  %v3109_v57 = vld [vmem:[%s3788_s5 + $0x94] sm:$0xf] }
  0xc2   : > { %1605 = vmatpush.bf16.msrb.mxu1 %v2832_v19  ;;  %v3172_v19 = vld [vmem:[%s3788_s5 + $0x28c] sm:$0xf]  ;;  %v3273_v6 = vld [vmem:[%s3788_s5 + $0x5ac] sm:$0xf0]  ;;  %v2397_v58 = vld [vmem:[%s3788_s5 + $0xb0] sm:$0xf0] }
  0xc3   : > { %1592 = vmatmul.bf16.vlgmr.msrb.gmra.mxu0 %v3899_v10  ;;  %1685 = vmatpush.bf16.msra.mxu3 %v2968_v4  ;;  %v2901_v22 = vld [vmem:[%s3788_s5 + $0x4a8] sm:$0xf0]  ;;  %v3209_v4 = vld [vmem:[%s3788_s5 + $0x3ac] sm:$0xf0] }
  0xc4   : > { %1619 = vmatpush.bf16.msrb.mxu2 %v2324_v20  ;;  %1640 = vmatpush.bf16.msra.mxu0 %v3060_v24  ;;  %v2645_v20 = vld [vmem:[%s3788_s5 + $0x2a8] sm:$0xf0]  ;;  %v2392_v24 = vor.u32 %v3108_v16, %v2389_v18  ;;  %v2904_v30 = vor.u32 %v3236_v21, %v2901_v22  ;;  %v3137_v14 = vld [vmem:[%s3788_s5 + $0x16c] sm:$0xf0]  ;;  %v2528_v16 = vor.u32 %v3141_v7, %v2525_v8  ;;  %v2493_v21 = vld [vmem:[%s3788_s5 + $0x170] sm:$0xf0] }
  0xc5   : > { %1606 = vmatmul.bf16.vlgmr.msrb.gmra.mxu1 %v3913_v25  ;;  %v3100_v29 = vld [vmem:[%s3788_s5 + $0x4c] sm:$0xf]  ;;  %v2747_v15 = vld [vmem:[%s3788_s5 + $0x350] sm:$0xf]  ;;  %v2365_v7 = vld [vmem:[%s3788_s5 + $0x70] sm:$0xf0] }
  0xc6   : > { %1654 = vmatpush.bf16.msra.mxu1 %v2552_v26  ;;  %v2648_v26 = vor.u32 %v3172_v19, %v2645_v20  ;;  %v2357_v31 = vld [vmem:[%s3788_s5 + $0x68] sm:$0xf0]  ;;  %v3003_v18 = vld [vmem:[%s3788_s5 + $0x550] sm:$0xf]  ;;  %v3133_v20 = vld [vmem:[%s3788_s5 + $0x154] sm:$0xf] }
  0xc7   : > { %1620 = vmatmul.bf16.vlgmr.msrb.gmra.mxu2 %v3888_v62  ;;  %1686 = vmatpush.bf16.msra.mxu3 %v2936_v17  ;;  %v3164_v32 = vld [vmem:[%s3788_s5 + $0x24c] sm:$0xf]  ;;  %v3201_v17 = vld [vmem:[%s3788_s5 + $0x36c] sm:$0xf0] }
  0xc8   : > { %1668 = vmatpush.bf16.msra.mxu2 %v2808_v27  ;;  %1641 = vmatpush.bf16.msra.mxu0 %v3028_v37  ;;  %v2867_v27 = vld [vmem:[%s3788_s5 + $0x448] sm:$0xf]  ;;  %v2613_v33 = vld [vmem:[%s3788_s5 + $0x268] sm:$0xf0]  ;;  %v3265_v19 = vld [vmem:[%s3788_s5 + $0x56c] sm:$0xf0] }
  0xc9   : > { %v3228_v34 = vld [vmem:[%s3788_s5 + $0x44c] sm:$0xf]  ;;  %v2868_v36 = vor.u32 %v3232_v28, %v2867_v27  ;;  %v2835_v37 = vld [vmem:[%s3788_s5 + $0x408] sm:$0xf]  ;;  %v2616_v40 = vor.u32 %v3164_v32, %v2613_v33  ;;  %v3129_v27 = vld [vmem:[%s3788_s5 + $0x12c] sm:$0xf0] }
  0xca   : > { %1655 = vmatpush.bf16.msra.mxu1 %v2520_v38  ;;  %v2869_v35 = vld [vmem:[%s3788_s5 + $0x468] sm:$0xf0]  ;;  %v3224_v38 = vld [vmem:[%s3788_s5 + $0x424] sm:$0xf0]  ;;  %v2715_v28 = vld [vmem:[%s3788_s5 + $0x310] sm:$0xf] }
  0xcb   : > { %v3092_v41 = vld [vmem:[%s3788_s5 + $0xc] sm:$0xf]  ;;  %1687 = vmatpush.bf16.msra.mxu3 %v2904_v30  ;;  %v2872_v44 = vor.u32 %v3228_v34, %v2869_v35  ;;  %v3193_v30 = vld [vmem:[%s3788_s5 + $0x32c] sm:$0xf0]  ;;  %v3125_v33 = vld [vmem:[%s3788_s5 + $0x114] sm:$0xf] }
  0xcc   : > { %1669 = vmatpush.bf16.msra.mxu2 %v2776_v39  ;;  %1642 = vmatpush.bf16.msra.mxu0 %v2996_v49  ;;  %v2360_v39 = vor.u32 %v3100_v29, %v2357_v31  ;;  %v2325_v42 = vld [vmem:[%s3788_s5 + $0x28] sm:$0xf0]  ;;  %v3153_v49 = vld [vmem:[%s3788_s5 + $0x1ec] sm:$0xf0]  ;;  %v2496_v29 = vor.u32 %v3133_v20, %v2493_v21  ;;  %v2461_v34 = vld [vmem:[%s3788_s5 + $0x130] sm:$0xf0] }
  0xcd   : > { %v3156_v43 = vld [vmem:[%s3788_s5 + $0x20c] sm:$0xf]  ;;  %v2328_v55 = vor.u32 %v3092_v41, %v2325_v42  ;;  %v2556_v60 = vor.u32 %v3153_v49, %v2555_v48  ;;  %v2971_v31 = vld [vmem:[%s3788_s5 + $0x510] sm:$0xf]  ;;  %v2464_v41 = vor.u32 %v3125_v33, %v2461_v34  ;;  %v2333_v20 = vld [vmem:[%s3788_s5 + $0x30] sm:$0xf0] }
  0xce   : > { %1656 = vmatpush.bf16.msra.mxu1 %v2488_v50  ;;  %v2581_v45 = vld [vmem:[%s3788_s5 + $0x228] sm:$0xf0]  ;;  %v2811_v50 = vld [vmem:[%s3788_s5 + $0x3d0] sm:$0xf]  ;;  %v3213_v21 = vld [vmem:[%s3788_s5 + $0x3d4] sm:$0xf] }
  0xcf   : > { %v3220_v46 = vld [vmem:[%s3788_s5 + $0x40c] sm:$0xf]  ;;  %v2584_v56 = vor.u32 %v3156_v43, %v2581_v45  ;;  %1688 = vmatpush.bf16.msra.mxu3 %v2872_v44  ;;  %v3257_v32 = vld [vmem:[%s3788_s5 + $0x52c] sm:$0xf0]  ;;  %v3117_v45 = vld [vmem:[%s3788_s5 + $0xd4] sm:$0xf] }
  0xd0   : > { %1670 = vmatpush.bf16.msra.mxu2 %v2744_v51  ;;  %1643 = vmatpush.bf16.msra.mxu0 %v2964_v61  ;;  %v2837_v47 = vld [vmem:[%s3788_s5 + $0x428] sm:$0xf0]  ;;  %v2836_v51 = vor.u32 %v3224_v38, %v2835_v37  ;;  %v2812_v61 = vor.u32 %v3217_v52, %v2811_v50  ;;  %v2972_v37 = vor.u32 %v3257_v32, %v2971_v31  ;;  %v2427_v38 = vld [vmem:[%s3788_s5 + $0xd0] sm:$0xf]  ;;  %v2819_v31 = vld [vmem:[%s3788_s5 + $0x3d8] sm:$0xf] }
  0xd1   : > { %v2840_v59 = vor.u32 %v3220_v46, %v2837_v47  ;;  %v3185_v42 = vld [vmem:[%s3788_s5 + $0x2ec] sm:$0xf0]  ;;  %v2429_v46 = vld [vmem:[%s3788_s5 + $0xf0] sm:$0xf0]  ;;  %v3218_v32 = vld [vmem:[%s3788_s5 + $0x3f4] sm:$0xf0] }
  0xd2   : > { %1657 = vmatpush.bf16.msra.mxu1 %v2456_v63  ;;  %v3068_v63 = vor.u32 %v3281_v54, %v3067_v53  ;;  %v2939_v43 = vld [vmem:[%s3788_s5 + $0x4d0] sm:$0xf]  ;;  %v2432_v53 = vor.u32 %v3117_v45, %v2429_v46  ;;  %v3210_v45 = vld [vmem:[%s3788_s5 + $0x3b4] sm:$0xf0] }
  0xd3   : > { %1689 = vmatpush.bf16.msra.mxu3 %v2840_v59  ;;  %v3249_v44 = vld [vmem:[%s3788_s5 + $0x4ec] sm:$0xf0] }
  0xd4   : > { %1671 = vmatpush.bf16.msra.mxu2 %v2712_v0  ;;  %1644 = vmatpush.bf16.msra.mxu0 %v2932_v11  ;;  %v2523_v0 = vld [vmem:[%s3788_s5 + $0x190] sm:$0xf]  ;;  %v2780_v11 = vor.u32 %v3209_v4, %v2779_v2  ;;  %v2940_v49 = vor.u32 %v3249_v44, %v2939_v43  ;;  %v2400_v2 = vor.u32 %v3109_v57, %v2397_v58  ;;  %v3146_v43 = vld [vmem:[%s3788_s5 + $0x1b4] sm:$0xf0] }
  0xd5   : > { %v2524_v9 = vor.u32 %v3145_v1, %v2523_v0  ;;  %v2395_v50 = vld [vmem:[%s3788_s5 + $0x90] sm:$0xf]  ;;  %v2787_v44 = vld [vmem:[%s3788_s5 + $0x398] sm:$0xf] }
  0xd6   : > { %1658 = vmatpush.bf16.msra.mxu1 %v2424_v12  ;;  %v3036_v12 = vor.u32 %v3273_v6, %v3035_v5  ;;  %1690 = vmatmul.bf16.vlgmr.msra.gmra.mxu3 %v3913_v25  ;;  %v2651_v52 = vld [vmem:[%s3788_s5 + $0x290] sm:$0xf]  ;;  %v3101_v6 = vld [vmem:[%s3788_s5 + $0x54] sm:$0xf]  ;;  %v3202_v57 = vld [vmem:[%s3788_s5 + $0x374] sm:$0xf0] }
  0xd7   : > { %1738 = vmatpush.bf16.msrb.mxu3 %v2560_v3  ;;  %v3177_v54 = vld [vmem:[%s3788_s5 + $0x2ac] sm:$0xf0] }
  0xd8   : > { %1672 = vmatpush.bf16.msra.mxu2 %v2680_v13  ;;  %1645 = vmatpush.bf16.msra.mxu0 %v2900_v23  ;;  %v2491_v13 = vld [vmem:[%s3788_s5 + $0x150] sm:$0xf]  ;;  %v2748_v23 = vor.u32 %v3201_v17, %v2747_v15  ;;  %v2368_v17 = vor.u32 %v3101_v6, %v2365_v7  ;;  %v3194_v6 = vld [vmem:[%s3788_s5 + $0x334] sm:$0xf0] }
  0xd9   : > { %v2492_v22 = vor.u32 %v3137_v14, %v2491_v13  ;;  %v3105_v0 = vld [vmem:[%s3788_s5 + $0x6c] sm:$0xf0] }
  0xda   : > { %1659 = vmatpush.bf16.msra.mxu1 %v2392_v24  ;;  %v3004_v24 = vor.u32 %v3265_v19, %v3003_v18  ;;  %v2619_v1 = vld [vmem:[%s3788_s5 + $0x250] sm:$0xf]  ;;  %v3093_v19 = vld [vmem:[%s3788_s5 + $0x14] sm:$0xf] }
  0xdb   : > { %1739 = vmatpush.bf16.msrb.mxu3 %v2528_v16  ;;  %v3169_v3 = vld [vmem:[%s3788_s5 + $0x26c] sm:$0xf0]  ;;  %v2336_v33 = vor.u32 %v3093_v19, %v2333_v20  ;;  %v3186_v19 = vld [vmem:[%s3788_s5 + $0x2f4] sm:$0xf0] }
  0xdc   : > { %1673 = vmatpush.bf16.msra.mxu2 %v2648_v26  ;;  %1646 = vmatpush.bf16.msra.mxu0 %v2868_v36  ;;  %v2459_v26 = vld [vmem:[%s3788_s5 + $0x110] sm:$0xf]  ;;  %v2716_v36 = vor.u32 %v3193_v30, %v2715_v28  ;;  %v3154_v28 = vld [vmem:[%s3788_s5 + $0x1f4] sm:$0xf0] }
  0xdd   : > { %v2460_v35 = vor.u32 %v3129_v27, %v2459_v26  ;;  %v2875_v4 = vld [vmem:[%s3788_s5 + $0x450] sm:$0xf]  ;;  %v3069_v26 = vld [vmem:[%s3788_s5 + $0x5f0] sm:$0xf0]  ;;  %v2563_v27 = vld [vmem:[%s3788_s5 + $0x1d8] sm:$0xf] }
  0xde   : > { %1660 = vmatpush.bf16.msra.mxu1 %v2360_v39  ;;  %v3121_v39 = vld [vmem:[%s3788_s5 + $0xec] sm:$0xf0] }
  0xdf   : > { %1740 = vmatpush.bf16.msrb.mxu3 %v2496_v29  ;;  %v2428_v47 = vor.u32 %v3121_v39, %v2427_v38  ;;  %v3233_v5 = vld [vmem:[%s3788_s5 + $0x46c] sm:$0xf0]  ;;  %v2781_v38 = vld [vmem:[%s3788_s5 + $0x3b0] sm:$0xf0] }
  0xe0   : > { %1674 = vmatpush.bf16.msra.mxu2 %v2616_v40  ;;  %1647 = vmatpush.bf16.msra.mxu0 %v2836_v51  ;;  %v2683_v40 = vld [vmem:[%s3788_s5 + $0x2d0] sm:$0xf]  ;;  %v2876_v13 = vor.u32 %v3233_v5, %v2875_v4  ;;  %v3269_v39 = vld [vmem:[%s3788_s5 + $0x594] sm:$0xf]  ;;  %v3130_v4 = vld [vmem:[%s3788_s5 + $0x134] sm:$0xf0] }
  0xe1   : > { %v2684_v48 = vor.u32 %v3185_v42, %v2683_v40  ;;  %v3113_v51 = vld [vmem:[%s3788_s5 + $0xac] sm:$0xf0]  ;;  %v2820_v40 = vor.u32 %v3218_v32, %v2819_v31  ;;  %v2531_v42 = vld [vmem:[%s3788_s5 + $0x198] sm:$0xf] }
  0xe2   : > { %1661 = vmatpush.bf16.msra.mxu1 %v2328_v55  ;;  %v2907_v55 = vld [vmem:[%s3788_s5 + $0x490] sm:$0xf]  ;;  %v2396_v59 = vor.u32 %v3113_v51, %v2395_v50  ;;  %v2749_v50 = vld [vmem:[%s3788_s5 + $0x370] sm:$0xf0]  ;;  %v2723_v5 = vld [vmem:[%s3788_s5 + $0x318] sm:$0xf] }
  0xe3   : > { %1648 = vmatmul.bf16.vlgmr.msra.gmra.mxu0 %v3913_v25  ;;  %1741 = vmatpush.bf16.msrb.mxu3 %v2464_v41  ;;  %v2587_v14 = vld [vmem:[%s3788_s5 + $0x210] sm:$0xf]  ;;  %v3037_v41 = vld [vmem:[%s3788_s5 + $0x5b0] sm:$0xf0]  ;;  %v2659_v31 = vld [vmem:[%s3788_s5 + $0x298] sm:$0xf] }
  0xe4   : > { %1675 = vmatpush.bf16.msra.mxu2 %v2584_v56  ;;  %1696 = vmatpush.bf16.msrb.mxu0 %v2556_v60  ;;  %v3241_v56 = vld [vmem:[%s3788_s5 + $0x4ac] sm:$0xf0]  ;;  %v2652_v60 = vor.u32 %v3177_v54, %v2651_v52  ;;  %v3261_v51 = vld [vmem:[%s3788_s5 + $0x554] sm:$0xf]  ;;  %v2788_v52 = vor.u32 %v3210_v45, %v2787_v44  ;;  %v2499_v54 = vld [vmem:[%s3788_s5 + $0x158] sm:$0xf] }
  0xe5   : > { %1662 = vmatmul.bf16.vlgmr.msra.gmra.mxu1 %v3888_v62  ;;  %v3161_v15 = vld [vmem:[%s3788_s5 + $0x22c] sm:$0xf0]  ;;  %v3178_v32 = vld [vmem:[%s3788_s5 + $0x2b4] sm:$0xf0] }
  0xe6   : > { %1710 = vmatpush.bf16.msrb.mxu1 %v2812_v61  ;;  %v2908_v61 = vor.u32 %v3241_v56, %v2907_v55  ;;  %v2843_v16 = vld [vmem:[%s3788_s5 + $0x410] sm:$0xf]  ;;  %v2588_v29 = vor.u32 %v3161_v15, %v2587_v14  ;;  %v3138_v55 = vld [vmem:[%s3788_s5 + $0x174] sm:$0xf0]  ;;  %v2724_v14 = vor.u32 %v3194_v6, %v2723_v5  ;;  %v2941_v15 = vld [vmem:[%s3788_s5 + $0x4f0] sm:$0xf0] }
  0xe7   : > { %1676 = vmatmul.bf16.vlgmr.msra.gmra.mxu2 %v3899_v10  ;;  %1742 = vmatpush.bf16.msrb.mxu3 %v2432_v53  ;;  %v3225_v18 = vld [vmem:[%s3788_s5 + $0x42c] sm:$0xf0]  ;;  %v3005_v53 = vld [vmem:[%s3788_s5 + $0x570] sm:$0xf0]  ;;  %v2755_v56 = vld [vmem:[%s3788_s5 + $0x358] sm:$0xf] }
  0xe8   : > { %1724 = vmatpush.bf16.msrb.mxu2 %v3068_v63  ;;  %1697 = vmatpush.bf16.msrb.mxu0 %v2524_v9  ;;  %v2363_v63 = vld [vmem:[%s3788_s5 + $0x50] sm:$0xf]  ;;  %v2844_v30 = vor.u32 %v3225_v18, %v2843_v16  ;;  %v2435_v16 = vld [vmem:[%s3788_s5 + $0xd8] sm:$0xf] }
  0xe9   : > { %v2364_v8 = vor.u32 %v3105_v0, %v2363_v63  ;;  %v2331_v9 = vld [vmem:[%s3788_s5 + $0x10] sm:$0xf]  ;;  %v2717_v63 = vld [vmem:[%s3788_s5 + $0x330] sm:$0xf0]  ;;  %v2691_v18 = vld [vmem:[%s3788_s5 + $0x2d8] sm:$0xf] }
  0xea   : > { %1711 = vmatpush.bf16.msrb.mxu1 %v2780_v11  ;;  %v3097_v11 = vld [vmem:[%s3788_s5 + $0x2c] sm:$0xf0]  ;;  %v3253_v0 = vld [vmem:[%s3788_s5 + $0x514] sm:$0xf]  ;;  %v3170_v44 = vld [vmem:[%s3788_s5 + $0x274] sm:$0xf0] }
  0xeb   : > { %1743 = vmatpush.bf16.msrb.mxu3 %v2400_v2  ;;  %v2973_v2 = vld [vmem:[%s3788_s5 + $0x530] sm:$0xf0] }
  0xec   : > { %1725 = vmatpush.bf16.msrb.mxu2 %v3036_v12  ;;  %1698 = vmatpush.bf16.msrb.mxu0 %v2492_v22  ;;  %v2620_v12 = vor.u32 %v3169_v3, %v2619_v1  ;;  %v2813_v22 = vld [vmem:[%s3788_s5 + $0x3f0] sm:$0xf0]  ;;  %v2756_v1 = vor.u32 %v3202_v57, %v2755_v56  ;;  %v2467_v3 = vld [vmem:[%s3788_s5 + $0x118] sm:$0xf] }
  0xed   : > { %v2816_v34 = vor.u32 %v3213_v21, %v2813_v22  ;;  %v3162_v56 = vld [vmem:[%s3788_s5 + $0x234] sm:$0xf0] }
  0xee   : > { %1712 = vmatpush.bf16.msrb.mxu1 %v2748_v23  ;;  %v3277_v23 = vld [vmem:[%s3788_s5 + $0x5d4] sm:$0xf]  ;;  %v3075_v57 = vld [vmem:[%s3788_s5 + $0x5d8] sm:$0xf] }
  0xef   : > { %1744 = vmatpush.bf16.msrb.mxu3 %v2368_v17  ;;  %v3122_v17 = vld [vmem:[%s3788_s5 + $0xf4] sm:$0xf0] }
  0xf0   : > { %1726 = vmatpush.bf16.msrb.mxu2 %v3004_v24  ;;  %1699 = vmatpush.bf16.msrb.mxu0 %v2460_v35  ;;  %v2332_v24 = vor.u32 %v3097_v11, %v2331_v9  ;;  %v3072_v35 = vor.u32 %v3277_v23, %v3069_v26  ;;  %v2468_v9 = vor.u32 %v3130_v4, %v2467_v3  ;;  %v3181_v11 = vld [vmem:[%s3788_s5 + $0x2d4] sm:$0xf]  ;;  %v3278_v3 = vld [vmem:[%s3788_s5 + $0x5dc] sm:$0xf] }
  0xf1   : > { %v2436_v22 = vor.u32 %v3122_v17, %v2435_v16  ;;  %v3173_v23 = vld [vmem:[%s3788_s5 + $0x294] sm:$0xf]  ;;  %v3077_v4 = vld [vmem:[%s3788_s5 + $0x5f8] sm:$0xf0] }
  0xf2   : > { %1713 = vmatpush.bf16.msrb.mxu1 %v2716_v36  ;;  %v2564_v36 = vor.u32 %v3154_v28, %v2563_v27  ;;  %v3237_v26 = vld [vmem:[%s3788_s5 + $0x494] sm:$0xf]  ;;  %v2692_v27 = vor.u32 %v3186_v19, %v2691_v18  ;;  %v2789_v16 = vld [vmem:[%s3788_s5 + $0x3b8] sm:$0xf0] }
  0xf3   : > { %1745 = vmatpush.bf16.msrb.mxu3 %v2336_v33  ;;  %v2909_v28 = vld [vmem:[%s3788_s5 + $0x4b0] sm:$0xf0]  ;;  %v3270_v17 = vld [vmem:[%s3788_s5 + $0x59c] sm:$0xf] }
  0xf4   : > { %1727 = vmatpush.bf16.msrb.mxu2 %v2972_v37  ;;  %1700 = vmatpush.bf16.msrb.mxu0 %v2428_v47  ;;  %v3205_v37 = vld [vmem:[%s3788_s5 + $0x394] sm:$0xf]  ;;  %v3040_v47 = vor.u32 %v3269_v39, %v3037_v41  ;;  %v2660_v39 = vor.u32 %v3178_v32, %v2659_v31  ;;  %v2371_v41 = vld [vmem:[%s3788_s5 + $0x58] sm:$0xf]  ;;  %v3045_v18 = vld [vmem:[%s3788_s5 + $0x5b8] sm:$0xf0] }
  0xf5   : > { %v2784_v46 = vor.u32 %v3205_v37, %v2781_v38  ;;  %v2621_v37 = vld [vmem:[%s3788_s5 + $0x270] sm:$0xf0]  ;;  %v3013_v31 = vld [vmem:[%s3788_s5 + $0x578] sm:$0xf0] }
  0xf6   : > { %1714 = vmatpush.bf16.msrb.mxu1 %v2684_v48  ;;  %v2532_v48 = vor.u32 %v3146_v43, %v2531_v42  ;;  %1746 = vmatmul.bf16.vlgmr.msrb.gmra.mxu3 %v3888_v62  ;;  %v3229_v38 = vld [vmem:[%s3788_s5 + $0x454] sm:$0xf]  ;;  %v3106_v42 = vld [vmem:[%s3788_s5 + $0x74] sm:$0xf0] }
  0xf7   : > { %1794 = vmatpush.bf16.msra.mxu3 %v2820_v40  ;;  %v2877_v40 = vld [vmem:[%s3788_s5 + $0x470] sm:$0xf0]  ;;  %v2627_v43 = vld [vmem:[%s3788_s5 + $0x258] sm:$0xf] }
  0xf8   : > { %1728 = vmatpush.bf16.msrb.mxu2 %v2940_v49  ;;  %1701 = vmatpush.bf16.msrb.mxu0 %v2396_v59  ;;  %v3197_v49 = vld [vmem:[%s3788_s5 + $0x354] sm:$0xf]  ;;  %v3008_v59 = vor.u32 %v3261_v51, %v3005_v53  ;;  %v2628_v53 = vor.u32 %v3170_v44, %v2627_v43  ;;  %v2981_v43 = vld [vmem:[%s3788_s5 + $0x538] sm:$0xf0] }
  0xf9   : > { %v2752_v58 = vor.u32 %v3197_v49, %v2749_v50  ;;  %v2372_v49 = vor.u32 %v3106_v42, %v2371_v41  ;;  %v3221_v50 = vld [vmem:[%s3788_s5 + $0x414] sm:$0xf]  ;;  %v2725_v41 = vld [vmem:[%s3788_s5 + $0x338] sm:$0xf0] }
  0xfa   : > { %1715 = vmatpush.bf16.msrb.mxu1 %v2652_v60  ;;  %v2500_v60 = vor.u32 %v3138_v55, %v2499_v54  ;;  %v2845_v51 = vld [vmem:[%s3788_s5 + $0x430] sm:$0xf0]  ;;  %v3098_v54 = vld [vmem:[%s3788_s5 + $0x34] sm:$0xf0]  ;;  %v3254_v42 = vld [vmem:[%s3788_s5 + $0x51c] sm:$0xf] }
  0xfb   : > { %1795 = vmatpush.bf16.msra.mxu3 %v2788_v52  ;;  %v2339_v52 = vld [vmem:[%s3788_s5 + $0x18] sm:$0xf] }
  0xfc   : > { %1729 = vmatpush.bf16.msrb.mxu2 %v2908_v61  ;;  %1702 = vmatpush.bf16.msrb.mxu0 %v2364_v8  ;;  %v3189_v61 = vld [vmem:[%s3788_s5 + $0x314] sm:$0xf]  ;;  %v2976_v8 = vor.u32 %v3253_v0, %v2973_v2  ;;  %v2595_v55 = vld [vmem:[%s3788_s5 + $0x218] sm:$0xf]  ;;  %v2821_v0 = vld [vmem:[%s3788_s5 + $0x3f8] sm:$0xf0]  ;;  %v2340_v2 = vor.u32 %v3098_v54, %v2339_v52 }
  0xfd   : > { %v2720_v7 = vor.u32 %v3189_v61, %v2717_v63  ;;  %v2565_v61 = vld [vmem:[%s3788_s5 + $0x1f8] sm:$0xf0]  ;;  %v2596_v5 = vor.u32 %v3162_v56, %v2595_v55 }
  0xfe   : > { %1716 = vmatpush.bf16.msrb.mxu1 %v2620_v12  ;;  %v2685_v12 = vld [vmem:[%s3788_s5 + $0x2f0] sm:$0xf0]  ;;  %v3214_v63 = vld [vmem:[%s3788_s5 + $0x3dc] sm:$0xf] }
  0xff   : > { %1796 = vmatpush.bf16.msra.mxu3 %v2756_v1  ;;  %v2688_v20 = vor.u32 %v3181_v11, %v2685_v12  ;;  %v2848_v1 = vor.u32 %v3221_v50, %v2845_v51  ;;  %v3274_v11 = vld [vmem:[%s3788_s5 + $0x5b4] sm:$0xf0]  ;;  %v3142_v12 = vld [vmem:[%s3788_s5 + $0x19c] sm:$0xf]  ;;  %v2984_v50 = vor.u32 %v3254_v42, %v2981_v43 }
 0x100   : > { %1730 = vmatpush.bf16.msrb.mxu2 %v2876_v13  ;;  %1703 = vmatpush.bf16.msrb.mxu0 %v2332_v24  ;;  %v3245_v13 = vld [vmem:[%s3788_s5 + $0x4d4] sm:$0xf]  ;;  %v2437_v51 = vld [vmem:[%s3788_s5 + $0xf8] sm:$0xf0] }
 0x101   : > { %v2944_v21 = vor.u32 %v3245_v13, %v2941_v15  ;;  %v2653_v24 = vld [vmem:[%s3788_s5 + $0x2b0] sm:$0xf0]  ;;  %v3080_v13 = vor.u32 %v3278_v3, %v3077_v4  ;;  %v3206_v15 = vld [vmem:[%s3788_s5 + $0x39c] sm:$0xf] }
 0x102   : > { %1717 = vmatpush.bf16.msrb.mxu1 %v2588_v29  ;;  %v2403_v29 = vld [vmem:[%s3788_s5 + $0x98] sm:$0xf]  ;;  %v2656_v33 = vor.u32 %v3173_v23, %v2653_v24  ;;  %v3134_v24 = vld [vmem:[%s3788_s5 + $0x15c] sm:$0xf] }
 0x103   : > { %1704 = vmatmul.bf16.vlgmr.msrb.gmra.mxu0 %v3888_v62  ;;  %1797 = vmatpush.bf16.msra.mxu3 %v2724_v14  ;;  %v2533_v14 = vld [vmem:[%s3788_s5 + $0x1b8] sm:$0xf0]  ;;  %v3266_v23 = vld [vmem:[%s3788_s5 + $0x574] sm:$0xf0] }
 0x104   : > { %1731 = vmatpush.bf16.msrb.mxu2 %v2844_v30  ;;  %1752 = vmatpush.bf16.msra.mxu0 %v2816_v34  ;;  %v3114_v30 = vld [vmem:[%s3788_s5 + $0xb4] sm:$0xf0]  ;;  %v2912_v34 = vor.u32 %v3237_v26, %v2909_v28  ;;  %v3048_v26 = vor.u32 %v3270_v17, %v3045_v18  ;;  %v3198_v28 = vld [vmem:[%s3788_s5 + $0x35c] sm:$0xf] }
 0x105   : > { %1718 = vmatmul.bf16.vlgmr.msrb.gmra.mxu1 %v3899_v10  ;;  %v3182_v52 = vld [vmem:[%s3788_s5 + $0x2dc] sm:$0xf] }
 0x106   : > { %1766 = vmatpush.bf16.msra.mxu1 %v3072_v35  ;;  %v2404_v35 = vor.u32 %v3114_v30, %v2403_v29  ;;  %v2757_v29 = vld [vmem:[%s3788_s5 + $0x378] sm:$0xf0] }
 0x107   : > { %1732 = vmatmul.bf16.vlgmr.msrb.gmra.mxu2 %v3913_v25  ;;  %1798 = vmatpush.bf16.msra.mxu3 %v2692_v27  ;;  %v2501_v27 = vld [vmem:[%s3788_s5 + $0x178] sm:$0xf0] }
 0x108   : > { %1780 = vmatpush.bf16.msra.mxu2 %v2564_v36  ;;  %1753 = vmatpush.bf16.msra.mxu0 %v2784_v46  ;;  %v3165_v36 = vld [vmem:[%s3788_s5 + $0x254] sm:$0xf]  ;;  %v3262_v30 = vld [vmem:[%s3788_s5 + $0x55c] sm:$0xf] }
 0x109   : > { %v2624_v45 = vor.u32 %v3165_v36, %v2621_v37  ;;  %v3157_v46 = vld [vmem:[%s3788_s5 + $0x214] sm:$0xf]  ;;  %v3258_v36 = vld [vmem:[%s3788_s5 + $0x534] sm:$0xf0]  ;;  %v3126_v37 = vld [vmem:[%s3788_s5 + $0x11c] sm:$0xf] }
 0x10a   : > { %1767 = vmatpush.bf16.msra.mxu1 %v3040_v47  ;;  %v2589_v47 = vld [vmem:[%s3788_s5 + $0x230] sm:$0xf0]  ;;  %v3246_v54 = vld [vmem:[%s3788_s5 + $0x4dc] sm:$0xf] }
 0x10b   : > { %1799 = vmatpush.bf16.msra.mxu3 %v2660_v39  ;;  %v2469_v39 = vld [vmem:[%s3788_s5 + $0x138] sm:$0xf0] }
 0x10c   : > { %1781 = vmatpush.bf16.msra.mxu2 %v2532_v48  ;;  %1754 = vmatpush.bf16.msra.mxu0 %v2752_v58  ;;  %v2880_v48 = vor.u32 %v3229_v38, %v2877_v40  ;;  %v3282_v58 = vld [vmem:[%s3788_s5 + $0x5f4] sm:$0xf0]  ;;  %v3016_v38 = vor.u32 %v3262_v30, %v3013_v31  ;;  %v3190_v40 = vld [vmem:[%s3788_s5 + $0x31c] sm:$0xf] }
 0x10d   : > { %v3076_v6 = vor.u32 %v3282_v58, %v3075_v57  ;;  %v2949_v55 = vld [vmem:[%s3788_s5 + $0x4f8] sm:$0xf0] }
 0x10e   : > { %1768 = vmatpush.bf16.msra.mxu1 %v3008_v59  ;;  %v3150_v59 = vld [vmem:[%s3788_s5 + $0x1dc] sm:$0xf] }
 0x10f   : > { %1800 = vmatpush.bf16.msra.mxu3 %v2628_v53  ;;  %v2693_v53 = vld [vmem:[%s3788_s5 + $0x2f8] sm:$0xf0] }
 0x110   : > { %1782 = vmatpush.bf16.msra.mxu2 %v2500_v60  ;;  %1755 = vmatpush.bf16.msra.mxu0 %v2720_v7  ;;  %v2592_v60 = vor.u32 %v3157_v46, %v2589_v47  ;;  %v2568_v7 = vor.u32 %v3150_v59, %v2565_v61  ;;  %v2728_v46 = vor.u32 %v3190_v40, %v2725_v41  ;;  %v2947_v47 = vld [vmem:[%s3788_s5 + $0x4d8] sm:$0xf]  ;;  %v3110_v61 = vld [vmem:[%s3788_s5 + $0x9c] sm:$0xf] }
 0x111   : > { %v2696_v58 = vor.u32 %v3182_v52, %v2693_v53  ;;  %v2915_v59 = vld [vmem:[%s3788_s5 + $0x498] sm:$0xf]  ;;  %v3238_v3 = vld [vmem:[%s3788_s5 + $0x49c] sm:$0xf]  ;;  %v341_v53 = vld [vmem:[#allocation2] sm:$0xff] }
 0x112   : > { %1769 = vmatpush.bf16.msra.mxu1 %v2976_v8  ;;  %v2824_v8 = vor.u32 %v3214_v63, %v2821_v0  ;;  %v2952_v63 = vor.u32 %v3246_v54, %v2949_v55  ;;  %v2405_v0 = vld [vmem:[%s3788_s5 + $0xb8] sm:$0xf0] }
 0x113   : > { %1801 = vmatpush.bf16.msra.mxu3 %v2596_v5  ;;  %v2917_v4 = vld [vmem:[%s3788_s5 + $0x4b8] sm:$0xf0] }
 0x114   : > { %1783 = vmatpush.bf16.msra.mxu2 %v2468_v9  ;;  %1756 = vmatpush.bf16.msra.mxu0 %v2688_v20  ;;  %v3043_v9 = vld [vmem:[%s3788_s5 + $0x598] sm:$0xf]  ;;  %v2536_v20 = vor.u32 %v3142_v12, %v2533_v14  ;;  %v2920_v14 = vor.u32 %v3238_v3, %v2917_v4  ;;  %v2629_v17 = vld [vmem:[%s3788_s5 + $0x278] sm:$0xf0] }
 0x115   : > { %v3044_v19 = vor.u32 %v3274_v11, %v3043_v9  ;;  %v2883_v11 = vld [vmem:[%s3788_s5 + $0x458] sm:$0xf]  ;;  %v2341_v31 = vld [vmem:[%s3788_s5 + $0x38] sm:$0xf0] }
 0x116   : > { %1770 = vmatpush.bf16.msra.mxu1 %v2944_v21  ;;  %v2792_v21 = vor.u32 %v3206_v15, %v2789_v16  ;;  %1802 = vmatmul.bf16.vlgmr.msra.gmra.mxu3 %v3899_v10  ;;  %v3234_v12 = vld [vmem:[%s3788_s5 + $0x474] sm:$0xf0]  ;;  %v2373_v15 = vld [vmem:[%s3788_s5 + $0x78] sm:$0xf0] }
 0x117   : > { %1850 = vmatpush.bf16.msrb.mxu3 %v3080_v13  ;;  %v3102_v13 = vld [vmem:[%s3788_s5 + $0x5c] sm:$0xf] }
 0x118   : > { %1784 = vmatpush.bf16.msra.mxu2 %v2436_v22  ;;  %1757 = vmatpush.bf16.msra.mxu0 %v2656_v33  ;;  %v3011_v22 = vld [vmem:[%s3788_s5 + $0x558] sm:$0xf]  ;;  %v2504_v33 = vor.u32 %v3134_v24, %v2501_v27  ;;  %v3166_v16 = vld [vmem:[%s3788_s5 + $0x25c] sm:$0xf] }
 0x119   : > { %v3012_v32 = vor.u32 %v3266_v23, %v3011_v22  ;;  %v2851_v22 = vld [vmem:[%s3788_s5 + $0x418] sm:$0xf]  ;;  %v2376_v23 = vor.u32 %v3102_v13, %v2373_v15  ;;  %v2632_v24 = vor.u32 %v3166_v16, %v2629_v17  ;;  %v3094_v27 = vld [vmem:[%s3788_s5 + $0x1c] sm:$0xf]  ;;  %v343_v15 = vld [vmem:[#allocation2 + $0x18] sm:$0xff] }
 0x11a   : > { %1771 = vmatpush.bf16.msra.mxu1 %v2912_v34  ;;  %v2760_v34 = vor.u32 %v3198_v28, %v2757_v29  ;;  %v340_v28 = vld [vmem:[#allocation2 + $0x30] sm:$0xff] }
 0x11b   : > { %1851 = vmatpush.bf16.msrb.mxu3 %v3048_v26  ;;  %v3226_v26 = vld [vmem:[%s3788_s5 + $0x434] sm:$0xf0] }
 0x11c   : > { %1785 = vmatpush.bf16.msra.mxu2 %v2404_v35  ;;  %1758 = vmatpush.bf16.msra.mxu0 %v2624_v45  ;;  %v2979_v35 = vld [vmem:[%s3788_s5 + $0x518] sm:$0xf]  ;;  %v2472_v45 = vor.u32 %v3126_v37, %v2469_v39  ;;  %v2852_v37 = vor.u32 %v3226_v26, %v2851_v22  ;;  %v2344_v39 = vor.u32 %v3094_v27, %v2341_v31 }
 0x11d   : > { %v2980_v44 = vor.u32 %v3258_v36, %v2979_v35  ;;  %v3222_v35 = vld [vmem:[%s3788_s5 + $0x41c] sm:$0xf] }
 0x11e   : > { %1772 = vmatpush.bf16.msra.mxu1 %v2880_v48  ;;  %v3250_v48 = vld [vmem:[%s3788_s5 + $0x4f4] sm:$0xf0]  ;;  %v2853_v36 = vld [vmem:[%s3788_s5 + $0x438] sm:$0xf0] }
 0x11f   : > { %1852 = vmatpush.bf16.msrb.mxu3 %v3016_v38  ;;  %v2948_v56 = vor.u32 %v3250_v48, %v2947_v47  ;;  %v2856_v43 = vor.u32 %v3222_v35, %v2853_v36 }
 0x120   : > { %1786 = vmatpush.bf16.msra.mxu2 %v2372_v49  ;;  %1759 = vmatpush.bf16.msra.mxu0 %v2592_v60  ;;  %v3118_v49 = vld [vmem:[%s3788_s5 + $0xdc] sm:$0xf]  ;;  %v3242_v60 = vld [vmem:[%s3788_s5 + $0x4b4] sm:$0xf0]  ;;  %v1537_v5 = vpop.f32.mrf.mxu0 }
 0x121   : > { %v2440_v57 = vor.u32 %v3118_v49, %v2437_v51  ;;  %v1579_v49 = vpop.f32.mrf.mxu3 }
 0x122   : > { %1773 = vmatpush.bf16.msra.mxu1 %v2848_v1  ;;  %v3174_v1 = vld [vmem:[%s3788_s5 + $0x29c] sm:$0xf] }
 0x123   : > { %1760 = vmatmul.bf16.vlgmr.msra.gmra.mxu0 %v3899_v10  ;;  %1853 = vmatpush.bf16.msrb.mxu3 %v2984_v50 }
 0x124   : > { %1787 = vmatpush.bf16.msra.mxu2 %v2340_v2  ;;  %1808 = vmatpush.bf16.msrb.mxu0 %v3076_v6  ;;  %v2661_v2 = vld [vmem:[%s3788_s5 + $0x2b8] sm:$0xf0]  ;;  %v1551_v6 = vpop.f32.mrf.mxu1 }
 0x125   : > { %1774 = vmatmul.bf16.vlgmr.msra.gmra.mxu1 %v3913_v25  ;;  %v2664_v9 = vor.u32 %v3174_v1, %v2661_v2  ;;  %v1552_v18 = vadd.f32 %v1551_v6, %v1537_v5  ;;  %v342_v2 = vld [vmem:[#allocation2 + $0x58] sm:$0xff] }
 0x126   : > { %1822 = vmatpush.bf16.msrb.mxu1 %v2568_v7  ;;  %v2916_v7 = vor.u32 %v3242_v60, %v2915_v59  ;;  %v349_v60 = vld [vmem:[#allocation2 + $0x20] sm:$0xff] }
 0x127   : > { %1788 = vmatmul.bf16.vlgmr.msra.gmra.mxu2 %v3888_v62  ;;  %1854 = vmatpush.bf16.msrb.mxu3 %v2952_v63 }
 0x128   : > { %1836 = vmatpush.bf16.msrb.mxu2 %v2824_v8  ;;  %1809 = vmatpush.bf16.msrb.mxu0 %v3044_v19  ;;  %v2408_v8 = vor.u32 %v3110_v61, %v2405_v0  ;;  %v3230_v19 = vld [vmem:[%s3788_s5 + $0x45c] sm:$0xf]  ;;  %v1539_v41 = vpop.f32.mrf.mxu0 }
 0x12a   : > { %1823 = vmatpush.bf16.msrb.mxu1 %v2536_v20  ;;  %v2885_v20 = vld [vmem:[%s3788_s5 + $0x478] sm:$0xf0]  ;;  %v1565_v29 = vpop.f32.mrf.mxu2 }
 0x12b   : > { %1855 = vmatpush.bf16.msrb.mxu3 %v2920_v14  ;;  %v2888_v30 = vor.u32 %v3230_v19, %v2885_v20 }
 0x12c   : > { %1837 = vmatpush.bf16.msrb.mxu2 %v2792_v21  ;;  %1810 = vmatpush.bf16.msrb.mxu0 %v3012_v32  ;;  %v2884_v21 = vor.u32 %v3234_v12, %v2883_v11  ;;  %v3158_v32 = vld [vmem:[%s3788_s5 + $0x21c] sm:$0xf]  ;;  %v1553_v42 = vpop.f32.mrf.mxu1  ;;  %v350_v11 = vld [vmem:[#allocation2 + $0x10] sm:$0xff] }
 0x12e   : > { %1824 = vmatpush.bf16.msrb.mxu1 %v2504_v33  ;;  %v2597_v33 = vld [vmem:[%s3788_s5 + $0x238] sm:$0xf0] }
 0x12f   : > { %v2600_v40 = vor.u32 %v3158_v32, %v2597_v33  ;;  %1856 = vmatpush.bf16.msrb.mxu3 %v2888_v30  ;;  %v344_v30 = vld [vmem:[#allocation2 + $0x50] sm:$0xff] }
 0x130   : > { %1838 = vmatpush.bf16.msrb.mxu2 %v2760_v34  ;;  %1811 = vmatpush.bf16.msrb.mxu0 %v2980_v44  ;;  %v1566_v34 = vadd.f32 %v1565_v29, %v1552_v18  ;;  %v1554_v44 = vadd.f32 %v1553_v42, %v1539_v41 }
 0x132   : > { %1825 = vmatpush.bf16.msrb.mxu1 %v2472_v45  ;;  %v1864_v38 = vadd.f32 %v1566_v34, %v340_v28  ;;  %v348_v45 = vld [vmem:[#allocation2 + $0x40] sm:$0xff] }
 0x133   : > { %1857 = vmatpush.bf16.msrb.mxu3 %v2856_v43 }
 0x134   : > { %1839 = vmatpush.bf16.msrb.mxu2 %v2728_v46  ;;  %1812 = vmatpush.bf16.msrb.mxu0 %v2948_v56  ;;  %1880 = vst [vmem:[#allocation2 + $0x30] sm:$0xff] %v1864_v38  ;;  %v1567_v46 = vpop.f32.mrf.mxu2  ;;  %v1581_v56 = vpop.f32.mrf.mxu3 }
 0x135   : > { %v1568_v47 = vadd.f32 %v1567_v46, %v1554_v44 }
 0x136   : > { %1826 = vmatpush.bf16.msrb.mxu1 %v2440_v57  ;;  %1858 = vmatmul.bf16.vlgmr.msrb.gmra.mxu3 %v3913_v25 }
 0x137   : > { %v1872_v48 = vadd.f32 %v1568_v47, %v348_v45  ;;  %v345_v45 = vld [vmem:[#allocation2 + $0x68] sm:$0xff] }
 0x138   : > { %1840 = vmatpush.bf16.msrb.mxu2 %v2696_v58  ;;  %1813 = vmatpush.bf16.msrb.mxu0 %v2916_v7 }
 0x139   : > { %1888 = vst [vmem:[#allocation2 + $0x40] sm:$0xff] %v1872_v48 }
 0x13a   : > { %1827 = vmatpush.bf16.msrb.mxu1 %v2408_v8 }
 0x13c   : > { %1841 = vmatpush.bf16.msrb.mxu2 %v2664_v9  ;;  %1814 = vmatpush.bf16.msrb.mxu0 %v2884_v21  ;;  %v1635_v63 = vpop.f32.mrf.mxu3 }
 0x13e   : > { %1828 = vmatpush.bf16.msrb.mxu1 %v2376_v23  ;;  %v351_v23 = vld [vmem:[#allocation2 + $0x38] sm:$0xff] }
 0x140   : > { %1842 = vmatpush.bf16.msrb.mxu2 %v2632_v24  ;;  %1815 = vmatpush.bf16.msrb.mxu0 %v2852_v37  ;;  %v1593_v50 = vpop.f32.mrf.mxu0  ;;  %v352_v37 = vld [vmem:[#allocation2 + $0x60] sm:$0xff] }
 0x141   : > { %v1594_v51 = vadd.f32 %v1593_v50, %v1579_v49 }
 0x142   : > { %1829 = vmatpush.bf16.msrb.mxu1 %v2344_v39  ;;  %v1607_v52 = vpop.f32.mrf.mxu1 }
 0x143   : > { %1816 = vmatmul.bf16.vlgmr.msrb.gmra.mxu0 %v3913_v25  ;;  %v1608_v54 = vadd.f32 %v1607_v52, %v1594_v51  ;;  %v353_v52 = vld [vmem:[#allocation2 + $0x70] sm:$0xff] }
 0x144   : > { %1843 = vmatpush.bf16.msrb.mxu2 %v2600_v40  ;;  %v1637_v1 = vpop.f32.mrf.mxu3 }
 0x145   : > { %1830 = vmatmul.bf16.vlgmr.msrb.gmra.mxu1 %v3888_v62  ;;  %v1865_v55 = vadd.f32 %v1608_v54, %v341_v53 }
 0x147   : > { %1844 = vmatmul.bf16.vlgmr.msrb.gmra.mxu2 %v3899_v10  ;;  %1881 = vst [vmem:[#allocation2] sm:$0xff] %v1865_v55 }
 0x148   : > { %v1595_v57 = vpop.f32.mrf.mxu0 }
 0x149   : > { %v1596_v58 = vadd.f32 %v1595_v57, %v1581_v56 }
 0x14a   : > { %v1609_v59 = vpop.f32.mrf.mxu1  ;;  %v1621_v10 = vpop.f32.mrf.mxu2 }
 0x14b   : > { %v1610_v62 = vadd.f32 %v1609_v59, %v1596_v58  ;;  %v1636_v25 = vadd.f32 %v1635_v63, %v1621_v10 }
 0x14d   : > { %v1873_v61 = vadd.f32 %v1610_v62, %v349_v60  ;;  %v346_v60 = vld [vmem:[#allocation2 + $0x8] sm:$0xff] }
 0x14f   : > { %1889 = vst [vmem:[#allocation2 + $0x20] sm:$0xff] %v1873_v61 }
 0x152   : > { %v1623_v0 = vpop.f32.mrf.mxu2 }
 0x153   : > { %v1638_v7 = vadd.f32 %v1637_v1, %v1623_v0 }
 0x159   : > { %v1691_v9 = vpop.f32.mrf.mxu3 }
 0x160   : > { %v1649_v3 = vpop.f32.mrf.mxu0 }
 0x161   : > { %v1650_v4 = vadd.f32 %v1649_v3, %v1636_v25  ;;  %v1693_v21 = vpop.f32.mrf.mxu3  ;;  %v354_v3 = vld [vmem:[#allocation2 + $0x78] sm:$0xff] }
 0x162   : > { %v1663_v6 = vpop.f32.mrf.mxu1 }
 0x163   : > { %v1866_v5 = vadd.f32 %v1650_v4, %v342_v2 }
 0x165   : > { %1882 = vst [vmem:[#allocation2 + $0x58] sm:$0xff] %v1866_v5  ;;  %v347_v5 = vld [vmem:[#allocation2 + $0x48] sm:$0xff] }
 0x168   : > { %v1651_v12 = vpop.f32.mrf.mxu0 }
 0x169   : > { %v1652_v14 = vadd.f32 %v1651_v12, %v1638_v7 }
 0x16a   : > { %v1677_v8 = vpop.f32.mrf.mxu2  ;;  %v1665_v19 = vpop.f32.mrf.mxu1 }
 0x16b   : > { %v1678_v13 = vadd.f32 %v1677_v8, %v1663_v6  ;;  %v1874_v17 = vadd.f32 %v1652_v14, %v350_v11  ;;  %v355_v14 = vld [vmem:[#allocation2 + $0x28] sm:$0xff] }
 0x16d   : > { %v1692_v16 = vadd.f32 %v1691_v9, %v1678_v13  ;;  %1890 = vst [vmem:[#allocation2 + $0x10] sm:$0xff] %v1874_v17 }
 0x16f   : > { %v1867_v18 = vadd.f32 %v1692_v16, %v343_v15 }
 0x171   : > { %1883 = vst [vmem:[#allocation2 + $0x18] sm:$0xff] %v1867_v18 }
 0x172   : > { %v1679_v20 = vpop.f32.mrf.mxu2 }
 0x173   : > { %v1680_v22 = vadd.f32 %v1679_v20, %v1665_v19 }
 0x175   : > { %v1694_v24 = vadd.f32 %v1693_v21, %v1680_v22 }
 0x177   : > { %v1875_v26 = vadd.f32 %v1694_v24, %v351_v23 }
 0x179   : > { %1891 = vst [vmem:[#allocation2 + $0x38] sm:$0xff] %v1875_v26  ;;  %v1747_v41 = vpop.f32.mrf.mxu3 }
 0x180   : > { %v1705_v27 = vpop.f32.mrf.mxu0 }
 0x181   : > { %v1749_v48 = vpop.f32.mrf.mxu3 }
 0x182   : > { %v1719_v28 = vpop.f32.mrf.mxu1 }
 0x183   : > { %v1720_v29 = vadd.f32 %v1719_v28, %v1705_v27 }
 0x188   : > { %v1707_v34 = vpop.f32.mrf.mxu0 }
 0x18a   : > { %v1733_v31 = vpop.f32.mrf.mxu2  ;;  %v1721_v35 = vpop.f32.mrf.mxu1 }
 0x18b   : > { %v1734_v32 = vadd.f32 %v1733_v31, %v1720_v29  ;;  %v1722_v36 = vadd.f32 %v1721_v35, %v1707_v34 }
 0x18d   : > { %v1868_v33 = vadd.f32 %v1734_v32, %v344_v30 }
 0x18f   : > { %1884 = vst [vmem:[#allocation2 + $0x50] sm:$0xff] %v1868_v33 }
 0x192   : > { %v1735_v38 = vpop.f32.mrf.mxu2 }
 0x193   : > { %v1736_v39 = vadd.f32 %v1735_v38, %v1722_v36 }
 0x195   : > { %v1876_v40 = vadd.f32 %v1736_v39, %v352_v37 }
 0x197   : > { %1892 = vst [vmem:[#allocation2 + $0x60] sm:$0xff] %v1876_v40 }
 0x199   : > { %v1803_v56 = vpop.f32.mrf.mxu3 }
 0x1a0   : > { %v1761_v42 = vpop.f32.mrf.mxu0 }
 0x1a1   : > { %v1762_v43 = vadd.f32 %v1761_v42, %v1747_v41  ;;  %v1805_v59 = vpop.f32.mrf.mxu3 }
 0x1a2   : > { %v1775_v44 = vpop.f32.mrf.mxu1 }
 0x1a3   : > { %v1776_v46 = vadd.f32 %v1775_v44, %v1762_v43 }
 0x1a5   : > { %v1869_v47 = vadd.f32 %v1776_v46, %v345_v45 }
 0x1a7   : > { %1885 = vst [vmem:[#allocation2 + $0x68] sm:$0xff] %v1869_v47 }
 0x1a8   : > { %v1763_v49 = vpop.f32.mrf.mxu0 }
 0x1a9   : > { %v1764_v50 = vadd.f32 %v1763_v49, %v1749_v48 }
 0x1aa   : > { %v1777_v51 = vpop.f32.mrf.mxu1  ;;  %v1789_v55 = vpop.f32.mrf.mxu2 }
 0x1ab   : > { %v1778_v53 = vadd.f32 %v1777_v51, %v1764_v50  ;;  %v1804_v57 = vadd.f32 %v1803_v56, %v1789_v55 }
 0x1ad   : > { %v1877_v54 = vadd.f32 %v1778_v53, %v353_v52 }
 0x1af   : > { %1893 = vst [vmem:[#allocation2 + $0x70] sm:$0xff] %v1877_v54 }
 0x1b2   : > { %v1791_v58 = vpop.f32.mrf.mxu2 }
 0x1b3   : > { %v1806_v25 = vadd.f32 %v1805_v59, %v1791_v58 }
 0x1b9   : > { %v1859_v2 = vpop.f32.mrf.mxu3 }
 0x1c0   : > { %v1817_v62 = vpop.f32.mrf.mxu0 }
 0x1c1   : > { %v1818_v61 = vadd.f32 %v1817_v62, %v1804_v57  ;;  %v1861_v15 = vpop.f32.mrf.mxu3 }
 0x1c2   : > { %v1831_v63 = vpop.f32.mrf.mxu1 }
 0x1c3   : > { %v1870_v10 = vadd.f32 %v1818_v61, %v346_v60 }
 0x1c5   : > { %1886 = vst [vmem:[#allocation2 + $0x8] sm:$0xff] %v1870_v10 }
 0x1c8   : > { %v1819_v4 = vpop.f32.mrf.mxu0 }
 0x1c9   : > { %v1820_v6 = vadd.f32 %v1819_v4, %v1806_v25 }
 0x1ca   : > { %v1845_v0 = vpop.f32.mrf.mxu2  ;;  %v1833_v11 = vpop.f32.mrf.mxu1 }
 0x1cb   : > { %v1846_v1 = vadd.f32 %v1845_v0, %v1831_v63  ;;  %v1878_v8 = vadd.f32 %v1820_v6, %v354_v3 }
 0x1cd   : > { %v1860_v7 = vadd.f32 %v1859_v2, %v1846_v1  ;;  %1894 = vst [vmem:[#allocation2 + $0x78] sm:$0xff] %v1878_v8 }
 0x1cf   : > { %v1871_v9 = vadd.f32 %v1860_v7, %v347_v5 }
 0x1d1   : > { %1887 = vst [vmem:[#allocation2 + $0x48] sm:$0xff] %v1871_v9 }
 0x1d2   : > { %v1847_v12 = vpop.f32.mrf.mxu2 }
 0x1d3   : > { %v1848_v13 = vadd.f32 %v1847_v12, %v1833_v11 }
 0x1d5   : > { %v1862_v16 = vadd.f32 %v1861_v15, %v1848_v13  ;;  %1899 = sbr.rel (%p3081_p10) target bundleno = 533 (0x215), region = 74 }
 0x1d7   : > { %v1879_v17 = vadd.f32 %v1862_v16, %v355_v14 }
 0x1d9   : > { %1895 = vst [vmem:[#allocation2 + $0x28] sm:$0xff] %v1879_v17 }
 0x1da   : > { %v1900_v18 = vld [vmem:[#allocation2 + $0x30] sm:$0xff]  ;;  %v1901_v19 = vld [vmem:[#allocation2] sm:$0xff]  ;;  %v1902_v23 = vld [vmem:[#allocation2 + $0x58] sm:$0xff] }
 0x1db   : > { %v4226_v20 = vld [vmem:[%s3795_s28] sm:$0xff]  ;;  %v1905_v29 = vld [vmem:[#allocation2 + $0x68] sm:$0xff]  ;;  %v1908_v5 = vld [vmem:[#allocation2 + $0x40] sm:$0xff] }
 0x1dc   : > { %v1918_v21 = vperm.slane %v4226_v20, 0  ;;  %v1919_v22 = vperm.slane %v4226_v20, 1  ;;  %v1903_v24 = vld [vmem:[#allocation2 + $0x18] sm:$0xff]  ;;  %v1920_v26 = vperm.slane %v4226_v20, 2  ;;  %v1921_v27 = vperm.slane %v4226_v20, 3  ;;  %v1904_v28 = vld [vmem:[#allocation2 + $0x50] sm:$0xff] }
 0x1dd   : > { %v1922_v30 = vperm.slane %v4226_v20, 4  ;;  %v1923_v31 = vperm.slane %v4226_v20, 5  ;;  %v1924_v32 = vperm.slane %v4226_v20, 6  ;;  %v1906_v37 = vld [vmem:[#allocation2 + $0x8] sm:$0xff]  ;;  %v1925_v42 = vperm.slane %v4226_v20, 7  ;;  %v1909_v6 = vld [vmem:[#allocation2 + $0x20] sm:$0xff] }
 0x1de   : > { %v1934_v33 = vadd.f32 %v1918_v21, %v1900_v18  ;;  %v1935_v34 = vadd.f32 %v1919_v22, %v1901_v19  ;;  %v1936_v35 = vadd.f32 %v1920_v26, %v1902_v23  ;;  %v1937_v36 = vadd.f32 %v1921_v27, %v1903_v24  ;;  %v1907_v45 = vld [vmem:[#allocation2 + $0x48] sm:$0xff] }
 0x1df   : > { %v1938_v38 = vadd.f32 %v1922_v30, %v1904_v28  ;;  %v1939_v39 = vadd.f32 %v1923_v31, %v1905_v29  ;;  %v1940_v46 = vadd.f32 %v1924_v32, %v1906_v37  ;;  %v1941_v58 = vadd.f32 %v1925_v42, %v1907_v45  ;;  %v1910_v28 = vld [vmem:[#allocation2 + $0x10] sm:$0xff] }
 0x1e0   : > { %v1966_v40 = vmul.f32 0.044715, %v1934_v33  ;;  %v1967_v41 = vmul.f32 0.044715, %v1935_v34  ;;  %v1968_v43 = vmul.f32 0.044715, %v1936_v35  ;;  %v4258_v18 = vadd.f32 %v1918_v21, %v1908_v5 }
 0x1e1   : > { %v1969_v44 = vmul.f32 0.044715, %v1937_v36  ;;  %v4248_v47 = vmul.f32 0.5, %v1934_v33  ;;  %v4250_v48 = vmul.f32 0.5, %v1935_v34  ;;  %v1970_v53 = vmul.f32 0.044715, %v1938_v38 }
 0x1e2   : > { %v1982_v49 = vmul.f32 %v1966_v40, %v1934_v33  ;;  %v1983_v50 = vmul.f32 %v1967_v41, %v1935_v34  ;;  %v1984_v51 = vmul.f32 %v1968_v43, %v1936_v35  ;;  %v1971_v54 = vmul.f32 0.044715, %v1939_v39 }
 0x1e3   : > { %v1985_v52 = vmul.f32 %v1969_v44, %v1937_v36  ;;  %v4252_v57 = vmul.f32 0.5, %v1936_v35  ;;  %v1986_v62 = vmul.f32 %v1970_v53, %v1938_v38  ;;  %v4256_v25 = vmul.f32 0.5, %v1937_v36 }
 0x1e4   : > { %v1998_v55 = vmul.f32 %v1982_v49, %v1934_v33  ;;  %v1999_v56 = vmul.f32 %v1983_v50, %v1935_v34  ;;  %v2000_v59 = vmul.f32 %v1984_v51, %v1936_v35  ;;  %v1987_v61 = vmul.f32 %v1971_v54, %v1939_v39 }
 0x1e5   : > { %v2001_v60 = vmul.f32 %v1985_v52, %v1937_v36  ;;  %v1972_v0 = vmul.f32 0.044715, %v1940_v46  ;;  %v2002_v3 = vmul.f32 %v1986_v62, %v1938_v38  ;;  %v1973_v9 = vmul.f32 0.044715, %v1941_v58 }
 0x1e6   : > { %v2014_v10 = vadd.f32 %v1998_v55, %v1934_v33  ;;  %v2015_v63 = vadd.f32 %v1999_v56, %v1935_v34  ;;  %v2016_v1 = vadd.f32 %v2000_v59, %v1936_v35  ;;  %v2003_v4 = vmul.f32 %v1987_v61, %v1939_v39  ;;  %v1911_v35 = vld [vmem:[#allocation2 + $0x38] sm:$0xff] }
 0x1e7   : > { %v2017_v2 = vadd.f32 %v2001_v60, %v1937_v36  ;;  %v1988_v11 = vmul.f32 %v1972_v0, %v1940_v46  ;;  %v2018_v14 = vadd.f32 %v2002_v3, %v1938_v38  ;;  %v1989_v16 = vmul.f32 %v1973_v9, %v1941_v58 }
 0x1e8   : > { %v2030_v7 = vmul.f32 0.7978846, %v2014_v10  ;;  %v2031_v8 = vmul.f32 0.7978846, %v2015_v63  ;;  %v2032_v12 = vmul.f32 0.7978846, %v2016_v1  ;;  %v2019_v15 = vadd.f32 %v2003_v4, %v1939_v39 }
 0x1e9   : > { %v2033_v13 = vmul.f32 0.7978846, %v2017_v2  ;;  %v2004_v17 = vmul.f32 %v1988_v11, %v1940_v46  ;;  %v2034_v19 = vmul.f32 0.7978846, %v2018_v14  ;;  %v4262_v24 = vadd.f32 %v1919_v22, %v1909_v6 }
 0x1ea   : > { %3402 = vtanh.f32 %v2030_v7  ;;  %v2035_v23 = vmul.f32 0.7978846, %v2019_v15  ;;  %v1954_v29 = vmul.f32 0.5, %v1938_v38  ;;  %v2005_v33 = vmul.f32 %v1989_v16, %v1941_v58  ;;  %v1913_v16 = vld [vmem:[#allocation2 + $0x70] sm:$0xff] }
 0x1eb   : > { %3404 = vtanh.f32 %v2031_v8  ;;  %v2020_v34 = vadd.f32 %v2004_v17, %v1940_v46  ;;  %v1955_v36 = vmul.f32 0.5, %v1939_v39  ;;  %v1974_v37 = vmul.f32 0.044715, %v4258_v18 }
 0x1ec   : > { %3406 = vtanh.f32 %v2032_v12  ;;  %v1975_v21 = vmul.f32 0.044715, %v4262_v24  ;;  %v2021_v40 = vadd.f32 %v2005_v33, %v1941_v58  ;;  %v4268_v43 = vadd.f32 %v1920_v26, %v1910_v28 }
 0x1ed   : > { %3408 = vtanh.f32 %v2033_v13  ;;  %v2036_v41 = vmul.f32 0.7978846, %v2020_v34  ;;  %v1990_v22 = vmul.f32 %v1974_v37, %v4258_v18  ;;  %v4274_v44 = vadd.f32 %v1921_v27, %v1911_v35  ;;  %v1915_v35 = vld [vmem:[#allocation2 + $0x28] sm:$0xff] }
 0x1ee   : > { %3410 = vtanh.f32 %v2034_v19  ;;  %v1991_v38 = vmul.f32 %v1975_v21, %v4262_v24  ;;  %v1956_v45 = vmul.f32 0.5, %v1940_v46  ;;  %v2037_v49 = vmul.f32 0.7978846, %v2021_v40 }
 0x1ef   : > { %3412 = vtanh.f32 %v2035_v23  ;;  %v1976_v50 = vmul.f32 0.044715, %v4268_v43  ;;  %v1957_v53 = vmul.f32 0.5, %v1941_v58  ;;  %v2006_v26 = vmul.f32 %v1990_v22, %v4258_v18 }
 0x1f0   : > { %v3403_v39 = vpop.eup %3402  ;;  %3414 = vtanh.f32 %v2036_v41  ;;  %v2007_v54 = vmul.f32 %v1991_v38, %v4262_v24  ;;  %v1977_v59 = vmul.f32 0.044715, %v4274_v44  ;;  %v1947_v40 = vadd.f32 %v1923_v31, %v1913_v16 }
 0x1f1   : > { %v3405_v51 = vpop.eup %3404  ;;  %v2062_v52 = vadd.f32 1.0, %v3403_v39  ;;  %3416 = vtanh.f32 %v2037_v49  ;;  %v1992_v27 = vmul.f32 %v1976_v50, %v4268_v43  ;;  %v2022_v61 = vadd.f32 %v2006_v26, %v4258_v18 }
 0x1f2   : > { %v3407_v55 = vpop.eup %3406  ;;  %v2063_v56 = vadd.f32 1.0, %v3405_v51  ;;  %v2023_v10 = vadd.f32 %v2007_v54, %v4262_v24  ;;  %v1993_v1 = vmul.f32 %v1977_v59, %v4274_v44  ;;  %v1958_v38 = vmul.f32 0.5, %v4258_v18 }
 0x1f3   : > { %v3409_v60 = vpop.eup %3408  ;;  %v2078_v46 = vmul.f32 %v2062_v52, %v4248_v47  ;;  %v2064_v62 = vadd.f32 1.0, %v3407_v55  ;;  %v2008_v2 = vmul.f32 %v1992_v27, %v4268_v43  ;;  %v2038_v6 = vmul.f32 0.7978846, %v2022_v61 }
 0x1f4   : > { %v3411_v58 = vpop.eup %3410  ;;  %v2079_v63 = vmul.f32 %v2063_v56, %v4250_v48  ;;  %v2065_v0 = vadd.f32 1.0, %v3409_v60  ;;  %v2039_v47 = vmul.f32 0.7978846, %v2023_v10  ;;  %v2009_v12 = vmul.f32 %v1993_v1, %v4274_v44  ;;  %v1912_v48 = vld [vmem:[#allocation2 + $0x60] sm:$0xff] }
 0x1f5   : > { %v3413_v3 = vpop.eup %3412  ;;  %v2080_v4 = vmul.f32 %v2064_v62, %v4252_v57  ;;  %v2066_v5 = vadd.f32 1.0, %v3411_v58  ;;  %3418 = vtanh.f32 %v2038_v6  ;;  %v2024_v15 = vadd.f32 %v2008_v2, %v4268_v43  ;;  %v1914_v57 = vld [vmem:[#allocation2 + $0x78] sm:$0xff] }
 0x1f6   : > { %v3415_v7 = vpop.eup %3414  ;;  %v2094_v8 = vpack.c.bf16 %v2079_v63, %v2078_v46  ;;  %v2081_v9 = vmul.f32 %v2065_v0, %v4256_v25  ;;  %v2067_v11 = vadd.f32 1.0, %v3413_v3  ;;  %3420 = vtanh.f32 %v2039_v47 }
 0x1f7   : > { %v2082_v13 = vmul.f32 %v2066_v5, %v1954_v29  ;;  %v2068_v14 = vadd.f32 1.0, %v3415_v7  ;;  %v3417_v17 = vpop.eup %3416  ;;  %v2025_v25 = vadd.f32 %v2009_v12, %v4274_v44  ;;  %v2040_v34 = vmul.f32 0.7978846, %v2024_v15 }
 0x1f8   : > { %2102 = vst [vmem:[%s3801_s15] sm:$0xff] %v2094_v8  ;;  %v2095_v19 = vpack.c.bf16 %v2081_v9, %v2080_v4  ;;  %v2083_v23 = vmul.f32 %v2067_v11, %v1955_v36  ;;  %v2069_v28 = vadd.f32 1.0, %v3417_v17  ;;  %v1946_v29 = vadd.f32 %v1922_v30, %v1912_v48 }
 0x1f9   : > { %v2084_v33 = vmul.f32 %v2068_v14, %v1956_v45  ;;  %v2041_v21 = vmul.f32 0.7978846, %v2025_v25  ;;  %v1948_v36 = vadd.f32 %v1924_v32, %v1914_v57  ;;  %3422 = vtanh.f32 %v2040_v34 }
 0x1fa   : > { %2103 = vst [vmem:[%s3801_s15 + $0x8] sm:$0xff] %v2095_v19  ;;  %v2096_v37 = vpack.c.bf16 %v2083_v23, %v2082_v13  ;;  %v2085_v41 = vmul.f32 %v2069_v28, %v1957_v53  ;;  %v1978_v22 = vmul.f32 0.044715, %v1946_v29  ;;  %v1979_v39 = vmul.f32 0.044715, %v1947_v40 }
 0x1fb   : > { %3424 = vtanh.f32 %v2041_v21  ;;  %v1949_v30 = vadd.f32 %v1925_v42, %v1915_v35  ;;  %v3419_v45 = vpop.eup %3418  ;;  %v1959_v50 = vmul.f32 0.5, %v4262_v24  ;;  %v1980_v51 = vmul.f32 0.044715, %v1948_v36 }
 0x1fc   : > { %2104 = vst [vmem:[%s3801_s15 + $0x10] sm:$0xff] %v2096_v37  ;;  %v2097_v49 = vpack.c.bf16 %v2085_v41, %v2084_v33  ;;  %v1994_v31 = vmul.f32 %v1978_v22, %v1946_v29  ;;  %v3421_v52 = vpop.eup %3420  ;;  %v2070_v32 = vadd.f32 1.0, %v3419_v45  ;;  %v1995_v53 = vmul.f32 %v1979_v39, %v1947_v40 }
 0x1fd   : > { %v1981_v26 = vmul.f32 0.044715, %v1949_v30  ;;  %v2071_v54 = vadd.f32 1.0, %v3421_v52  ;;  %v1996_v56 = vmul.f32 %v1980_v51, %v1948_v36  ;;  %v1960_v59 = vmul.f32 0.5, %v4268_v43 }
 0x1fe   : > { %2105 = vst [vmem:[%s3801_s15 + $0x18] sm:$0xff] %v2097_v49  ;;  %v2010_v55 = vmul.f32 %v1994_v31, %v1946_v29  ;;  %v2086_v18 = vmul.f32 %v2070_v32, %v1958_v38  ;;  %v2011_v27 = vmul.f32 %v1995_v53, %v1947_v40  ;;  %v1961_v24 = vmul.f32 0.5, %v4274_v44 }
 0x1ff   : > { %v1997_v20 = vmul.f32 %v1981_v26, %v1949_v30  ;;  %v3423_v42 = vpop.eup %3422  ;;  %v2087_v60 = vmul.f32 %v2071_v54, %v1959_v50  ;;  %v2012_v62 = vmul.f32 %v1996_v56, %v1948_v36  ;;  %v1962_v8 = vmul.f32 0.5, %v1946_v29 }
 0x200   : > { %v2026_v46 = vadd.f32 %v2010_v55, %v1946_v29  ;;  %v2072_v10 = vadd.f32 1.0, %v3423_v42  ;;  %v2027_v58 = vadd.f32 %v2011_v27, %v1947_v40  ;;  %v1963_v11 = vmul.f32 0.5, %v1947_v40 }
 0x201   : > { %v3425_v61 = vpop.eup %3424  ;;  %v2013_v63 = vmul.f32 %v1997_v20, %v1949_v30  ;;  %v2098_v0 = vpack.c.bf16 %v2087_v60, %v2086_v18  ;;  %v2028_v3 = vadd.f32 %v2012_v62, %v1948_v36  ;;  %v1964_v13 = vmul.f32 0.5, %v1948_v36 }
 0x202   : > { %v2073_v1 = vadd.f32 1.0, %v3425_v61  ;;  %v2042_v2 = vmul.f32 0.7978846, %v2026_v46  ;;  %v2088_v4 = vmul.f32 %v2072_v10, %v1960_v59  ;;  %v2043_v43 = vmul.f32 0.7978846, %v2027_v58 }
 0x203   : > { %v2029_v5 = vadd.f32 %v2013_v63, %v1949_v30  ;;  %2106 = vst [vmem:[%s3801_s15 + $0x20] sm:$0xff] %v2098_v0  ;;  %v2044_v47 = vmul.f32 0.7978846, %v2028_v3  ;;  %v1965_v16 = vmul.f32 0.5, %v1949_v30 }
 0x204   : > { %v2089_v6 = vmul.f32 %v2073_v1, %v1961_v24  ;;  %3426 = vtanh.f32 %v2042_v2 }
 0x205   : > { %3428 = vtanh.f32 %v2043_v43  ;;  %v2045_v44 = vmul.f32 0.7978846, %v2029_v5 }
 0x206   : > { %v2099_v7 = vpack.c.bf16 %v2089_v6, %v2088_v4  ;;  %3430 = vtanh.f32 %v2044_v47 }
 0x207   : > { %3432 = vtanh.f32 %v2045_v44 }
 0x208   : > { %2107 = vst [vmem:[%s3801_s15 + $0x28] sm:$0xff] %v2099_v7 }
 0x20a   : > { %v3427_v9 = vpop.eup %3426 }
 0x20b   : > { %v3429_v12 = vpop.eup %3428  ;;  %v2074_v48 = vadd.f32 1.0, %v3427_v9 }
 0x20c   : > { %v3431_v14 = vpop.eup %3430  ;;  %v2075_v15 = vadd.f32 1.0, %v3429_v12 }
 0x20d   : > { %v3433_v57 = vpop.eup %3432  ;;  %v2090_v17 = vmul.f32 %v2074_v48, %v1962_v8  ;;  %v2076_v19 = vadd.f32 1.0, %v3431_v14 }
 0x20e   : > { %v2091_v23 = vmul.f32 %v2075_v15, %v1963_v11  ;;  %v2077_v25 = vadd.f32 1.0, %v3433_v57 }
 0x20f   : > { %v2092_v28 = vmul.f32 %v2076_v19, %v1964_v13 }
 0x210   : > { %v2100_v33 = vpack.c.bf16 %v2091_v23, %v2090_v17  ;;  %v2093_v34 = vmul.f32 %v2077_v25, %v1965_v16 }
 0x212   : > { %2108 = vst [vmem:[%s3801_s15 + $0x30] sm:$0xff] %v2100_v33  ;;  %v2101_v29 = vpack.c.bf16 %v2093_v34, %v2092_v28 }
 0x214   : > { %2109 = vst [vmem:[%s3801_s15 + $0x38] sm:$0xff] %v2101_v29 }
 0x215 PF: > { %2116 = sbr.rel (!%p3756_p6) target bundleno = 549 (0x225), region = 78  ;;  %s4406_s30 = sld [smem:[#allocation14_spill]] (%p3756_p6)  ;;  %v2135_v35 = vld [vmem:[%s3801_s15] sm:$0xff] (%p3756_p6)  ;;  %v2137_v37 = vld [vmem:[%s3801_s15 + $0x8] sm:$0xff] (%p3756_p6)  ;;  %v2139_v21 = vld [vmem:[%s3801_s15 + $0x10] sm:$0xff] (%p3756_p6) }
 0x216   : > { %s4407_s7 = sld [smem:[#allocation24_spill]] (%p3756_p6)  ;;  %v2141_v40 = vld [vmem:[%s3801_s15 + $0x18] sm:$0xff] (%p3756_p6)  ;;  %v2143_v36 = vld [vmem:[%s3801_s15 + $0x20] sm:$0xff] (%p3756_p6)  ;;  %v2145_v41 = vld [vmem:[%s3801_s15 + $0x28] sm:$0xff] (%p3756_p6) }
 0x219   : > { %v2147_v22 = vld [vmem:[%s3801_s15 + $0x30] sm:$0xff] (%p3756_p6) }
 0x21b   : > { %s3283_s6 = sshll.u32 %s4406_s30, 5  ;;  %v2149_v38 = vld [vmem:[%s3801_s15 + $0x38] sm:$0xff] }
 0x21c   : > { %s2122_s12 = scalar_lea.vmem %s4407_s7, %s3283_s6 }
 0x21d   : > { %2136 = vst [vmem:[%s2122_s12] sm:$0xff] %v2135_v35 }
 0x21e   : > { %2138 = vst [vmem:[%s2122_s12 + $0x8] sm:$0xff] %v2137_v37 }
 0x21f   : > { %2140 = vst [vmem:[%s2122_s12 + $0x10] sm:$0xff] %v2139_v21 }
 0x220   : > { %2142 = vst [vmem:[%s2122_s12 + $0x18] sm:$0xff] %v2141_v40 }
 0x221   : > { %2144 = vst [vmem:[%s2122_s12 + $0x60] sm:$0xff] %v2143_v36 }
 0x222   : > { %2146 = vst [vmem:[%s2122_s12 + $0x68] sm:$0xff] %v2145_v41 }
 0x223   : > { %2148 = vst [vmem:[%s2122_s12 + $0x70] sm:$0xff] %v2147_v22 }
 0x224   : > { %2150 = vst [vmem:[%s2122_s12 + $0x78] sm:$0xff] %v2149_v38 }
 0x225 PF: > { %s19_s24 = sadd.s32 1, %s3600_s24   ;;  %s4409_s11 = sld [smem:[#allocation21_spill]] }
 0x226   : > { %p4327_p11 = scmp.ge.s32.totalorder %s19_s24, 8   ;;  %s4410_s19 = sld [smem:[#allocation11_spill]] }
 0x227   : > { %s4411_s17 = sld [smem:[#allocation20_spill]]  ;;  %s4418_s12 = smov %s3556_s13 }
 0x228   : > { %s4412_s18 = sld [smem:[#allocation12_spill]]  ;;  %s4419_s13 = smov %s3560_s14 }
 0x229   : > { %s4413_s0 = sld [smem:[#allocation19_spill]]  ;;  %s4421_s15 = smov %s3568_s16 }
 0x22a   : > { %s4414_s20 = sld [smem:[#allocation15_spill]] }
 0x22b   : > { %s4415_s21 = sld [smem:[#allocation16_spill]]  ;;  %s4420_s14 = smov %s4409_s11 }
 0x22c   : > { %s4416_s22 = sld [smem:[#allocation17_spill]]  ;;  %s4422_s16 = smov %s4410_s19 }
 0x22d   : > { %s4417_s23 = sld [smem:[#allocation18_spill]]  ;;  %18 = sbr.rel (!%p4327_p11) target bundleno = 13 (0xd), region = 156 }
 0x22f   : > { %s4423_s19 = smov %s4413_s0 }
 0x232   :  { %2166 = vsyncpa [#allocation5], 1 }
 0x233   :  { %2168 = vsyncpa [#allocation5 + $0x1], 1 }
 0x234   :  { %2169 = vsyncpa [#allocation7], 1 }
 0x235   :  { %2171 = vsyncpa [#allocation7 + $0x1], 1 }

// kernel: bert_base_uncased_forward.23
= control target key start
LH: loop header
LB: loop body
LE: loop exit
PB: predicated region body
PF: predicated region fallthrough
CT: control target
= control target key end

     0   :  { %s3989_s0 = inlined_call_operand.vmem [shape: bf16[2,768], index: 0, kind: input, shape index: {}]   ;;  %s3990_s1 = inlined_call_operand.hbm [shape: bf16[768,768], index: 1, kind: input, shape index: {}]   ;;  %s3991_s2 = inlined_call_operand.vmem [shape: f32[1,768], index: 2, kind: input, shape index: {}]   ;;  %s3992_s3 = inlined_call_operand.hbm [shape: f32[1,768], index: 3, kind: input, shape index: {}]   ;;  %s3993_s4 = inlined_call_operand.<no memory space> [shape: f32[1,1], index: 4, kind: input, shape index: {}]   ;;  %s3994_s5 = inlined_call_operand.vmem [shape: f32[2,1], index: 5, kind: output, shape index: {}]  }
   0x1   :  { %v10_v0 = vstv %s3993_s4 }
   0x2   :  { %11 = vst [vmem:[#allocation2] sm:$0x1] %v10_v0 }
   0x3   :  { %12 = vsyncpa [#allocation4], 0  ;;  %s20_s22 = sshll.u32 %s3990_s1, 4  ;;  %s21_s22 = int_to_ptr.hbm [resolvable:$true] %s20_s22 }
   0x4   :  { %13 = vsyncpa [#allocation6], 0  ;;  %s3846_s23 = smov [#allocation3]   ;;  %s36_s27 = sshll.u32 %s3992_s3, 4  ;;  %s37_s27 = int_to_ptr.hbm [resolvable:$true] %s36_s27 }
   0x5   :  { %s22_s24 = sshll.u32 %s3846_s23, 4  ;;  %s3847_s28 = smov 384   ;;  %s23_s24 = int_to_ptr.vmem [resolvable:$true] %s22_s24 }
   0x6   :  { %s3848_s29 = smov 24   ;;  %s3849_s4 = smov [#allocation5]  }
   0x7   :  { %28 = dma.hbm_to_vmem [thread:$0]  %s21_s22, 36864, %s23_s24, [#allocation4], %s3847_s28, %s3847_s28, %s3848_s29  }
   0x8   :  { %s38_s30 = sshll.u32 %s3849_s4, 4  ;;  %s39_s30 = int_to_ptr.vmem [resolvable:$true] %s38_s30 }
   0x9   :  { %41 = dma.hbm_to_vmem [thread:$0]  %s37_s27, 96, %s39_s30, [#allocation6]  }
   0xa   :  { %3842 = dma.done.wait [#allocation4], 36864  }
   0xb   :  { %3843 = vsyncadd [#allocation4], 4294930432 }
   0xc   :  { %3844 = dma.done.wait [#allocation6], 96  }
   0xd   :  { %3845 = vsyncadd [#allocation6], 4294967200  ;;  %v2500_v1 = vld [vmem:[#allocation3 + $0x150] sm:$0xf]  ;;  %v3527_v2 = vld [vmem:[#allocation3 + $0x164] sm:$0xf0] }
   0xe   :  { %v2692_v3 = vld [vmem:[#allocation3 + $0x2d0] sm:$0xf]  ;;  %v2501_v4 = vor.u32 %v3527_v2, %v2500_v1  ;;  %v3575_v5 = vld [vmem:[#allocation3 + $0x2e4] sm:$0xf0]  ;;  %v2476_v12 = vld [vmem:[#allocation3 + $0x120] sm:$0xf] }
   0xf   :  { %v2884_v6 = vld [vmem:[#allocation3 + $0x450] sm:$0xf]  ;;  %v3623_v7 = vld [vmem:[#allocation3 + $0x464] sm:$0xf0]  ;;  %v2693_v8 = vor.u32 %v3575_v5, %v2692_v3  ;;  %v3521_v14 = vld [vmem:[#allocation3 + $0x134] sm:$0xf0] }
  0x10   :  { %v2885_v9 = vor.u32 %v3623_v7, %v2884_v6  ;;  %v3076_v10 = vld [vmem:[#allocation3 + $0x5d0] sm:$0xf]  ;;  %v3671_v11 = vld [vmem:[#allocation3 + $0x5e4] sm:$0xf0]  ;;  %1809 = vmatpush.bf16.msra.mxu0 %v2501_v4  ;;  %v2668_v15 = vld [vmem:[#allocation3 + $0x2a0] sm:$0xf]  ;;  %v2477_v17 = vor.u32 %v3521_v14, %v2476_v12 }
  0x11   :  { %v3077_v13 = vor.u32 %v3671_v11, %v3076_v10  ;;  %v3569_v16 = vld [vmem:[#allocation3 + $0x2b4] sm:$0xf0]  ;;  %1822 = vmatpush.bf16.msra.mxu1 %v2693_v8  ;;  %v2860_v19 = vld [vmem:[#allocation3 + $0x420] sm:$0xf]  ;;  %v2452_v24 = vld [vmem:[#allocation3 + $0xf0] sm:$0xf] }
  0x12   :  { %1835 = vmatpush.bf16.msra.mxu2 %v2885_v9  ;;  %v2669_v18 = vor.u32 %v3569_v16, %v2668_v15  ;;  %v3617_v20 = vld [vmem:[#allocation3 + $0x434] sm:$0xf0]  ;;  %v3052_v21 = vld [vmem:[#allocation3 + $0x5a0] sm:$0xf]  ;;  %v3515_v25 = vld [vmem:[#allocation3 + $0x104] sm:$0xf0] }
  0x13   :  { %1848 = vmatpush.bf16.msra.mxu3 %v3077_v13  ;;  %v2861_v22 = vor.u32 %v3617_v20, %v2860_v19  ;;  %v3665_v23 = vld [vmem:[#allocation3 + $0x5b4] sm:$0xf0]  ;;  %v2644_v27 = vld [vmem:[#allocation3 + $0x270] sm:$0xf]  ;;  %v3563_v28 = vld [vmem:[#allocation3 + $0x284] sm:$0xf0]  ;;  %v2453_v30 = vor.u32 %v3515_v25, %v2452_v24 }
  0x14   :  { %v3053_v26 = vor.u32 %v3665_v23, %v3052_v21  ;;  %v2836_v29 = vld [vmem:[#allocation3 + $0x3f0] sm:$0xf]  ;;  %1810 = vmatpush.bf16.msra.mxu0 %v2477_v17  ;;  %v3611_v31 = vld [vmem:[#allocation3 + $0x404] sm:$0xf0]  ;;  %v2645_v34 = vor.u32 %v3563_v28, %v2644_v27  ;;  %v2428_v36 = vld [vmem:[#allocation3 + $0xc0] sm:$0xf] }
  0x15   :  { %v3028_v32 = vld [vmem:[#allocation3 + $0x570] sm:$0xf]  ;;  %v3659_v33 = vld [vmem:[#allocation3 + $0x584] sm:$0xf0]  ;;  %1823 = vmatpush.bf16.msra.mxu1 %v2669_v18  ;;  %v2837_v35 = vor.u32 %v3611_v31, %v2836_v29  ;;  %v3509_v37 = vld [vmem:[#allocation3 + $0xd4] sm:$0xf0] }
  0x16   :  { %1836 = vmatpush.bf16.msra.mxu2 %v2861_v22  ;;  %v2620_v38 = vld [vmem:[#allocation3 + $0x240] sm:$0xf]  ;;  %v3029_v39 = vor.u32 %v3659_v33, %v3028_v32  ;;  %v3557_v40 = vld [vmem:[#allocation3 + $0x254] sm:$0xf0]  ;;  %v2429_v45 = vor.u32 %v3509_v37, %v2428_v36  ;;  %v2404_v48 = vld [vmem:[#allocation3 + $0x90] sm:$0xf] }
  0x17   :  { %1849 = vmatpush.bf16.msra.mxu3 %v3053_v26  ;;  %v2812_v41 = vld [vmem:[#allocation3 + $0x3c0] sm:$0xf]  ;;  %v3605_v42 = vld [vmem:[#allocation3 + $0x3d4] sm:$0xf0]  ;;  %v2621_v46 = vor.u32 %v3557_v40, %v2620_v38  ;;  %v3503_v49 = vld [vmem:[#allocation3 + $0xa4] sm:$0xf0] }
  0x18   :  { %v3004_v43 = vld [vmem:[#allocation3 + $0x540] sm:$0xf]  ;;  %v3653_v44 = vld [vmem:[#allocation3 + $0x554] sm:$0xf0]  ;;  %1811 = vmatpush.bf16.msra.mxu0 %v2453_v30  ;;  %v2813_v47 = vor.u32 %v3605_v42, %v2812_v41  ;;  %v2596_v50 = vld [vmem:[#allocation3 + $0x210] sm:$0xf]  ;;  %v2405_v57 = vor.u32 %v3503_v49, %v2404_v48 }
  0x19   :  { %1824 = vmatpush.bf16.msra.mxu1 %v2645_v34  ;;  %v3005_v51 = vor.u32 %v3653_v44, %v3004_v43  ;;  %v3551_v52 = vld [vmem:[#allocation3 + $0x224] sm:$0xf0]  ;;  %v2788_v53 = vld [vmem:[#allocation3 + $0x390] sm:$0xf]  ;;  %v2380_v60 = vld [vmem:[#allocation3 + $0x60] sm:$0xf] }
  0x1a   :  { %1837 = vmatpush.bf16.msra.mxu2 %v2837_v35  ;;  %v3599_v54 = vld [vmem:[#allocation3 + $0x3a4] sm:$0xf0]  ;;  %v2980_v55 = vld [vmem:[#allocation3 + $0x510] sm:$0xf]  ;;  %v2597_v58 = vor.u32 %v3551_v52, %v2596_v50  ;;  %v3497_v61 = vld [vmem:[#allocation3 + $0x74] sm:$0xf0] }
  0x1b   :  { %1850 = vmatpush.bf16.msra.mxu3 %v3029_v39  ;;  %v3647_v56 = vld [vmem:[#allocation3 + $0x524] sm:$0xf0]  ;;  %v2789_v59 = vor.u32 %v3599_v54, %v2788_v53  ;;  %v2572_v62 = vld [vmem:[#allocation3 + $0x1e0] sm:$0xf]  ;;  %v3545_v0 = vld [vmem:[#allocation3 + $0x1f4] sm:$0xf0]  ;;  %v2381_v5 = vor.u32 %v3497_v61, %v2380_v60 }
  0x1c   :  { %1812 = vmatpush.bf16.msra.mxu0 %v2429_v45  ;;  %v2981_v63 = vor.u32 %v3647_v56, %v2980_v55  ;;  %v2764_v1 = vld [vmem:[#allocation3 + $0x360] sm:$0xf]  ;;  %v3593_v2 = vld [vmem:[#allocation3 + $0x374] sm:$0xf0]  ;;  %v2573_v6 = vor.u32 %v3545_v0, %v2572_v62  ;;  %v2356_v8 = vld [vmem:[#allocation3 + $0x30] sm:$0xf] }
  0x1d   :  { %1825 = vmatpush.bf16.msra.mxu1 %v2621_v46  ;;  %v2956_v3 = vld [vmem:[#allocation3 + $0x4e0] sm:$0xf]  ;;  %v3641_v4 = vld [vmem:[#allocation3 + $0x4f4] sm:$0xf0]  ;;  %v2765_v7 = vor.u32 %v3593_v2, %v2764_v1  ;;  %v3491_v9 = vld [vmem:[#allocation3 + $0x44] sm:$0xf0] }
  0x1e   :  { %1838 = vmatpush.bf16.msra.mxu2 %v2813_v47  ;;  %v2548_v10 = vld [vmem:[#allocation3 + $0x1b0] sm:$0xf]  ;;  %v2957_v11 = vor.u32 %v3641_v4, %v2956_v3  ;;  %v3539_v12 = vld [vmem:[#allocation3 + $0x1c4] sm:$0xf0]  ;;  %v2357_v17 = vor.u32 %v3491_v9, %v2356_v8  ;;  %v2332_v18 = vld [vmem:[#allocation3] sm:$0xf] }
  0x1f   :  { %1851 = vmatpush.bf16.msra.mxu3 %v3005_v51  ;;  %v2740_v13 = vld [vmem:[#allocation3 + $0x330] sm:$0xf]  ;;  %v3587_v14 = vld [vmem:[#allocation3 + $0x344] sm:$0xf0]  ;;  %v3485_v19 = vld [vmem:[#allocation3 + $0x14] sm:$0xf0]  ;;  %v2549_v20 = vor.u32 %v3539_v12, %v2548_v10 }
  0x20   :  { %1813 = vmatpush.bf16.msra.mxu0 %v2405_v57  ;;  %v2932_v15 = vld [vmem:[#allocation3 + $0x4b0] sm:$0xf]  ;;  %v3635_v16 = vld [vmem:[#allocation3 + $0x4c4] sm:$0xf0]  ;;  %v2741_v21 = vor.u32 %v3587_v14, %v2740_v13  ;;  %v2524_v22 = vld [vmem:[#allocation3 + $0x180] sm:$0xf]  ;;  %v2333_v32 = vor.u32 %v3485_v19, %v2332_v18 }
  0x21   :  { %1826 = vmatpush.bf16.msra.mxu1 %v2597_v58  ;;  %v3533_v23 = vld [vmem:[#allocation3 + $0x194] sm:$0xf0]  ;;  %v2716_v24 = vld [vmem:[#allocation3 + $0x300] sm:$0xf]  ;;  %v2933_v25 = vor.u32 %v3635_v16, %v2932_v15  ;;  %v3268_v29 = vld [vmem:[#allocation3 + $0x750] sm:$0xf] }
  0x22   :  { %1839 = vmatpush.bf16.msra.mxu2 %v2789_v59  ;;  %v3581_v26 = vld [vmem:[#allocation3 + $0x314] sm:$0xf0]  ;;  %v2908_v27 = vld [vmem:[#allocation3 + $0x480] sm:$0xf]  ;;  %v3719_v30 = vld [vmem:[#allocation3 + $0x764] sm:$0xf0]  ;;  %v2525_v36 = vor.u32 %v3533_v23, %v2524_v22 }
  0x23   :  { %1852 = vmatpush.bf16.msra.mxu3 %v2981_v63  ;;  %v3629_v28 = vld [vmem:[#allocation3 + $0x494] sm:$0xf0]  ;;  %v3460_v31 = vld [vmem:[#allocation3 + $0x8d0] sm:$0xf]  ;;  %v3767_v33 = vld [vmem:[#allocation3 + $0x8e4] sm:$0xf0]  ;;  %v2717_v37 = vor.u32 %v3581_v26, %v2716_v24  ;;  %v3269_v41 = vor.u32 %v3719_v30, %v3268_v29 }
  0x24   :  { %1814 = vmatpush.bf16.msra.mxu0 %v2381_v5  ;;  %v3524_v34 = vld [vmem:[#allocation3 + $0x154] sm:$0xf]  ;;  %v2502_v35 = vld [vmem:[#allocation3 + $0x168] sm:$0xf0]  ;;  %v2909_v40 = vor.u32 %v3629_v28, %v2908_v27  ;;  %v3461_v42 = vor.u32 %v3767_v33, %v3460_v31  ;;  %v3244_v44 = vld [vmem:[#allocation3 + $0x720] sm:$0xf] }
  0x25   :  { %1827 = vmatpush.bf16.msra.mxu1 %v2573_v6  ;;  %v3572_v38 = vld [vmem:[#allocation3 + $0x2d4] sm:$0xf]  ;;  %v2694_v39 = vld [vmem:[#allocation3 + $0x2e8] sm:$0xf0]  ;;  %v2505_v43 = vor.u32 %v3524_v34, %v2502_v35  ;;  %v3713_v45 = vld [vmem:[#allocation3 + $0x734] sm:$0xf0] }
  0x26   :  { %1840 = vmatpush.bf16.msra.mxu2 %v2765_v7  ;;  %v3436_v46 = vld [vmem:[#allocation3 + $0x8a0] sm:$0xf]  ;;  %v2697_v47 = vor.u32 %v3572_v38, %v2694_v39  ;;  %v3761_v48 = vld [vmem:[#allocation3 + $0x8b4] sm:$0xf0]  ;;  %v3518_v49 = vld [vmem:[#allocation3 + $0x124] sm:$0xf]  ;;  %v3245_v53 = vor.u32 %v3713_v45, %v3244_v44 }
  0x27   :  { %1853 = vmatpush.bf16.msra.mxu3 %v2957_v11  ;;  %v2478_v50 = vld [vmem:[#allocation3 + $0x138] sm:$0xf0]  ;;  %v3566_v51 = vld [vmem:[#allocation3 + $0x2a4] sm:$0xf]  ;;  %v3437_v54 = vor.u32 %v3761_v48, %v3436_v46  ;;  %v3220_v56 = vld [vmem:[#allocation3 + $0x6f0] sm:$0xf] }
  0x28   :  { %1815 = vmatpush.bf16.msra.mxu0 %v2357_v17  ;;  %v2670_v52 = vld [vmem:[#allocation3 + $0x2b8] sm:$0xf0]  ;;  %v2481_v55 = vor.u32 %v3518_v49, %v2478_v50  ;;  %v3707_v57 = vld [vmem:[#allocation3 + $0x704] sm:$0xf0]  ;;  %v3412_v58 = vld [vmem:[#allocation3 + $0x870] sm:$0xf] }
  0x29   :  { %1828 = vmatpush.bf16.msra.mxu1 %v2549_v20  ;;  %v2673_v59 = vor.u32 %v3566_v51, %v2670_v52  ;;  %v3755_v60 = vld [vmem:[#allocation3 + $0x884] sm:$0xf0]  ;;  %v3512_v61 = vld [vmem:[#allocation3 + $0xf4] sm:$0xf]  ;;  %v2454_v62 = vld [vmem:[#allocation3 + $0x108] sm:$0xf0]  ;;  %v3221_v1 = vor.u32 %v3707_v57, %v3220_v56 }
  0x2a   :  { %1841 = vmatpush.bf16.msra.mxu2 %v2741_v21  ;;  %v3560_v63 = vld [vmem:[#allocation3 + $0x274] sm:$0xf]  ;;  %v2646_v0 = vld [vmem:[#allocation3 + $0x288] sm:$0xf0]  ;;  %v3196_v2 = vld [vmem:[#allocation3 + $0x6c0] sm:$0xf]  ;;  %v3413_v4 = vor.u32 %v3755_v60, %v3412_v58  ;;  %v2457_v5 = vor.u32 %v3512_v61, %v2454_v62 }
  0x2b   :  { %1854 = vmatpush.bf16.msra.mxu3 %v2933_v25  ;;  %v52_v3 = vld [vmem:[%s3989_s0] sm:$0x3f]  ;;  %v3388_v7 = vld [vmem:[#allocation3 + $0x840] sm:$0xf]  ;;  %v2649_v8 = vor.u32 %v3560_v63, %v2646_v0  ;;  %v3506_v10 = vld [vmem:[#allocation3 + $0xc4] sm:$0xf] }
  0x2c   :  { %1816 = vmatpush.bf16.msra.mxu0 %v2333_v32  ;;  %v3701_v6 = vld [vmem:[#allocation3 + $0x6d4] sm:$0xf0]  ;;  %356 = vst [vmem:[#allocation1] ss:$9 sm:$0xff] %v52_v3  ;;  %v2430_v11 = vld [vmem:[#allocation3 + $0xd8] sm:$0xf0] }
  0x2d   :  { %1829 = vmatpush.bf16.msra.mxu1 %v2525_v36  ;;  %v3749_v9 = vld [vmem:[#allocation3 + $0x854] sm:$0xf0]  ;;  %v3554_v12 = vld [vmem:[#allocation3 + $0x244] sm:$0xf]  ;;  %v2622_v13 = vld [vmem:[#allocation3 + $0x258] sm:$0xf0]  ;;  %v3197_v14 = vor.u32 %v3701_v6, %v3196_v2  ;;  %v2433_v16 = vor.u32 %v3506_v10, %v2430_v11 }
  0x2e   :  { %1842 = vmatpush.bf16.msra.mxu2 %v2717_v37  ;;  %v3389_v15 = vor.u32 %v3749_v9, %v3388_v7  ;;  %v3172_v17 = vld [vmem:[#allocation3 + $0x690] sm:$0xf]  ;;  %v3695_v18 = vld [vmem:[#allocation3 + $0x6a4] sm:$0xf0]  ;;  %v2625_v20 = vor.u32 %v3554_v12, %v2622_v13  ;;  %v3500_v22 = vld [vmem:[#allocation3 + $0x94] sm:$0xf] }
  0x2f   :  { %1855 = vmatpush.bf16.msra.mxu3 %v2909_v40  ;;  %v3364_v19 = vld [vmem:[#allocation3 + $0x810] sm:$0xf]  ;;  %v3743_v21 = vld [vmem:[#allocation3 + $0x824] sm:$0xf0]  ;;  %v2406_v23 = vld [vmem:[#allocation3 + $0xa8] sm:$0xf0]  ;;  %v3173_v27 = vor.u32 %v3695_v18, %v3172_v17 }
  0x30   :  { %1861 = vmatpush.bf16.msrb.mxu0 %v3269_v41  ;;  %v3548_v24 = vld [vmem:[#allocation3 + $0x214] sm:$0xf]  ;;  %v2598_v25 = vld [vmem:[#allocation3 + $0x228] sm:$0xf0]  ;;  %v3148_v26 = vld [vmem:[#allocation3 + $0x660] sm:$0xf]  ;;  %v3365_v31 = vor.u32 %v3743_v21, %v3364_v19  ;;  %v2409_v32 = vor.u32 %v3500_v22, %v2406_v23 }
  0x31   :  { %1874 = vmatpush.bf16.msrb.mxu1 %v3461_v42  ;;  %v3689_v33 = vld [vmem:[#allocation3 + $0x674] sm:$0xf0]  ;;  %v3340_v34 = vld [vmem:[#allocation3 + $0x7e0] sm:$0xf]  ;;  %v2601_v36 = vor.u32 %v3548_v24, %v2598_v25  ;;  %v3494_v38 = vld [vmem:[#allocation3 + $0x64] sm:$0xf] }
  0x32   :  { %1887 = vmatpush.bf16.msrb.mxu2 %v2505_v43  ;;  %v3737_v37 = vld [vmem:[#allocation3 + $0x7f4] sm:$0xf0]  ;;  %v2382_v39 = vld [vmem:[#allocation3 + $0x78] sm:$0xf0]  ;;  %v3542_v40 = vld [vmem:[#allocation3 + $0x1e4] sm:$0xf]  ;;  %v3149_v42 = vor.u32 %v3689_v33, %v3148_v26 }
  0x33   :  { %1900 = vmatpush.bf16.msrb.mxu3 %v2697_v47  ;;  %v3892_v28 = vld [vmem:[#allocation1 + $0x12] sm:$0xff]  ;;  %v3894_v29 = vld [vmem:[#allocation1] sm:$0xff]  ;;  %v3898_v35 = vld [vmem:[#allocation1 + $0x9] sm:$0xff]  ;;  %v3341_v43 = vor.u32 %v3737_v37, %v3340_v34  ;;  %v2385_v44 = vor.u32 %v3494_v38, %v2382_v39  ;;  %vm2303_vm0 = vcmask 1041408   ;;  %vm2322_vm1 = vcmask 1024  }
  0x34   :  { %1862 = vmatpush.bf16.msrb.mxu0 %v3245_v53  ;;  %v3896_v30 = vld [vmem:[#allocation1 + $0x1b] sm:$0xff]  ;;  %1843 = vmatmul.bf16.vlgmr.msra.gmra.mxu2 %v3892_v28  ;;  %v2574_v41 = vld [vmem:[#allocation3 + $0x1f8] sm:$0xf0]  ;;  %v3683_v46 = vld [vmem:[#allocation3 + $0x644] sm:$0xf0] }
  0x35   :  { %1875 = vmatpush.bf16.msrb.mxu1 %v3437_v54  ;;  %1817 = vmatmul.bf16.vlgmr.msra.gmra.mxu0 %v3894_v29  ;;  %v3124_v45 = vld [vmem:[#allocation3 + $0x630] sm:$0xf]  ;;  %v2577_v48 = vor.u32 %v3542_v40, %v2574_v41  ;;  %v3731_v49 = vld [vmem:[#allocation3 + $0x7c4] sm:$0xf0]  ;;  %v3488_v50 = vld [vmem:[#allocation3 + $0x34] sm:$0xf] }
  0x36   :  { %1888 = vmatpush.bf16.msrb.mxu2 %v2481_v55  ;;  %1856 = vmatmul.bf16.vlgmr.msra.gmra.mxu3 %v3896_v30  ;;  %v3316_v47 = vld [vmem:[#allocation3 + $0x7b0] sm:$0xf]  ;;  %v2358_v51 = vld [vmem:[#allocation3 + $0x48] sm:$0xf0]  ;;  %v3536_v52 = vld [vmem:[#allocation3 + $0x1b4] sm:$0xf]  ;;  %v3125_v54 = vor.u32 %v3683_v46, %v3124_v45 }
  0x37   :  { %1901 = vmatpush.bf16.msrb.mxu3 %v2673_v59  ;;  %1830 = vmatmul.bf16.vlgmr.msra.gmra.mxu1 %v3898_v35  ;;  %v2550_v53 = vld [vmem:[#allocation3 + $0x1c8] sm:$0xf0]  ;;  %v3100_v55 = vld [vmem:[#allocation3 + $0x600] sm:$0xf]  ;;  %v3677_v56 = vld [vmem:[#allocation3 + $0x614] sm:$0xf0]  ;;  %v3317_v57 = vor.u32 %v3731_v49, %v3316_v47  ;;  %v2361_v58 = vor.u32 %v3488_v50, %v2358_v51 }
  0x38   :  { %1863 = vmatpush.bf16.msrb.mxu0 %v3221_v1  ;;  %v3292_v59 = vld [vmem:[#allocation3 + $0x780] sm:$0xf]  ;;  %v3725_v60 = vld [vmem:[#allocation3 + $0x794] sm:$0xf0]  ;;  %v3482_v61 = vld [vmem:[#allocation3 + $0x4] sm:$0xf]  ;;  %v2553_v62 = vor.u32 %v3536_v52, %v2550_v53 }
  0x39   :  { %1876 = vmatpush.bf16.msrb.mxu1 %v3413_v4  ;;  %v2334_v63 = vld [vmem:[#allocation3 + $0x18] sm:$0xf0]  ;;  %v3530_v0 = vld [vmem:[#allocation3 + $0x184] sm:$0xf]  ;;  %v3620_v2 = vld [vmem:[#allocation3 + $0x454] sm:$0xf]  ;;  %v3293_v9 = vor.u32 %v3725_v60, %v3292_v59 }
  0x3a   :  { %1889 = vmatpush.bf16.msrb.mxu2 %v2457_v5  ;;  %v2526_v1 = vld [vmem:[#allocation3 + $0x198] sm:$0xf0]  ;;  %v2886_v3 = vld [vmem:[#allocation3 + $0x468] sm:$0xf0]  ;;  %v3668_v4 = vld [vmem:[#allocation3 + $0x5d4] sm:$0xf]  ;;  %v3101_v5 = vor.u32 %v3677_v56, %v3100_v55  ;;  %v2337_v10 = vor.u32 %v3482_v61, %v2334_v63 }
  0x3b   :  { %1902 = vmatpush.bf16.msrb.mxu3 %v2649_v8  ;;  %v3078_v6 = vld [vmem:[#allocation3 + $0x5e8] sm:$0xf0]  ;;  %v3716_v7 = vld [vmem:[#allocation3 + $0x754] sm:$0xf]  ;;  %v2529_v13 = vor.u32 %v3530_v0, %v2526_v1  ;;  %v3614_v17 = vld [vmem:[#allocation3 + $0x424] sm:$0xf] }
  0x3c   :  { %1864 = vmatpush.bf16.msrb.mxu0 %v3197_v14  ;;  %v3270_v8 = vld [vmem:[#allocation3 + $0x768] sm:$0xf0]  ;;  %v3764_v11 = vld [vmem:[#allocation3 + $0x8d4] sm:$0xf]  ;;  %v2889_v14 = vor.u32 %v3620_v2, %v2886_v3  ;;  %v2862_v18 = vld [vmem:[#allocation3 + $0x438] sm:$0xf0] }
  0x3d   :  { %1877 = vmatpush.bf16.msrb.mxu1 %v3389_v15  ;;  %v3462_v12 = vld [vmem:[#allocation3 + $0x8e8] sm:$0xf0]  ;;  %v3081_v15 = vor.u32 %v3668_v4, %v3078_v6  ;;  %v3662_v19 = vld [vmem:[#allocation3 + $0x5a4] sm:$0xf]  ;;  %v3054_v21 = vld [vmem:[#allocation3 + $0x5b8] sm:$0xf0] }
  0x3e   :  { %1890 = vmatpush.bf16.msrb.mxu2 %v2433_v16  ;;  %v3273_v16 = vor.u32 %v3716_v7, %v3270_v8  ;;  %v3710_v22 = vld [vmem:[#allocation3 + $0x724] sm:$0xf]  ;;  %v3246_v23 = vld [vmem:[#allocation3 + $0x738] sm:$0xf0]  ;;  %v3608_v34 = vld [vmem:[#allocation3 + $0x3f4] sm:$0xf] }
  0x3f   :  { %1903 = vmatpush.bf16.msrb.mxu3 %v2625_v20  ;;  %v3465_v20 = vor.u32 %v3764_v11, %v3462_v12  ;;  %v3758_v24 = vld [vmem:[#allocation3 + $0x8a4] sm:$0xf]  ;;  %v3438_v25 = vld [vmem:[#allocation3 + $0x8b8] sm:$0xf0]  ;;  %v3249_v33 = vor.u32 %v3710_v22, %v3246_v23  ;;  %v3656_v37 = vld [vmem:[#allocation3 + $0x574] sm:$0xf] }
  0x40   :  { %1865 = vmatpush.bf16.msrb.mxu0 %v3173_v27  ;;  %v3904_v26 = vld [vmem:[#allocation1 + $0x24] sm:$0xff]  ;;  %v2865_v27 = vor.u32 %v3614_v17, %v2862_v18  ;;  %v3441_v38 = vor.u32 %v3758_v24, %v3438_v25  ;;  %v3030_v39 = vld [vmem:[#allocation3 + $0x588] sm:$0xf0]  ;;  %v3704_v40 = vld [vmem:[#allocation3 + $0x6f4] sm:$0xf] }
  0x41   :  { %1878 = vmatpush.bf16.msrb.mxu1 %v3365_v31  ;;  %v3906_v31 = vld [vmem:[#allocation1 + $0x2d] sm:$0xff]  ;;  %v3222_v41 = vld [vmem:[#allocation3 + $0x708] sm:$0xf0]  ;;  %v3033_v45 = vor.u32 %v3656_v37, %v3030_v39  ;;  %v3006_v51 = vld [vmem:[#allocation3 + $0x558] sm:$0xf0] }
  0x42   :  { %1891 = vmatpush.bf16.msrb.mxu2 %v2409_v32  ;;  %v3057_v32 = vor.u32 %v3662_v19, %v3054_v21  ;;  %v3225_v46 = vor.u32 %v3704_v40, %v3222_v41  ;;  %v3602_v47 = vld [vmem:[#allocation3 + $0x3c4] sm:$0xf]  ;;  %v3198_v53 = vld [vmem:[#allocation3 + $0x6d8] sm:$0xf0]  ;;  %v3596_v59 = vld [vmem:[#allocation3 + $0x394] sm:$0xf] }
  0x43   :  { %1904 = vmatpush.bf16.msrb.mxu3 %v2601_v36  ;;  %v2838_v36 = vld [vmem:[#allocation3 + $0x408] sm:$0xf0]  ;;  %v3650_v49 = vld [vmem:[#allocation3 + $0x544] sm:$0xf]  ;;  %v3390_v55 = vld [vmem:[#allocation3 + $0x858] sm:$0xf0] }
  0x44   :  { %1866 = vmatpush.bf16.msrb.mxu0 %v3149_v42  ;;  %v3752_v42 = vld [vmem:[#allocation3 + $0x874] sm:$0xf]  ;;  %v3698_v52 = vld [vmem:[#allocation3 + $0x6c4] sm:$0xf]  ;;  %v2790_v60 = vld [vmem:[#allocation3 + $0x3a8] sm:$0xf0] }
  0x45   :  { %1879 = vmatpush.bf16.msrb.mxu1 %v3341_v43  ;;  %v3414_v43 = vld [vmem:[#allocation3 + $0x888] sm:$0xf0]  ;;  %v3644_v61 = vld [vmem:[#allocation3 + $0x514] sm:$0xf]  ;;  %v2793_v4 = vor.u32 %v3596_v59, %v2790_v60  ;;  %v3590_v7 = vld [vmem:[#allocation3 + $0x364] sm:$0xf] }
  0x46   :  { %1892 = vmatpush.bf16.msrb.mxu2 %v2385_v44  ;;  %v2841_v44 = vor.u32 %v3608_v34, %v2838_v36  ;;  %v3417_v50 = vor.u32 %v3752_v42, %v3414_v43  ;;  %v2982_v63 = vld [vmem:[#allocation3 + $0x528] sm:$0xf0]  ;;  %v3692_v0 = vld [vmem:[#allocation3 + $0x694] sm:$0xf]  ;;  %v2766_v8 = vld [vmem:[#allocation3 + $0x378] sm:$0xf0] }
  0x47   :  { %1905 = vmatpush.bf16.msrb.mxu3 %v2577_v48  ;;  %v2814_v48 = vld [vmem:[#allocation3 + $0x3d8] sm:$0xf0]  ;;  %v3174_v1 = vld [vmem:[#allocation3 + $0x6a8] sm:$0xf0]  ;;  %v3740_v2 = vld [vmem:[#allocation3 + $0x814] sm:$0xf] }
  0x48   :  { %1867 = vmatpush.bf16.msrb.mxu0 %v3125_v54  ;;  %v3746_v54 = vld [vmem:[#allocation3 + $0x844] sm:$0xf]  ;;  %v2817_v56 = vor.u32 %v3602_v47, %v2814_v48  ;;  %v3366_v3 = vld [vmem:[#allocation3 + $0x828] sm:$0xf0]  ;;  %v3177_v6 = vor.u32 %v3692_v0, %v3174_v1  ;;  %v2958_v11 = vld [vmem:[#allocation3 + $0x4f8] sm:$0xf0] }
  0x49   :  { %1880 = vmatpush.bf16.msrb.mxu1 %v3317_v57  ;;  %v3009_v57 = vor.u32 %v3650_v49, %v3006_v51  ;;  %v3686_v12 = vld [vmem:[#allocation3 + $0x664] sm:$0xf]  ;;  %v3584_v19 = vld [vmem:[#allocation3 + $0x334] sm:$0xf]  ;;  %v2934_v23 = vld [vmem:[#allocation3 + $0x4c8] sm:$0xf0] }
  0x4a   :  { %1893 = vmatpush.bf16.msrb.mxu2 %v2361_v58  ;;  %v3201_v58 = vor.u32 %v3698_v52, %v3198_v53  ;;  %v3632_v21 = vld [vmem:[#allocation3 + $0x4b4] sm:$0xf]  ;;  %v3126_v25 = vld [vmem:[#allocation3 + $0x648] sm:$0xf0]  ;;  %v3578_v34 = vld [vmem:[#allocation3 + $0x304] sm:$0xf] }
  0x4b   :  { %1906 = vmatpush.bf16.msrb.mxu3 %v2553_v62  ;;  %v3393_v62 = vor.u32 %v3746_v54, %v3390_v55  ;;  %v3680_v24 = vld [vmem:[#allocation3 + $0x634] sm:$0xf]  ;;  %v2718_v36 = vld [vmem:[#allocation3 + $0x318] sm:$0xf0]  ;;  %v2937_v37 = vor.u32 %v3632_v21, %v2934_v23  ;;  %v3626_v39 = vld [vmem:[#allocation3 + $0x484] sm:$0xf] }
  0x4c   :  { %1868 = vmatpush.bf16.msrb.mxu0 %v3101_v5  ;;  %v2985_v5 = vor.u32 %v3644_v61, %v2982_v63  ;;  %v2910_v40 = vld [vmem:[#allocation3 + $0x498] sm:$0xf0]  ;;  %v3674_v41 = vld [vmem:[#allocation3 + $0x604] sm:$0xf]  ;;  %v3528_v47 = vld [vmem:[#allocation3 + $0x16c] sm:$0xf0]  ;;  %v2721_v49 = vor.u32 %v3578_v34, %v2718_v36 }
  0x4d   :  { %1881 = vmatpush.bf16.msrb.mxu1 %v3293_v9  ;;  %v3638_v9 = vld [vmem:[#allocation3 + $0x4e4] sm:$0xf]  ;;  %v3102_v43 = vld [vmem:[#allocation3 + $0x618] sm:$0xf0]  ;;  %v2700_v48 = vld [vmem:[#allocation3 + $0x2d8] sm:$0xf]  ;;  %v2913_v53 = vor.u32 %v3626_v39, %v2910_v40 }
  0x4e   :  { %1894 = vmatpush.bf16.msrb.mxu2 %v2337_v10  ;;  %v3369_v10 = vor.u32 %v3740_v2, %v3366_v3  ;;  %v2961_v17 = vor.u32 %v3638_v9, %v2958_v11  ;;  %v2892_v51 = vld [vmem:[#allocation3 + $0x458] sm:$0xf]  ;;  %v3624_v52 = vld [vmem:[#allocation3 + $0x46c] sm:$0xf0]  ;;  %v3105_v54 = vor.u32 %v3674_v41, %v3102_v43  ;;  %v2484_v61 = vld [vmem:[#allocation3 + $0x128] sm:$0xf] }
  0x4f   :  { %1907 = vmatpush.bf16.msrb.mxu3 %v2529_v13  ;;  %1869 = vmatmul.bf16.vlgmr.msrb.gmra.mxu0 %v3904_v26  ;;  %v3150_v13 = vld [vmem:[#allocation3 + $0x678] sm:$0xf0]  ;;  %v3084_v55 = vld [vmem:[#allocation3 + $0x5d8] sm:$0xf]  ;;  %v2893_v60 = vor.u32 %v3624_v52, %v2892_v51  ;;  %v2676_v63 = vld [vmem:[#allocation3 + $0x2a8] sm:$0xf] }
  0x50   :  { %1913 = vmatpush.bf16.msra.mxu0 %v2889_v14  ;;  %1882 = vmatmul.bf16.vlgmr.msrb.gmra.mxu1 %v3906_v31  ;;  %v3734_v14 = vld [vmem:[#allocation3 + $0x7e4] sm:$0xf]  ;;  %v3153_v18 = vor.u32 %v3686_v12, %v3150_v13  ;;  %v3570_v1 = vld [vmem:[#allocation3 + $0x2bc] sm:$0xf0]  ;;  %v2868_v2 = vld [vmem:[#allocation3 + $0x428] sm:$0xf] }
  0x51   :  { %1926 = vmatpush.bf16.msra.mxu1 %v3081_v15  ;;  %1895 = vmatmul.bf16.vlgmr.msrb.gmra.mxu2 %v3894_v29  ;;  %v3342_v15 = vld [vmem:[#allocation3 + $0x7f8] sm:$0xf0]  ;;  %v3618_v3 = vld [vmem:[#allocation3 + $0x43c] sm:$0xf0]  ;;  %v2460_v9 = vld [vmem:[#allocation3 + $0xf8] sm:$0xf] }
  0x52   :  { %1939 = vmatpush.bf16.msra.mxu2 %v3273_v16  ;;  %1908 = vmatmul.bf16.vlgmr.msrb.gmra.mxu3 %v3898_v35  ;;  %v2769_v16 = vor.u32 %v3590_v7, %v2766_v8  ;;  %v3345_v22 = vor.u32 %v3734_v14, %v3342_v15  ;;  %v2677_v7 = vor.u32 %v3570_v1, %v2676_v63  ;;  %v2652_v11 = vld [vmem:[#allocation3 + $0x278] sm:$0xf]  ;;  %v3564_v13 = vld [vmem:[#allocation3 + $0x28c] sm:$0xf0]  ;;  %v2436_v21 = vld [vmem:[#allocation3 + $0xc8] sm:$0xf] }
  0x53   :  { %1952 = vmatpush.bf16.msra.mxu3 %v3465_v20  ;;  %v2742_v20 = vld [vmem:[#allocation3 + $0x348] sm:$0xf0]  ;;  %v2869_v8 = vor.u32 %v3618_v3, %v2868_v2  ;;  %v2844_v14 = vld [vmem:[#allocation3 + $0x3f8] sm:$0xf]  ;;  %v3612_v15 = vld [vmem:[#allocation3 + $0x40c] sm:$0xf0] }
  0x54   :  { %1914 = vmatpush.bf16.msra.mxu0 %v2865_v27  ;;  %v3728_v27 = vld [vmem:[#allocation3 + $0x7b4] sm:$0xf]  ;;  %v2628_v23 = vld [vmem:[#allocation3 + $0x248] sm:$0xf]  ;;  %v3654_v34 = vld [vmem:[#allocation3 + $0x55c] sm:$0xf0] }
  0x55   :  { %1927 = vmatpush.bf16.msra.mxu1 %v3057_v32  ;;  %v3318_v32 = vld [vmem:[#allocation3 + $0x7c8] sm:$0xf0]  ;;  %v2412_v39 = vld [vmem:[#allocation3 + $0x98] sm:$0xf]  ;;  %v3504_v40 = vld [vmem:[#allocation3 + $0xac] sm:$0xf0] }
  0x56   :  { %1940 = vmatpush.bf16.msra.mxu2 %v3249_v33  ;;  %v2745_v33 = vor.u32 %v3584_v19, %v2742_v20  ;;  %v3321_v42 = vor.u32 %v3728_v27, %v3318_v32  ;;  %v2653_v19 = vor.u32 %v3564_v13, %v2652_v11  ;;  %v2845_v20 = vor.u32 %v3612_v15, %v2844_v14  ;;  %v2820_v27 = vld [vmem:[#allocation3 + $0x3c8] sm:$0xf]  ;;  %v3606_v32 = vld [vmem:[#allocation3 + $0x3dc] sm:$0xf0]  ;;  %v2604_v41 = vld [vmem:[#allocation3 + $0x218] sm:$0xf] }
  0x57   :  { %1953 = vmatpush.bf16.msra.mxu3 %v3441_v38  ;;  %v3129_v38 = vor.u32 %v3680_v24, %v3126_v25  ;;  %v3558_v25 = vld [vmem:[#allocation3 + $0x25c] sm:$0xf0]  ;;  %v3552_v43 = vld [vmem:[#allocation3 + $0x22c] sm:$0xf0]  ;;  %v2388_v51 = vld [vmem:[#allocation3 + $0x68] sm:$0xf] }
  0x58   :  { %1915 = vmatpush.bf16.msra.mxu0 %v2841_v44  ;;  %v3722_v44 = vld [vmem:[#allocation3 + $0x784] sm:$0xf]  ;;  %v3498_v52 = vld [vmem:[#allocation3 + $0x7c] sm:$0xf0]  ;;  %v2364_v63 = vld [vmem:[#allocation3 + $0x38] sm:$0xf] }
  0x59   :  { %1928 = vmatpush.bf16.msra.mxu1 %v3033_v45  ;;  %v3294_v45 = vld [vmem:[#allocation3 + $0x798] sm:$0xf0]  ;;  %v2556_v1 = vld [vmem:[#allocation3 + $0x1b8] sm:$0xf]  ;;  %v3540_v3 = vld [vmem:[#allocation3 + $0x1cc] sm:$0xf0] }
  0x5a   :  { %1941 = vmatpush.bf16.msra.mxu2 %v3225_v46  ;;  %v2508_v46 = vld [vmem:[#allocation3 + $0x158] sm:$0xf]  ;;  %v2557_v11 = vor.u32 %v3540_v3, %v2556_v1  ;;  %v2532_v13 = vld [vmem:[#allocation3 + $0x188] sm:$0xf]  ;;  %v3534_v14 = vld [vmem:[#allocation3 + $0x19c] sm:$0xf0] }
  0x5b   :  { %1954 = vmatpush.bf16.msra.mxu3 %v3417_v50  ;;  %v3576_v50 = vld [vmem:[#allocation3 + $0x2ec] sm:$0xf0]  ;;  %v2724_v15 = vld [vmem:[#allocation3 + $0x308] sm:$0xf] }
  0x5c   :  { %1916 = vmatpush.bf16.msra.mxu0 %v2817_v56  ;;  %v3672_v56 = vld [vmem:[#allocation3 + $0x5ec] sm:$0xf0]  ;;  %v2701_v59 = vor.u32 %v3576_v50, %v2700_v48  ;;  %v2413_v48 = vor.u32 %v3504_v40, %v2412_v39  ;;  %v3204_v1 = vld [vmem:[#allocation3 + $0x6c8] sm:$0xf] }
  0x5d   :  { %1929 = vmatpush.bf16.msra.mxu1 %v3009_v57  ;;  %v3297_v57 = vor.u32 %v3722_v44, %v3294_v45  ;;  %v3085_v0 = vor.u32 %v3672_v56, %v3084_v55  ;;  %v2796_v44 = vld [vmem:[#allocation3 + $0x398] sm:$0xf]  ;;  %v3600_v45 = vld [vmem:[#allocation3 + $0x3ac] sm:$0xf0]  ;;  %v3546_v55 = vld [vmem:[#allocation3 + $0x1fc] sm:$0xf0] }
  0x5e   :  { %1942 = vmatpush.bf16.msra.mxu2 %v3201_v58  ;;  %v2509_v58 = vor.u32 %v3528_v47, %v2508_v46  ;;  %v2988_v46 = vld [vmem:[#allocation3 + $0x518] sm:$0xf]  ;;  %v3648_v47 = vld [vmem:[#allocation3 + $0x52c] sm:$0xf0]  ;;  %v2797_v50 = vor.u32 %v3600_v45, %v2796_v44  ;;  %v2772_v56 = vld [vmem:[#allocation3 + $0x368] sm:$0xf] }
  0x5f   :  { %1955 = vmatpush.bf16.msra.mxu3 %v3393_v62  ;;  %v3522_v62 = vld [vmem:[#allocation3 + $0x13c] sm:$0xf0]  ;;  %v3396_v3 = vld [vmem:[#allocation3 + $0x848] sm:$0xf] }
  0x60   :  { %1917 = vmatpush.bf16.msra.mxu0 %v2793_v4  ;;  %v3060_v4 = vld [vmem:[#allocation3 + $0x5a8] sm:$0xf]  ;;  %v3762_v45 = vld [vmem:[#allocation3 + $0x8bc] sm:$0xf0] }
  0x61   :  { %1930 = vmatpush.bf16.msra.mxu1 %v2985_v5  ;;  %v3666_v5 = vld [vmem:[#allocation3 + $0x5bc] sm:$0xf0] }
  0x62   :  { %1943 = vmatpush.bf16.msra.mxu2 %v3177_v6  ;;  %v2485_v6 = vor.u32 %v3522_v62, %v2484_v61  ;;  %v3061_v12 = vor.u32 %v3666_v5, %v3060_v4  ;;  %v2748_v4 = vld [vmem:[#allocation3 + $0x338] sm:$0xf]  ;;  %v3588_v5 = vld [vmem:[#allocation3 + $0x34c] sm:$0xf0] }
  0x63   :  { %1956 = vmatpush.bf16.msra.mxu3 %v3369_v10  ;;  %v3516_v10 = vld [vmem:[#allocation3 + $0x10c] sm:$0xf0] }
  0x64   :  { %1918 = vmatpush.bf16.msra.mxu0 %v2769_v16  ;;  %v3036_v16 = vld [vmem:[#allocation3 + $0x578] sm:$0xf] }
  0x65   :  { %1931 = vmatpush.bf16.msra.mxu1 %v2961_v17  ;;  %v3660_v17 = vld [vmem:[#allocation3 + $0x58c] sm:$0xf0] }
  0x66   :  { %1944 = vmatpush.bf16.msra.mxu2 %v3153_v18  ;;  %v2461_v18 = vor.u32 %v3516_v10, %v2460_v9  ;;  %v3037_v24 = vor.u32 %v3660_v17, %v3036_v16  ;;  %v2340_v9 = vld [vmem:[#allocation3 + $0x8] sm:$0xf]  ;;  %v3486_v10 = vld [vmem:[#allocation3 + $0x1c] sm:$0xf0] }
  0x67   :  { %1957 = vmatpush.bf16.msra.mxu3 %v3345_v22  ;;  %v3510_v22 = vld [vmem:[#allocation3 + $0xdc] sm:$0xf0] }
  0x68   :  { %1919 = vmatpush.bf16.msra.mxu0 %v2745_v33  ;;  %v3012_v33 = vld [vmem:[#allocation3 + $0x548] sm:$0xf]  ;;  %v2437_v36 = vor.u32 %v3510_v22, %v2436_v21  ;;  %v3582_v17 = vld [vmem:[#allocation3 + $0x31c] sm:$0xf0]  ;;  %v3720_v21 = vld [vmem:[#allocation3 + $0x76c] sm:$0xf0] }
  0x69   :  { %1932 = vmatpush.bf16.msra.mxu1 %v2937_v37  ;;  %v2629_v37 = vor.u32 %v3558_v25, %v2628_v23  ;;  %v3468_v22 = vld [vmem:[#allocation3 + $0x8d8] sm:$0xf]  ;;  %v2341_v23 = vor.u32 %v3486_v10, %v2340_v9  ;;  %v3525_v25 = vld [vmem:[#allocation3 + $0x15c] sm:$0xf]  ;;  %v2630_v9 = vld [vmem:[#allocation3 + $0x260] sm:$0xf0] }
  0x6a   :  { %1945 = vmatpush.bf16.msra.mxu2 %v3129_v38  ;;  %v2821_v38 = vor.u32 %v3606_v32, %v2820_v27  ;;  %v2510_v27 = vld [vmem:[#allocation3 + $0x170] sm:$0xf0]  ;;  %v2533_v32 = vor.u32 %v3534_v14, %v2532_v13  ;;  %v3372_v13 = vld [vmem:[#allocation3 + $0x818] sm:$0xf] }
  0x6b   :  { %1958 = vmatpush.bf16.msra.mxu3 %v3321_v42  ;;  %v3013_v42 = vor.u32 %v3654_v34, %v3012_v33  ;;  %v2725_v33 = vor.u32 %v3582_v17, %v2724_v15  ;;  %v3573_v34 = vld [vmem:[#allocation3 + $0x2dc] sm:$0xf]  ;;  %v2513_v40 = vor.u32 %v3525_v25, %v2510_v27  ;;  %v3744_v15 = vld [vmem:[#allocation3 + $0x82c] sm:$0xf0]  ;;  %v2414_v17 = vld [vmem:[#allocation3 + $0xb0] sm:$0xf0] }
  0x6c   :  { %1920 = vmatpush.bf16.msra.mxu0 %v2721_v49  ;;  %v2605_v49 = vor.u32 %v3552_v43, %v2604_v41  ;;  %v3252_v41 = vld [vmem:[#allocation3 + $0x728] sm:$0xf] }
  0x6d   :  { %1933 = vmatpush.bf16.msra.mxu1 %v2913_v53  ;;  %v2580_v53 = vld [vmem:[#allocation3 + $0x1e8] sm:$0xf] }
  0x6e   :  { %1946 = vmatpush.bf16.msra.mxu2 %v3105_v54  ;;  %v2989_v54 = vor.u32 %v3648_v47, %v2988_v46  ;;  %v2581_v61 = vor.u32 %v3546_v55, %v2580_v53  ;;  %v3444_v43 = vld [vmem:[#allocation3 + $0x8a8] sm:$0xf]  ;;  %v3519_v46 = vld [vmem:[#allocation3 + $0x12c] sm:$0xf]  ;;  %v2486_v47 = vld [vmem:[#allocation3 + $0x140] sm:$0xf0] }
  0x6f   :  { %1959 = vmatpush.bf16.msra.mxu3 %v3297_v57  ;;  %1921 = vmatmul.bf16.vlgmr.msra.gmra.mxu0 %v3892_v28  ;;  %v3594_v57 = vld [vmem:[#allocation3 + $0x37c] sm:$0xf0]  ;;  %v3228_v53 = vld [vmem:[#allocation3 + $0x6f8] sm:$0xf]  ;;  %v3348_v25 = vld [vmem:[#allocation3 + $0x7e8] sm:$0xf] }
  0x70   :  { %1965 = vmatpush.bf16.msrb.mxu0 %v2509_v58  ;;  %1934 = vmatmul.bf16.vlgmr.msra.gmra.mxu1 %v3896_v30  ;;  %v2964_v58 = vld [vmem:[#allocation3 + $0x4e8] sm:$0xf]  ;;  %v2773_v62 = vor.u32 %v3594_v57, %v2772_v56  ;;  %v3420_v55 = vld [vmem:[#allocation3 + $0x878] sm:$0xf]  ;;  %v3756_v57 = vld [vmem:[#allocation3 + $0x88c] sm:$0xf0] }
  0x71   :  { %1978 = vmatpush.bf16.msrb.mxu1 %v2701_v59  ;;  %1947 = vmatmul.bf16.vlgmr.msra.gmra.mxu2 %v3904_v26  ;;  %v3642_v59 = vld [vmem:[#allocation3 + $0x4fc] sm:$0xf0] }
  0x72   :  { %1991 = vmatpush.bf16.msrb.mxu2 %v2893_v60  ;;  %1960 = vmatmul.bf16.vlgmr.msra.gmra.mxu3 %v3906_v31  ;;  %v2389_v60 = vor.u32 %v3498_v52, %v2388_v51  ;;  %v2965_v2 = vor.u32 %v3642_v59, %v2964_v58  ;;  %v3445_v51 = vor.u32 %v3762_v45, %v3444_v43  ;;  %v3513_v58 = vld [vmem:[#allocation3 + $0xfc] sm:$0xf]  ;;  %v2462_v59 = vld [vmem:[#allocation3 + $0x110] sm:$0xf0]  ;;  %v3324_v43 = vld [vmem:[#allocation3 + $0x7b8] sm:$0xf] }
  0x73   :  { %2004 = vmatpush.bf16.msrb.mxu3 %v3085_v0  ;;  %v3492_v0 = vld [vmem:[#allocation3 + $0x4c] sm:$0xf0]  ;;  %v2489_v52 = vor.u32 %v3519_v46, %v2486_v47  ;;  %v3489_v46 = vld [vmem:[#allocation3 + $0x3c] sm:$0xf]  ;;  %v2366_v47 = vld [vmem:[#allocation3 + $0x50] sm:$0xf0] }
  0x74   :  { %1966 = vmatpush.bf16.msrb.mxu0 %v2485_v6  ;;  %v2940_v6 = vld [vmem:[#allocation3 + $0x4b8] sm:$0xf]  ;;  %v3732_v45 = vld [vmem:[#allocation3 + $0x7cc] sm:$0xf0] }
  0x75   :  { %1979 = vmatpush.bf16.msrb.mxu1 %v2677_v7  ;;  %v3636_v7 = vld [vmem:[#allocation3 + $0x4cc] sm:$0xf0] }
  0x76   :  { %1992 = vmatpush.bf16.msrb.mxu2 %v2869_v8  ;;  %v2365_v8 = vor.u32 %v3492_v0, %v2364_v63  ;;  %v2941_v16 = vor.u32 %v3636_v7, %v2940_v6  ;;  %v3421_v63 = vor.u32 %v3756_v57, %v3420_v55  ;;  %v2465_v0 = vor.u32 %v3513_v58, %v2462_v59  ;;  %v3507_v6 = vld [vmem:[#allocation3 + $0xcc] sm:$0xf]  ;;  %v2438_v7 = vld [vmem:[#allocation3 + $0xe0] sm:$0xf0]  ;;  %v3300_v55 = vld [vmem:[#allocation3 + $0x788] sm:$0xf] }
  0x77   :  { %2005 = vmatpush.bf16.msrb.mxu3 %v3061_v12  ;;  %v2749_v12 = vor.u32 %v3588_v5, %v2748_v4  ;;  %v3750_v5 = vld [vmem:[#allocation3 + $0x85c] sm:$0xf0]  ;;  %v3483_v57 = vld [vmem:[#allocation3 + $0xc] sm:$0xf]  ;;  %v2342_v59 = vld [vmem:[#allocation3 + $0x20] sm:$0xf0] }
  0x78   :  { %1967 = vmatpush.bf16.msrb.mxu0 %v2461_v18  ;;  %v2916_v18 = vld [vmem:[#allocation3 + $0x488] sm:$0xf]  ;;  %v3397_v10 = vor.u32 %v3750_v5, %v3396_v3  ;;  %v3717_v3 = vld [vmem:[#allocation3 + $0x75c] sm:$0xf] }
  0x79   :  { %1980 = vmatpush.bf16.msrb.mxu1 %v2653_v19  ;;  %v3630_v19 = vld [vmem:[#allocation3 + $0x49c] sm:$0xf0] }
  0x7a   :  { %1993 = vmatpush.bf16.msrb.mxu2 %v2845_v20  ;;  %v3276_v20 = vld [vmem:[#allocation3 + $0x758] sm:$0xf] }
  0x7b   :  { %2006 = vmatpush.bf16.msrb.mxu3 %v3037_v24  ;;  %v3768_v24 = vld [vmem:[#allocation3 + $0x8ec] sm:$0xf0] }
  0x7c   :  { %1968 = vmatpush.bf16.msrb.mxu0 %v2437_v36  ;;  %v2702_v36 = vld [vmem:[#allocation3 + $0x2f0] sm:$0xf0]  ;;  %v3469_v39 = vor.u32 %v3768_v24, %v3468_v22  ;;  %v3690_v24 = vld [vmem:[#allocation3 + $0x67c] sm:$0xf0] }
  0x7d   :  { %1981 = vmatpush.bf16.msrb.mxu1 %v2629_v37  ;;  %v2917_v37 = vor.u32 %v3630_v19, %v2916_v18  ;;  %v2705_v44 = vor.u32 %v3573_v34, %v2702_v36  ;;  %v3549_v18 = vld [vmem:[#allocation3 + $0x21c] sm:$0xf]  ;;  %v2606_v19 = vld [vmem:[#allocation3 + $0x230] sm:$0xf0]  ;;  %v2390_v34 = vld [vmem:[#allocation3 + $0x80] sm:$0xf0] }
  0x7e   :  { %1994 = vmatpush.bf16.msrb.mxu2 %v2821_v38  ;;  %v3277_v38 = vor.u32 %v3720_v21, %v3276_v20  ;;  %v3373_v21 = vor.u32 %v3744_v15, %v3372_v13  ;;  %v2609_v27 = vor.u32 %v3549_v18, %v2606_v19  ;;  %v3543_v36 = vld [vmem:[#allocation3 + $0x1ec] sm:$0xf]  ;;  %v3062_v15 = vld [vmem:[#allocation3 + $0x5c0] sm:$0xf0] }
  0x7f   :  { %2007 = vmatpush.bf16.msrb.mxu3 %v3013_v42  ;;  %v3714_v42 = vld [vmem:[#allocation3 + $0x73c] sm:$0xf0]  ;;  %v3663_v13 = vld [vmem:[#allocation3 + $0x5ac] sm:$0xf]  ;;  %v3446_v19 = vld [vmem:[#allocation3 + $0x8c0] sm:$0xf0] }
  0x80   :  { %1969 = vmatpush.bf16.msrb.mxu0 %v2413_v48  ;;  %v3567_v48 = vld [vmem:[#allocation3 + $0x2ac] sm:$0xf] }
  0x81   :  { %1982 = vmatpush.bf16.msrb.mxu1 %v2605_v49  ;;  %v2678_v49 = vld [vmem:[#allocation3 + $0x2c0] sm:$0xf0]  ;;  %v3759_v18 = vld [vmem:[#allocation3 + $0x8ac] sm:$0xf] }
  0x82   :  { %1995 = vmatpush.bf16.msrb.mxu2 %v2797_v50  ;;  %v3253_v50 = vor.u32 %v3714_v42, %v3252_v41  ;;  %v2681_v56 = vor.u32 %v3567_v48, %v2678_v49  ;;  %v3132_v41 = vld [vmem:[#allocation3 + $0x638] sm:$0xf]  ;;  %v3684_v42 = vld [vmem:[#allocation3 + $0x64c] sm:$0xf0]  ;;  %v3537_v48 = vld [vmem:[#allocation3 + $0x1bc] sm:$0xf] }
  0x83   :  { %2008 = vmatpush.bf16.msrb.mxu3 %v2989_v54  ;;  %v3708_v54 = vld [vmem:[#allocation3 + $0x70c] sm:$0xf0]  ;;  %v2558_v49 = vld [vmem:[#allocation3 + $0x1d0] sm:$0xf0] }
  0x84   :  { %1970 = vmatpush.bf16.msrb.mxu0 %v2389_v60  ;;  %v3561_v60 = vld [vmem:[#allocation3 + $0x27c] sm:$0xf]  ;;  %v2561_v58 = vor.u32 %v3537_v48, %v2558_v49 }
  0x85   :  { %1983 = vmatpush.bf16.msrb.mxu1 %v2581_v61  ;;  %v2654_v61 = vld [vmem:[#allocation3 + $0x290] sm:$0xf0]  ;;  %v3597_v49 = vld [vmem:[#allocation3 + $0x39c] sm:$0xf] }
  0x86   :  { %1996 = vmatpush.bf16.msrb.mxu2 %v2773_v62  ;;  %v3229_v62 = vor.u32 %v3708_v54, %v3228_v53  ;;  %v2657_v4 = vor.u32 %v3561_v60, %v2654_v61  ;;  %v3325_v53 = vor.u32 %v3732_v45, %v3324_v43  ;;  %v2369_v54 = vor.u32 %v3489_v46, %v2366_v47  ;;  %v3531_v60 = vld [vmem:[#allocation3 + $0x18c] sm:$0xf]  ;;  %v2534_v61 = vld [vmem:[#allocation3 + $0x1a0] sm:$0xf0] }
  0x87   :  { %2009 = vmatpush.bf16.msrb.mxu3 %v2965_v2  ;;  %v3702_v2 = vld [vmem:[#allocation3 + $0x6dc] sm:$0xf0]  ;;  %v3699_v45 = vld [vmem:[#allocation3 + $0x6cc] sm:$0xf]  ;;  %v3398_v47 = vld [vmem:[#allocation3 + $0x860] sm:$0xf0] }
  0x88   :  { %1971 = vmatpush.bf16.msrb.mxu0 %v2365_v8  ;;  %v3555_v8 = vld [vmem:[#allocation3 + $0x24c] sm:$0xf] }
  0x89   :  { %1984 = vmatpush.bf16.msrb.mxu1 %v2557_v11  ;;  %v3180_v11 = vld [vmem:[#allocation3 + $0x698] sm:$0xf]  ;;  %v2633_v14 = vor.u32 %v3555_v8, %v2630_v9  ;;  %v3470_v8 = vld [vmem:[#allocation3 + $0x8f0] sm:$0xf0]  ;;  %v2537_v9 = vor.u32 %v3531_v60, %v2534_v61  ;;  %v3747_v46 = vld [vmem:[#allocation3 + $0x84c] sm:$0xf] }
  0x8a   :  { %1997 = vmatpush.bf16.msrb.mxu2 %v2749_v12  ;;  %v3696_v12 = vld [vmem:[#allocation3 + $0x6ac] sm:$0xf0] }
  0x8b   :  { %2010 = vmatpush.bf16.msrb.mxu3 %v2941_v16  ;;  %v3501_v16 = vld [vmem:[#allocation3 + $0x9c] sm:$0xf]  ;;  %v3181_v20 = vor.u32 %v3696_v12, %v3180_v11  ;;  %v3615_v11 = vld [vmem:[#allocation3 + $0x42c] sm:$0xf]  ;;  %v2870_v12 = vld [vmem:[#allocation3 + $0x440] sm:$0xf0] }
  0x8c   :  { %1972 = vmatpush.bf16.msrb.mxu0 %v2341_v23  ;;  %v2417_v22 = vor.u32 %v3501_v16, %v2414_v17  ;;  %v3156_v23 = vld [vmem:[#allocation3 + $0x668] sm:$0xf]  ;;  %v3711_v16 = vld [vmem:[#allocation3 + $0x72c] sm:$0xf]  ;;  %v3254_v17 = vld [vmem:[#allocation3 + $0x740] sm:$0xf0] }
  0x8d   :  { %1985 = vmatpush.bf16.msrb.mxu1 %v2533_v32  ;;  %v3738_v32 = vld [vmem:[#allocation3 + $0x7fc] sm:$0xf0] }
  0x8e   :  { %1998 = vmatpush.bf16.msrb.mxu2 %v2725_v33  ;;  %v3495_v33 = vld [vmem:[#allocation3 + $0x6c] sm:$0xf] }
  0x8f   :  { %2011 = vmatpush.bf16.msrb.mxu3 %v2917_v37  ;;  %1973 = vmatmul.bf16.vlgmr.msrb.gmra.mxu0 %v3894_v29  ;;  %v2582_v37 = vld [vmem:[#allocation3 + $0x200] sm:$0xf0] }
  0x90   :  { %2017 = vmatpush.bf16.msra.mxu0 %v3277_v38  ;;  %1986 = vmatmul.bf16.vlgmr.msrb.gmra.mxu1 %v3898_v35  ;;  %v3157_v38 = vor.u32 %v3690_v24, %v3156_v23  ;;  %v3609_v23 = vld [vmem:[#allocation3 + $0x3fc] sm:$0xf]  ;;  %v2846_v24 = vld [vmem:[#allocation3 + $0x410] sm:$0xf0] }
  0x91   :  { %2030 = vmatpush.bf16.msra.mxu1 %v3469_v39  ;;  %1999 = vmatmul.bf16.vlgmr.msrb.gmra.mxu2 %v3892_v28  ;;  %v3205_v28 = vor.u32 %v3702_v2, %v3204_v1  ;;  %v3349_v39 = vor.u32 %v3738_v32, %v3348_v25  ;;  %v3086_v2 = vld [vmem:[#allocation3 + $0x5f0] sm:$0xf0]  ;;  %v3657_v25 = vld [vmem:[#allocation3 + $0x57c] sm:$0xf] }
  0x92   :  { %2043 = vmatpush.bf16.msra.mxu2 %v2513_v40  ;;  %2012 = vmatmul.bf16.vlgmr.msrb.gmra.mxu3 %v3896_v30  ;;  %v2441_v30 = vor.u32 %v3507_v6, %v2438_v7  ;;  %v2393_v40 = vor.u32 %v3495_v33, %v2390_v34  ;;  %v2345_v6 = vor.u32 %v3483_v57, %v2342_v59  ;;  %v3765_v7 = vld [vmem:[#allocation3 + $0x8dc] sm:$0xf]  ;;  %v3038_v32 = vld [vmem:[#allocation3 + $0x590] sm:$0xf0]  ;;  %v3591_v59 = vld [vmem:[#allocation3 + $0x36c] sm:$0xf] }
  0x93   :  { %2056 = vmatpush.bf16.msra.mxu3 %v2705_v44  ;;  %v2585_v44 = vor.u32 %v3543_v36, %v2582_v37  ;;  %v3705_v33 = vld [vmem:[#allocation3 + $0x6fc] sm:$0xf]  ;;  %v3230_v34 = vld [vmem:[#allocation3 + $0x710] sm:$0xf0] }
  0x94   :  { %2018 = vmatpush.bf16.msra.mxu0 %v3253_v50  ;;  %v3133_v50 = vor.u32 %v3684_v42, %v3132_v41  ;;  %v3753_v36 = vld [vmem:[#allocation3 + $0x87c] sm:$0xf]  ;;  %v3422_v37 = vld [vmem:[#allocation3 + $0x890] sm:$0xf0]  ;;  %v3603_v41 = vld [vmem:[#allocation3 + $0x3cc] sm:$0xf] }
  0x95   :  { %2031 = vmatpush.bf16.msra.mxu1 %v3445_v51  ;;  %v3108_v51 = vld [vmem:[#allocation3 + $0x608] sm:$0xf]  ;;  %v3651_v42 = vld [vmem:[#allocation3 + $0x54c] sm:$0xf]  ;;  %v3425_v43 = vor.u32 %v3753_v36, %v3422_v37  ;;  %v3374_v57 = vld [vmem:[#allocation3 + $0x830] sm:$0xf0] }
  0x96   :  { %2044 = vmatpush.bf16.msra.mxu2 %v2489_v52  ;;  %v3678_v52 = vld [vmem:[#allocation3 + $0x61c] sm:$0xf0]  ;;  %v3110_v36 = vld [vmem:[#allocation3 + $0x620] sm:$0xf0]  ;;  %v3723_v37 = vld [vmem:[#allocation3 + $0x78c] sm:$0xf] }
  0x97   :  { %2057 = vmatpush.bf16.msra.mxu3 %v2681_v56  ;;  %v3726_v56 = vld [vmem:[#allocation3 + $0x79c] sm:$0xf0]  ;;  %v3109_v1 = vor.u32 %v3678_v52, %v3108_v51  ;;  %v3645_v51 = vld [vmem:[#allocation3 + $0x51c] sm:$0xf]  ;;  %v3401_v52 = vor.u32 %v3747_v46, %v3398_v47 }
  0x98   :  { %2019 = vmatpush.bf16.msra.mxu0 %v3229_v62  ;;  %v3621_v62 = vld [vmem:[#allocation3 + $0x45c] sm:$0xf]  ;;  %v3301_v5 = vor.u32 %v3726_v56, %v3300_v55  ;;  %v3182_v55 = vld [vmem:[#allocation3 + $0x6b0] sm:$0xf0]  ;;  %v3092_v47 = vld [vmem:[#allocation3 + $0x5e0] sm:$0xf] }
  0x99   :  { %2032 = vmatpush.bf16.msra.mxu1 %v3421_v63  ;;  %v2894_v63 = vld [vmem:[#allocation3 + $0x470] sm:$0xf0]  ;;  %v3741_v56 = vld [vmem:[#allocation3 + $0x81c] sm:$0xf] }
  0x9a   :  { %2045 = vmatpush.bf16.msra.mxu2 %v2465_v0  ;;  %v3669_v0 = vld [vmem:[#allocation3 + $0x5dc] sm:$0xf] }
  0x9b   :  { %2058 = vmatpush.bf16.msra.mxu3 %v2657_v4  ;;  %v3278_v4 = vld [vmem:[#allocation3 + $0x770] sm:$0xf0] }
  0x9c   :  { %2020 = vmatpush.bf16.msra.mxu0 %v3205_v28  ;;  %v2897_v28 = vor.u32 %v3621_v62, %v2894_v63  ;;  %v2774_v62 = vld [vmem:[#allocation3 + $0x380] sm:$0xf0]  ;;  %v3639_v63 = vld [vmem:[#allocation3 + $0x4ec] sm:$0xf] }
  0x9d   :  { %2033 = vmatpush.bf16.msra.mxu1 %v3397_v10  ;;  %v3089_v10 = vor.u32 %v3669_v0, %v3086_v2  ;;  %v2966_v0 = vld [vmem:[#allocation3 + $0x500] sm:$0xf0]  ;;  %v3687_v2 = vld [vmem:[#allocation3 + $0x66c] sm:$0xf] }
  0x9e   :  { %2046 = vmatpush.bf16.msra.mxu2 %v2441_v30  ;;  %v3281_v30 = vor.u32 %v3717_v3, %v3278_v4  ;;  %v3158_v3 = vld [vmem:[#allocation3 + $0x680] sm:$0xf0]  ;;  %v3927_v4 = vld [vmem:[%s3991_s2] sm:$0x3f] }
  0x9f   :  { %2059 = vmatpush.bf16.msra.mxu3 %v2633_v14  ;;  %v3473_v14 = vor.u32 %v3765_v7, %v3470_v8  ;;  %v2777_v7 = vor.u32 %v3591_v59, %v2774_v62  ;;  %v3585_v8 = vld [vmem:[#allocation3 + $0x33c] sm:$0xf]  ;;  %v2876_v59 = vld [vmem:[#allocation3 + $0x430] sm:$0xf] }
  0xa0   :  { %2021 = vmatpush.bf16.msra.mxu0 %v3181_v20  ;;  %v2873_v20 = vor.u32 %v3615_v11, %v2870_v12  ;;  %v343_v11 = vperm.slane %v3927_v4, 0 }
  0xa1   :  { %2034 = vmatpush.bf16.msra.mxu1 %v3373_v21  ;;  %v3065_v21 = vor.u32 %v3663_v13, %v3062_v15  ;;  %v2942_v13 = vld [vmem:[#allocation3 + $0x4d0] sm:$0xf0] }
  0xa2   :  { %2047 = vmatpush.bf16.msra.mxu2 %v2417_v22  ;;  %v3257_v22 = vor.u32 %v3711_v16, %v3254_v17  ;;  %v3134_v15 = vld [vmem:[#allocation3 + $0x650] sm:$0xf0]  ;;  %v3729_v16 = vld [vmem:[#allocation3 + $0x7bc] sm:$0xf] }
  0xa3   :  { %2060 = vmatpush.bf16.msra.mxu3 %v2609_v27  ;;  %v3449_v27 = vor.u32 %v3759_v18, %v3446_v19  ;;  %v3326_v17 = vld [vmem:[#allocation3 + $0x7d0] sm:$0xf0]  ;;  %v3579_v19 = vld [vmem:[#allocation3 + $0x30c] sm:$0xf] }
  0xa4   :  { %2022 = vmatpush.bf16.msra.mxu0 %v3157_v38  ;;  %v2849_v38 = vor.u32 %v3609_v23, %v2846_v24  ;;  %v3627_v24 = vld [vmem:[#allocation3 + $0x48c] sm:$0xf] }
  0xa5   :  { %2035 = vmatpush.bf16.msra.mxu1 %v3349_v39  ;;  %v3041_v39 = vor.u32 %v3657_v25, %v3038_v32  ;;  %v2918_v25 = vld [vmem:[#allocation3 + $0x4a0] sm:$0xf0] }
  0xa6   :  { %2048 = vmatpush.bf16.msra.mxu2 %v2393_v40  ;;  %v3233_v40 = vor.u32 %v3705_v33, %v3230_v34  ;;  %v3329_v34 = vor.u32 %v3729_v16, %v3326_v17  ;;  %v3939_v17 = vld [vmem:[#allocation1 + $0x1b] sm:$0xff] }
  0xa7   :  { %2061 = vmatpush.bf16.msra.mxu3 %v2585_v44  ;;  %v3014_v44 = vld [vmem:[#allocation3 + $0x560] sm:$0xf0] }
  0xa8   :  { %2023 = vmatpush.bf16.msra.mxu0 %v3133_v50  ;;  %v3017_v48 = vor.u32 %v3651_v42, %v3014_v44  ;;  %v2798_v50 = vld [vmem:[#allocation3 + $0x3b0] sm:$0xf0]  ;;  %v2900_v44 = vld [vmem:[#allocation3 + $0x460] sm:$0xf] }
  0xa9   :  { %2036 = vmatpush.bf16.msra.mxu1 %v3325_v53  ;;  %v2990_v53 = vld [vmem:[#allocation3 + $0x530] sm:$0xf0] }
  0xaa   :  { %2049 = vmatpush.bf16.msra.mxu2 %v2369_v54  ;;  %v3693_v54 = vld [vmem:[#allocation3 + $0x69c] sm:$0xf]  ;;  %v2993_v60 = vor.u32 %v3645_v51, %v2990_v53 }
  0xab   :  { %2062 = vmatpush.bf16.msra.mxu3 %v2561_v58  ;;  %v2801_v58 = vor.u32 %v3597_v49, %v2798_v50  ;;  %v3185_v61 = vor.u32 %v3693_v54, %v3182_v55  ;;  %v2492_v54 = vld [vmem:[#allocation3 + $0x130] sm:$0xf]  ;;  %v3523_v55 = vld [vmem:[#allocation3 + $0x144] sm:$0xf0] }
  0xac   :  { %2024 = vmatpush.bf16.msra.mxu0 %v3109_v1  ;;  %v3377_v1 = vor.u32 %v3741_v56, %v3374_v57  ;;  %v2684_v56 = vld [vmem:[#allocation3 + $0x2b0] sm:$0xf] }
  0xad   :  { %2037 = vmatpush.bf16.msra.mxu1 %v3301_v5  ;;  %v3735_v5 = vld [vmem:[#allocation3 + $0x7ec] sm:$0xf] }
  0xae   :  { %2050 = vmatpush.bf16.msra.mxu2 %v2345_v6  ;;  %v3350_v6 = vld [vmem:[#allocation3 + $0x800] sm:$0xf0] }
  0xaf   :  { %2063 = vmatpush.bf16.msra.mxu3 %v2537_v9  ;;  %2025 = vmatmul.bf16.vlgmr.msra.gmra.mxu0 %v3904_v26  ;;  %v2822_v26 = vld [vmem:[#allocation3 + $0x3e0] sm:$0xf0]  ;;  %v2969_v9 = vor.u32 %v3639_v63, %v2966_v0  ;;  %v3353_v12 = vor.u32 %v3735_v5, %v3350_v6  ;;  %v3068_v63 = vld [vmem:[#allocation3 + $0x5b0] sm:$0xf]  ;;  %v3667_v0 = vld [vmem:[#allocation3 + $0x5c4] sm:$0xf0] }
  0xb0   :  { %2069 = vmatpush.bf16.msrb.mxu0 %v2897_v28  ;;  %2038 = vmatmul.bf16.vlgmr.msra.gmra.mxu1 %v3906_v31  ;;  %v3206_v31 = vld [vmem:[#allocation3 + $0x6e0] sm:$0xf0]  ;;  %v3161_v28 = vor.u32 %v3687_v2, %v3158_v3  ;;  %v2493_v2 = vor.u32 %v3523_v55, %v2492_v54  ;;  %v2468_v6 = vld [vmem:[#allocation3 + $0x100] sm:$0xf]  ;;  %v3499_v54 = vld [vmem:[#allocation3 + $0x84] sm:$0xf0] }
  0xb1   :  { %2082 = vmatpush.bf16.msrb.mxu1 %v3089_v10  ;;  %2051 = vmatmul.bf16.vlgmr.msra.gmra.mxu2 %v3894_v29  ;;  %v2825_v29 = vor.u32 %v3603_v41, %v2822_v26  ;;  %v2750_v10 = vld [vmem:[#allocation3 + $0x350] sm:$0xf0]  ;;  %v2708_v41 = vld [vmem:[#allocation3 + $0x2e0] sm:$0xf]  ;;  %v2588_v55 = vld [vmem:[#allocation3 + $0x1f0] sm:$0xf] }
  0xb2   :  { %2095 = vmatpush.bf16.msrb.mxu2 %v3281_v30  ;;  %2064 = vmatmul.bf16.vlgmr.msra.gmra.mxu3 %v3898_v35  ;;  %v3209_v35 = vor.u32 %v3699_v45, %v3206_v31  ;;  %v3633_v30 = vld [vmem:[#allocation3 + $0x4bc] sm:$0xf]  ;;  %v2753_v18 = vor.u32 %v3585_v8, %v2750_v10  ;;  %v3625_v45 = vld [vmem:[#allocation3 + $0x474] sm:$0xf0]  ;;  %v2921_v31 = vor.u32 %v3627_v24, %v2918_v25  ;;  %v2660_v8 = vld [vmem:[#allocation3 + $0x280] sm:$0xf] }
  0xb3   :  { %2108 = vmatpush.bf16.msrb.mxu3 %v3473_v14  ;;  %v3681_v14 = vld [vmem:[#allocation3 + $0x63c] sm:$0xf]  ;;  %v2901_v53 = vor.u32 %v3625_v45, %v2900_v44  ;;  %v3565_v10 = vld [vmem:[#allocation3 + $0x294] sm:$0xf0]  ;;  %v2636_v24 = vld [vmem:[#allocation3 + $0x250] sm:$0xf] }
  0xb4   :  { %2070 = vmatpush.bf16.msrb.mxu0 %v2873_v20  ;;  %v2726_v20 = vld [vmem:[#allocation3 + $0x320] sm:$0xf0]  ;;  %v3137_v23 = vor.u32 %v3681_v14, %v3134_v15  ;;  %v1831_v33 = vpop.f32.mrf.mxu1  ;;  %v3044_v14 = vld [vmem:[#allocation3 + $0x580] sm:$0xf]  ;;  %v3661_v15 = vld [vmem:[#allocation3 + $0x594] sm:$0xf0] }
  0xb5   :  { %2083 = vmatpush.bf16.msrb.mxu1 %v3065_v21  ;;  %v1818_v21 = vpop.f32.mrf.mxu0  ;;  %v2729_v42 = vor.u32 %v3579_v19, %v2726_v20  ;;  %v2661_v20 = vor.u32 %v3565_v10, %v2660_v8  ;;  %v3045_v25 = vor.u32 %v3661_v15, %v3044_v14  ;;  %v2612_v44 = vld [vmem:[#allocation3 + $0x220] sm:$0xf]  ;;  %v3493_v8 = vld [vmem:[#allocation3 + $0x54] sm:$0xf0] }
  0xb6   :  { %2096 = vmatpush.bf16.msrb.mxu2 %v3257_v22  ;;  %v2945_v22 = vor.u32 %v3633_v30, %v2942_v13  ;;  %v1819_v32 = vadd.f32 %v1818_v21, %v343_v11  ;;  %v2852_v30 = vld [vmem:[#allocation3 + $0x400] sm:$0xf]  ;;  %v3613_v11 = vld [vmem:[#allocation3 + $0x414] sm:$0xf0]  ;;  %v3936_v13 = vld [vmem:[#allocation1 + $0x2d] sm:$0xff] }
  0xb7   :  { %2109 = vmatpush.bf16.msrb.mxu3 %v3449_v27  ;;  %v3675_v27 = vld [vmem:[#allocation3 + $0x60c] sm:$0xf]  ;;  %v2853_v21 = vor.u32 %v3613_v11, %v2852_v30  ;;  %v3541_v11 = vld [vmem:[#allocation3 + $0x1d4] sm:$0xf0]  ;;  %v2756_v14 = vld [vmem:[#allocation3 + $0x340] sm:$0xf] }
  0xb8   :  { %2071 = vmatpush.bf16.msrb.mxu0 %v2849_v38  ;;  %v3302_v38 = vld [vmem:[#allocation3 + $0x7a0] sm:$0xf0]  ;;  %v1832_v26 = vadd.f32 %v1831_v33, %v1819_v32  ;;  %v3113_v46 = vor.u32 %v3675_v27, %v3110_v36  ;;  %v3559_v27 = vld [vmem:[#allocation3 + $0x264] sm:$0xf0]  ;;  %v2828_v32 = vld [vmem:[#allocation3 + $0x3d0] sm:$0xf] }
  0xb9   :  { %2084 = vmatpush.bf16.msrb.mxu1 %v3041_v39  ;;  %v2516_v39 = vld [vmem:[#allocation3 + $0x160] sm:$0xf]  ;;  %v1857_v51 = vpop.f32.mrf.mxu3  ;;  %v3607_v33 = vld [vmem:[#allocation3 + $0x3e4] sm:$0xf0]  ;;  %v3589_v15 = vld [vmem:[#allocation3 + $0x354] sm:$0xf0] }
  0xba   :  { %2097 = vmatpush.bf16.msrb.mxu2 %v3233_v40  ;;  %v3529_v40 = vld [vmem:[#allocation3 + $0x174] sm:$0xf0]  ;;  %v3655_v36 = vld [vmem:[#allocation3 + $0x564] sm:$0xf0] }
  0xbb   :  { %2110 = vmatpush.bf16.msrb.mxu3 %v3425_v43  ;;  %v3577_v43 = vld [vmem:[#allocation3 + $0x2f4] sm:$0xf0]  ;;  %v2517_v49 = vor.u32 %v3529_v40, %v2516_v39 }
  0xbc   :  { %2072 = vmatpush.bf16.msrb.mxu0 %v2825_v29  ;;  %v3673_v29 = vld [vmem:[#allocation3 + $0x5f4] sm:$0xf0] }
  0xbd   :  { %2085 = vmatpush.bf16.msrb.mxu1 %v3017_v48  ;;  %v1844_v48 = vpop.f32.mrf.mxu2  ;;  %v3093_v57 = vor.u32 %v3673_v29, %v3092_v47  ;;  %v1820_v62 = vpop.f32.mrf.mxu0  ;;  %v3601_v47 = vld [vmem:[#allocation3 + $0x3b4] sm:$0xf0] }
  0xbe   :  { %2098 = vmatpush.bf16.msrb.mxu2 %v3209_v35  ;;  %v3305_v35 = vor.u32 %v3723_v37, %v3302_v38  ;;  %v1845_v50 = vadd.f32 %v1844_v48, %v1832_v26  ;;  %v2829_v26 = vor.u32 %v3607_v33, %v2828_v32  ;;  %v2996_v48 = vld [vmem:[#allocation3 + $0x520] sm:$0xf]  ;;  %v3643_v62 = vld [vmem:[#allocation3 + $0x504] sm:$0xf0] }
  0xbf   :  { %2111 = vmatpush.bf16.msrb.mxu3 %v3401_v52  ;;  %v2709_v52 = vor.u32 %v3577_v43, %v2708_v41  ;;  %v2637_v41 = vor.u32 %v3559_v27, %v2636_v24  ;;  %v3505_v43 = vld [vmem:[#allocation3 + $0xb4] sm:$0xf0]  ;;  %v2540_v24 = vld [vmem:[#allocation3 + $0x190] sm:$0xf]  ;;  %v3583_v33 = vld [vmem:[#allocation3 + $0x324] sm:$0xf0] }
  0xc0   :  { %2073 = vmatpush.bf16.msrb.mxu0 %v2801_v58  ;;  %v3571_v58 = vld [vmem:[#allocation3 + $0x2c4] sm:$0xf0]  ;;  %v2732_v27 = vld [vmem:[#allocation3 + $0x310] sm:$0xf] }
  0xc1   :  { %2086 = vmatpush.bf16.msrb.mxu1 %v2993_v60  ;;  %v3619_v60 = vld [vmem:[#allocation3 + $0x444] sm:$0xf0]  ;;  %v2685_v3 = vor.u32 %v3571_v58, %v2684_v56  ;;  %v1859_v19 = vpop.f32.mrf.mxu3  ;;  %v2780_v58 = vld [vmem:[#allocation3 + $0x370] sm:$0xf] }
  0xc2   :  { %2099 = vmatpush.bf16.msrb.mxu2 %v3185_v61  ;;  %v1858_v61 = vadd.f32 %v1857_v51, %v1845_v50  ;;  %v2877_v5 = vor.u32 %v3619_v60, %v2876_v59  ;;  %v3595_v59 = vld [vmem:[#allocation3 + $0x384] sm:$0xf0] }
  0xc3   :  { %2112 = vmatpush.bf16.msrb.mxu3 %v3377_v1  ;;  %v1833_v1 = vpop.f32.mrf.mxu1 }
  0xc4   :  { %2074 = vmatpush.bf16.msrb.mxu0 %v2777_v7  ;;  %v3517_v7 = vld [vmem:[#allocation3 + $0x114] sm:$0xf0] }
  0xc5   :  { %2087 = vmatpush.bf16.msrb.mxu1 %v2969_v9  ;;  %v3930_v9 = vld [vmem:[#allocation1 + $0x24] sm:$0xff]  ;;  %v1846_v16 = vpop.f32.mrf.mxu2 }
  0xc6   :  { %2100 = vmatpush.bf16.msrb.mxu2 %v3161_v28  ;;  %v3069_v28 = vor.u32 %v3667_v0, %v3068_v63  ;;  %v2948_v16 = vld [vmem:[#allocation3 + $0x4c0] sm:$0xf] }
  0xc7   :  { %2113 = vmatpush.bf16.msrb.mxu3 %v3353_v12  ;;  %v3933_v12 = vld [vmem:[#allocation1 + $0x12] sm:$0xff] }
  0xc8   :  { %2075 = vmatpush.bf16.msrb.mxu0 %v2753_v18  ;;  %v2469_v18 = vor.u32 %v3517_v7, %v2468_v6  ;;  %v2781_v6 = vor.u32 %v3595_v59, %v2780_v58  ;;  %v2372_v7 = vld [vmem:[#allocation3 + $0x40] sm:$0xf]  ;;  %v3568_v58 = vld [vmem:[#allocation3 + $0x2b4] sm:$0xf]  ;;  %v2686_v59 = vld [vmem:[#allocation3 + $0x2c8] sm:$0xf0] }
  0xc9   :  { %2088 = vmatpush.bf16.msrb.mxu1 %v2945_v22  ;;  %v2444_v22 = vld [vmem:[#allocation3 + $0xd0] sm:$0xf]  ;;  %v2373_v19 = vor.u32 %v3493_v8, %v2372_v7  ;;  %v3947_v7 = vld [vmem:[#allocation1] sm:$0xff]  ;;  %v3562_v8 = vld [vmem:[#allocation3 + $0x284] sm:$0xf] }
  0xca   :  { %2101 = vmatpush.bf16.msrb.mxu2 %v3137_v23  ;;  %v3511_v23 = vld [vmem:[#allocation3 + $0xe4] sm:$0xf0] }
  0xcb   :  { %2114 = vmatpush.bf16.msrb.mxu3 %v3329_v34  ;;  %v3020_v34 = vld [vmem:[#allocation3 + $0x550] sm:$0xf]  ;;  %v2445_v38 = vor.u32 %v3511_v23, %v2444_v22  ;;  %v2757_v23 = vor.u32 %v3589_v15, %v2756_v14 }
  0xcc   :  { %2076 = vmatpush.bf16.msrb.mxu0 %v2729_v42  ;;  %v1870_v37 = vpop.f32.mrf.mxu0  ;;  %v2420_v42 = vld [vmem:[#allocation3 + $0xa0] sm:$0xf]  ;;  %v3021_v45 = vor.u32 %v3655_v36, %v3020_v34  ;;  %v2924_v34 = vld [vmem:[#allocation3 + $0x490] sm:$0xf]  ;;  %v3631_v36 = vld [vmem:[#allocation3 + $0x4a4] sm:$0xf0] }
  0xcd   :  { %2089 = vmatpush.bf16.msrb.mxu1 %v2921_v31  ;;  %v1871_v39 = vadd.f32 %v1870_v37, %v1858_v61  ;;  %v1883_v40 = vpop.f32.mrf.mxu1  ;;  %v3553_v31 = vld [vmem:[#allocation3 + $0x234] sm:$0xf0]  ;;  %v2421_v50 = vor.u32 %v3505_v43, %v2420_v42  ;;  %v2972_v61 = vld [vmem:[#allocation3 + $0x4f0] sm:$0xf]  ;;  %v3526_v43 = vld [vmem:[#allocation3 + $0x164] sm:$0xf] }
  0xce   :  { %2102 = vmatpush.bf16.msrb.mxu2 %v3113_v46  ;;  %v2804_v46 = vld [vmem:[#allocation3 + $0x3a0] sm:$0xf]  ;;  %v2613_v51 = vor.u32 %v3553_v31, %v2612_v44  ;;  %v2973_v30 = vor.u32 %v3643_v62, %v2972_v61  ;;  %v3769_v42 = vld [vmem:[#allocation3 + $0x8f4] sm:$0xf0]  ;;  %v2518_v44 = vld [vmem:[#allocation3 + $0x178] sm:$0xf0]  ;;  %v2733_v31 = vor.u32 %v3583_v33, %v2732_v27 }
  0xcf   :  { %2115 = vmatpush.bf16.msrb.mxu3 %v3305_v35  ;;  %2077 = vmatmul.bf16.vlgmr.msrb.gmra.mxu0 %v3933_v12  ;;  %v3942_v29 = vadd.f32 %v1883_v40, %v1871_v39  ;;  %v3649_v35 = vld [vmem:[#allocation3 + $0x534] sm:$0xf0]  ;;  %v3476_v40 = vld [vmem:[#allocation3 + $0x8e0] sm:$0xf] }
  0xd0   :  { %2121 = vmatpush.bf16.msra.mxu0 %v2517_v49  ;;  %2090 = vmatmul.bf16.vlgmr.msrb.gmra.mxu1 %v3939_v17  ;;  %v344_v49 = vperm.slane %v3927_v4, 1  ;;  %v2997_v56 = vor.u32 %v3649_v35, %v2996_v48  ;;  %v3721_v39 = vld [vmem:[#allocation3 + $0x774] sm:$0xf0]  ;;  %v2925_v48 = vor.u32 %v3631_v36, %v2924_v34 }
  0xd1   :  { %2134 = vmatpush.bf16.msra.mxu1 %v2709_v52  ;;  %2103 = vmatmul.bf16.vlgmr.msrb.gmra.mxu2 %v3930_v9  ;;  %v2805_v52 = vor.u32 %v3601_v47, %v2804_v46  ;;  %v3574_v46 = vld [vmem:[#allocation3 + $0x2e4] sm:$0xf]  ;;  %v2710_v47 = vld [vmem:[#allocation3 + $0x2f8] sm:$0xf0]  ;;  %3775 = vtanh.f32 %v3942_v29  ;;  %v3140_v29 = vld [vmem:[#allocation3 + $0x640] sm:$0xf] }
  0xd2   :  { %2147 = vmatpush.bf16.msra.mxu2 %v2901_v53  ;;  %2116 = vmatmul.bf16.vlgmr.msrb.gmra.mxu3 %v3936_v13  ;;  %v2396_v53 = vld [vmem:[#allocation3 + $0x70] sm:$0xf] }
  0xd3   :  { %2160 = vmatpush.bf16.msra.mxu3 %v3093_v57  ;;  %v3547_v57 = vld [vmem:[#allocation3 + $0x204] sm:$0xf0] }
  0xd4   :  { %2122 = vmatpush.bf16.msra.mxu0 %v2493_v2  ;;  %v1896_v60 = vpop.f32.mrf.mxu2  ;;  %v1872_v1 = vpop.f32.mrf.mxu0  ;;  %v2397_v2 = vor.u32 %v3499_v54, %v2396_v53  ;;  %v3452_v53 = vld [vmem:[#allocation3 + $0x8b0] sm:$0xf]  ;;  %v2713_v54 = vor.u32 %v3574_v46, %v2710_v47 }
  0xd5   :  { %2135 = vmatpush.bf16.msra.mxu1 %v2685_v3  ;;  %v1897_v63 = vadd.f32 %v1896_v60, %v344_v49  ;;  %v1909_v0 = vpop.f32.mrf.mxu3  ;;  %v1885_v3 = vpop.f32.mrf.mxu1  ;;  %v3477_v49 = vor.u32 %v3769_v42, %v3476_v40  ;;  %v3428_v1 = vld [vmem:[#allocation3 + $0x880] sm:$0xf]  ;;  %v3502_v42 = vld [vmem:[#allocation3 + $0xa4] sm:$0xf] }
  0xd6   :  { %2148 = vmatpush.bf16.msra.mxu2 %v2877_v5  ;;  %v2589_v5 = vor.u32 %v3547_v57, %v2588_v55  ;;  %v3763_v55 = vld [vmem:[#allocation3 + $0x8c4] sm:$0xf0]  ;;  %v2494_v57 = vld [vmem:[#allocation3 + $0x148] sm:$0xf0]  ;;  %v3757_v3 = vld [vmem:[#allocation3 + $0x894] sm:$0xf0] }
  0xd7   :  { %2161 = vmatpush.bf16.msra.mxu3 %v3069_v28  ;;  %v2564_v28 = vld [vmem:[#allocation3 + $0x1c0] sm:$0xf]  ;;  %v3945_v10 = vadd.f32 %v1909_v0, %v1897_v63  ;;  %v3453_v61 = vor.u32 %v3763_v55, %v3452_v53  ;;  %v3709_v0 = vld [vmem:[#allocation3 + $0x714] sm:$0xf0]  ;;  %v3429_v14 = vor.u32 %v3757_v3, %v3428_v1  ;;  %v3496_v55 = vld [vmem:[#allocation3 + $0x74] sm:$0xf] }
  0xd8   :  { %2123 = vmatpush.bf16.msra.mxu0 %v2469_v18  ;;  %v3637_v18 = vld [vmem:[#allocation3 + $0x4d4] sm:$0xf0]  ;;  %v2565_v22 = vor.u32 %v3541_v11, %v2564_v28  ;;  %v3236_v63 = vld [vmem:[#allocation3 + $0x700] sm:$0xf]  ;;  %v2662_v28 = vld [vmem:[#allocation3 + $0x298] sm:$0xf0] }
  0xd9   :  { %2136 = vmatpush.bf16.msra.mxu1 %v2661_v20  ;;  %v2348_v20 = vld [vmem:[#allocation3 + $0x10] sm:$0xf]  ;;  %v2949_v32 = vor.u32 %v3637_v18, %v2948_v16  ;;  %v3237_v11 = vor.u32 %v3709_v0, %v3236_v63  ;;  %v3703_v18 = vld [vmem:[#allocation3 + $0x6e4] sm:$0xf0]  ;;  %v3380_v40 = vld [vmem:[#allocation3 + $0x820] sm:$0xf] }
  0xda   :  { %2149 = vmatpush.bf16.msra.mxu2 %v2853_v21  ;;  %v3487_v21 = vld [vmem:[#allocation3 + $0x24] sm:$0xf0]  ;;  %v3212_v16 = vld [vmem:[#allocation3 + $0x6d0] sm:$0xf]  ;;  %v3685_v1 = vld [vmem:[#allocation3 + $0x654] sm:$0xf0] }
  0xdb   :  { %2162 = vmatpush.bf16.msra.mxu3 %v3045_v25  ;;  %v3535_v25 = vld [vmem:[#allocation3 + $0x1a4] sm:$0xf0]  ;;  %v3213_v27 = vor.u32 %v3703_v18, %v3212_v16  ;;  %v3776_v16 = vpop.eup %3775 }
  0xdc   :  { %2124 = vmatpush.bf16.msra.mxu0 %v2445_v38  ;;  %v1898_v37 = vpop.f32.mrf.mxu2  ;;  %v3284_v38 = vld [vmem:[#allocation3 + $0x760] sm:$0xf] }
  0xdd   :  { %2137 = vmatpush.bf16.msra.mxu1 %v2637_v41  ;;  %v1911_v41 = vpop.f32.mrf.mxu3  ;;  %v3285_v35 = vor.u32 %v3721_v39, %v3284_v38  ;;  %v3188_v38 = vld [vmem:[#allocation3 + $0x6a0] sm:$0xf]  ;;  %v3697_v39 = vld [vmem:[#allocation3 + $0x6b4] sm:$0xf0] }
  0xde   :  { %2150 = vmatpush.bf16.msra.mxu2 %v2829_v26  ;;  %v2349_v26 = vor.u32 %v3487_v21, %v2348_v20  ;;  %v2665_v20 = vor.u32 %v3562_v8, %v2662_v28  ;;  %v3751_v21 = vld [vmem:[#allocation3 + $0x864] sm:$0xf0]  ;;  %v3189_v46 = vor.u32 %v3697_v39, %v3188_v38  ;;  %v3490_v8 = vld [vmem:[#allocation3 + $0x44] sm:$0xf]  ;;  %v2374_v28 = vld [vmem:[#allocation3 + $0x58] sm:$0xf0] }
  0xdf   :  { %2163 = vmatpush.bf16.msra.mxu3 %v3021_v45  ;;  %v2541_v45 = vor.u32 %v3535_v25, %v2540_v24  ;;  %v3556_v24 = vld [vmem:[#allocation3 + $0x254] sm:$0xf]  ;;  %v2638_v25 = vld [vmem:[#allocation3 + $0x268] sm:$0xf0] }
  0xe0   :  { %2125 = vmatpush.bf16.msra.mxu0 %v2421_v50  ;;  %v2521_v50 = vor.u32 %v3526_v43, %v2518_v44  ;;  %v2641_v41 = vor.u32 %v3556_v24, %v2638_v25  ;;  %v2422_v43 = vld [vmem:[#allocation3 + $0xb8] sm:$0xf0]  ;;  %v3308_v24 = vld [vmem:[#allocation3 + $0x790] sm:$0xf]  ;;  %v3727_v25 = vld [vmem:[#allocation3 + $0x7a4] sm:$0xf0] }
  0xe1   :  { %2138 = vmatpush.bf16.msra.mxu1 %v2613_v51  ;;  %v3260_v51 = vld [vmem:[#allocation3 + $0x730] sm:$0xf] }
  0xe2   :  { %2151 = vmatpush.bf16.msra.mxu2 %v2805_v52  ;;  %v3715_v52 = vld [vmem:[#allocation3 + $0x744] sm:$0xf0] }
  0xe3   :  { %2164 = vmatpush.bf16.msra.mxu3 %v2997_v56  ;;  %v3520_v56 = vld [vmem:[#allocation3 + $0x134] sm:$0xf]  ;;  %v3261_v60 = vor.u32 %v3715_v52, %v3260_v51 }
  0xe4   :  { %2126 = vmatpush.bf16.msra.mxu0 %v2397_v2  ;;  %v2497_v62 = vor.u32 %v3520_v56, %v2494_v57  ;;  %v2689_v2 = vor.u32 %v3568_v58, %v2686_v59  ;;  %v2398_v56 = vld [vmem:[#allocation3 + $0x88] sm:$0xf0]  ;;  %v3544_v57 = vld [vmem:[#allocation3 + $0x1f4] sm:$0xf]  ;;  %v3957_v59 = vld [vmem:[#allocation5] sm:$0x3f] }
  0xe5   :  { %2139 = vmatpush.bf16.msra.mxu1 %v2589_v5  ;;  %v3514_v5 = vld [vmem:[#allocation3 + $0x104] sm:$0xf]  ;;  %v2590_v58 = vld [vmem:[#allocation3 + $0x208] sm:$0xf0]  ;;  %v2401_v0 = vor.u32 %v3496_v55, %v2398_v56  ;;  %v2286_v18 = vperm.slane %v3957_v59, 1 }
  0xe6   :  { %2152 = vmatpush.bf16.msra.mxu2 %v2781_v6  ;;  %v2470_v6 = vld [vmem:[#allocation3 + $0x118] sm:$0xf0]  ;;  %v3664_v55 = vld [vmem:[#allocation3 + $0x5b4] sm:$0xf] }
  0xe7   :  { %2165 = vmatpush.bf16.msra.mxu3 %v2973_v30  ;;  %v3950_v30 = vld [vmem:[#allocation1 + $0x9] sm:$0xff]  ;;  %v2473_v15 = vor.u32 %v3514_v5, %v2470_v6  ;;  %v2593_v5 = vor.u32 %v3544_v57, %v2590_v58  ;;  %v3733_v6 = vld [vmem:[#allocation3 + $0x7d4] sm:$0xf0] }
  0xe8   :  { %2127 = vmatpush.bf16.msra.mxu0 %v2373_v19  ;;  %v3404_v19 = vld [vmem:[#allocation3 + $0x850] sm:$0xf] }
  0xe9   :  { %2140 = vmatpush.bf16.msra.mxu1 %v2565_v22  ;;  %v3508_v22 = vld [vmem:[#allocation3 + $0xd4] sm:$0xf]  ;;  %v3405_v33 = vor.u32 %v3751_v21, %v3404_v19  ;;  %v3141_v19 = vor.u32 %v3685_v1, %v3140_v29  ;;  %v3679_v21 = vld [vmem:[#allocation3 + $0x624] sm:$0xf0]  ;;  %v3454_v29 = vld [vmem:[#allocation3 + $0x8c8] sm:$0xf0] }
  0xea   :  { %2153 = vmatpush.bf16.msra.mxu2 %v2757_v23  ;;  %v2446_v23 = vld [vmem:[#allocation3 + $0xe8] sm:$0xf0] }
  0xeb   :  { %2166 = vmatpush.bf16.msra.mxu3 %v2949_v32  ;;  %v2449_v34 = vor.u32 %v3508_v22, %v2446_v23  ;;  %v2377_v23 = vor.u32 %v3490_v8, %v2374_v28  ;;  %v3658_v8 = vld [vmem:[#allocation3 + $0x584] sm:$0xf] }
  0xec   :  { %2128 = vmatpush.bf16.msra.mxu0 %v2349_v26  ;;  %v1922_v32 = vpop.f32.mrf.mxu0  ;;  %v3745_v26 = vld [vmem:[#allocation3 + $0x834] sm:$0xf0] }
  0xed   :  { %2141 = vmatpush.bf16.msra.mxu1 %v2541_v45  ;;  %v1923_v36 = vadd.f32 %v1922_v32, %v3945_v10  ;;  %v1935_v37 = vpop.f32.mrf.mxu1  ;;  %v3550_v45 = vld [vmem:[#allocation3 + $0x224] sm:$0xf]  ;;  %v3381_v47 = vor.u32 %v3745_v26, %v3380_v40  ;;  %v3164_v10 = vld [vmem:[#allocation3 + $0x670] sm:$0xf] }
  0xee   :  { %2154 = vmatpush.bf16.msra.mxu2 %v2733_v31  ;;  %v2614_v31 = vld [vmem:[#allocation3 + $0x238] sm:$0xf0]  ;;  %v3622_v40 = vld [vmem:[#allocation3 + $0x464] sm:$0xf] }
  0xef   :  { %2167 = vmatpush.bf16.msra.mxu3 %v2925_v48  ;;  %2129 = vmatmul.bf16.vlgmr.msra.gmra.mxu0 %v3947_v7  ;;  %v1936_v44 = vadd.f32 %v1935_v37, %v1923_v36  ;;  %v2425_v48 = vor.u32 %v3502_v42, %v2422_v43  ;;  %v2617_v51 = vor.u32 %v3550_v45, %v2614_v31  ;;  %v3532_v36 = vld [vmem:[#allocation3 + $0x194] sm:$0xf]  ;;  %v2542_v37 = vld [vmem:[#allocation3 + $0x1a8] sm:$0xf0]  ;;  %v3670_v26 = vld [vmem:[#allocation3 + $0x5e4] sm:$0xf] }
  0xf0   :  { %2173 = vmatpush.bf16.msrb.mxu0 %v3285_v35  ;;  %2142 = vmatmul.bf16.vlgmr.msra.gmra.mxu1 %v3950_v30  ;;  %v3718_v45 = vld [vmem:[#allocation3 + $0x764] sm:$0xf]  ;;  %v3286_v31 = vld [vmem:[#allocation3 + $0x778] sm:$0xf0] }
  0xf1   :  { %2186 = vmatpush.bf16.msrb.mxu1 %v3477_v49  ;;  %2155 = vmatmul.bf16.vlgmr.msra.gmra.mxu2 %v3933_v12  ;;  %v3691_v49 = vld [vmem:[#allocation3 + $0x684] sm:$0xf0] }
  0xf2   :  { %2199 = vmatpush.bf16.msrb.mxu2 %v2521_v50  ;;  %2168 = vmatmul.bf16.vlgmr.msra.gmra.mxu3 %v3939_v17  ;;  %v3356_v50 = vld [vmem:[#allocation3 + $0x7f0] sm:$0xf] }
  0xf3   :  { %2212 = vmatpush.bf16.msrb.mxu3 %v2713_v54  ;;  %v3739_v54 = vld [vmem:[#allocation3 + $0x804] sm:$0xf0] }
  0xf4   :  { %2174 = vmatpush.bf16.msrb.mxu0 %v3261_v60  ;;  %v1948_v35 = vpop.f32.mrf.mxu2  ;;  %v3357_v63 = vor.u32 %v3739_v54, %v3356_v50  ;;  %v2878_v54 = vld [vmem:[#allocation3 + $0x448] sm:$0xf0] }
  0xf5   :  { %2187 = vmatpush.bf16.msrb.mxu1 %v3453_v61  ;;  %v1949_v52 = vadd.f32 %v1948_v35, %v1936_v44  ;;  %v1961_v53 = vpop.f32.mrf.mxu3  ;;  %v3165_v61 = vor.u32 %v3691_v49, %v3164_v10  ;;  %v1937_v3 = vpop.f32.mrf.mxu1  ;;  %v3094_v44 = vld [vmem:[#allocation3 + $0x5f8] sm:$0xf0]  ;;  %v3766_v35 = vld [vmem:[#allocation3 + $0x8e4] sm:$0xf]  ;;  %v2545_v49 = vor.u32 %v3532_v36, %v2542_v37  ;;  %v3406_v36 = vld [vmem:[#allocation3 + $0x868] sm:$0xf0] }
  0xf6   :  { %2200 = vmatpush.bf16.msrb.mxu2 %v2497_v62  ;;  %v1924_v62 = vpop.f32.mrf.mxu0  ;;  %v3478_v10 = vld [vmem:[#allocation3 + $0x8f8] sm:$0xf0] }
  0xf7   :  { %2213 = vmatpush.bf16.msrb.mxu3 %v2689_v2  ;;  %v1962_v60 = vadd.f32 %v1961_v53, %v1949_v52  ;;  %v3332_v2 = vld [vmem:[#allocation3 + $0x7c0] sm:$0xf]  ;;  %v3097_v52 = vor.u32 %v3670_v26, %v3094_v44  ;;  %v3289_v53 = vor.u32 %v3718_v45, %v3286_v31  ;;  %v3481_v58 = vor.u32 %v3766_v35, %v3478_v10  ;;  %v3262_v62 = vld [vmem:[#allocation3 + $0x748] sm:$0xf0]  ;;  %v2806_v26 = vld [vmem:[#allocation3 + $0x3b8] sm:$0xf0] }
  0xf8   :  { %2175 = vmatpush.bf16.msrb.mxu0 %v3237_v11  ;;  %v2285_v11 = vperm.slane %v3957_v59, 0  ;;  %v3333_v22 = vor.u32 %v3733_v6, %v3332_v2  ;;  %v2854_v6 = vld [vmem:[#allocation3 + $0x418] sm:$0xf0]  ;;  %v3694_v45 = vld [vmem:[#allocation3 + $0x6a4] sm:$0xf] }
  0xf9   :  { %2188 = vmatpush.bf16.msrb.mxu1 %v3429_v14  ;;  %3777 = vtanh.f32 %v1962_v60  ;;  %v3538_v14 = vld [vmem:[#allocation3 + $0x1c4] sm:$0xf]  ;;  %v3070_v60 = vld [vmem:[#allocation3 + $0x5c8] sm:$0xf0]  ;;  %v2998_v44 = vld [vmem:[#allocation3 + $0x538] sm:$0xf0] }
  0xfa   :  { %2201 = vmatpush.bf16.msrb.mxu2 %v2473_v15  ;;  %v2566_v15 = vld [vmem:[#allocation3 + $0x1d8] sm:$0xf0]  ;;  %v2297_v39 = vmul.f32 %v3776_v16, %v2285_v11  ;;  %v3073_v2 = vor.u32 %v3664_v55, %v3070_v60  ;;  %v3754_v16 = vld [vmem:[#allocation3 + $0x884] sm:$0xf]  ;;  %v3688_v55 = vld [vmem:[#allocation3 + $0x674] sm:$0xf] }
  0xfb   :  { %2214 = vmatpush.bf16.msrb.mxu3 %v2665_v20  ;;  %v3116_v20 = vld [vmem:[#allocation3 + $0x610] sm:$0xf]  ;;  %v3046_v11 = vld [vmem:[#allocation3 + $0x598] sm:$0xf0]  ;;  %v3358_v60 = vld [vmem:[#allocation3 + $0x808] sm:$0xf0] }
  0xfc   :  { %2176 = vmatpush.bf16.msrb.mxu0 %v3213_v27  ;;  %v3484_v27 = vld [vmem:[#allocation3 + $0x14] sm:$0xf]  ;;  %v1950_v32 = vpop.f32.mrf.mxu2  ;;  %v3117_v43 = vor.u32 %v3679_v21, %v3116_v20  ;;  %v2304_v56 = vsel %vm2303_vm0, %v2297_v39, 0.0  ;;  %v345_v20 = vperm.slane %v3927_v4, 2  ;;  %v3049_v21 = vor.u32 %v3658_v8, %v3046_v11  ;;  %v3190_v31 = vld [vmem:[#allocation3 + $0x6b8] sm:$0xf0] }
  0xfd   :  { %2189 = vmatpush.bf16.msrb.mxu1 %v3405_v33  ;;  %v2569_v33 = vor.u32 %v3538_v14, %v2566_v15  ;;  %v1963_v38 = vpop.f32.mrf.mxu3  ;;  %v3706_v14 = vld [vmem:[#allocation3 + $0x704] sm:$0xf]  ;;  %v3238_v15 = vld [vmem:[#allocation3 + $0x718] sm:$0xf0]  ;;  %v3022_v32 = vld [vmem:[#allocation3 + $0x568] sm:$0xf0] }
  0xfe   :  { %2202 = vmatpush.bf16.msrb.mxu2 %v2449_v34  ;;  %v2350_v34 = vld [vmem:[#allocation3 + $0x28] sm:$0xf0]  ;;  %v3634_v8 = vld [vmem:[#allocation3 + $0x4c4] sm:$0xf] }
  0xff   :  { %2215 = vmatpush.bf16.msrb.mxu3 %v2641_v41  ;;  %v2902_v41 = vld [vmem:[#allocation3 + $0x478] sm:$0xf0]  ;;  %v3778_v42 = vpop.eup %3777 }
 0x100   :  { %2177 = vmatpush.bf16.msrb.mxu0 %v3189_v46  ;;  %v2298_v46 = vmul.f32 %v3778_v42, %v2286_v18  ;;  %v2905_v50 = vor.u32 %v3622_v40, %v2902_v41  ;;  %v3430_v18 = vld [vmem:[#allocation3 + $0x898] sm:$0xf0]  ;;  %v3598_v41 = vld [vmem:[#allocation3 + $0x3a4] sm:$0xf] }
 0x101   :  { %2190 = vmatpush.bf16.msrb.mxu1 %v3381_v47  ;;  %v3309_v47 = vor.u32 %v3727_v25, %v3308_v24  ;;  %v2830_v24 = vld [vmem:[#allocation3 + $0x3e8] sm:$0xf0]  ;;  %v3652_v25 = vld [vmem:[#allocation3 + $0x554] sm:$0xf]  ;;  %v3646_v42 = vld [vmem:[#allocation3 + $0x524] sm:$0xf]  ;;  %v2809_v35 = vor.u32 %v3598_v41, %v2806_v26 }
 0x102   :  { %2203 = vmatpush.bf16.msrb.mxu2 %v2425_v48  ;;  %v2353_v48 = vor.u32 %v3484_v27, %v2350_v34  ;;  %v2305_v57 = vsel %vm2303_vm0, %v2298_v46, 0.0  ;;  %v3433_v27 = vor.u32 %v3754_v16, %v3430_v18  ;;  %v3748_v34 = vld [vmem:[#allocation3 + $0x854] sm:$0xf]  ;;  %v3025_v4 = vor.u32 %v3652_v25, %v3022_v32  ;;  %v3142_v16 = vld [vmem:[#allocation3 + $0x658] sm:$0xf0] }
 0x103   :  { %2216 = vmatpush.bf16.msrb.mxu3 %v2617_v51  ;;  %v3616_v51 = vld [vmem:[#allocation3 + $0x434] sm:$0xf]  ;;  %v3001_v10 = vor.u32 %v3646_v42, %v2998_v44  ;;  %v3730_v18 = vld [vmem:[#allocation3 + $0x7c4] sm:$0xf]  ;;  %v2926_v32 = vld [vmem:[#allocation3 + $0x4a8] sm:$0xf0] }
 0x104   :  { %2178 = vmatpush.bf16.msrb.mxu0 %v3165_v61  ;;  %v3712_v61 = vld [vmem:[#allocation3 + $0x734] sm:$0xf]  ;;  %v2881_v1 = vor.u32 %v3616_v51, %v2878_v54  ;;  %v2782_v51 = vld [vmem:[#allocation3 + $0x388] sm:$0xf0] }
 0x105   :  { %2191 = vmatpush.bf16.msrb.mxu1 %v3357_v63  ;;  %v3963_v63 = vadd.f32 %v2305_v57, %v2304_v56  ;;  %v3265_v3 = vor.u32 %v3712_v61, %v3262_v62  ;;  %v2974_v54 = vld [vmem:[#allocation3 + $0x508] sm:$0xf0]  ;;  %v3628_v25 = vld [vmem:[#allocation3 + $0x494] sm:$0xf] }
 0x106   :  { %2204 = vmatpush.bf16.msrb.mxu2 %v2401_v0  ;;  %v3760_v0 = vld [vmem:[#allocation3 + $0x8b4] sm:$0xf]  ;;  %v3166_v56 = vld [vmem:[#allocation3 + $0x688] sm:$0xf0] }
 0x107   :  { %2217 = vmatpush.bf16.msrb.mxu3 %v2593_v5  ;;  %v3610_v5 = vld [vmem:[#allocation3 + $0x404] sm:$0xf]  ;;  %v3457_v28 = vor.u32 %v3760_v0, %v3454_v29  ;;  %v3793_v44 = vld [vmem:[%s3991_s2] sm:$0x3f] }
 0x108   :  { %2179 = vmatpush.bf16.msrb.mxu0 %v3141_v19  ;;  %v2857_v19 = vor.u32 %v3610_v5, %v2854_v6  ;;  %v3586_v5 = vld [vmem:[#allocation3 + $0x344] sm:$0xf]  ;;  %v2758_v6 = vld [vmem:[#allocation3 + $0x358] sm:$0xf0] }
 0x109   :  { %2192 = vmatpush.bf16.msrb.mxu1 %v3333_v22  ;;  %v3241_v22 = vor.u32 %v3706_v14, %v3238_v15  ;;  %v2950_v14 = vld [vmem:[#allocation3 + $0x4d8] sm:$0xf0]  ;;  %v3682_v15 = vld [vmem:[#allocation3 + $0x644] sm:$0xf] }
 0x10a   :  { %2205 = vmatpush.bf16.msrb.mxu2 %v2377_v23  ;;  %v3604_v23 = vld [vmem:[#allocation3 + $0x3d4] sm:$0xf] }
 0x10b   :  { %2218 = vmatpush.bf16.msrb.mxu3 %v2569_v33  ;;  %v3700_v33 = vld [vmem:[#allocation3 + $0x6d4] sm:$0xf]  ;;  %v2833_v38 = vor.u32 %v3604_v23, %v2830_v24  ;;  %v2734_v24 = vld [vmem:[#allocation3 + $0x328] sm:$0xf0] }
 0x10c   :  { %2180 = vmatpush.bf16.msrb.mxu0 %v3117_v43  ;;  %v1974_v37 = vpop.f32.mrf.mxu0  ;;  %v3409_v43 = vor.u32 %v3748_v34, %v3406_v36  ;;  %v3580_v23 = vld [vmem:[#allocation3 + $0x314] sm:$0xf] }
 0x10d   :  { %2193 = vmatpush.bf16.msrb.mxu1 %v3309_v47  ;;  %v1987_v39 = vpop.f32.mrf.mxu1  ;;  %v3742_v47 = vld [vmem:[#allocation3 + $0x824] sm:$0xf]  ;;  %v3724_v36 = vld [vmem:[#allocation3 + $0x794] sm:$0xf] }
 0x10e   :  { %2206 = vmatpush.bf16.msrb.mxu2 %v2353_v48  ;;  %v3382_v48 = vld [vmem:[#allocation3 + $0x838] sm:$0xf0] }
 0x10f   :  { %2219 = vmatpush.bf16.msrb.mxu3 %v2545_v49  ;;  %2181 = vmatmul.bf16.vlgmr.msrb.gmra.mxu0 %v3930_v9  ;;  %v3193_v49 = vor.u32 %v3694_v45, %v3190_v31  ;;  %v346_v45 = vperm.slane %v3793_v44, 3 }
 0x110   :  { %2225 = vmatpush.bf16.msra.mxu0 %v2905_v50  ;;  %2194 = vmatmul.bf16.vlgmr.msrb.gmra.mxu1 %v3936_v13  ;;  %v3592_v50 = vld [vmem:[#allocation3 + $0x374] sm:$0xf] }
 0x111   :  { %2238 = vmatpush.bf16.msra.mxu1 %v3097_v52  ;;  %2207 = vmatmul.bf16.vlgmr.msrb.gmra.mxu2 %v3947_v7  ;;  %v3214_v7 = vld [vmem:[#allocation3 + $0x6e8] sm:$0xf0]  ;;  %v3640_v52 = vld [vmem:[#allocation3 + $0x4f4] sm:$0xf]  ;;  %v2785_v29 = vor.u32 %v3592_v50, %v2782_v51 }
 0x112   :  { %2251 = vmatpush.bf16.msra.mxu2 %v3289_v53  ;;  %2220 = vmatmul.bf16.vlgmr.msrb.gmra.mxu3 %v3950_v30  ;;  %v1975_v30 = vadd.f32 %v1974_v37, %v345_v20  ;;  %v3217_v40 = vor.u32 %v3700_v33, %v3214_v7  ;;  %v3385_v53 = vor.u32 %v3742_v47, %v3382_v48  ;;  %v3676_v33 = vld [vmem:[#allocation3 + $0x614] sm:$0xf]  ;;  %v3118_v7 = vld [vmem:[#allocation3 + $0x628] sm:$0xf0] }
 0x113   :  { %2264 = vmatpush.bf16.msra.mxu3 %v3481_v58  ;;  %v3736_v58 = vld [vmem:[#allocation3 + $0x7f4] sm:$0xf]  ;;  %v2761_v20 = vor.u32 %v3586_v5, %v2758_v6  ;;  %v3310_v37 = vld [vmem:[#allocation3 + $0x7a8] sm:$0xf0] }
 0x114   :  { %2226 = vmatpush.bf16.msra.mxu0 %v2881_v1  ;;  %v1988_v46 = vadd.f32 %v1987_v39, %v1975_v30  ;;  %v2000_v57 = vpop.f32.mrf.mxu2  ;;  %v1976_v61 = vpop.f32.mrf.mxu0  ;;  %v3361_v11 = vor.u32 %v3736_v58, %v3358_v60  ;;  %v2737_v30 = vor.u32 %v3580_v23, %v2734_v24  ;;  %v2929_v39 = vor.u32 %v3628_v25, %v2926_v32 }
 0x115   :  { %2239 = vmatpush.bf16.msra.mxu1 %v3073_v2  ;;  %v2013_v0 = vpop.f32.mrf.mxu3  ;;  %v1989_v1 = vpop.f32.mrf.mxu1  ;;  %v2977_v2 = vor.u32 %v3640_v52, %v2974_v54 }
 0x116   :  { %2252 = vmatpush.bf16.msra.mxu2 %v3265_v3  ;;  %v2001_v62 = vadd.f32 %v2000_v57, %v1988_v46  ;;  %v3169_v3 = vor.u32 %v3688_v55, %v3166_v56  ;;  %v2287_v46 = vperm.slane %v3957_v59, 2 }
 0x117   :  { %2265 = vmatpush.bf16.msra.mxu3 %v3457_v28 }
 0x118   :  { %2227 = vmatpush.bf16.msra.mxu0 %v2857_v19  ;;  %v2014_v28 = vadd.f32 %v2013_v0, %v2001_v62  ;;  %v3334_v19 = vld [vmem:[#allocation3 + $0x7d8] sm:$0xf0] }
 0x119   :  { %2240 = vmatpush.bf16.msra.mxu1 %v3049_v21  ;;  %v2953_v21 = vor.u32 %v3634_v8, %v2950_v14 }
 0x11a   :  { %2253 = vmatpush.bf16.msra.mxu2 %v3241_v22  ;;  %v3145_v22 = vor.u32 %v3682_v15, %v3142_v16 }
 0x11b   :  { %2266 = vmatpush.bf16.msra.mxu3 %v3433_v27  ;;  %v3337_v27 = vor.u32 %v3730_v18, %v3334_v19 }
 0x11c   :  { %2228 = vmatpush.bf16.msra.mxu0 %v2833_v38  ;;  %v2002_v34 = vpop.f32.mrf.mxu2 }
 0x11d   :  { %2241 = vmatpush.bf16.msra.mxu1 %v3025_v4  ;;  %v2015_v38 = vpop.f32.mrf.mxu3  ;;  %v3121_v4 = vor.u32 %v3676_v33, %v3118_v7 }
 0x11e   :  { %2254 = vmatpush.bf16.msra.mxu2 %v3217_v40  ;;  %v3313_v40 = vor.u32 %v3724_v36, %v3310_v37  ;;  %v348_v37 = vperm.slane %v3793_v44, 5 }
 0x11f   :  { %2267 = vmatpush.bf16.msra.mxu3 %v3409_v43 }
 0x120   :  { %2229 = vmatpush.bf16.msra.mxu0 %v2809_v35 }
 0x121   :  { %2242 = vmatpush.bf16.msra.mxu1 %v3001_v10 }
 0x122   :  { %2255 = vmatpush.bf16.msra.mxu2 %v3193_v49 }
 0x123   :  { %2268 = vmatpush.bf16.msra.mxu3 %v3385_v53 }
 0x124   :  { %2230 = vmatpush.bf16.msra.mxu0 %v2785_v29  ;;  %v2288_v29 = vperm.slane %v3957_v59, 3 }
 0x125   :  { %2243 = vmatpush.bf16.msra.mxu1 %v2977_v2 }
 0x126   :  { %2256 = vmatpush.bf16.msra.mxu2 %v3169_v3 }
 0x127   :  { %2269 = vmatpush.bf16.msra.mxu3 %v3361_v11 }
 0x128   :  { %2231 = vmatpush.bf16.msra.mxu0 %v2761_v20 }
 0x129   :  { %2244 = vmatpush.bf16.msra.mxu1 %v2953_v21  ;;  %v347_v21 = vperm.slane %v3793_v44, 4 }
 0x12a   :  { %2257 = vmatpush.bf16.msra.mxu2 %v3145_v22 }
 0x12b   :  { %2270 = vmatpush.bf16.msra.mxu3 %v3337_v27 }
 0x12c   :  { %2232 = vmatpush.bf16.msra.mxu0 %v2737_v30  ;;  %v2026_v41 = vpop.f32.mrf.mxu0 }
 0x12d   :  { %2245 = vmatpush.bf16.msra.mxu1 %v2929_v39  ;;  %v2027_v26 = vadd.f32 %v2026_v41, %v2014_v28  ;;  %v2039_v42 = vpop.f32.mrf.mxu1 }
 0x12e   :  { %2258 = vmatpush.bf16.msra.mxu2 %v3121_v4 }
 0x12f   :  { %2271 = vmatpush.bf16.msra.mxu3 %v3313_v40  ;;  %2233 = vmatmul.bf16.vlgmr.msra.gmra.mxu0 %v3933_v12  ;;  %v2040_v43 = vadd.f32 %v2039_v42, %v2027_v26 }
 0x130   :  { %2246 = vmatmul.bf16.vlgmr.msra.gmra.mxu1 %v3939_v17 }
 0x131   :  { %2259 = vmatmul.bf16.vlgmr.msra.gmra.mxu2 %v3930_v9  ;;  %3779 = vtanh.f32 %v2040_v43 }
 0x132   :  { %2272 = vmatmul.bf16.vlgmr.msra.gmra.mxu3 %v3936_v13 }
 0x134   :  { %v2052_v31 = vpop.f32.mrf.mxu2  ;;  %v2028_v17 = vpop.f32.mrf.mxu0 }
 0x135   :  { %v2053_v12 = vadd.f32 %v2052_v31, %v346_v45  ;;  %v2065_v47 = vpop.f32.mrf.mxu3  ;;  %v2041_v48 = vpop.f32.mrf.mxu1 }
 0x137   :  { %v2066_v9 = vadd.f32 %v2065_v47, %v2053_v12  ;;  %v3780_v35 = vpop.eup %3779  ;;  %v2289_v47 = vperm.slane %v3957_v59, 4 }
 0x138   :  { %v2299_v13 = vmul.f32 %v3780_v35, %v2287_v46  ;;  %v2290_v35 = vperm.slane %v3957_v59, 5 }
 0x13a   :  { %v2307_v10 = vsel %vm2303_vm0, %v2299_v13, 0.0 }
 0x13b   :  { %v2308_v50 = vadd.f32 %v2307_v10, %v3963_v63 }
 0x13c   :  { %v2054_v49 = vpop.f32.mrf.mxu2 }
 0x13d   :  { %v2067_v51 = vpop.f32.mrf.mxu3 }
 0x14c   :  { %v2078_v52 = vpop.f32.mrf.mxu0 }
 0x14d   :  { %v2079_v53 = vadd.f32 %v2078_v52, %v2066_v9  ;;  %v2091_v54 = vpop.f32.mrf.mxu1 }
 0x14f   :  { %v2092_v55 = vadd.f32 %v2091_v54, %v2079_v53  ;;  %v3774_v54 = vld [vmem:[#allocation2] ss:$0 sm:$0xff] }
 0x154   :  { %v2104_v56 = vpop.f32.mrf.mxu2  ;;  %v2080_v61 = vpop.f32.mrf.mxu0 }
 0x155   :  { %v2105_v57 = vadd.f32 %v2104_v56, %v2092_v55  ;;  %v2117_v58 = vpop.f32.mrf.mxu3  ;;  %v2093_v62 = vpop.f32.mrf.mxu1 }
 0x157   :  { %v2118_v60 = vadd.f32 %v2117_v58, %v2105_v57 }
 0x159   :  { %3781 = vtanh.f32 %v2118_v60 }
 0x15c   :  { %v2106_v0 = vpop.f32.mrf.mxu2 }
 0x15d   :  { %v2119_v1 = vpop.f32.mrf.mxu3 }
 0x15f   :  { %v3782_v2 = vpop.eup %3781 }
 0x160   :  { %v2300_v3 = vmul.f32 %v3782_v2, %v2288_v29 }
 0x162   :  { %v2309_v63 = vsel %vm2303_vm0, %v2300_v3, 0.0 }
 0x163   :  { %v2310_v5 = vadd.f32 %v2309_v63, %v2308_v50 }
 0x16c   :  { %v2130_v6 = vpop.f32.mrf.mxu0 }
 0x16d   :  { %v2143_v8 = vpop.f32.mrf.mxu1  ;;  %v2131_v25 = vadd.f32 %v2130_v6, %v347_v21 }
 0x16f   :  { %v2144_v32 = vadd.f32 %v2143_v8, %v2131_v25 }
 0x174   :  { %v2156_v28 = vpop.f32.mrf.mxu2  ;;  %v2132_v11 = vpop.f32.mrf.mxu0 }
 0x175   :  { %v2169_v14 = vpop.f32.mrf.mxu3  ;;  %v2145_v15 = vpop.f32.mrf.mxu1  ;;  %v2157_v34 = vadd.f32 %v2156_v28, %v2144_v32 }
 0x177   :  { %v2170_v36 = vadd.f32 %v2169_v14, %v2157_v34 }
 0x17c   :  { %v2158_v16 = vpop.f32.mrf.mxu2 }
 0x17d   :  { %v2171_v18 = vpop.f32.mrf.mxu3 }
 0x18c   :  { %v2182_v19 = vpop.f32.mrf.mxu0 }
 0x18d   :  { %v2195_v20 = vpop.f32.mrf.mxu1  ;;  %v2183_v38 = vadd.f32 %v2182_v19, %v2170_v36 }
 0x18f   :  { %v2196_v39 = vadd.f32 %v2195_v20, %v2183_v38 }
 0x191   :  { %3783 = vtanh.f32 %v2196_v39 }
 0x194   :  { %v2208_v22 = vpop.f32.mrf.mxu2  ;;  %v2184_v24 = vpop.f32.mrf.mxu0 }
 0x195   :  { %v2221_v23 = vpop.f32.mrf.mxu3  ;;  %v2197_v27 = vpop.f32.mrf.mxu1  ;;  %v2209_v30 = vadd.f32 %v2208_v22, %v348_v37 }
 0x197   :  { %v2222_v4 = vadd.f32 %v2221_v23, %v2209_v30  ;;  %v3784_v17 = vpop.eup %3783 }
 0x198   :  { %v2301_v44 = vmul.f32 %v3784_v17, %v2289_v47 }
 0x19a   :  { %v2311_v10 = vsel %vm2303_vm0, %v2301_v44, 0.0 }
 0x19b   :  { %v2312_v51 = vadd.f32 %v2311_v10, %v2310_v5 }
 0x19c   :  { %v2210_v33 = vpop.f32.mrf.mxu2 }
 0x19d   :  { %v2223_v7 = vpop.f32.mrf.mxu3 }
 0x1ac   :  { %v2234_v40 = vpop.f32.mrf.mxu0 }
 0x1ad   :  { %v2247_v41 = vpop.f32.mrf.mxu1  ;;  %v2235_v26 = vadd.f32 %v2234_v40, %v2222_v4 }
 0x1af   :  { %v2248_v42 = vadd.f32 %v2247_v41, %v2235_v26 }
 0x1b4   :  { %v2260_v43 = vpop.f32.mrf.mxu2  ;;  %v2236_v46 = vpop.f32.mrf.mxu0 }
 0x1b5   :  { %v2261_v45 = vadd.f32 %v2260_v43, %v2248_v42  ;;  %v2273_v31 = vpop.f32.mrf.mxu3  ;;  %v2249_v12 = vpop.f32.mrf.mxu1 }
 0x1b7   :  { %v2274_v48 = vadd.f32 %v2273_v31, %v2261_v45 }
 0x1b9   :  { %3785 = vtanh.f32 %v2274_v48 }
 0x1bc   :  { %v2262_v9 = vpop.f32.mrf.mxu2 }
 0x1bd   :  { %v2275_v13 = vpop.f32.mrf.mxu3 }
 0x1bf   :  { %v3786_v49 = vpop.eup %3785 }
 0x1c0   :  { %v2302_v50 = vmul.f32 %v3786_v49, %v2290_v35 }
 0x1c2   :  { %v2313_v52 = vsel %vm2303_vm0, %v2302_v50, 0.0 }
 0x1c3   :  { %v2314_v53 = vadd.f32 %v2313_v52, %v2312_v51 }
 0x1c5   :  { %2315 = vadd.xlane.f32.xlu0 %v2314_v53 }
 0x238   :  { %v2316_v55 = vpop.xlane.xlu0 %2315 }
 0x239   :  { %v2321_v56 = vadd.f32 %v3774_v54, %v2316_v55 }
 0x23b   :  { %2323 = vst.msk [vmem:[%s3994_s5] sm:$0x3] %vm2322_vm1, %v2321_v56 }
 0x23c   :  { %2328 = vsyncpa [#allocation4], 1 }
 0x23d   :  { %2329 = vsyncpa [#allocation6], 1 }

</bundles_post_ra>
